<compile_context>
chip_gen: v6e
topology: v6e:2x2x1
jax: 0.10.0
libtpu: 0.0.40
codegen_flags: <defaults>
</compile_context>

<pallas_src>
import functools

import jax
import jax.numpy as jnp
from jax import lax
from jax.experimental import pallas as pl
from jax.experimental.pallas import tpu as pltpu


def _round_up(x, m):
    return ((x + m - 1) // m) * m


def _default_tile_n(c_out):
    """Output-channel tile: 256 on 256-wide-MXU chips (v6e/v7x), else 128."""
    if c_out <= 128:
        return 128
    try:
        kind = jax.devices()[0].device_kind.lower()
    except Exception:
        kind = ""
    for tag in ("v2", "v3", "v4", "v5"):   # 128-wide MXU generations
        if tag in kind:
            return 128
    return 256


def _pick_tile_rows(needed_rows, halo, cin_pad, kk, tn, out_bytes,
                    target_rows=1024, vmem_budget=20 * 2 ** 20):
    """Largest row tile (multiple of `halo`) whose double-buffered footprint fits."""
    tr_max = max(halo, _round_up(needed_rows, halo))
    tr = min(max(halo, _round_up(target_rows, halo)), tr_max)

    def footprint(t):
        in_blk = (t + halo) * cin_pad * 2                 # main + halo blocks (bf16)
        w_blk = kk * cin_pad * tn * 2 + 2 * tn * 4        # weight tile + BN scale/shift
        out_blk = t * tn * out_bytes
        scratch = (t + halo) * cin_pad * 2 + t * kk * cin_pad * 2
        return 2 * (in_blk + w_blk + out_blk) + scratch   # x2: double buffering

    while tr > halo and footprint(tr) > vmem_budget:
        tr -= halo
    return tr, footprint(tr)


def _conv_bn_relu_kernel(x_ref, xh_ref, w_ref, scale_ref, shift_ref, o_ref,
                         xs_ref, col_ref, *, offsets, cin_pad, tile_rows):
    # x_ref:     (1, TR, Cin_pad)        bf16  main rows of the flattened padded image
    # xh_ref:    (1, HALO, Cin_pad)      bf16  halo rows (window starting at (r+1)*TR)
    # w_ref:     (kh*kw*Cin_pad, tn)     bf16  tap-major im2col-ordered weights
    # scale_ref: (1, tn)                 f32   gamma / sqrt(var + eps)
    # shift_ref: (1, tn)                 f32   beta - mean * scale
    # o_ref:     (1, TR, tn)                   dense (stride-1) conv output rows
    # xs_ref:    (TR+HALO, Cin_pad)      bf16  scratch: stitched contiguous slab
    # col_ref:   (TR, kh*kw*Cin_pad)     bf16  scratch: im2col tile
    tr = tile_rows
    halo = xs_ref.shape[0] - tr

    # Stitch main + halo rows into one contiguous slab (aligned sublane copies).
    xs_ref[0:tr, :] = x_ref[0]
    xs_ref[tr:tr + halo, :] = xh_ref[0]

    # Fused im2col: lay the kh*kw shifted row-windows side by side along lanes so the
    # whole conv is ONE matmul with K = kh*kw*Cin_pad (good MXU K-fill) instead of
    # kh*kw skinny-K matmuls + f32 accumulate passes.
    for t, off in enumerate(offsets):           # static unroll; `off` is a Python int
        col_ref[:, t * cin_pad:(t + 1) * cin_pad] = xs_ref[off:off + tr, :]

    acc = jnp.dot(col_ref[...], w_ref[...], preferred_element_type=jnp.float32)
    # Folded BN affine + ReLU epilogue in f32, single store to the output block.
    # NOTE: rows whose tap window runs past the valid image (h >= Ho1 or w >= Wo1) are
    # computed on zero padding and discarded by the wrapper slice below.
    o_ref[0] = jnp.maximum(acc * scale_ref[...] + shift_ref[...], 0.0).astype(o_ref.dtype)


@functools.partial(
    jax.jit,
    static_argnames=("stride", "padding", "dilation", "eps", "tn", "out_dtype",
                     "input_format", "output_format"))
def conv_bn_relu(x, weight, gamma, beta, running_mean, running_var, *,
                 stride=1, padding=1, dilation=1, eps=1e-5,
                 tn=None, out_dtype=jnp.float32,
                 input_format="NCHW", output_format="NCHW"):
    """Conv2d(bias=False) -> BatchNorm2d(eval, running stats) -> ReLU.

    x: (N,C,H,W) if input_format=="NCHW" else (N,H,W,C).  weight: (C_out,C_in,kh,kw).
    """
    if input_format == "NCHW":
        N, C_in, H, W = x.shape
        # Cast BEFORE the layout transpose: halves the HBM traffic of this glue pass.
        x_nhwc = x.astype(jnp.bfloat16).transpose(0, 2, 3, 1)
    elif input_format == "NHWC":
        N, H, W, C_in = x.shape
        x_nhwc = x.astype(jnp.bfloat16)
    else:
        raise ValueError(f"bad input_format {input_format}")

    C_out, _, kh, kw = weight.shape
    s, p, d = stride, padding, dilation
    kk = kh * kw

    Ho = (H + 2 * p - d * (kh - 1) - 1) // s + 1
    Wo = (W + 2 * p - d * (kw - 1) - 1) // s + 1
    Hp, Wp = H + 2 * p, W + 2 * p
    # Pad padded-width to a multiple of 16 so the i*Wp component of every tap offset is
    # sublane-aligned for bf16 (no per-tap relayout on the operand loaded kh*kw times).
    Wp_pad = _round_up(Wp, 16)
    Ho1 = Hp - d * (kh - 1)                      # dense (stride-1) valid output rows

    Cin_pad = _round_up(C_in, 16)                # bf16 packs 16 sublanes per vreg
    if tn is None:
        tn = _default_tile_n(C_out)
    Cout_pad = _round_up(C_out, tn)              # lane-dense output channels
    out_bytes = jnp.dtype(out_dtype).itemsize

    # Static flat row offsets of the kh*kw taps within the flattened padded image.
    offsets = tuple(i * d * Wp_pad + j * d for i in range(kh) for j in range(kw))
    max_off = offsets[-1]
    halo = max(16, _round_up(max_off, 16))       # halo rows; divides tile_rows below

    needed_rows = Ho1 * Wp_pad                   # dense rows the wrapper actually keeps
    tile_rows, fp_bytes = _pick_tile_rows(needed_rows, halo, Cin_pad, kk, tn, out_bytes)
    HT = pl.cdiv(needed_rows, tile_rows)
    CT = Cout_pad // tn
    R_total = HT * tile_rows + halo              # per-image rows incl. tail halo

    # ---- glue: NHWC -> flattened (row = h*Wp_pad + w, lanes = Cin) bf16 slab ----
    xp = jnp.pad(x_nhwc, ((0, 0), (p, p), (p, p + (Wp_pad - Wp)), (0, Cin_pad - C_in)))
    xflat = jnp.pad(xp.reshape(N, Hp * Wp_pad, Cin_pad),
                    ((0, 0), (0, R_total - Hp * Wp_pad), (0, 0)))

    # Weights: (C_out,C_in,kh,kw) -> tap-major (kh*kw*Cin_pad, Cout_pad) bf16, matching
    # the im2col lane layout built in the kernel.
    w2d = weight.astype(jnp.bfloat16).transpose(2, 3, 1, 0)
    w2d = jnp.pad(w2d, ((0, 0), (0, 0), (0, Cin_pad - C_in), (0, Cout_pad - C_out)))
    w2d = w2d.reshape(kk * Cin_pad, Cout_pad)

    # Fold BN (inference: running stats + affine) into per-channel scale/shift (f32).
    scale = (gamma / jnp.sqrt(running_var + eps)).astype(jnp.float32)
    shift = (beta - running_mean * scale).astype(jnp.float32)
    scale = jnp.pad(scale, (0, Cout_pad - C_out)).reshape(1, Cout_pad)
    shift = jnp.pad(shift, (0, Cout_pad - C_out)).reshape(1, Cout_pad)

    kernel = functools.partial(_conv_bn_relu_kernel, offsets=offsets,
                               cin_pad=Cin_pad, tile_rows=tile_rows)

    halo_blocks = tile_rows // halo              # static; halo divides tile_rows
    # Keep the larger per-step operand resident across the innermost grid axis:
    # if the weight tile outweighs the activation slab, iterate row tiles innermost
    # (weights stay put); otherwise iterate Cout tiles innermost (slab stays put).
    w_blk_bytes = kk * Cin_pad * tn * 2
    x_blk_bytes = (tile_rows + halo) * Cin_pad * 2
    if w_blk_bytes <= x_blk_bytes:
        grid = (N, HT, CT)                       # c innermost
        x_map = lambda n, r, c: (n, r, 0)
        h_map = lambda n, r, c: (n, (r + 1) * halo_blocks, 0)
        w_map = lambda n, r, c: (0, c)
        v_map = lambda n, r, c: (0, c)
        o_map = lambda n, r, c: (n, r, c)
    else:
        grid = (N, CT, HT)                       # r innermost
        x_map = lambda n, c, r: (n, r, 0)
        h_map = lambda n, c, r: (n, (r + 1) * halo_blocks, 0)
        w_map = lambda n, c, r: (0, c)
        v_map = lambda n, c, r: (0, c)
        o_map = lambda n, c, r: (n, r, c)

    out = pl.pallas_call(
        kernel,
        out_shape=jax.ShapeDtypeStruct((N, HT * tile_rows, Cout_pad), out_dtype),
        grid=grid,
        in_specs=[
            pl.BlockSpec((1, tile_rows, Cin_pad), x_map),     # main rows of the slab
            pl.BlockSpec((1, halo, Cin_pad), h_map),          # halo rows (same array)
            pl.BlockSpec((kk * Cin_pad, tn), w_map),          # im2col-ordered weights
            pl.BlockSpec((1, tn), v_map),                     # BN scale
            pl.BlockSpec((1, tn), v_map),                     # BN shift
        ],
        out_specs=pl.BlockSpec((1, tile_rows, tn), o_map),
        scratch_shapes=[
            pltpu.VMEM((tile_rows + halo, Cin_pad), jnp.bfloat16),   # stitched slab
            pltpu.VMEM((tile_rows, kk * Cin_pad), jnp.bfloat16),     # im2col tile
        ],
        compiler_params=pltpu.CompilerParams(
            dimension_semantics=("parallel", "parallel", "parallel"),
            vmem_limit_bytes=int(min(64 * 2 ** 20, max(32 * 2 ** 20, 2 * fp_bytes)))),
    )(xflat, xflat, w2d, scale, shift)

    # Unflatten the dense (stride-1) map; rows h >= Ho1, cols w >= Wo1 and channels
    # >= C_out were computed on zero padding and are discarded here.
    out = out[:, :needed_rows, :C_out].reshape(N, Ho1, Wp_pad, C_out)
    out = out[:, ::s, ::s, :][:, :Ho, :Wo, :]
    # TODO(synk): stride > 1 still computes the dense stride-1 map and subsamples here
    # (~s^2 extra MXU work + writeback); a phase-decomposed strided path would fix that.
    if output_format == "NHWC":
        return out
    return out.transpose(0, 3, 1, 2)


def _reference(x, weight, gamma, beta, running_mean, running_var,
               *, stride, padding, dilation, eps=1e-5):
    y = lax.conv_general_dilated(
        x, weight,
        window_strides=(stride, stride),
        padding=((padding, padding), (padding, padding)),
        rhs_dilation=(dilation, dilation),
        dimension_numbers=("NCHW", "OIHW", "NCHW"),
        precision=lax.Precision.HIGHEST,
    )
    scale = gamma / jnp.sqrt(running_var + eps)
    shift = beta - running_mean * scale
    return jnp.maximum(y * scale[None, :, None, None] + shift[None, :, None, None], 0.0)


if __name__ == "__main__":
    # ConvBNReLU(c_in=4, c_out=8, kernel_size=3, ...)
    N, C_in, C_out, H, W = 2, 4, 8, 16, 16
    kh = kw = 3

    key = jax.random.PRNGKey(0)
    kx, kw_, kg, kb, km, kv = jax.random.split(key, 6)
    x = jax.random.normal(kx, (N, C_in, H, W), dtype=jnp.float32)
    weight = jax.random.normal(kw_, (C_out, C_in, kh, kw), dtype=jnp.float32) * 0.1
    gamma = 1.0 + 0.1 * jax.random.normal(kg, (C_out,), dtype=jnp.float32)
    beta = 0.1 * jax.random.normal(kb, (C_out,), dtype=jnp.float32)
    running_mean = 0.05 * jax.random.normal(km, (C_out,), dtype=jnp.float32)
    running_var = jnp.abs(1.0 + 0.1 * jax.random.normal(kv, (C_out,), dtype=jnp.float32))

    # Precision-matched inputs (kernel feeds the MXU bf16 operands, f32 accumulate).
    xb = x.astype(jnp.bfloat16).astype(jnp.float32)
    wb = weight.astype(jnp.bfloat16).astype(jnp.float32)

    # Config 1: stride=1, padding=1, dilation=1 (the canonical ConvBNReLU block).
    out = conv_bn_relu(x, weight, gamma, beta, running_mean, running_var,
                       stride=1, padding=1, dilation=1)
    out = jax.block_until_ready(out)
    assert out.shape == (N, C_out, H, W), out.shape
    ref = _reference(x, weight, gamma, beta, running_mean, running_var,
                     stride=1, padding=1, dilation=1)
    assert jnp.allclose(out, ref, atol=5e-2, rtol=5e-2), \
        float(jnp.max(jnp.abs(out - ref)))
    ref_bf = _reference(xb, wb, gamma, beta, running_mean, running_var,
                        stride=1, padding=1, dilation=1)
    assert jnp.allclose(out, ref_bf, atol=1e-3, rtol=1e-3), \
        float(jnp.max(jnp.abs(out - ref_bf)))

    # Config 2: exercise the strided + dilated path (stride=2, padding=2, dilation=2).
    out2 = conv_bn_relu(x, weight, gamma, beta, running_mean, running_var,
                        stride=2, padding=2, dilation=2)
    out2 = jax.block_until_ready(out2)
    ref2_bf = _reference(xb, wb, gamma, beta, running_mean, running_var,
                         stride=2, padding=2, dilation=2)
    assert out2.shape == ref2_bf.shape, (out2.shape, ref2_bf.shape)
    assert jnp.allclose(out2, ref2_bf, atol=1e-3, rtol=1e-3), \
        float(jnp.max(jnp.abs(out2 - ref2_bf)))

    print("KERNEL_OK")
</pallas_src>

<mosaic_0001>
module attributes {stable_mosaic.version = 11 : i64} {
  func.func @_conv_bn_relu_kernel(%arg0: i32, %arg1: i32, %arg2: i32, %arg3: memref<1x560x16xbf16, #tpu.memory_space<vmem>>, %arg4: memref<1x80x16xbf16, #tpu.memory_space<vmem>>, %arg5: memref<144x128xbf16, #tpu.memory_space<vmem>>, %arg6: memref<1x128xf32, #tpu.memory_space<vmem>>, %arg7: memref<1x128xf32, #tpu.memory_space<vmem>>, %arg8: memref<1x560x128xf32, #tpu.memory_space<vmem>>, %arg9: memref<640x16xbf16, #tpu.memory_space<vmem>>, %arg10: memref<560x144xbf16, #tpu.memory_space<vmem>>) attributes {dimension_semantics = [#tpu.dimension_semantics<parallel>, #tpu.dimension_semantics<parallel>, #tpu.dimension_semantics<parallel>], iteration_bounds = array<i64: 2, 1, 1>, scalar_prefetch = 0 : i64, scratch_operands = 2 : i64, tpu.core_type = #tpu.core_type<tc>, window_params = [{transform_indices = @transform_0, window_bounds = array<i64: 1, 560, 16>}, {transform_indices = @transform_1, window_bounds = array<i64: 1, 80, 16>}, {transform_indices = @transform_2, window_bounds = array<i64: 144, 128>}, {transform_indices = @transform_3, window_bounds = array<i64: 1, 128>}, {transform_indices = @transform_4, window_bounds = array<i64: 1, 128>}, {transform_indices = @transform_5, window_bounds = array<i64: 1, 560, 128>}]} {
    %c0 = arith.constant 0 : index
    %c0_0 = arith.constant 0 : index
    %c0_1 = arith.constant 0 : index
    %0 = vector.load %arg3[%c0, %c0_0, %c0_1] : memref<1x560x16xbf16, #tpu.memory_space<vmem>>, vector<1x560x16xbf16>
    %1 = vector.shape_cast %0 : vector<1x560x16xbf16> to vector<560x16xbf16>
    %c0_2 = arith.constant 0 : index
    %c0_3 = arith.constant 0 : index
    %2 = vector.load %arg9[%c0_2, %c0_3] : memref<640x16xbf16, #tpu.memory_space<vmem>>, vector<560x16xbf16>
    tpu.vector_store %arg9[%c0_2, %c0_3], %1 {strides = array<i32>} : memref<640x16xbf16, #tpu.memory_space<vmem>>, vector<560x16xbf16>,
    %c0_4 = arith.constant 0 : index
    %c0_5 = arith.constant 0 : index
    %c0_6 = arith.constant 0 : index
    %3 = vector.load %arg4[%c0_4, %c0_5, %c0_6] : memref<1x80x16xbf16, #tpu.memory_space<vmem>>, vector<1x80x16xbf16>
    %4 = vector.shape_cast %3 : vector<1x80x16xbf16> to vector<80x16xbf16>
    %c560 = arith.constant 560 : index
    %c0_7 = arith.constant 0 : index
    %5 = vector.load %arg9[%c560, %c0_7] : memref<640x16xbf16, #tpu.memory_space<vmem>>, vector<80x16xbf16>
    tpu.vector_store %arg9[%c560, %c0_7], %4 {strides = array<i32>} : memref<640x16xbf16, #tpu.memory_space<vmem>>, vector<80x16xbf16>,
    %c0_8 = arith.constant 0 : index
    %c0_9 = arith.constant 0 : index
    %6 = vector.load %arg9[%c0_8, %c0_9] : memref<640x16xbf16, #tpu.memory_space<vmem>>, vector<560x16xbf16>
    %c0_10 = arith.constant 0 : index
    %c0_11 = arith.constant 0 : index
    %7 = vector.load %arg10[%c0_10, %c0_11] : memref<560x144xbf16, #tpu.memory_space<vmem>>, vector<560x16xbf16>
    tpu.vector_store %arg10[%c0_10, %c0_11], %6 {strides = array<i32>} : memref<560x144xbf16, #tpu.memory_space<vmem>>, vector<560x16xbf16>,
    %c1 = arith.constant 1 : index
    %c0_12 = arith.constant 0 : index
    %8 = vector.load %arg9[%c1, %c0_12] : memref<640x16xbf16, #tpu.memory_space<vmem>>, vector<560x16xbf16>
    %c0_13 = arith.constant 0 : index
    %c16 = arith.constant 16 : index
    %9 = vector.load %arg10[%c0_13, %c16] : memref<560x144xbf16, #tpu.memory_space<vmem>>, vector<560x16xbf16>
    tpu.vector_store %arg10[%c0_13, %c16], %8 {strides = array<i32>} : memref<560x144xbf16, #tpu.memory_space<vmem>>, vector<560x16xbf16>,
    %c2 = arith.constant 2 : index
    %c0_14 = arith.constant 0 : index
    %10 = vector.load %arg9[%c2, %c0_14] : memref<640x16xbf16, #tpu.memory_space<vmem>>, vector<560x16xbf16>
    %c0_15 = arith.constant 0 : index
    %c32 = arith.constant 32 : index
    %11 = vector.load %arg10[%c0_15, %c32] : memref<560x144xbf16, #tpu.memory_space<vmem>>, vector<560x16xbf16>
    tpu.vector_store %arg10[%c0_15, %c32], %10 {strides = array<i32>} : memref<560x144xbf16, #tpu.memory_space<vmem>>, vector<560x16xbf16>,
    %c32_16 = arith.constant 32 : index
    %c0_17 = arith.constant 0 : index
    %12 = vector.load %arg9[%c32_16, %c0_17] : memref<640x16xbf16, #tpu.memory_space<vmem>>, vector<560x16xbf16>
    %c0_18 = arith.constant 0 : index
    %c48 = arith.constant 48 : index
    %13 = vector.load %arg10[%c0_18, %c48] : memref<560x144xbf16, #tpu.memory_space<vmem>>, vector<560x16xbf16>
    tpu.vector_store %arg10[%c0_18, %c48], %12 {strides = array<i32>} : memref<560x144xbf16, #tpu.memory_space<vmem>>, vector<560x16xbf16>,
    %c33 = arith.constant 33 : index
    %c0_19 = arith.constant 0 : index
    %14 = vector.load %arg9[%c33, %c0_19] : memref<640x16xbf16, #tpu.memory_space<vmem>>, vector<560x16xbf16>
    %c0_20 = arith.constant 0 : index
    %c64 = arith.constant 64 : index
    %15 = vector.load %arg10[%c0_20, %c64] : memref<560x144xbf16, #tpu.memory_space<vmem>>, vector<560x16xbf16>
    tpu.vector_store %arg10[%c0_20, %c64], %14 {strides = array<i32>} : memref<560x144xbf16, #tpu.memory_space<vmem>>, vector<560x16xbf16>,
    %c34 = arith.constant 34 : index
    %c0_21 = arith.constant 0 : index
    %16 = vector.load %arg9[%c34, %c0_21] : memref<640x16xbf16, #tpu.memory_space<vmem>>, vector<560x16xbf16>
    %c0_22 = arith.constant 0 : index
    %c80 = arith.constant 80 : index
    %17 = vector.load %arg10[%c0_22, %c80] : memref<560x144xbf16, #tpu.memory_space<vmem>>, vector<560x16xbf16>
    tpu.vector_store %arg10[%c0_22, %c80], %16 {strides = array<i32>} : memref<560x144xbf16, #tpu.memory_space<vmem>>, vector<560x16xbf16>,
    %c64_23 = arith.constant 64 : index
    %c0_24 = arith.constant 0 : index
    %18 = vector.load %arg9[%c64_23, %c0_24] : memref<640x16xbf16, #tpu.memory_space<vmem>>, vector<560x16xbf16>
    %c0_25 = arith.constant 0 : index
    %c96 = arith.constant 96 : index
    %19 = vector.load %arg10[%c0_25, %c96] : memref<560x144xbf16, #tpu.memory_space<vmem>>, vector<560x16xbf16>
    tpu.vector_store %arg10[%c0_25, %c96], %18 {strides = array<i32>} : memref<560x144xbf16, #tpu.memory_space<vmem>>, vector<560x16xbf16>,
    %c65 = arith.constant 65 : index
    %c0_26 = arith.constant 0 : index
    %20 = vector.load %arg9[%c65, %c0_26] : memref<640x16xbf16, #tpu.memory_space<vmem>>, vector<560x16xbf16>
    %c0_27 = arith.constant 0 : index
    %c112 = arith.constant 112 : index
    %21 = vector.load %arg10[%c0_27, %c112] : memref<560x144xbf16, #tpu.memory_space<vmem>>, vector<560x16xbf16>
    tpu.vector_store %arg10[%c0_27, %c112], %20 {strides = array<i32>} : memref<560x144xbf16, #tpu.memory_space<vmem>>, vector<560x16xbf16>,
    %c66 = arith.constant 66 : index
    %c0_28 = arith.constant 0 : index
    %22 = vector.load %arg9[%c66, %c0_28] : memref<640x16xbf16, #tpu.memory_space<vmem>>, vector<560x16xbf16>
    %c0_29 = arith.constant 0 : index
    %c128 = arith.constant 128 : index
    %23 = vector.load %arg10[%c0_29, %c128] : memref<560x144xbf16, #tpu.memory_space<vmem>>, vector<560x16xbf16>
    tpu.vector_store %arg10[%c0_29, %c128], %22 {strides = array<i32>} : memref<560x144xbf16, #tpu.memory_space<vmem>>, vector<560x16xbf16>,
    %c0_30 = arith.constant 0 : index
    %c0_31 = arith.constant 0 : index
    %24 = vector.load %arg10[%c0_30, %c0_31] : memref<560x144xbf16, #tpu.memory_space<vmem>>, vector<560x144xbf16>
    %c0_32 = arith.constant 0 : index
    %c0_33 = arith.constant 0 : index
    %25 = vector.load %arg5[%c0_32, %c0_33] : memref<144x128xbf16, #tpu.memory_space<vmem>>, vector<144x128xbf16>
    %cst = arith.constant dense<0.000000e+00> : vector<560x128xf32>
    %26 = tpu.matmul %24, %25, %cst {dimension_numbers = #tpu.dot_dimension_numbers<[1], [0], [0], [1], [0, 0, 1, 1], [], []>} : vector<560x144xbf16>, vector<144x128xbf16>, vector<560x128xf32> -> vector<560x128xf32>
    %c0_34 = arith.constant 0 : index
    %c0_35 = arith.constant 0 : index
    %27 = vector.load %arg6[%c0_34, %c0_35] : memref<1x128xf32, #tpu.memory_space<vmem>>, vector<1x128xf32>
    %28 = vector.broadcast %27 : vector<1x128xf32> to vector<560x128xf32>
    %29 = arith.mulf %26, %28 : vector<560x128xf32>
    %c0_36 = arith.constant 0 : index
    %c0_37 = arith.constant 0 : index
    %30 = vector.load %arg7[%c0_36, %c0_37] : memref<1x128xf32, #tpu.memory_space<vmem>>, vector<1x128xf32>
    %31 = vector.broadcast %30 : vector<1x128xf32> to vector<560x128xf32>
    %32 = arith.addf %29, %31 : vector<560x128xf32>
    %cst_38 = arith.constant 0.000000e+00 : f32
    %33 = vector.broadcast %cst_38 : f32 to vector<560x128xf32>
    %34 = arith.maximumf %32, %33 : vector<560x128xf32>
    %c0_39 = arith.constant 0 : index
    %c0_40 = arith.constant 0 : index
    %c0_41 = arith.constant 0 : index
    %35 = vector.load %arg8[%c0_39, %c0_40, %c0_41] : memref<1x560x128xf32, #tpu.memory_space<vmem>>, vector<1x560x128xf32>
    %36 = vector.shape_cast %35 : vector<1x560x128xf32> to vector<560x128xf32>
    %37 = vector.shape_cast %34 : vector<560x128xf32> to vector<1x560x128xf32>
    tpu.vector_store %arg8[%c0_39, %c0_40, %c0_41], %37 {strides = array<i32>} : memref<1x560x128xf32, #tpu.memory_space<vmem>>, vector<1x560x128xf32>,
    return
  }
  func.func @transform_0(%arg0: i32, %arg1: i32, %arg2: i32) -> (i32, i32, i32) {
    %c0_i32 = arith.constant 0 : i32
    %c0_i32_0 = arith.constant 0 : i32
    return %arg0, %arg2, %c0_i32 : i32, i32, i32
  }
  func.func @transform_1(%arg0: i32, %arg1: i32, %arg2: i32) -> (i32, i32, i32) {
    %c1_i32 = arith.constant 1 : i32
    %0 = arith.addi %arg2, %c1_i32 : i32
    %c7_i32 = arith.constant 7 : i32
    %1 = arith.muli %0, %c7_i32 : i32
    %c0_i32 = arith.constant 0 : i32
    %c0_i32_0 = arith.constant 0 : i32
    return %arg0, %1, %c0_i32 : i32, i32, i32
  }
  func.func @transform_2(%arg0: i32, %arg1: i32, %arg2: i32) -> (i32, i32) {
    %c0_i32 = arith.constant 0 : i32
    %c0_i32_0 = arith.constant 0 : i32
    return %c0_i32, %arg1 : i32, i32
  }
  func.func @transform_3(%arg0: i32, %arg1: i32, %arg2: i32) -> (i32, i32) {
    %c0_i32 = arith.constant 0 : i32
    %c0_i32_0 = arith.constant 0 : i32
    return %c0_i32, %arg1 : i32, i32
  }
  func.func @transform_4(%arg0: i32, %arg1: i32, %arg2: i32) -> (i32, i32) {
    %c0_i32 = arith.constant 0 : i32
    %c0_i32_0 = arith.constant 0 : i32
    return %c0_i32, %arg1 : i32, i32
  }
  func.func @transform_5(%arg0: i32, %arg1: i32, %arg2: i32) -> (i32, i32, i32) {
    %c0_i32 = arith.constant 0 : i32
    return %arg0, %arg2, %arg1 : i32, i32, i32
  }
}

</mosaic_0001>

<bundles_post_ra>
// kernel: conv_bn_relu.1
= control target key start
LH: loop header
LB: loop body
LE: loop exit
PB: predicated region body
PF: predicated region fallthrough
CT: control target
= control target key end

     0   :  { %s8135_s18 = smov 0   ;;  %s8137_s19 = smov 0   ;;  %s12040_s0 = inlined_call_operand.vmem [shape: bf16[2,640,16], index: 0, kind: input, shape index: {}, may-alias: {0,1}]   ;;  %s12041_s1 = inlined_call_operand.vmem [shape: bf16[2,640,16], index: 1, kind: input, shape index: {}, may-alias: {0,1}]   ;;  %s12042_s2 = inlined_call_operand.vmem [shape: bf16[144,128], index: 2, kind: input, shape index: {}]   ;;  %s12043_s3 = inlined_call_operand.vmem [shape: f32[1,128], index: 3, kind: input, shape index: {}]   ;;  %s12044_s4 = inlined_call_operand.vmem [shape: f32[1,128], index: 4, kind: input, shape index: {}]   ;;  %s12045_s5 = inlined_call_operand.vmem [shape: f32[2,560,128], index: 5, kind: output, shape index: {}]  }
   0x1   :  { %s8139_s20 = smov 0  }
   0x2 LB: > { %s34_s21 = sadd.s32 1, %s8091_s19  ;;  %p7807_p0 = scmp.ge.s32.totalorder %s8095_s20, 1  ;;  %s8095_s20 = sphi %s8139_s20, %s15_s20   ;;  %s8091_s19 = sphi %s8137_s19, %s12051_s19   ;;  %s8087_s18 = sphi %s8135_s18, %s12050_s18  }
   0x3   : > { %p36_p1 = scmp.ge.s32.totalorder %s34_s21, 2  ;;  %p275_p2 = scmp.lt.s32.totalorder %s8095_s20, 3 }
   0x5   : > { %s12053_s21 = smov (%p36_p1, %s34_s21), 0  ;;  %p276_p3 = pnand %p7807_p0, %p275_p2 }
   0x6   : > { %p344_p4 = scmp.lt.s32.totalorder (!%p276_p3), %s8087_s18, 1  ;;  %s8097_s26 = smov (!%p276_p3), 16  }
   0x7   : > { %279 = sbr.rel (%p276_p3) target bundleno = 1351 (0x547), region = 40  ;;  %s8098_s6 = smov (!%p276_p3), 32  }
   0x8   : > { %s8099_s7 = smov (!%p276_p3), 48   ;;  %s8100_s8 = smov (!%p276_p3), 64  }
   0x9   : > { %s8104_s9 = smov (!%p276_p3), 112  }
   0xc   : > { %s12055_s18 = smov (!%p344_p4, %s8087_s18), 1  ;;  %vm465_vm0 = vcmask 125952   ;;  %vm767_vm1 = vsmask.f32 3328  ;;  %vm768_vm2 = vsmask.f32 7440 }
   0xd   : > { %s7952_s22 = smul.u32 320, %s12055_s18  ;;  %vm8213_vm3 = vmor %vm767_vm1, %vm768_vm2  ;;  %vm1684_vm4 = vcmask 257152   ;;  %vm1897_vm5 = vcmask 1042432   ;;  %vm1898_vm6 = vcmask 1046532   ;;  %vm2321_vm8 = vcmask 388352  }
   0xe   : > { %vm8829_vm7 = vmor %vm1897_vm5, %vm1898_vm6  ;;  %vm2742_vm9 = vcmask 519552   ;;  %vm3798_vm10 = vcmask 650752   ;;  %vm4432_vm11 = vcmask 781952   ;;  %vm4853_vm12 = vcmask 913152   ;;  %s7954_s13 = smul.u32 560, %s12055_s18 }
   0xf   : > { %s8161_s25 = scalar_lea.vmem %s12040_s0, %s7952_s22  ;;  %s7933_s27 = sadd.s32 280, %s7952_s22  ;;  %vm5909_vm13 = vcmask 1044352   ;;  %vm6930_vm14 = vcmask 130048  }
  0x10   : > { %v397_v0 = vld [vmem:[%s8161_s25 + $0x8] sm:$0xf]  ;;  %v398_v1 = vld [vmem:[%s8161_s25 + $0xc] sm:$0xf]  ;;  %v395_v2 = vld [vmem:[%s8161_s25] sm:$0xf]  ;;  %s8625_s30 = scalar_lea.vmem %s12041_s1, %s7933_s27  ;;  %s11409_s15 = scalar_lea.vmem %s12045_s5, %s7954_s13 }
  0x11   : > { %468 = vst.msk [vmem:[#allocation2 + $0x8] sm:$0xf] %vm465_vm0, %v397_v0  ;;  %469 = vst.msk [vmem:[#allocation2 + $0xc] sm:$0xf] %vm465_vm0, %v398_v1  ;;  %v396_v3 = vld [vmem:[%s8161_s25 + $0x4] sm:$0xf] }
  0x12   : > { %466 = vst.msk [vmem:[#allocation2] sm:$0xf] %vm465_vm0, %v395_v2  ;;  %v399_v4 = vld [vmem:[%s8161_s25 + $0x10] sm:$0xf]  ;;  %v400_v5 = vld [vmem:[%s8161_s25 + $0x14] sm:$0xf] }
  0x13   : > { %467 = vst.msk [vmem:[#allocation2 + $0x4] sm:$0xf] %vm465_vm0, %v396_v3  ;;  %470 = vst.msk [vmem:[#allocation2 + $0x10] sm:$0xf] %vm465_vm0, %v399_v4  ;;  %v401_v6 = vld [vmem:[%s8161_s25 + $0x18] sm:$0xf] }
  0x14   : > { %471 = vst.msk [vmem:[#allocation2 + $0x14] sm:$0xf] %vm465_vm0, %v400_v5  ;;  %v402_v7 = vld [vmem:[%s8161_s25 + $0x1c] sm:$0xf]  ;;  %v403_v8 = vld [vmem:[%s8161_s25 + $0x20] sm:$0xf] }
  0x15   : > { %472 = vst.msk [vmem:[#allocation2 + $0x18] sm:$0xf] %vm465_vm0, %v401_v6  ;;  %473 = vst.msk [vmem:[#allocation2 + $0x1c] sm:$0xf] %vm465_vm0, %v402_v7  ;;  %v404_v9 = vld [vmem:[%s8161_s25 + $0x24] sm:$0xf] }
  0x16   : > { %474 = vst.msk [vmem:[#allocation2 + $0x20] sm:$0xf] %vm465_vm0, %v403_v8  ;;  %v405_v10 = vld [vmem:[%s8161_s25 + $0x28] sm:$0xf]  ;;  %v406_v11 = vld [vmem:[%s8161_s25 + $0x2c] sm:$0xf] }
  0x17   : > { %475 = vst.msk [vmem:[#allocation2 + $0x24] sm:$0xf] %vm465_vm0, %v404_v9  ;;  %476 = vst.msk [vmem:[#allocation2 + $0x28] sm:$0xf] %vm465_vm0, %v405_v10  ;;  %v407_v12 = vld [vmem:[%s8161_s25 + $0x30] sm:$0xf] }
  0x18   : > { %477 = vst.msk [vmem:[#allocation2 + $0x2c] sm:$0xf] %vm465_vm0, %v406_v11  ;;  %v408_v13 = vld [vmem:[%s8161_s25 + $0x34] sm:$0xf]  ;;  %v409_v14 = vld [vmem:[%s8161_s25 + $0x38] sm:$0xf] }
  0x19   : > { %478 = vst.msk [vmem:[#allocation2 + $0x30] sm:$0xf] %vm465_vm0, %v407_v12  ;;  %479 = vst.msk [vmem:[#allocation2 + $0x34] sm:$0xf] %vm465_vm0, %v408_v13  ;;  %v410_v15 = vld [vmem:[%s8161_s25 + $0x3c] sm:$0xf] }
  0x1a   : > { %480 = vst.msk [vmem:[#allocation2 + $0x38] sm:$0xf] %vm465_vm0, %v409_v14  ;;  %v411_v16 = vld [vmem:[%s8161_s25 + $0x40] sm:$0xf]  ;;  %v412_v17 = vld [vmem:[%s8161_s25 + $0x44] sm:$0xf] }
  0x1b   : > { %481 = vst.msk [vmem:[#allocation2 + $0x3c] sm:$0xf] %vm465_vm0, %v410_v15  ;;  %482 = vst.msk [vmem:[#allocation2 + $0x40] sm:$0xf] %vm465_vm0, %v411_v16  ;;  %v413_v18 = vld [vmem:[%s8161_s25 + $0x48] sm:$0xf] }
  0x1c   : > { %483 = vst.msk [vmem:[#allocation2 + $0x44] sm:$0xf] %vm465_vm0, %v412_v17  ;;  %v414_v19 = vld [vmem:[%s8161_s25 + $0x4c] sm:$0xf]  ;;  %v415_v20 = vld [vmem:[%s8161_s25 + $0x50] sm:$0xf] }
  0x1d   : > { %484 = vst.msk [vmem:[#allocation2 + $0x48] sm:$0xf] %vm465_vm0, %v413_v18  ;;  %485 = vst.msk [vmem:[#allocation2 + $0x4c] sm:$0xf] %vm465_vm0, %v414_v19  ;;  %v416_v21 = vld [vmem:[%s8161_s25 + $0x54] sm:$0xf] }
  0x1e   : > { %486 = vst.msk [vmem:[#allocation2 + $0x50] sm:$0xf] %vm465_vm0, %v415_v20  ;;  %v417_v22 = vld [vmem:[%s8161_s25 + $0x58] sm:$0xf]  ;;  %v418_v23 = vld [vmem:[%s8161_s25 + $0x5c] sm:$0xf] }
  0x1f   : > { %v698_v24 = vld [vmem:[#allocation2 + $0x8] sm:$0xf]  ;;  %v699_v25 = vld [vmem:[#allocation2 + $0xc] sm:$0xf]  ;;  %v696_v26 = vld [vmem:[#allocation2] sm:$0xf] }
  0x20   : > { %487 = vst.msk [vmem:[#allocation2 + $0x54] sm:$0xf] %vm465_vm0, %v416_v21  ;;  %488 = vst.msk [vmem:[#allocation2 + $0x58] sm:$0xf] %vm465_vm0, %v417_v22  ;;  %v790_v27 = vshll.u32 %v698_v24, 16  ;;  %v794_v28 = vshrl.u32 %v698_v24, 16 }
  0x21   : > { %489 = vst.msk [vmem:[#allocation2 + $0x5c] sm:$0xf] %vm465_vm0, %v418_v23  ;;  %v800_v29 = vshll.u32 %v699_v25, 16  ;;  %v804_v30 = vshrl.u32 %v699_v25, 16  ;;  %v697_v31 = vld [vmem:[#allocation2 + $0x4] sm:$0xf] }
  0x22   : > { %v771_v32 = vshrl.u32 %v696_v26, 16  ;;  %v774_v33 = vshll.u32 %v696_v26, 16  ;;  %v780_v34 = vshll.u32 %v697_v31, 16  ;;  %v784_v35 = vshrl.u32 %v697_v31, 16  ;;  %v700_v36 = vld [vmem:[#allocation2 + $0x10] sm:$0xf] }
  0x23   : > { %v792_v37 = vrot.slane %v790_v27, 5  ;;  %v796_v38 = vrot.slane %v794_v28, 4  ;;  %v802_v39 = vrot.slane %v800_v29, 5  ;;  %v806_v40 = vrot.slane %v804_v30, 4  ;;  %v701_v41 = vld [vmem:[#allocation2 + $0x14] sm:$0xf] }
  0x24   : > { %v773_v42 = vrot.slane %v771_v32, 4  ;;  %v776_v43 = vrot.slane %v774_v33, 5  ;;  %v782_v44 = vrot.slane %v780_v34, 5  ;;  %v786_v45 = vrot.slane %v784_v35, 4  ;;  %v702_v46 = vld [vmem:[#allocation2 + $0x18] sm:$0xf] }
  0x25   : > { %v797_v47 = vor.u32 %v796_v38, %v792_v37  ;;  %v807_v48 = vor.u32 %v806_v40, %v802_v39  ;;  %v810_v49 = vshll.u32 %v700_v36, 16  ;;  %v814_v50 = vshrl.u32 %v700_v36, 16  ;;  %v703_v60 = vld [vmem:[#allocation2 + $0x1c] sm:$0xf]  ;;  %v704_v1 = vld [vmem:[#allocation2 + $0x20] sm:$0xf] }
  0x26   : > { %v777_v52 = vor.u32 %v776_v43, %v773_v42  ;;  %v787_v53 = vor.u32 %v786_v45, %v782_v44  ;;  %v820_v54 = vshll.u32 %v701_v41, 16  ;;  %v824_v55 = vshrl.u32 %v701_v41, 16  ;;  %v705_v6 = vld [vmem:[#allocation2 + $0x24] sm:$0xf]  ;;  %v706_v18 = vld [vmem:[#allocation2 + $0x28] sm:$0xf] }
  0x27   : > { %v798_v56 = vrot.slane %v797_v47, 4  ;;  %v808_v57 = vrot.slane %v807_v48, 4  ;;  %v812_v58 = vrot.slane %v810_v49, 5  ;;  %v830_v59 = vshll.u32 %v702_v46, 16  ;;  %v707_v24 = vld [vmem:[#allocation2 + $0x2c] sm:$0xf] }
  0x28   : > { %v778_v61 = vrot.slane %v777_v52, 4  ;;  %v788_v62 = vrot.slane %v787_v53, 4  ;;  %v822_v63 = vrot.slane %v820_v54, 5  ;;  %v826_v0 = vrot.slane %v824_v55, 4  ;;  %v708_v29 = vld [vmem:[#allocation2 + $0x30] sm:$0xf] }
  0x29   : > { %v803_v2 = vsel %vm8213_vm3, %v798_v56, %v802_v39  ;;  %v813_v3 = vsel %vm8213_vm3, %v808_v57, %v812_v58  ;;  %v832_v4 = vrot.slane %v830_v59, 5  ;;  %v834_v5 = vshrl.u32 %v702_v46, 16  ;;  %v709_v34 = vld [vmem:[#allocation2 + $0x34] sm:$0xf]  ;;  %v419_v39 = vld [vmem:[%s8161_s25 + $0x60] sm:$0xf] }
  0x2a   : > { %1478 = vrot.lane.b32.xlu1 %v803_v2, %s8097_s26  ;;  %v783_v7 = vsel %vm8213_vm3, %v778_v61, %v782_v44  ;;  %v793_v8 = vsel %vm8213_vm3, %v788_v62, %v792_v37  ;;  %v827_v9 = vor.u32 %v826_v0, %v822_v63  ;;  %v816_v10 = vrot.slane %v814_v50, 4  ;;  %v8242_v44 = vld [vmem:[#allocation2 + $0x38] sm:$0xf]  ;;  %490 = vst.msk [vmem:[#allocation2 + $0x60] sm:$0xf] %vm465_vm0, %v419_v39 }
  0x2b   : > { %1474 = vrot.lane.b32.xlu0 %v783_v7, %s8097_s26  ;;  %v840_v11 = vshll.u32 %v703_v60, 16  ;;  %v844_v12 = vshrl.u32 %v703_v60, 16  ;;  %v850_v13 = vshll.u32 %v704_v1, 16  ;;  %v854_v14 = vshrl.u32 %v704_v1, 16  ;;  %v420_v49 = vld [vmem:[%s8161_s25 + $0x64] sm:$0xf] }
  0x2c   : > { %v828_v15 = vrot.slane %v827_v9, 4  ;;  %v817_v16 = vor.u32 %v816_v10, %v812_v58  ;;  %v836_v17 = vrot.slane %v834_v5, 4  ;;  %v860_v19 = vshll.u32 %v705_v6, 16  ;;  %v421_v50 = vld [vmem:[%s8161_s25 + $0x68] sm:$0xf] }
  0x2d   : > { %v8227_v20 = vrot.slane %v840_v11, 5  ;;  %v846_v21 = vrot.slane %v844_v12, 4  ;;  %v852_v22 = vrot.slane %v850_v13, 5  ;;  %v864_v23 = vshrl.u32 %v705_v6, 16  ;;  %v711_v56 = vld [vmem:[#allocation2 + $0x3c] sm:$0xf] }
  0x2e   : > { %1480 = vrot.lane.b32.xlu1 %v813_v3, %s8097_s26  ;;  %v833_v25 = vsel %vm8213_vm3, %v828_v15, %v832_v4  ;;  %v818_v26 = vrot.slane %v817_v16, 4  ;;  %v837_v27 = vor.u32 %v836_v17, %v832_v4  ;;  %v8232_v28 = vrot.slane %v860_v19, 5  ;;  %v8256_v57 = vld [vmem:[#allocation2 + $0x40] sm:$0xf]  ;;  %491 = vst.msk [vmem:[#allocation2 + $0x64] sm:$0xf] %vm465_vm0, %v420_v49 }
  0x2f   : > { %1476 = vrot.lane.b32.xlu0 %v793_v8, %s8097_s26  ;;  %v847_v30 = vor.u32 %v846_v21, %v8227_v20  ;;  %v866_v31 = vrot.slane %v864_v23, 4  ;;  %v870_v32 = vshll.u32 %v706_v18, 16  ;;  %v874_v33 = vshrl.u32 %v706_v18, 16  ;;  %492 = vst.msk [vmem:[#allocation2 + $0x68] sm:$0xf] %vm465_vm0, %v421_v50 }
  0x30   : > { %v823_v35 = vsel %vm8213_vm3, %v818_v26, %v822_v63  ;;  %v838_v36 = vrot.slane %v837_v27, 4  ;;  %v856_v37 = vrot.slane %v854_v14, 4  ;;  %v880_v38 = vshll.u32 %v707_v24, 16  ;;  %v422_v58 = vld [vmem:[%s8161_s25 + $0x6c] sm:$0xf] }
  0x31   : > { %v848_v40 = vrot.slane %v847_v30, 4  ;;  %v867_v41 = vor.u32 %v866_v31, %v8232_v28  ;;  %v8240_v42 = vrot.slane %v870_v32, 5  ;;  %v884_v43 = vshrl.u32 %v707_v24, 16  ;;  %v423_v63 = vld [vmem:[%s8161_s25 + $0x70] sm:$0xf] }
  0x32   : > { %1484 = vrot.lane.b32.xlu1 %v833_v25, %s8097_s26  ;;  %v843_v45 = vsel %vm8213_vm3, %v838_v36, %v8227_v20  ;;  %v857_v46 = vor.u32 %v856_v37, %v852_v22  ;;  %v8249_v47 = vrot.slane %v880_v38, 5  ;;  %v890_v48 = vshll.u32 %v708_v29, 16  ;;  %493 = vst.msk [vmem:[#allocation2 + $0x6c] sm:$0xf] %vm465_vm0, %v422_v58  ;;  %494 = vst.msk [vmem:[#allocation2 + $0x70] sm:$0xf] %vm465_vm0, %v423_v63 }
  0x33   : > { %1482 = vrot.lane.b32.xlu0 %v823_v35, %s8097_s26  ;;  %v853_v52 = vsel %vm8213_vm3, %v848_v40, %v852_v22  ;;  %v868_v53 = vrot.slane %v867_v41, 4  ;;  %v886_v54 = vrot.slane %v884_v43, 4  ;;  %v894_v55 = vshrl.u32 %v708_v29, 16  ;;  %v424_v3 = vld [vmem:[%s8161_s25 + $0x74] sm:$0xf] }
  0x34   : > { %v858_v59 = vrot.slane %v857_v46, 4  ;;  %v892_v60 = vrot.slane %v890_v48, 5  ;;  %v876_v61 = vrot.slane %v874_v33, 4  ;;  %v900_v62 = vshll.u32 %v709_v34, 16  ;;  %v425_v4 = vld [vmem:[%s8161_s25 + $0x78] sm:$0xf] }
  0x35   : > { %v887_v0 = vor.u32 %v886_v54, %v8249_v47  ;;  %v904_v1 = vshrl.u32 %v709_v34, 16  ;;  %v910_v2 = vshll.u32 %v8242_v44, 16  ;;  %v873_v5 = vsel %vm8213_vm3, %v868_v53, %v8240_v42  ;;  %v713_v9 = vld [vmem:[#allocation2 + $0x44] sm:$0xf]  ;;  %495 = vst.msk [vmem:[#allocation2 + $0x74] sm:$0xf] %vm465_vm0, %v424_v3 }
  0x36   : > { %1488 = vrot.lane.b32.xlu1 %v853_v52, %s8097_s26  ;;  %v863_v6 = vsel %vm8213_vm3, %v858_v59, %v8232_v28  ;;  %v877_v7 = vor.u32 %v876_v61, %v8240_v42  ;;  %v8276_v8 = vrot.slane %v900_v62, 5  ;;  %496 = vst.msk [vmem:[#allocation2 + $0x78] sm:$0xf] %vm465_vm0, %v425_v4  ;;  %v426_v10 = vld [vmem:[%s8161_s25 + $0x7c] sm:$0xf]  ;;  %v914_v14 = vshrl.u32 %v8242_v44, 16 }
  0x37   : > { %v427_v11 = vld [vmem:[%s8161_s25 + $0x80] sm:$0xf]  ;;  %1486 = vrot.lane.b32.xlu0 %v843_v45, %s8097_s26  ;;  %v888_v12 = vrot.slane %v887_v0, 4  ;;  %v906_v13 = vrot.slane %v904_v1, 4  ;;  %v896_v15 = vrot.slane %v894_v55, 4  ;;  %v920_v18 = vshll.u32 %v711_v56, 16 }
  0x38   : > { %497 = vst.msk [vmem:[#allocation2 + $0x7c] sm:$0xf] %vm465_vm0, %v426_v10  ;;  %498 = vst.msk [vmem:[#allocation2 + $0x80] sm:$0xf] %vm465_vm0, %v427_v11  ;;  %v428_v16 = vld [vmem:[%s8161_s25 + $0x84] sm:$0xf] }
  0x39   : > { %v878_v17 = vrot.slane %v877_v7, 4  ;;  %v924_v19 = vshrl.u32 %v711_v56, 16  ;;  %v930_v20 = vshll.u32 %v8256_v57, 16  ;;  %v714_v21 = vld [vmem:[#allocation2 + $0x48] sm:$0xf]  ;;  %v893_v22 = vsel %vm8213_vm3, %v888_v12, %v892_v60 }
  0x3a   : > { %499 = vst.msk [vmem:[#allocation2 + $0x84] sm:$0xf] %vm465_vm0, %v428_v16  ;;  %v907_v23 = vor.u32 %v906_v13, %v8276_v8  ;;  %v912_v24 = vrot.slane %v910_v2, 5  ;;  %v897_v25 = vor.u32 %v896_v15, %v892_v60  ;;  %v429_v26 = vld [vmem:[%s8161_s25 + $0x88] sm:$0xf]  ;;  %1492 = vrot.lane.b32.xlu1 %v873_v5, %s8097_s26  ;;  %v8298_v29 = vrot.slane %v920_v18, 5 }
  0x3b   : > { %v430_v27 = vld [vmem:[%s8161_s25 + $0x8c] sm:$0xf]  ;;  %v883_v28 = vsel %vm8213_vm3, %v878_v17, %v8249_v47  ;;  %v926_v30 = vrot.slane %v924_v19, 4  ;;  %v934_v31 = vshrl.u32 %v8256_v57, 16  ;;  %500 = vst.msk [vmem:[#allocation2 + $0x88] sm:$0xf] %vm465_vm0, %v429_v26  ;;  %1490 = vrot.lane.b32.xlu0 %v863_v6, %s8097_s26 }
  0x3c   : > { %501 = vst.msk [vmem:[#allocation2 + $0x8c] sm:$0xf] %vm465_vm0, %v430_v27  ;;  %v908_v32 = vrot.slane %v907_v23, 4  ;;  %v898_v33 = vrot.slane %v897_v25, 4  ;;  %v916_v34 = vrot.slane %v914_v14, 4  ;;  %v940_v35 = vshll.u32 %v713_v9, 16 }
  0x3d   : > { %v927_v36 = vor.u32 %v926_v30, %v8298_v29  ;;  %v932_v37 = vrot.slane %v930_v20, 5  ;;  %v944_v38 = vshrl.u32 %v713_v9, 16  ;;  %v950_v39 = vshll.u32 %v714_v21, 16  ;;  %v715_v40 = vld [vmem:[#allocation2 + $0x4c] sm:$0xf] }
  0x3e   : > { %v917_v41 = vor.u32 %v916_v34, %v912_v24  ;;  %v8305_v42 = vrot.slane %v940_v35, 5  ;;  %v954_v43 = vshrl.u32 %v714_v21, 16  ;;  %v716_v44 = vld [vmem:[#allocation2 + $0x50] sm:$0xf]  ;;  %1496 = vrot.lane.b32.xlu1 %v893_v22, %s8097_s26  ;;  %v913_v45 = vsel %vm8213_vm3, %v908_v32, %v912_v24  ;;  %v717_v54 = vld [vmem:[#allocation2 + $0x54] sm:$0xf] }
  0x3f   : > { %v928_v46 = vrot.slane %v927_v36, 4  ;;  %v946_v47 = vrot.slane %v944_v38, 4  ;;  %v936_v48 = vrot.slane %v934_v31, 4  ;;  %1494 = vrot.lane.b32.xlu0 %v883_v28, %s8097_s26  ;;  %v903_v49 = vsel %vm8213_vm3, %v898_v33, %v8276_v8  ;;  %v718_v59 = vld [vmem:[#allocation2 + $0x58] sm:$0xf] }
  0x40   : > { %v8314_v50 = vrot.slane %v950_v39, 5  ;;  %v960_v52 = vshll.u32 %v715_v40, 16  ;;  %v964_v53 = vshrl.u32 %v715_v40, 16  ;;  %v918_v55 = vrot.slane %v917_v41, 4  ;;  %v719_v63 = vld [vmem:[#allocation2 + $0x5c] sm:$0xf] }
  0x41   : > { %v947_v56 = vor.u32 %v946_v47, %v8305_v42  ;;  %v937_v57 = vor.u32 %v936_v48, %v932_v37  ;;  %v970_v58 = vshll.u32 %v716_v44, 16  ;;  %v974_v62 = vshrl.u32 %v716_v44, 16  ;;  %v431_v4 = vld [vmem:[%s8161_s25 + $0x90] sm:$0xf]  ;;  %v720_v9 = vld [vmem:[#allocation2 + $0x60] sm:$0xf] }
  0x42   : > { %v8317_v60 = vrot.slane %v960_v52, 5  ;;  %v966_v61 = vrot.slane %v964_v53, 4  ;;  %1500 = vrot.lane.b32.xlu1 %v913_v45, %s8097_s26  ;;  %v933_v0 = vsel %vm8213_vm3, %v928_v46, %v932_v37  ;;  %v956_v2 = vrot.slane %v954_v43, 4  ;;  %502 = vst.msk [vmem:[#allocation2 + $0x90] sm:$0xf] %vm465_vm0, %v431_v4 }
  0x43   : > { %v948_v1 = vrot.slane %v947_v56, 4  ;;  %v980_v3 = vshll.u32 %v717_v54, 16  ;;  %1498 = vrot.lane.b32.xlu0 %v903_v49, %s8097_s26  ;;  %v938_v5 = vrot.slane %v937_v57, 4  ;;  %v984_v7 = vshrl.u32 %v717_v54, 16  ;;  %v721_v14 = vld [vmem:[#allocation2 + $0x64] sm:$0xf] }
  0x44   : > { %v967_v6 = vor.u32 %v966_v61, %v8317_v60  ;;  %v990_v8 = vshll.u32 %v718_v59, 16  ;;  %v923_v10 = vsel %vm8213_vm3, %v918_v55, %v8298_v29  ;;  %v8329_v11 = vrot.slane %v970_v58, 5  ;;  %v432_v15 = vld [vmem:[%s8161_s25 + $0x94] sm:$0xf]  ;;  %v433_v16 = vld [vmem:[%s8161_s25 + $0x98] sm:$0xf] }
  0x45   : > { %v957_v12 = vor.u32 %v956_v2, %v8314_v50  ;;  %v8332_v13 = vrot.slane %v980_v3, 5  ;;  %v953_v17 = vsel %vm8213_vm3, %v948_v1, %v8314_v50  ;;  %v986_v18 = vrot.slane %v984_v7, 4  ;;  %503 = vst.msk [vmem:[#allocation2 + $0x94] sm:$0xf] %vm465_vm0, %v432_v15  ;;  %504 = vst.msk [vmem:[#allocation2 + $0x98] sm:$0xf] %vm465_vm0, %v433_v16 }
  0x46   : > { %v994_v19 = vshrl.u32 %v718_v59, 16  ;;  %v976_v20 = vrot.slane %v974_v62, 4  ;;  %v434_v21 = vld [vmem:[%s8161_s25 + $0x9c] sm:$0xf]  ;;  %1504 = vrot.lane.b32.xlu1 %v933_v0, %s8097_s26  ;;  %v968_v22 = vrot.slane %v967_v6, 4  ;;  %v1000_v23 = vshll.u32 %v719_v63, 16 }
  0x47   : > { %v1004_v24 = vshrl.u32 %v719_v63, 16  ;;  %v1010_v25 = vshll.u32 %v720_v9, 16  ;;  %v722_v26 = vld [vmem:[#allocation2 + $0x68] sm:$0xf]  ;;  %v435_v27 = vld [vmem:[%s8161_s25 + $0xa0] sm:$0xf]  ;;  %1502 = vrot.lane.b32.xlu0 %v923_v10, %s8097_s26  ;;  %v943_v28 = vsel %vm8213_vm3, %v938_v5, %v8305_v42  ;;  %v987_v30 = vor.u32 %v986_v18, %v8332_v13 }
  0x48   : > { %505 = vst.msk [vmem:[#allocation2 + $0x9c] sm:$0xf] %vm465_vm0, %v434_v21  ;;  %v958_v29 = vrot.slane %v957_v12, 4  ;;  %v992_v31 = vrot.slane %v990_v8, 5  ;;  %506 = vst.msk [vmem:[#allocation2 + $0xa0] sm:$0xf] %vm465_vm0, %v435_v27  ;;  %v977_v34 = vor.u32 %v976_v20, %v8329_v11  ;;  %v973_v43 = vsel %vm8213_vm3, %v968_v22, %v8329_v11 }
  0x49   : > { %v436_v32 = vld [vmem:[%s8161_s25 + $0xa4] sm:$0xf]  ;;  %v437_v33 = vld [vmem:[%s8161_s25 + $0xa8] sm:$0xf]  ;;  %v8354_v35 = vrot.slane %v1000_v23, 5  ;;  %v1006_v36 = vrot.slane %v1004_v24, 4 }
  0x4a   : > { %v1014_v37 = vshrl.u32 %v720_v9, 16  ;;  %507 = vst.msk [vmem:[#allocation2 + $0xa4] sm:$0xf] %vm465_vm0, %v436_v32  ;;  %508 = vst.msk [vmem:[#allocation2 + $0xa8] sm:$0xf] %vm465_vm0, %v437_v33  ;;  %v988_v39 = vrot.slane %v987_v30, 4  ;;  %1508 = vrot.lane.b32.xlu1 %v953_v17, %s8097_s26  ;;  %v963_v48 = vsel %vm8213_vm3, %v958_v29, %v8317_v60 }
  0x4b   : > { %v438_v38 = vld [vmem:[%s8161_s25 + $0xac] sm:$0xf]  ;;  %v996_v40 = vrot.slane %v994_v19, 4  ;;  %v1020_v41 = vshll.u32 %v721_v14, 16  ;;  %v439_v42 = vld [vmem:[%s8161_s25 + $0xb0] sm:$0xf]  ;;  %v1007_v44 = vor.u32 %v1006_v36, %v8354_v35  ;;  %1506 = vrot.lane.b32.xlu0 %v943_v28, %s8097_s26 }
  0x4c   : > { %509 = vst.msk [vmem:[#allocation2 + $0xac] sm:$0xf] %vm465_vm0, %v438_v38  ;;  %v8366_v45 = vrot.slane %v1010_v25, 5  ;;  %v1024_v46 = vshrl.u32 %v721_v14, 16  ;;  %v723_v47 = vld [vmem:[#allocation2 + $0x6c] sm:$0xf]  ;;  %v993_v61 = vsel %vm8213_vm3, %v988_v39, %v992_v31 }
  0x4d   : > { %510 = vst.msk [vmem:[#allocation2 + $0xb0] sm:$0xf] %vm465_vm0, %v439_v42  ;;  %v997_v49 = vor.u32 %v996_v40, %v992_v31  ;;  %v8373_v50 = vrot.slane %v1020_v41, 5  ;;  %v1030_v52 = vshll.u32 %v722_v26, 16  ;;  %v440_v53 = vld [vmem:[%s8161_s25 + $0xb4] sm:$0xf] }
  0x4e   : > { %v441_v54 = vld [vmem:[%s8161_s25 + $0xb8] sm:$0xf]  ;;  %v978_v55 = vrot.slane %v977_v34, 4  ;;  %v1026_v56 = vrot.slane %v1024_v46, 4  ;;  %v1034_v57 = vshrl.u32 %v722_v26, 16  ;;  %v1016_v58 = vrot.slane %v1014_v37, 4  ;;  %1512 = vrot.lane.b32.xlu1 %v973_v43, %s8097_s26 }
  0x4f   : > { %v724_v59 = vld [vmem:[#allocation2 + $0x70] sm:$0xf]  ;;  %511 = vst.msk [vmem:[#allocation2 + $0xb4] sm:$0xf] %vm465_vm0, %v440_v53  ;;  %512 = vst.msk [vmem:[#allocation2 + $0xb8] sm:$0xf] %vm465_vm0, %v441_v54  ;;  %1510 = vrot.lane.b32.xlu0 %v963_v48, %s8097_s26 }
  0x50   : > { %v1040_v62 = vshll.u32 %v723_v47, 16  ;;  %v1044_v60 = vshrl.u32 %v723_v47, 16  ;;  %v725_v63 = vld [vmem:[#allocation2 + $0x74] sm:$0xf]  ;;  %v1008_v0 = vrot.slane %v1007_v44, 4  ;;  %v998_v1 = vrot.slane %v997_v49, 4 }
  0x51   : > { %v1027_v2 = vor.u32 %v1026_v56, %v8373_v50  ;;  %v1017_v3 = vor.u32 %v1016_v58, %v8366_v45  ;;  %v8385_v4 = vrot.slane %v1030_v52, 5  ;;  %v1050_v7 = vshll.u32 %v724_v59, 16  ;;  %v726_v8 = vld [vmem:[#allocation2 + $0x78] sm:$0xf]  ;;  %v727_v17 = vld [vmem:[#allocation2 + $0x7c] sm:$0xf] }
  0x52   : > { %v8387_v5 = vrot.slane %v1040_v62, 5  ;;  %v1046_v6 = vrot.slane %v1044_v60, 4  ;;  %v983_v9 = vsel %vm8213_vm3, %v978_v55, %v8332_v13  ;;  %v1054_v10 = vshrl.u32 %v724_v59, 16  ;;  %1516 = vrot.lane.b32.xlu1 %v993_v61, %s8097_s26  ;;  %v442_v21 = vld [vmem:[%s8161_s25 + $0xbc] sm:$0xf] }
  0x53   : > { %v1036_v11 = vrot.slane %v1034_v57, 4  ;;  %v1060_v12 = vshll.u32 %v725_v63, 16  ;;  %v1028_v14 = vrot.slane %v1027_v2, 4  ;;  %v1018_v15 = vrot.slane %v1017_v3, 4  ;;  %1514 = vrot.lane.b32.xlu0 %v983_v9, %s8097_s26  ;;  %v728_v26 = vld [vmem:[#allocation2 + $0x80] sm:$0xf] }
  0x54   : > { %v1064_v16 = vshrl.u32 %v725_v63, 16  ;;  %v1013_v18 = vsel %vm8213_vm3, %v1008_v0, %v8366_v45  ;;  %v1003_v19 = vsel %vm8213_vm3, %v998_v1, %v8354_v35  ;;  %v1047_v20 = vor.u32 %v1046_v6, %v8387_v5  ;;  %513 = vst.msk [vmem:[#allocation2 + $0xbc] sm:$0xf] %vm465_vm0, %v442_v21  ;;  %v729_v31 = vld [vmem:[#allocation2 + $0x84] sm:$0xf] }
  0x55   : > { %v1070_v13 = vshll.u32 %v726_v8, 16  ;;  %v8402_v22 = vrot.slane %v1050_v7, 5  ;;  %v1037_v23 = vor.u32 %v1036_v11, %v8385_v4  ;;  %v8405_v24 = vrot.slane %v1060_v12, 5  ;;  %v730_v34 = vld [vmem:[#allocation2 + $0x88] sm:$0xf] }
  0x56   : > { %v1066_v25 = vrot.slane %v1064_v16, 4  ;;  %v1074_v27 = vshrl.u32 %v726_v8, 16  ;;  %v1056_v28 = vrot.slane %v1054_v10, 4  ;;  %v1080_v29 = vshll.u32 %v727_v17, 16  ;;  %v443_v35 = vld [vmem:[%s8161_s25 + $0xc0] sm:$0xf]  ;;  %1520 = vrot.lane.b32.xlu1 %v1013_v18, %s8097_s26 }
  0x57   : > { %v1084_v30 = vshrl.u32 %v727_v17, 16  ;;  %v1033_v32 = vsel %vm8213_vm3, %v1028_v14, %v8385_v4  ;;  %v1023_v33 = vsel %vm8213_vm3, %v1018_v15, %v8373_v50  ;;  %v444_v36 = vld [vmem:[%s8161_s25 + $0xc4] sm:$0xf]  ;;  %v1048_v37 = vrot.slane %v1047_v20, 4  ;;  %v731_v41 = vld [vmem:[#allocation2 + $0x8c] sm:$0xf]  ;;  %1518 = vrot.lane.b32.xlu0 %v1003_v19, %s8097_s26 }
  0x58   : > { %v8417_v38 = vrot.slane %v1070_v13, 5  ;;  %v8419_v39 = vrot.slane %v1080_v29, 5  ;;  %514 = vst.msk [vmem:[#allocation2 + $0xc0] sm:$0xf] %vm465_vm0, %v443_v35  ;;  %v445_v42 = vld [vmem:[%s8161_s25 + $0xc8] sm:$0xf]  ;;  %v1067_v44 = vor.u32 %v1066_v25, %v8405_v24  ;;  %v1057_v48 = vor.u32 %v1056_v28, %v8402_v22 }
  0x59   : > { %v1086_v40 = vrot.slane %v1084_v30, 4  ;;  %515 = vst.msk [vmem:[#allocation2 + $0xc4] sm:$0xf] %vm465_vm0, %v444_v36  ;;  %v1038_v43 = vrot.slane %v1037_v23, 4  ;;  %v1090_v45 = vshll.u32 %v728_v26, 16  ;;  %v1100_v46 = vshll.u32 %v729_v31, 16 }
  0x5a   : > { %516 = vst.msk [vmem:[#allocation2 + $0xc8] sm:$0xf] %vm465_vm0, %v445_v42  ;;  %v446_v47 = vld [vmem:[%s8161_s25 + $0xcc] sm:$0xf]  ;;  %v1094_v49 = vshrl.u32 %v728_v26, 16  ;;  %v1076_v50 = vrot.slane %v1074_v27, 4  ;;  %1524 = vrot.lane.b32.xlu1 %v1033_v32, %s8097_s26  ;;  %v1053_v59 = vsel %vm8213_vm3, %v1048_v37, %v8402_v22 }
  0x5b   : > { %v1104_v52 = vshrl.u32 %v729_v31, 16  ;;  %v447_v53 = vld [vmem:[%s8161_s25 + $0xd0] sm:$0xf]  ;;  %517 = vst.msk [vmem:[#allocation2 + $0xcc] sm:$0xf] %vm465_vm0, %v446_v47  ;;  %v1087_v54 = vor.u32 %v1086_v40, %v8419_v39  ;;  %v8432_v55 = vrot.slane %v1100_v46, 5  ;;  %1522 = vrot.lane.b32.xlu0 %v1023_v33, %s8097_s26  ;;  %v1043_v6 = vsel %vm8213_vm3, %v1038_v43, %v8387_v5 }
  0x5c   : > { %v732_v56 = vld [vmem:[#allocation2 + $0x90] sm:$0xf]  ;;  %518 = vst.msk [vmem:[#allocation2 + $0xd0] sm:$0xf] %vm465_vm0, %v447_v53  ;;  %v448_v57 = vld [vmem:[%s8161_s25 + $0xd4] sm:$0xf]  ;;  %v1077_v8 = vor.u32 %v1076_v50, %v8417_v38 }
  0x5d   : > { %v449_v58 = vld [vmem:[%s8161_s25 + $0xd8] sm:$0xf]  ;;  %v1106_v61 = vrot.slane %v1104_v52, 4  ;;  %v1110_v62 = vshll.u32 %v730_v34, 16  ;;  %v1114_v60 = vshrl.u32 %v730_v34, 16  ;;  %v1068_v0 = vrot.slane %v1067_v44, 4 }
  0x5e   : > { %v733_v63 = vld [vmem:[#allocation2 + $0x94] sm:$0xf]  ;;  %519 = vst.msk [vmem:[#allocation2 + $0xd4] sm:$0xf] %vm465_vm0, %v448_v57  ;;  %520 = vst.msk [vmem:[#allocation2 + $0xd8] sm:$0xf] %vm465_vm0, %v449_v58  ;;  %1528 = vrot.lane.b32.xlu1 %v1053_v59, %s8097_s26 }
  0x5f   : > { %v1092_v1 = vrot.slane %v1090_v45, 5  ;;  %v1120_v2 = vshll.u32 %v731_v41, 16  ;;  %v1124_v3 = vshrl.u32 %v731_v41, 16  ;;  %v450_v4 = vld [vmem:[%s8161_s25 + $0xdc] sm:$0xf]  ;;  %v1058_v7 = vrot.slane %v1057_v48, 4  ;;  %1526 = vrot.lane.b32.xlu0 %v1043_v6, %s8097_s26 }
  0x60   : > { %v1096_v9 = vrot.slane %v1094_v49, 4  ;;  %v451_v10 = vld [vmem:[%s8161_s25 + $0xe0] sm:$0xf]  ;;  %521 = vst.msk [vmem:[#allocation2 + $0xdc] sm:$0xf] %vm465_vm0, %v450_v4  ;;  %v1088_v12 = vrot.slane %v1087_v54, 4  ;;  %v1107_v14 = vor.u32 %v1106_v61, %v8432_v55  ;;  %v1073_v20 = vsel %vm8213_vm3, %v1068_v0, %v8417_v38 }
  0x61   : > { %v452_v11 = vld [vmem:[%s8161_s25 + $0xe4] sm:$0xf]  ;;  %v8453_v15 = vrot.slane %v1120_v2, 5  ;;  %v1126_v16 = vrot.slane %v1124_v3, 4  ;;  %522 = vst.msk [vmem:[#allocation2 + $0xe0] sm:$0xf] %vm465_vm0, %v451_v10  ;;  %v1063_v25 = vsel %vm8213_vm3, %v1058_v7, %v8405_v24 }
  0x62   : > { %523 = vst.msk [vmem:[#allocation2 + $0xe4] sm:$0xf] %vm465_vm0, %v452_v11  ;;  %v8458_v5 = vrot.slane %v1110_v62, 5  ;;  %v1130_v17 = vshll.u32 %v732_v56, 16  ;;  %v1116_v18 = vrot.slane %v1114_v60, 4  ;;  %v1134_v13 = vshrl.u32 %v732_v56, 16  ;;  %1532 = vrot.lane.b32.xlu1 %v1073_v20, %s8097_s26 }
  0x63   : > { %v734_v19 = vld [vmem:[#allocation2 + $0x98] sm:$0xf]  ;;  %v1140_v21 = vshll.u32 %v733_v63, 16  ;;  %v1144_v22 = vshrl.u32 %v733_v63, 16  ;;  %v735_v23 = vld [vmem:[#allocation2 + $0x9c] sm:$0xf]  ;;  %v1097_v27 = vor.u32 %v1096_v9, %v1092_v1  ;;  %v1093_v28 = vsel %vm8213_vm3, %v1088_v12, %v1092_v1  ;;  %1530 = vrot.lane.b32.xlu0 %v1063_v25, %s8097_s26 }
  0x64   : > { %v1078_v26 = vrot.slane %v1077_v8, 4  ;;  %v1108_v29 = vrot.slane %v1107_v14, 4  ;;  %v1127_v30 = vor.u32 %v1126_v16, %v8453_v15  ;;  %v1150_v31 = vshll.u32 %v734_v19, 16  ;;  %v8470_v32 = vld [vmem:[#allocation2 + $0xa0] sm:$0xf] }
  0x65   : > { %v8473_v33 = vrot.slane %v1130_v17, 5  ;;  %v1117_v34 = vor.u32 %v1116_v18, %v8458_v5  ;;  %v1154_v35 = vshrl.u32 %v734_v19, 16  ;;  %v1160_v24 = vshll.u32 %v735_v23, 16  ;;  %v737_v36 = vld [vmem:[#allocation2 + $0xa4] sm:$0xf] }
  0x66   : > { %v8477_v37 = vrot.slane %v1140_v21, 5  ;;  %v1146_v38 = vrot.slane %v1144_v22, 4  ;;  %v1136_v40 = vrot.slane %v1134_v13, 4  ;;  %v1164_v41 = vshrl.u32 %v735_v23, 16  ;;  %v453_v42 = vld [vmem:[%s8161_s25 + $0xe8] sm:$0xf]  ;;  %1536 = vrot.lane.b32.xlu1 %v1093_v28, %s8097_s26 }
  0x67   : > { %v1083_v43 = vsel %vm8213_vm3, %v1078_v26, %v8419_v39  ;;  %v1098_v44 = vrot.slane %v1097_v27, 4  ;;  %v738_v45 = vld [vmem:[#allocation2 + $0xa8] sm:$0xf]  ;;  %524 = vst.msk [vmem:[#allocation2 + $0xe8] sm:$0xf] %vm465_vm0, %v453_v42  ;;  %v1113_v46 = vsel %vm8213_vm3, %v1108_v29, %v8458_v5  ;;  %v1128_v47 = vrot.slane %v1127_v30, 4 }
  0x68   : > { %v8487_v48 = vrot.slane %v1150_v31, 5  ;;  %v1180_v49 = vshll.u32 %v737_v36, 16  ;;  %v739_v50 = vld [vmem:[#allocation2 + $0xac] sm:$0xf]  ;;  %v1118_v52 = vrot.slane %v1117_v34, 4  ;;  %v8490_v53 = vrot.slane %v1160_v24, 5  ;;  %1534 = vrot.lane.b32.xlu0 %v1083_v43, %s8097_s26 }
  0x69   : > { %v1170_v39 = vshll.u32 %v8470_v32, 16  ;;  %v1184_v54 = vshrl.u32 %v737_v36, 16  ;;  %v558_v56 = vld [vmem:[#allocation2 + $0x8] sm:$0xf]  ;;  %v1147_v57 = vor.u32 %v1146_v38, %v8477_v37  ;;  %v1137_v58 = vor.u32 %v1136_v40, %v8473_v33  ;;  %v8496_v62 = vld [vmem:[#allocation2 + $0xb0] sm:$0xf] }
  0x6a   : > { %v1166_v59 = vrot.slane %v1164_v41, 4  ;;  %v1156_v61 = vrot.slane %v1154_v35, 4  ;;  %628 = vst.msk [vmem:[#allocation3 + $0x10] sm:$0xf] %vm465_vm0, %v558_v56  ;;  %v556_v60 = vld [vmem:[#allocation2] sm:$0xf]  ;;  %v1103_v0 = vsel %vm8213_vm3, %v1098_v44, %v8432_v55  ;;  %1540 = vrot.lane.b32.xlu1 %v1113_v46, %s8097_s26  ;;  %v1133_v55 = vsel %vm8213_vm3, %v1128_v47, %v8473_v33 }
  0x6b   : > { %v454_v63 = vld [vmem:[%s8161_s25 + $0xec] sm:$0xf]  ;;  %v1174_v1 = vshrl.u32 %v8470_v32, 16  ;;  %v1190_v2 = vshll.u32 %v738_v45, 16  ;;  %v1194_v3 = vshrl.u32 %v738_v45, 16  ;;  %v8507_v7 = vrot.slane %v1180_v49, 5 }
  0x6c   : > { %v741_v4 = vld [vmem:[#allocation2 + $0xb4] sm:$0xf]  ;;  %626 = vst.msk [vmem:[#allocation3] sm:$0xf] %vm465_vm0, %v556_v60  ;;  %v455_v6 = vld [vmem:[%s8161_s25 + $0xf0] sm:$0xf]  ;;  %v1123_v12 = vsel %vm8213_vm3, %v1118_v52, %v8453_v15  ;;  %1538 = vrot.lane.b32.xlu0 %v1103_v0, %s8097_s26  ;;  %v1167_v19 = vor.u32 %v1166_v59, %v8490_v53  ;;  %v1157_v20 = vor.u32 %v1156_v61, %v8487_v48 }
  0x6d   : > { %525 = vst.msk [vmem:[#allocation2 + $0xec] sm:$0xf] %vm465_vm0, %v454_v63  ;;  %v1186_v8 = vrot.slane %v1184_v54, 4  ;;  %v1200_v9 = vshll.u32 %v739_v50, 16  ;;  %v1204_v10 = vshrl.u32 %v739_v50, 16  ;;  %v8517_v14 = vrot.slane %v1170_v39, 5 }
  0x6e   : > { %526 = vst.msk [vmem:[#allocation2 + $0xf0] sm:$0xf] %vm465_vm0, %v455_v6  ;;  %v559_v11 = vld [vmem:[#allocation2 + $0xc] sm:$0xf]  ;;  %v557_v16 = vld [vmem:[#allocation2 + $0x4] sm:$0xf]  ;;  %1544 = vrot.lane.b32.xlu1 %v1133_v55, %s8097_s26 }
  0x6f   : > { %629 = vst.msk [vmem:[#allocation3 + $0x18] sm:$0xf] %vm465_vm0, %v559_v11  ;;  %v456_v5 = vld [vmem:[%s8161_s25 + $0xf4] sm:$0xf]  ;;  %v1148_v17 = vrot.slane %v1147_v57, 4  ;;  %v1138_v18 = vrot.slane %v1137_v58, 4  ;;  %v1187_v26 = vor.u32 %v1186_v8, %v8507_v7 }
  0x70   : > { %v8524_v13 = vld [vmem:[#allocation2 + $0xb8] sm:$0xf]  ;;  %627 = vst.msk [vmem:[#allocation3 + $0x8] sm:$0xf] %vm465_vm0, %v557_v16  ;;  %527 = vst.msk [vmem:[#allocation2 + $0xf4] sm:$0xf] %vm465_vm0, %v456_v5  ;;  %1542 = vrot.lane.b32.xlu0 %v1123_v12, %s8097_s26 }
  0x71   : > { %v1176_v15 = vrot.slane %v1174_v1, 4  ;;  %v8528_v21 = vrot.slane %v1200_v9, 5  ;;  %v1206_v22 = vrot.slane %v1204_v10, 4  ;;  %v1210_v23 = vshll.u32 %v8496_v62, 16  ;;  %v457_v25 = vld [vmem:[%s8161_s25 + $0xf8] sm:$0xf] }
  0x72   : > { %v8533_v27 = vrot.slane %v1190_v2, 5  ;;  %v1196_v28 = vrot.slane %v1194_v3, 4  ;;  %v1220_v29 = vshll.u32 %v741_v4, 16  ;;  %528 = vst.msk [vmem:[#allocation2 + $0xf8] sm:$0xf] %vm465_vm0, %v457_v25  ;;  %v1214_v31 = vshrl.u32 %v8496_v62, 16 }
  0x73   : > { %v561_v30 = vld [vmem:[#allocation2 + $0x14] sm:$0xf]  ;;  %v1224_v32 = vshrl.u32 %v741_v4, 16  ;;  %v560_v33 = vld [vmem:[#allocation2 + $0x10] sm:$0xf]  ;;  %v1153_v35 = vsel %vm8213_vm3, %v1148_v17, %v8487_v48  ;;  %v1143_v24 = vsel %vm8213_vm3, %v1138_v18, %v8477_v37  ;;  %v1168_v36 = vrot.slane %v1167_v19, 4 }
  0x74   : > { %631 = vst.msk [vmem:[#allocation3 + $0x28] sm:$0xf] %vm465_vm0, %v561_v30  ;;  %v458_v34 = vld [vmem:[%s8161_s25 + $0xfc] sm:$0xf]  ;;  %v1158_v38 = vrot.slane %v1157_v20, 4  ;;  %v1177_v41 = vor.u32 %v1176_v15, %v8517_v14  ;;  %v1207_v42 = vor.u32 %v1206_v22, %v8528_v21  ;;  %v8551_v43 = vrot.slane %v1210_v23, 5  ;;  %1548 = vrot.lane.b32.xlu1 %v1153_v35, %s8097_s26  ;;  %1546 = vrot.lane.b32.xlu0 %v1143_v24, %s8097_s26 }
  0x75   : > { %v743_v40 = vld [vmem:[#allocation2 + $0xbc] sm:$0xf]  ;;  %630 = vst.msk [vmem:[#allocation3 + $0x20] sm:$0xf] %vm465_vm0, %v560_v33  ;;  %529 = vst.msk [vmem:[#allocation2 + $0xfc] sm:$0xf] %vm465_vm0, %v458_v34  ;;  %v1197_v46 = vor.u32 %v1196_v28, %v8533_v27  ;;  %v1173_v56 = vsel %vm8213_vm3, %v1168_v36, %v8517_v14 }
  0x76   : > { %v1230_v44 = vshll.u32 %v8524_v13, 16  ;;  %v1188_v45 = vrot.slane %v1187_v26, 4  ;;  %v8555_v47 = vrot.slane %v1220_v29, 5  ;;  %v459_v37 = vld [vmem:[%s8161_s25 + $0x100] sm:$0xf]  ;;  %v1226_v49 = vrot.slane %v1224_v32, 4 }
  0x77   : > { %v563_v48 = vld [vmem:[#allocation2 + $0x1c] sm:$0xf]  ;;  %v1216_v50 = vrot.slane %v1214_v31, 4  ;;  %v744_v52 = vld [vmem:[#allocation2 + $0xc0] sm:$0xf]  ;;  %v1240_v39 = vshll.u32 %v743_v40, 16  ;;  %v1163_v61 = vsel %vm8213_vm3, %v1158_v38, %v8490_v53 }
  0x78   : > { %v1244_v54 = vshrl.u32 %v743_v40, 16  ;;  %530 = vst.msk [vmem:[#allocation2 + $0x100] sm:$0xf] %vm465_vm0, %v459_v37  ;;  %633 = vst.msk [vmem:[#allocation3 + $0x38] sm:$0xf] %vm465_vm0, %v563_v48  ;;  %v1234_v57 = vshrl.u32 %v8524_v13, 16  ;;  %v1193_v1 = vsel %vm8213_vm3, %v1188_v45, %v8533_v27  ;;  %1552 = vrot.lane.b32.xlu1 %v1173_v56, %s8097_s26  ;;  %v1227_v53 = vor.u32 %v1226_v49, %v8555_v47 }
  0x79   : > { %v745_v58 = vld [vmem:[#allocation2 + $0xc4] sm:$0xf]  ;;  %v562_v59 = vld [vmem:[#allocation2 + $0x18] sm:$0xf]  ;;  %v1178_v62 = vrot.slane %v1177_v41, 4  ;;  %v8569_v60 = vrot.slane %v1207_v42, 4  ;;  %v1217_v8 = vor.u32 %v1216_v50, %v8551_v43  ;;  %1550 = vrot.lane.b32.xlu0 %v1163_v61, %s8097_s26 }
  0x7a   : > { %v8571_v63 = vrot.slane %v1230_v44, 5  ;;  %v747_v0 = vld [vmem:[#allocation2 + $0xcc] sm:$0xf]  ;;  %632 = vst.msk [vmem:[#allocation3 + $0x30] sm:$0xf] %vm465_vm0, %v562_v59  ;;  %v8577_v2 = vrot.slane %v1197_v46, 4 }
  0x7b   : > { %v1250_v3 = vshll.u32 %v744_v52, 16  ;;  %v460_v4 = vld [vmem:[%s8161_s25 + $0x104] sm:$0xf]  ;;  %v461_v6 = vld [vmem:[%s8161_s25 + $0x108] sm:$0xf]  ;;  %v8584_v9 = vrot.slane %v1240_v39, 5  ;;  %v1183_v18 = vsel %vm8213_vm3, %v1178_v62, %v8507_v7  ;;  %v1213_v22 = vsel %vm8213_vm3, %v8569_v60, %v8551_v43 }
  0x7c   : > { %v1246_v10 = vrot.slane %v1244_v54, 4  ;;  %v746_v11 = vld [vmem:[#allocation2 + $0xc8] sm:$0xf]  ;;  %v8586_v55 = vld [vmem:[#allocation2 + $0xd0] sm:$0xf]  ;;  %v1254_v12 = vshrl.u32 %v744_v52, 16  ;;  %1556 = vrot.lane.b32.xlu1 %v1193_v1, %s8097_s26  ;;  %v1203_v24 = vsel %vm8213_vm3, %v8577_v2, %v8528_v21 }
  0x7d   : > { %531 = vst.msk [vmem:[#allocation2 + $0x104] sm:$0xf] %vm465_vm0, %v460_v4  ;;  %532 = vst.msk [vmem:[#allocation2 + $0x108] sm:$0xf] %vm465_vm0, %v461_v6  ;;  %v1236_v14 = vrot.slane %v1234_v57, 4  ;;  %v1260_v16 = vshll.u32 %v745_v58, 16  ;;  %1554 = vrot.lane.b32.xlu0 %v1183_v18, %s8097_s26 }
  0x7e   : > { %v1264_v5 = vshrl.u32 %v745_v58, 16  ;;  %v565_v17 = vld [vmem:[#allocation2 + $0x24] sm:$0xf]  ;;  %v1280_v19 = vshll.u32 %v747_v0, 16  ;;  %v1284_v20 = vshrl.u32 %v747_v0, 16  ;;  %v1270_v23 = vshll.u32 %v746_v11, 16 }
  0x7f   : > { %635 = vst.msk [vmem:[#allocation3 + $0x48] sm:$0xf] %vm465_vm0, %v565_v17  ;;  %v564_v13 = vld [vmem:[#allocation2 + $0x20] sm:$0xf]  ;;  %v462_v15 = vld [vmem:[%s8161_s25 + $0x10c] sm:$0xf]  ;;  %v1247_v28 = vor.u32 %v1246_v10, %v8584_v9  ;;  %v1237_v36 = vor.u32 %v1236_v14, %v8571_v63 }
  0x80   : > { %v1274_v25 = vshrl.u32 %v746_v11, 16  ;;  %v749_v26 = vld [vmem:[#allocation2 + $0xd4] sm:$0xf]  ;;  %634 = vst.msk [vmem:[#allocation3 + $0x40] sm:$0xf] %vm465_vm0, %v564_v13  ;;  %v1228_v7 = vrot.slane %v1227_v53, 4  ;;  %1560 = vrot.lane.b32.xlu1 %v1213_v22, %s8097_s26 }
  0x81   : > { %533 = vst.msk [vmem:[#allocation2 + $0x10c] sm:$0xf] %vm465_vm0, %v462_v15  ;;  %v1218_v27 = vrot.slane %v1217_v8, 4  ;;  %v8606_v29 = vrot.slane %v1250_v3, 5  ;;  %v463_v30 = vld [vmem:[%s8161_s25 + $0x110] sm:$0xf]  ;;  %1558 = vrot.lane.b32.xlu0 %v1203_v24, %s8097_s26 }
  0x82   : > { %v8610_v31 = vrot.slane %v1260_v16, 5  ;;  %v1266_v32 = vrot.slane %v1264_v5, 4  ;;  %v1256_v33 = vrot.slane %v1254_v12, 4  ;;  %v1290_v34 = vshll.u32 %v8586_v55, 16  ;;  %534 = vst.msk [vmem:[#allocation2 + $0x110] sm:$0xf] %vm465_vm0, %v463_v30 }
  0x83   : > { %v567_v35 = vld [vmem:[#allocation2 + $0x2c] sm:$0xf]  ;;  %v8619_v38 = vrot.slane %v1280_v19, 5  ;;  %v1286_v40 = vrot.slane %v1284_v20, 4  ;;  %v566_v41 = vld [vmem:[#allocation2 + $0x28] sm:$0xf]  ;;  %v1233_v49 = vsel %vm8213_vm3, %v1228_v7, %v8571_v63  ;;  %v1223_v50 = vsel %vm8213_vm3, %v1218_v27, %v8555_v47 }
  0x84   : > { %637 = vst.msk [vmem:[#allocation3 + $0x58] sm:$0xf] %vm465_vm0, %v567_v35  ;;  %v464_v42 = vld [vmem:[%s8161_s25 + $0x114] sm:$0xf]  ;;  %v8628_v43 = vrot.slane %v1270_v23, 5  ;;  %v1276_v44 = vrot.slane %v1274_v25, 4  ;;  %v1267_v39 = vor.u32 %v1266_v32, %v8610_v31  ;;  %v1257_v57 = vor.u32 %v1256_v33, %v8606_v29  ;;  %1564 = vrot.lane.b32.xlu1 %v1233_v49, %s8097_s26 }
  0x85   : > { %v1300_v45 = vshll.u32 %v749_v26, 16  ;;  %v1304_v21 = vshrl.u32 %v749_v26, 16  ;;  %636 = vst.msk [vmem:[#allocation3 + $0x50] sm:$0xf] %vm465_vm0, %v566_v41  ;;  %535 = vst.msk [vmem:[#allocation2 + $0x114] sm:$0xf] %vm465_vm0, %v464_v42  ;;  %v1287_v58 = vor.u32 %v1286_v40, %v8619_v38  ;;  %1562 = vrot.lane.b32.xlu0 %v1223_v50, %s8097_s26 }
  0x86   : > { %v1294_v46 = vshrl.u32 %v8586_v55, 16  ;;  %v750_v37 = vld [vmem:[#allocation2 + $0xd8] sm:$0xf]  ;;  %v751_v48 = vld [vmem:[#allocation2 + $0xdc] sm:$0xf]  ;;  %v1248_v52 = vrot.slane %v1247_v28, 4  ;;  %v1277_v61 = vor.u32 %v1276_v44, %v8628_v43 }
  0x87   : > { %v536_v54 = vld [vmem:[%s8625_s30] sm:$0xf]  ;;  %v1238_v56 = vrot.slane %v1237_v36, 4  ;;  %v8645_v59 = vrot.slane %v1290_v34, 5  ;;  %v8649_v62 = vrot.slane %v1300_v45, 5  ;;  %v1306_v60 = vrot.slane %v1304_v21, 4 }
  0x88   : > { %546 = vst.msk [vmem:[#allocation2 + $0x118] sm:$0xf] %vm465_vm0, %v536_v54  ;;  %v1310_v63 = vshll.u32 %v750_v37, 16  ;;  %v569_v47 = vld [vmem:[#allocation2 + $0x34] sm:$0xf]  ;;  %v1314_v0 = vshrl.u32 %v750_v37, 16  ;;  %v1253_v6 = vsel %vm8213_vm3, %v1248_v52, %v8606_v29 }
  0x89   : > { %v1296_v1 = vrot.slane %v1294_v46, 4  ;;  %v752_v2 = vld [vmem:[#allocation2 + $0xe0] sm:$0xf]  ;;  %v1320_v3 = vshll.u32 %v751_v48, 16  ;;  %v1324_v4 = vshrl.u32 %v751_v48, 16  ;;  %v1268_v53 = vrot.slane %v1267_v39, 4  ;;  %1568 = vrot.lane.b32.xlu1 %v1253_v6, %s8097_s26 }
  0x8a   : > { %639 = vst.msk [vmem:[#allocation3 + $0x68] sm:$0xf] %vm465_vm0, %v569_v47  ;;  %v568_v8 = vld [vmem:[#allocation2 + $0x30] sm:$0xf]  ;;  %v1243_v10 = vsel %vm8213_vm3, %v1238_v56, %v8584_v9  ;;  %v1258_v11 = vrot.slane %v1257_v57, 4  ;;  %v1288_v55 = vrot.slane %v1287_v58, 4  ;;  %v1307_v16 = vor.u32 %v1306_v60, %v8649_v62 }
  0x8b   : > { %v753_v12 = vld [vmem:[#allocation2 + $0xe4] sm:$0xf]  ;;  %638 = vst.msk [vmem:[#allocation3 + $0x60] sm:$0xf] %vm465_vm0, %v568_v8  ;;  %v1278_v14 = vrot.slane %v1277_v61, 4  ;;  %v8662_v5 = vrot.slane %v1310_v63, 5  ;;  %v1297_v18 = vor.u32 %v1296_v1, %v8645_v59  ;;  %1566 = vrot.lane.b32.xlu0 %v1243_v10, %s8097_s26  ;;  %v1273_v15 = vsel %vm8213_vm3, %v1268_v53, %v8628_v43 }
  0x8c   : > { %v1330_v17 = vshll.u32 %v752_v2, 16  ;;  %v8666_v19 = vrot.slane %v1320_v3, 5  ;;  %v1326_v20 = vrot.slane %v1324_v4, 4  ;;  %v1316_v13 = vrot.slane %v1314_v0, 4  ;;  %v571_v9 = vld [vmem:[#allocation2 + $0x3c] sm:$0xf] }
  0x8d   : > { %v754_v22 = vld [vmem:[#allocation2 + $0xe8] sm:$0xf]  ;;  %v1340_v23 = vshll.u32 %v753_v12, 16  ;;  %v1344_v25 = vshrl.u32 %v753_v12, 16  ;;  %641 = vst.msk [vmem:[#allocation3 + $0x78] sm:$0xf] %vm465_vm0, %v571_v9  ;;  %v1263_v26 = vsel %vm8213_vm3, %v1258_v11, %v8610_v31  ;;  %v1293_v29 = vsel %vm8213_vm3, %v1288_v55, %v8645_v59  ;;  %1572 = vrot.lane.b32.xlu1 %v1273_v15, %s8097_s26 }
  0x8e   : > { %v1334_v7 = vshrl.u32 %v752_v2, 16  ;;  %v755_v27 = vld [vmem:[#allocation2 + $0xec] sm:$0xf]  ;;  %v570_v28 = vld [vmem:[#allocation2 + $0x38] sm:$0xf]  ;;  %v1283_v30 = vsel %vm8213_vm3, %v1278_v14, %v8619_v38  ;;  %v1308_v32 = vrot.slane %v1307_v16, 4  ;;  %v1327_v24 = vor.u32 %v1326_v20, %v8666_v19 }
  0x8f   : > { %v8682_v33 = vrot.slane %v1330_v17, 5  ;;  %v756_v34 = vld [vmem:[#allocation2 + $0xf0] sm:$0xf]  ;;  %v757_v35 = vld [vmem:[#allocation2 + $0xf4] sm:$0xf]  ;;  %v1298_v31 = vrot.slane %v1297_v18, 4  ;;  %v1317_v36 = vor.u32 %v1316_v13, %v8662_v5  ;;  %1570 = vrot.lane.b32.xlu0 %v1263_v26, %s8097_s26 }
  0x90   : > { %640 = vst.msk [vmem:[#allocation3 + $0x70] sm:$0xf] %vm465_vm0, %v570_v28  ;;  %v1350_v40 = vshll.u32 %v754_v22, 16  ;;  %v573_v41 = vld [vmem:[#allocation2 + $0x44] sm:$0xf]  ;;  %v8689_v42 = vrot.slane %v1340_v23, 5  ;;  %v1313_v39 = vsel %vm8213_vm3, %v1308_v32, %v8662_v5 }
  0x91   : > { %v1346_v38 = vrot.slane %v1344_v25, 4  ;;  %v1360_v43 = vshll.u32 %v755_v27, 16  ;;  %v1364_v44 = vshrl.u32 %v755_v27, 16  ;;  %643 = vst.msk [vmem:[#allocation3 + $0x88] sm:$0xf] %vm465_vm0, %v573_v41  ;;  %v1354_v21 = vshrl.u32 %v754_v22, 16  ;;  %1576 = vrot.lane.b32.xlu1 %v1293_v29, %s8097_s26 }
  0x92   : > { %v572_v45 = vld [vmem:[#allocation2 + $0x40] sm:$0xf]  ;;  %v1336_v46 = vrot.slane %v1334_v7, 4  ;;  %v1370_v37 = vshll.u32 %v756_v34, 16  ;;  %v1380_v48 = vshll.u32 %v757_v35, 16  ;;  %v1374_v49 = vshrl.u32 %v756_v34, 16 }
  0x93   : > { %642 = vst.msk [vmem:[#allocation3 + $0x80] sm:$0xf] %vm465_vm0, %v572_v45  ;;  %v1384_v50 = vshrl.u32 %v757_v35, 16  ;;  %v575_v52 = vld [vmem:[#allocation2 + $0x4c] sm:$0xf]  ;;  %v1303_v54 = vsel %vm8213_vm3, %v1298_v31, %v8649_v62  ;;  %v1328_v56 = vrot.slane %v1327_v24, 4  ;;  %1574 = vrot.lane.b32.xlu0 %v1283_v30, %s8097_s26  ;;  %v1347_v60 = vor.u32 %v1346_v38, %v8689_v42 }
  0x94   : > { %v8700_v57 = vrot.slane %v1350_v40, 5  ;;  %v759_v58 = vld [vmem:[#allocation2 + $0xfc] sm:$0xf]  ;;  %645 = vst.msk [vmem:[#allocation3 + $0x98] sm:$0xf] %vm465_vm0, %v575_v52  ;;  %v1318_v61 = vrot.slane %v1317_v36, 4  ;;  %v1337_v62 = vor.u32 %v1336_v46, %v8682_v33 }
  0x95   : > { %v574_v59 = vld [vmem:[#allocation2 + $0x48] sm:$0xf]  ;;  %v8705_v63 = vrot.slane %v1360_v43, 5  ;;  %v1366_v47 = vrot.slane %v1364_v44, 4  ;;  %v758_v0 = vld [vmem:[#allocation2 + $0xf8] sm:$0xf]  ;;  %1580 = vrot.lane.b32.xlu1 %v1313_v39, %s8097_s26  ;;  %v1333_v14 = vsel %vm8213_vm3, %v1328_v56, %v8682_v33 }
  0x96   : > { %644 = vst.msk [vmem:[#allocation3 + $0x90] sm:$0xf] %vm465_vm0, %v574_v59  ;;  %v8709_v1 = vrot.slane %v1370_v37, 5  ;;  %v1356_v2 = vrot.slane %v1354_v21, 4  ;;  %v8711_v3 = vrot.slane %v1380_v48, 5  ;;  %v1386_v6 = vrot.slane %v1384_v50, 4 }
  0x97   : > { %v577_v4 = vld [vmem:[#allocation2 + $0x54] sm:$0xf]  ;;  %v1376_v53 = vrot.slane %v1374_v49, 4  ;;  %v1400_v8 = vshll.u32 %v759_v58, 16  ;;  %v1404_v10 = vshrl.u32 %v759_v58, 16  ;;  %v1390_v55 = vshll.u32 %v758_v0, 16  ;;  %1578 = vrot.lane.b32.xlu0 %v1303_v54, %s8097_s26 }
  0x98   : > { %647 = vst.msk [vmem:[#allocation3 + $0xa8] sm:$0xf] %vm465_vm0, %v577_v4  ;;  %v576_v11 = vld [vmem:[#allocation2 + $0x50] sm:$0xf]  ;;  %v1394_v12 = vshrl.u32 %v758_v0, 16  ;;  %v1348_v16 = vrot.slane %v1347_v60, 4  ;;  %v1367_v5 = vor.u32 %v1366_v47, %v8705_v63  ;;  %v1323_v20 = vsel %vm8213_vm3, %v1318_v61, %v8666_v19 }
  0x99   : > { %646 = vst.msk [vmem:[#allocation3 + $0xa0] sm:$0xf] %vm465_vm0, %v576_v11  ;;  %v761_v17 = vld [vmem:[#allocation2 + $0x104] sm:$0xf]  ;;  %v579_v18 = vld [vmem:[#allocation2 + $0x5c] sm:$0xf]  ;;  %v1357_v9 = vor.u32 %v1356_v2, %v8700_v57  ;;  %v1387_v22 = vor.u32 %v1386_v6, %v8711_v3  ;;  %v1377_v23 = vor.u32 %v1376_v53, %v8709_v1  ;;  %1584 = vrot.lane.b32.xlu1 %v1333_v14, %s8097_s26 }
  0x9a   : > { %v1338_v13 = vrot.slane %v1337_v62, 4  ;;  %649 = vst.msk [vmem:[#allocation3 + $0xb8] sm:$0xf] %vm465_vm0, %v579_v18  ;;  %v578_v15 = vld [vmem:[#allocation2 + $0x58] sm:$0xf]  ;;  %v8728_v26 = vrot.slane %v1400_v8, 5  ;;  %v1353_v33 = vsel %vm8213_vm3, %v1348_v16, %v8700_v57 }
  0x9b   : > { %v760_v25 = vld [vmem:[#allocation2 + $0x100] sm:$0xf]  ;;  %v1406_v7 = vrot.slane %v1404_v10, 4  ;;  %648 = vst.msk [vmem:[#allocation3 + $0xb0] sm:$0xf] %vm465_vm0, %v578_v15  ;;  %v8732_v19 = vrot.slane %v1390_v55, 5  ;;  %1582 = vrot.lane.b32.xlu0 %v1323_v20, %s8097_s26 }
  0x9c   : > { %v581_v27 = vld [vmem:[#allocation2 + $0x64] sm:$0xf]  ;;  %v1396_v28 = vrot.slane %v1394_v12, 4  ;;  %v1420_v29 = vshll.u32 %v761_v17, 16  ;;  %v1424_v30 = vshrl.u32 %v761_v17, 16  ;;  %v1368_v34 = vrot.slane %v1367_v5, 4  ;;  %v1479_v56 = vpop.permute.xlu1 %1478 }
  0x9d   : > { %651 = vst.msk [vmem:[#allocation3 + $0xc8] sm:$0xf] %vm465_vm0, %v581_v27  ;;  %v580_v32 = vld [vmem:[#allocation2 + $0x60] sm:$0xf]  ;;  %v762_v35 = vld [vmem:[#allocation2 + $0x108] sm:$0xf]  ;;  %v1343_v24 = vsel %vm8213_vm3, %v1338_v13, %v8689_v42  ;;  %v1407_v45 = vor.u32 %v1406_v7, %v8728_v26  ;;  %1588 = vrot.lane.b32.xlu1 %v1353_v33, %s8097_s26  ;;  %v1475_v47 = vpop.permute.xlu0 %1474 }
  0x9e   : > { %v763_v31 = vld [vmem:[#allocation2 + $0x10c] sm:$0xf]  ;;  %650 = vst.msk [vmem:[#allocation3 + $0xc0] sm:$0xf] %vm465_vm0, %v580_v32  ;;  %v1358_v36 = vrot.slane %v1357_v9, 4  ;;  %v1410_v40 = vshll.u32 %v760_v25, 16  ;;  %v1397_v46 = vor.u32 %v1396_v28, %v8732_v19  ;;  %v1373_v49 = vsel %vm8213_vm3, %v1368_v34, %v8709_v1 }
  0x9f   : > { %v1414_v41 = vshrl.u32 %v760_v25, 16  ;;  %v583_v38 = vld [vmem:[#allocation2 + $0x6c] sm:$0xf]  ;;  %v1388_v43 = vrot.slane %v1387_v22, 4  ;;  %v1378_v44 = vrot.slane %v1377_v23, 4  ;;  %v8747_v37 = vrot.slane %v1420_v29, 5  ;;  %1586 = vrot.lane.b32.xlu0 %v1343_v24, %s8097_s26 }
  0xa0   : > { %653 = vst.msk [vmem:[#allocation3 + $0xd8] sm:$0xf] %vm465_vm0, %v583_v38  ;;  %v582_v21 = vld [vmem:[#allocation2 + $0x68] sm:$0xf]  ;;  %v1426_v48 = vrot.slane %v1424_v30, 4  ;;  %v1430_v42 = vshll.u32 %v762_v35, 16  ;;  %v1363_v57 = vsel %vm8213_vm3, %v1358_v36, %v8705_v63  ;;  %v1481_v12 = vpop.permute.xlu1 %1480 }
  0xa1   : > { %652 = vst.msk [vmem:[#allocation3 + $0xd0] sm:$0xf] %vm465_vm0, %v582_v21  ;;  %v1440_v50 = vshll.u32 %v763_v31, 16  ;;  %v1444_v52 = vshrl.u32 %v763_v31, 16  ;;  %v765_v39 = vld [vmem:[#allocation2 + $0x114] sm:$0xf]  ;;  %v1393_v0 = vsel %vm8213_vm3, %v1388_v43, %v8732_v19  ;;  %v1383_v62 = vsel %vm8213_vm3, %v1378_v44, %v8711_v3  ;;  %1592 = vrot.lane.b32.xlu1 %v1373_v49, %s8097_s26  ;;  %v1477_v18 = vpop.permute.xlu0 %1476 }
  0xa2   : > { %v585_v54 = vld [vmem:[#allocation2 + $0x74] sm:$0xf]  ;;  %v1412_v58 = vrot.slane %v1410_v40, 5  ;;  %v1434_v59 = vshrl.u32 %v762_v35, 16  ;;  %v1416_v61 = vrot.slane %v1414_v41, 4  ;;  %v1408_v63 = vrot.slane %v1407_v45, 4 }
  0xa3   : > { %655 = vst.msk [vmem:[#allocation3 + $0xe8] sm:$0xf] %vm465_vm0, %v585_v54  ;;  %v584_v60 = vld [vmem:[#allocation2 + $0x70] sm:$0xf]  ;;  %v1398_v2 = vrot.slane %v1397_v46, 4  ;;  %v1427_v4 = vor.u32 %v1426_v48, %v8747_v37  ;;  %v1432_v6 = vrot.slane %v1430_v42, 5  ;;  %1590 = vrot.lane.b32.xlu0 %v1363_v57, %s8097_s26 }
  0xa4   : > { %1687 = vst.msk [vmem:[#allocation3 + $0x10] sm:$0xf] %vm1684_vm4, %v1479_v56  ;;  %v764_v1 = vld [vmem:[#allocation2 + $0x110] sm:$0xf]  ;;  %1685 = vst.msk [vmem:[#allocation3] sm:$0xf] %vm1684_vm4, %v1475_v47  ;;  %v1417_v14 = vor.u32 %v1416_v61, %v1412_v58  ;;  %v1413_v13 = vsel %vm8213_vm3, %v1408_v63, %v1412_v58  ;;  %v1485_v19 = vpop.permute.xlu1 %1484 }
  0xa5   : > { %654 = vst.msk [vmem:[#allocation3 + $0xe0] sm:$0xf] %vm465_vm0, %v584_v60  ;;  %v587_v53 = vld [vmem:[#allocation2 + $0x7c] sm:$0xf]  ;;  %v8770_v8 = vrot.slane %v1440_v50, 5  ;;  %v1446_v10 = vrot.slane %v1444_v52, 4  ;;  %1596 = vrot.lane.b32.xlu1 %v1393_v0, %s8097_s26  ;;  %v1403_v9 = vsel %vm8213_vm3, %v1398_v2, %v8728_v26  ;;  %v1483_v33 = vpop.permute.xlu0 %1482 }
  0xa6   : > { %v1460_v11 = vshll.u32 %v765_v39, 16  ;;  %v1464_v3 = vshrl.u32 %v765_v39, 16  ;;  %657 = vst.msk [vmem:[#allocation3 + $0xf8] sm:$0xf] %vm465_vm0, %v587_v53  ;;  %v586_v55 = vld [vmem:[#allocation2 + $0x78] sm:$0xf] }
  0xa7   : > { %v1450_v16 = vshll.u32 %v764_v1, 16  ;;  %v1454_v5 = vshrl.u32 %v764_v1, 16  ;;  %v1436_v17 = vrot.slane %v1434_v59, 4  ;;  %656 = vst.msk [vmem:[#allocation3 + $0xf0] sm:$0xf] %vm465_vm0, %v586_v55  ;;  %1594 = vrot.lane.b32.xlu0 %v1383_v62, %s8097_s26  ;;  %v1428_v22 = vrot.slane %v1427_v4, 4 }
  0xa8   : > { %1688 = vst.msk [vmem:[#allocation3 + $0x18] sm:$0xf] %vm1684_vm4, %v1481_v12  ;;  %v589_v20 = vld [vmem:[#allocation2 + $0x84] sm:$0xf]  ;;  %1686 = vst.msk [vmem:[#allocation3 + $0x8] sm:$0xf] %vm1684_vm4, %v1477_v18  ;;  %v1447_v23 = vor.u32 %v1446_v10, %v8770_v8  ;;  %v1489_v38 = vpop.permute.xlu1 %1488 }
  0xa9   : > { %659 = vst.msk [vmem:[#allocation3 + $0x108] sm:$0xf] %vm465_vm0, %v589_v20  ;;  %v588_v15 = vld [vmem:[#allocation2 + $0x80] sm:$0xf]  ;;  %v766_v25 = vld [vmem:[#allocation2 + $0x118] sm:$0x1]  ;;  %v1437_v30 = vor.u32 %v1436_v17, %v1432_v6  ;;  %1600 = vrot.lane.b32.xlu1 %v1413_v13, %s8097_s26  ;;  %v1433_v31 = vsel %vm8213_vm3, %v1428_v22, %v1432_v6  ;;  %v1487_v46 = vpop.permute.xlu0 %1486 }
  0xaa   : > { %v8785_v7 = vrot.slane %v1460_v11, 5  ;;  %v1466_v27 = vrot.slane %v1464_v3, 4  ;;  %658 = vst.msk [vmem:[#allocation3 + $0x100] sm:$0xf] %vm465_vm0, %v588_v15  ;;  %v1418_v28 = vrot.slane %v1417_v14, 4  ;;  %v1452_v29 = vrot.slane %v1450_v16, 5 }
  0xab   : > { %v1456_v32 = vrot.slane %v1454_v5, 4  ;;  %v591_v26 = vld [vmem:[#allocation2 + $0x8c] sm:$0xf]  ;;  %1690 = vst.msk [vmem:[#allocation3 + $0x28] sm:$0xf] %vm1684_vm4, %v1485_v19  ;;  %1598 = vrot.lane.b32.xlu0 %v1403_v9, %s8097_s26  ;;  %v1448_v24 = vrot.slane %v1447_v23, 4 }
  0xac   : > { %661 = vst.msk [vmem:[#allocation3 + $0x118] sm:$0xf] %vm465_vm0, %v591_v26  ;;  %v590_v34 = vld [vmem:[#allocation2 + $0x88] sm:$0xf]  ;;  %v593_v35 = vld [vmem:[#allocation2 + $0x94] sm:$0xf]  ;;  %v1467_v36 = vor.u32 %v1466_v27, %v8785_v7  ;;  %v1423_v43 = vsel %vm8213_vm3, %v1418_v28, %v8747_v37  ;;  %v1493_v54 = vpop.permute.xlu1 %1492 }
  0xad   : > { %1689 = vst.msk [vmem:[#allocation3 + $0x20] sm:$0xf] %vm1684_vm4, %v1483_v33  ;;  %v1470_v40 = vshll.u32 %v766_v25, 16  ;;  %v592_v41 = vld [vmem:[#allocation2 + $0x90] sm:$0xf]  ;;  %v1438_v44 = vrot.slane %v1437_v30, 4  ;;  %v1457_v45 = vor.u32 %v1456_v32, %v1452_v29  ;;  %1604 = vrot.lane.b32.xlu1 %v1433_v31, %s8097_s26  ;;  %v1453_v49 = vsel %vm8213_vm3, %v1448_v24, %v1452_v29  ;;  %v1491_v61 = vpop.permute.xlu0 %1490 }
  0xae   : > { %660 = vst.msk [vmem:[#allocation3 + $0x110] sm:$0xf] %vm465_vm0, %v590_v34  ;;  %663 = vst.msk [vmem:[#allocation3 + $0x128] sm:$0xf] %vm465_vm0, %v593_v35  ;;  %v1756_v21 = vld [vmem:[#allocation2 + $0x4] sm:$0xf] }
  0xaf   : > { %662 = vst.msk [vmem:[#allocation3 + $0x120] sm:$0xf] %vm465_vm0, %v592_v41  ;;  %v1757_v48 = vld [vmem:[#allocation2 + $0x8] sm:$0xf]  ;;  %v595_v42 = vld [vmem:[#allocation2 + $0x9c] sm:$0xf]  ;;  %1602 = vrot.lane.b32.xlu0 %v1423_v43, %s8097_s26  ;;  %v1443_v56 = vsel %vm8213_vm3, %v1438_v44, %v8770_v8 }
  0xb0   : > { %1692 = vst.msk [vmem:[#allocation3 + $0x38] sm:$0xf] %vm1684_vm4, %v1489_v38  ;;  %1691 = vst.msk [vmem:[#allocation3 + $0x30] sm:$0xf] %vm1684_vm4, %v1487_v46  ;;  %v1468_v37 = vrot.slane %v1467_v36, 4  ;;  %v1472_v50 = vrot.slane %v1470_v40, 5  ;;  %v1497_v4 = vpop.permute.xlu1 %1496 }
  0xb1   : > { %v1902_v52 = vrot.slane %v1756_v21, 5  ;;  %665 = vst.msk [vmem:[#allocation3 + $0x138] sm:$0xf] %vm465_vm0, %v595_v42  ;;  %v594_v39 = vld [vmem:[#allocation2 + $0x98] sm:$0xf]  ;;  %v1458_v57 = vrot.slane %v1457_v45, 4  ;;  %1608 = vrot.lane.b32.xlu1 %v1453_v49, %s8097_s26  ;;  %v1495_v3 = vpop.permute.xlu0 %1494 }
  0xb2   : > { %v8812_v58 = vld [vmem:[#allocation2 + $0xc] sm:$0xf]  ;;  %664 = vst.msk [vmem:[#allocation3 + $0x130] sm:$0xf] %vm465_vm0, %v594_v39  ;;  %v597_v59 = vld [vmem:[#allocation2 + $0xa4] sm:$0xf]  ;;  %v1473_v0 = vsel %vm8213_vm3, %v1468_v37, %v1472_v50 }
  0xb3   : > { %1694 = vst.msk [vmem:[#allocation3 + $0x48] sm:$0xf] %vm1684_vm4, %v1493_v54  ;;  %v1755_v60 = vld [vmem:[#allocation2] sm:$0xe]  ;;  %1693 = vst.msk [vmem:[#allocation3 + $0x40] sm:$0xf] %vm1684_vm4, %v1491_v61  ;;  %1606 = vrot.lane.b32.xlu0 %v1443_v56, %s8097_s26  ;;  %v1463_v6 = vsel %vm8213_vm3, %v1458_v57, %v8785_v7 }
  0xb4   : > { %667 = vst.msk [vmem:[#allocation3 + $0x148] sm:$0xf] %vm465_vm0, %v597_v59  ;;  %v596_v47 = vld [vmem:[#allocation2 + $0xa0] sm:$0xf]  ;;  %v1904_v62 = vrot.slane %v1902_v52, 4  ;;  %v1905_v1 = vrot.slane %v1757_v48, 5  ;;  %v1501_v13 = vpop.permute.xlu1 %1500 }
  0xb5   : > { %666 = vst.msk [vmem:[#allocation3 + $0x140] sm:$0xf] %vm465_vm0, %v596_v47  ;;  %v1759_v63 = vld [vmem:[#allocation2 + $0x10] sm:$0xf]  ;;  %v1908_v2 = vrot.slane %v8812_v58, 5  ;;  %v7811_v8 = vrot.slane %v1755_v60, 9  ;;  %1612 = vrot.lane.b32.xlu1 %v1473_v0, %s8097_s26  ;;  %v1499_v25 = vpop.permute.xlu0 %1498 }
  0xb6   : > { %v8833_v10 = vld [vmem:[#allocation2 + $0x14] sm:$0xf]  ;;  %v599_v11 = vld [vmem:[#allocation2 + $0xac] sm:$0xf]  ;;  %1696 = vst.msk [vmem:[#allocation3 + $0x58] sm:$0xf] %vm1684_vm4, %v1497_v4  ;;  %v1906_v16 = vsel %vm8829_vm7, %v1904_v62, %v1905_v1 }
  0xb7   : > { %669 = vst.msk [vmem:[#allocation3 + $0x158] sm:$0xf] %vm465_vm0, %v599_v11  ;;  %v598_v55 = vld [vmem:[#allocation2 + $0xa8] sm:$0xf]  ;;  %v1761_v12 = vld [vmem:[#allocation2 + $0x18] sm:$0xf]  ;;  %1610 = vrot.lane.b32.xlu0 %v1463_v6, %s8097_s26  ;;  %v1903_v9 = vsel %vm8829_vm7, %v7811_v8, %v1902_v52 }
  0xb8   : > { %1695 = vst.msk [vmem:[#allocation3 + $0x50] sm:$0xf] %vm1684_vm4, %v1495_v3  ;;  %v601_v14 = vld [vmem:[#allocation2 + $0xb4] sm:$0xf]  ;;  %v1910_v5 = vrot.slane %v1908_v2, 4  ;;  %v1911_v17 = vrot.slane %v1759_v63, 5  ;;  %v1505_v33 = vpop.permute.xlu1 %1504 }
  0xb9   : > { %668 = vst.msk [vmem:[#allocation3 + $0x150] sm:$0xf] %vm465_vm0, %v598_v55  ;;  %v1914_v18 = vrot.slane %v8833_v10, 5  ;;  %671 = vst.msk [vmem:[#allocation3 + $0x168] sm:$0xf] %vm465_vm0, %v601_v14  ;;  %v1907_v15 = vrot.slane %v1905_v1, 4  ;;  %2113 = vrot.lane.b32.xlu1 %v1906_v16, %s8098_s6  ;;  %v1503_v36 = vpop.permute.xlu0 %1502 }
  0xba   : > { %v600_v20 = vld [vmem:[#allocation2 + $0xb0] sm:$0xf]  ;;  %v8847_v22 = vld [vmem:[#allocation2 + $0x1c] sm:$0xf]  ;;  %1698 = vst.msk [vmem:[#allocation3 + $0x68] sm:$0xf] %vm1684_vm4, %v1501_v13  ;;  %v1912_v28 = vsel %vm8829_vm7, %v1910_v5, %v1911_v17 }
  0xbb   : > { %670 = vst.msk [vmem:[#allocation3 + $0x160] sm:$0xf] %vm465_vm0, %v600_v20  ;;  %v603_v23 = vld [vmem:[#allocation2 + $0xbc] sm:$0xf]  ;;  %v602_v7 = vld [vmem:[#allocation2 + $0xb8] sm:$0xf]  ;;  %2111 = vrot.lane.b32.xlu0 %v1903_v9, %s8098_s6  ;;  %v1909_v34 = vsel %vm8829_vm7, %v1907_v15, %v1908_v2 }
  0xbc   : > { %673 = vst.msk [vmem:[#allocation3 + $0x178] sm:$0xf] %vm465_vm0, %v603_v23  ;;  %v1763_v27 = vld [vmem:[#allocation2 + $0x20] sm:$0xf]  ;;  %672 = vst.msk [vmem:[#allocation3 + $0x170] sm:$0xf] %vm465_vm0, %v602_v7  ;;  %v1509_v48 = vpop.permute.xlu1 %1508 }
  0xbd   : > { %1697 = vst.msk [vmem:[#allocation3 + $0x60] sm:$0xf] %vm1684_vm4, %v1499_v25  ;;  %v605_v19 = vld [vmem:[#allocation2 + $0xc4] sm:$0xf]  ;;  %v1916_v29 = vrot.slane %v1914_v18, 4  ;;  %v1917_v30 = vrot.slane %v1761_v12, 5  ;;  %2117 = vrot.lane.b32.xlu1 %v1912_v28, %s8098_s6  ;;  %v1507_v52 = vpop.permute.xlu0 %1506 }
  0xbe   : > { %v1920_v32 = vrot.slane %v8847_v22, 5  ;;  %675 = vst.msk [vmem:[#allocation3 + $0x188] sm:$0xf] %vm465_vm0, %v605_v19  ;;  %v604_v26 = vld [vmem:[#allocation2 + $0xc0] sm:$0xf]  ;;  %v1913_v35 = vrot.slane %v1911_v17, 4 }
  0xbf   : > { %v8862_v31 = vld [vmem:[#allocation2 + $0x24] sm:$0xf]  ;;  %674 = vst.msk [vmem:[#allocation3 + $0x180] sm:$0xf] %vm465_vm0, %v604_v26  ;;  %v607_v24 = vld [vmem:[#allocation2 + $0xcc] sm:$0xf]  ;;  %2115 = vrot.lane.b32.xlu0 %v1909_v34, %s8098_s6  ;;  %v1918_v43 = vsel %vm8829_vm7, %v1916_v29, %v1917_v30 }
  0xc0   : > { %1700 = vst.msk [vmem:[#allocation3 + $0x78] sm:$0xf] %vm1684_vm4, %v1505_v33  ;;  %v606_v40 = vld [vmem:[#allocation2 + $0xc8] sm:$0xf]  ;;  %1699 = vst.msk [vmem:[#allocation3 + $0x70] sm:$0xf] %vm1684_vm4, %v1503_v36  ;;  %v1915_v42 = vsel %vm8829_vm7, %v1913_v35, %v1914_v18  ;;  %v1513_v47 = vpop.permute.xlu1 %1512 }
  0xc1   : > { %677 = vst.msk [vmem:[#allocation3 + $0x198] sm:$0xf] %vm465_vm0, %v607_v24  ;;  %v1765_v41 = vld [vmem:[#allocation2 + $0x28] sm:$0xf]  ;;  %676 = vst.msk [vmem:[#allocation3 + $0x190] sm:$0xf] %vm465_vm0, %v606_v40  ;;  %2121 = vrot.lane.b32.xlu1 %v1918_v43, %s8098_s6  ;;  %v1511_v2 = vpop.permute.xlu0 %1510 }
  0xc2   : > { %v609_v38 = vld [vmem:[#allocation2 + $0xd4] sm:$0xf]  ;;  %v1922_v44 = vrot.slane %v1920_v32, 4  ;;  %v1923_v45 = vrot.slane %v1763_v27, 5  ;;  %v1926_v21 = vrot.slane %v8862_v31, 5  ;;  %v1919_v49 = vrot.slane %v1917_v30, 4 }
  0xc3   : > { %679 = vst.msk [vmem:[#allocation3 + $0x1a8] sm:$0xf] %vm465_vm0, %v609_v38  ;;  %v608_v46 = vld [vmem:[#allocation2 + $0xd0] sm:$0xf]  ;;  %v8877_v37 = vld [vmem:[#allocation2 + $0x2c] sm:$0xf]  ;;  %2119 = vrot.lane.b32.xlu0 %v1915_v42, %s8098_s6 }
  0xc4   : > { %678 = vst.msk [vmem:[#allocation3 + $0x1a0] sm:$0xf] %vm465_vm0, %v608_v46  ;;  %v611_v50 = vld [vmem:[#allocation2 + $0xdc] sm:$0xf]  ;;  %v610_v39 = vld [vmem:[#allocation2 + $0xd8] sm:$0xf]  ;;  %v1924_v57 = vsel %vm8829_vm7, %v1922_v44, %v1923_v45  ;;  %v1921_v0 = vsel %vm8829_vm7, %v1919_v49, %v1920_v32  ;;  %v1517_v14 = vpop.permute.xlu1 %1516 }
  0xc5   : > { %1702 = vst.msk [vmem:[#allocation3 + $0x88] sm:$0xf] %vm1684_vm4, %v1509_v48  ;;  %1701 = vst.msk [vmem:[#allocation3 + $0x80] sm:$0xf] %vm1684_vm4, %v1507_v52  ;;  %v1767_v54 = vld [vmem:[#allocation2 + $0x30] sm:$0xf]  ;;  %2125 = vrot.lane.b32.xlu1 %v1924_v57, %s8098_s6  ;;  %v1515_v20 = vpop.permute.xlu0 %1514 }
  0xc6   : > { %681 = vst.msk [vmem:[#allocation3 + $0x1b8] sm:$0xf] %vm465_vm0, %v611_v50  ;;  %680 = vst.msk [vmem:[#allocation3 + $0x1b0] sm:$0xf] %vm465_vm0, %v610_v39  ;;  %v613_v56 = vld [vmem:[#allocation2 + $0xe4] sm:$0xf] }
  0xc7   : > { %v1928_v58 = vrot.slane %v1926_v21, 4  ;;  %v1929_v59 = vrot.slane %v1765_v41, 5  ;;  %v1932_v61 = vrot.slane %v8877_v37, 5  ;;  %683 = vst.msk [vmem:[#allocation3 + $0x1c8] sm:$0xf] %vm465_vm0, %v613_v56  ;;  %v1925_v62 = vrot.slane %v1923_v45, 4  ;;  %2123 = vrot.lane.b32.xlu0 %v1921_v0, %s8098_s6 }
  0xc8   : > { %v612_v60 = vld [vmem:[#allocation2 + $0xe0] sm:$0xf]  ;;  %v8892_v1 = vld [vmem:[#allocation2 + $0x34] sm:$0xf]  ;;  %v615_v63 = vld [vmem:[#allocation2 + $0xec] sm:$0xf]  ;;  %v1521_v19 = vpop.permute.xlu1 %1520 }
  0xc9   : > { %682 = vst.msk [vmem:[#allocation3 + $0x1c0] sm:$0xf] %vm465_vm0, %v612_v60  ;;  %685 = vst.msk [vmem:[#allocation3 + $0x1d8] sm:$0xf] %vm465_vm0, %v615_v63  ;;  %v614_v4 = vld [vmem:[#allocation2 + $0xe8] sm:$0xf]  ;;  %v1930_v10 = vsel %vm8829_vm7, %v1928_v58, %v1929_v59  ;;  %v1927_v16 = vsel %vm8829_vm7, %v1925_v62, %v1926_v21  ;;  %v1519_v26 = vpop.permute.xlu0 %1518 }
  0xca   : > { %1704 = vst.msk [vmem:[#allocation3 + $0x98] sm:$0xf] %vm1684_vm4, %v1513_v47  ;;  %1703 = vst.msk [vmem:[#allocation3 + $0x90] sm:$0xf] %vm1684_vm4, %v1511_v2  ;;  %v1769_v6 = vld [vmem:[#allocation2 + $0x38] sm:$0xf]  ;;  %2129 = vrot.lane.b32.xlu1 %v1930_v10, %s8098_s6 }
  0xcb   : > { %684 = vst.msk [vmem:[#allocation3 + $0x1d0] sm:$0xf] %vm465_vm0, %v614_v4  ;;  %v617_v8 = vld [vmem:[#allocation2 + $0xf4] sm:$0xf]  ;;  %v1934_v11 = vrot.slane %v1932_v61, 4  ;;  %v1935_v3 = vrot.slane %v1767_v54, 5  ;;  %2127 = vrot.lane.b32.xlu0 %v1927_v16, %s8098_s6 }
  0xcc   : > { %v1938_v55 = vrot.slane %v8892_v1, 5  ;;  %687 = vst.msk [vmem:[#allocation3 + $0x1e8] sm:$0xf] %vm465_vm0, %v617_v8  ;;  %v616_v12 = vld [vmem:[#allocation2 + $0xf0] sm:$0xf]  ;;  %v1931_v5 = vrot.slane %v1929_v59, 4  ;;  %v1525_v41 = vpop.permute.xlu1 %1524 }
  0xcd   : > { %v1770_v17 = vld [vmem:[#allocation2 + $0x3c] sm:$0xf]  ;;  %686 = vst.msk [vmem:[#allocation3 + $0x1e0] sm:$0xf] %vm465_vm0, %v616_v12  ;;  %v618_v13 = vld [vmem:[#allocation2 + $0xf8] sm:$0xf]  ;;  %v1936_v22 = vsel %vm8829_vm7, %v1934_v11, %v1935_v3  ;;  %v1523_v21 = vpop.permute.xlu0 %1522 }
  0xce   : > { %v619_v18 = vld [vmem:[#allocation2 + $0xfc] sm:$0xf]  ;;  %1706 = vst.msk [vmem:[#allocation3 + $0xa8] sm:$0xf] %vm1684_vm4, %v1517_v14  ;;  %1705 = vst.msk [vmem:[#allocation3 + $0xa0] sm:$0xf] %vm1684_vm4, %v1515_v20  ;;  %v1933_v28 = vsel %vm8829_vm7, %v1931_v5, %v1932_v61  ;;  %2133 = vrot.lane.b32.xlu1 %v1936_v22, %s8098_s6 }
  0xcf   : > { %689 = vst.msk [vmem:[#allocation3 + $0x1f8] sm:$0xf] %vm465_vm0, %v619_v18  ;;  %v1771_v9 = vld [vmem:[#allocation2 + $0x40] sm:$0xf]  ;;  %688 = vst.msk [vmem:[#allocation3 + $0x1f0] sm:$0xf] %vm465_vm0, %v618_v13  ;;  %2131 = vrot.lane.b32.xlu0 %v1933_v28, %s8098_s6 }
  0xd0   : > { %v621_v15 = vld [vmem:[#allocation2 + $0x104] sm:$0xf]  ;;  %v1940_v23 = vrot.slane %v1938_v55, 4  ;;  %v1941_v25 = vrot.slane %v1769_v6, 5  ;;  %v1944_v7 = vrot.slane %v1770_v17, 5  ;;  %v1937_v29 = vrot.slane %v1935_v3, 4  ;;  %v1529_v37 = vpop.permute.xlu1 %1528 }
  0xd1   : > { %691 = vst.msk [vmem:[#allocation3 + $0x208] sm:$0xf] %vm465_vm0, %v621_v15  ;;  %v620_v27 = vld [vmem:[#allocation2 + $0x100] sm:$0xf]  ;;  %v1772_v30 = vld [vmem:[#allocation2 + $0x44] sm:$0xf]  ;;  %v1527_v56 = vpop.permute.xlu0 %1526 }
  0xd2   : > { %690 = vst.msk [vmem:[#allocation3 + $0x200] sm:$0xf] %vm465_vm0, %v620_v27  ;;  %v623_v32 = vld [vmem:[#allocation2 + $0x10c] sm:$0xf]  ;;  %v622_v33 = vld [vmem:[#allocation2 + $0x108] sm:$0xf]  ;;  %v1942_v35 = vsel %vm8829_vm7, %v1940_v23, %v1941_v25  ;;  %v1939_v38 = vsel %vm8829_vm7, %v1937_v29, %v1938_v55 }
  0xd3   : > { %1708 = vst.msk [vmem:[#allocation3 + $0xb8] sm:$0xf] %vm1684_vm4, %v1521_v19  ;;  %1707 = vst.msk [vmem:[#allocation3 + $0xb0] sm:$0xf] %vm1684_vm4, %v1519_v26  ;;  %v625_v34 = vld [vmem:[#allocation2 + $0x114] sm:$0xf]  ;;  %2137 = vrot.lane.b32.xlu1 %v1942_v35, %s8098_s6  ;;  %2135 = vrot.lane.b32.xlu0 %v1939_v38, %s8098_s6 }
  0xd4   : > { %693 = vst.msk [vmem:[#allocation3 + $0x218] sm:$0xf] %vm465_vm0, %v623_v32  ;;  %692 = vst.msk [vmem:[#allocation3 + $0x210] sm:$0xf] %vm465_vm0, %v622_v33  ;;  %v1946_v31 = vrot.slane %v1944_v7, 4  ;;  %v1947_v24 = vrot.slane %v1771_v9, 5  ;;  %v1533_v60 = vpop.permute.xlu1 %1532 }
  0xd5   : > { %v1950_v36 = vrot.slane %v1772_v30, 5  ;;  %695 = vst.msk [vmem:[#allocation3 + $0x228] sm:$0xf] %vm465_vm0, %v625_v34  ;;  %v624_v40 = vld [vmem:[#allocation2 + $0x110] sm:$0xf]  ;;  %v1943_v43 = vrot.slane %v1941_v25, 4  ;;  %v1531_v63 = vpop.permute.xlu0 %1530 }
  0xd6   : > { %v1773_v44 = vld [vmem:[#allocation2 + $0x48] sm:$0xf]  ;;  %v1774_v45 = vld [vmem:[#allocation2 + $0x4c] sm:$0xf]  ;;  %694 = vst.msk [vmem:[#allocation3 + $0x220] sm:$0xf] %vm465_vm0, %v624_v40  ;;  %v1948_v46 = vsel %vm8829_vm7, %v1946_v31, %v1947_v24 }
  0xd7   : > { %1710 = vst.msk [vmem:[#allocation3 + $0xc8] sm:$0xf] %vm1684_vm4, %v1525_v41  ;;  %1709 = vst.msk [vmem:[#allocation3 + $0xc0] sm:$0xf] %vm1684_vm4, %v1523_v21  ;;  %v1952_v48 = vrot.slane %v1950_v36, 4  ;;  %v1953_v42 = vrot.slane %v1773_v44, 5  ;;  %v1945_v50 = vsel %vm8829_vm7, %v1943_v43, %v1944_v7  ;;  %2141 = vrot.lane.b32.xlu1 %v1948_v46, %s8098_s6 }
  0xd8   : > { %v1956_v49 = vrot.slane %v1774_v45, 5  ;;  %v1949_v52 = vrot.slane %v1947_v24, 4  ;;  %v1775_v39 = vld [vmem:[#allocation2 + $0x50] sm:$0xf]  ;;  %v1776_v54 = vld [vmem:[#allocation2 + $0x54] sm:$0xf]  ;;  %2139 = vrot.lane.b32.xlu0 %v1945_v50, %s8098_s6  ;;  %v1537_v11 = vpop.permute.xlu1 %1536 }
  0xd9   : > { %1712 = vst.msk [vmem:[#allocation3 + $0xd8] sm:$0xf] %vm1684_vm4, %v1529_v37  ;;  %1711 = vst.msk [vmem:[#allocation3 + $0xd0] sm:$0xf] %vm1684_vm4, %v1527_v56  ;;  %v1954_v57 = vsel %vm8829_vm7, %v1952_v48, %v1953_v42  ;;  %v1959_v59 = vrot.slane %v1775_v39, 5  ;;  %v1962_v61 = vrot.slane %v1776_v54, 5 }
  0xda   : > { %v1958_v58 = vrot.slane %v1956_v49, 4  ;;  %v1951_v47 = vsel %vm8829_vm7, %v1949_v52, %v1950_v36  ;;  %v1955_v0 = vrot.slane %v1953_v42, 4  ;;  %v1777_v62 = vld [vmem:[#allocation2 + $0x58] sm:$0xf]  ;;  %v1778_v1 = vld [vmem:[#allocation2 + $0x5c] sm:$0xf]  ;;  %v1535_v14 = vpop.permute.xlu0 %1534 }
  0xdb   : > { %1714 = vst.msk [vmem:[#allocation3 + $0xe8] sm:$0xf] %vm1684_vm4, %v1533_v60  ;;  %1713 = vst.msk [vmem:[#allocation3 + $0xe0] sm:$0xf] %vm1684_vm4, %v1531_v63  ;;  %2145 = vrot.lane.b32.xlu1 %v1954_v57, %s8098_s6  ;;  %v1964_v4 = vrot.slane %v1962_v61, 4  ;;  %v1965_v6 = vrot.slane %v1777_v62, 5 }
  0xdc   : > { %2143 = vrot.lane.b32.xlu0 %v1951_v47, %s8098_s6  ;;  %v1960_v2 = vsel %vm8829_vm7, %v1958_v58, %v1959_v59  ;;  %v1779_v8 = vld [vmem:[#allocation2 + $0x60] sm:$0xf]  ;;  %v1968_v10 = vrot.slane %v1778_v1, 5  ;;  %v1957_v3 = vsel %vm8829_vm7, %v1955_v0, %v1956_v49  ;;  %v1961_v55 = vrot.slane %v1959_v59, 4  ;;  %v1780_v12 = vld [vmem:[#allocation2 + $0x64] sm:$0xf]  ;;  %v1541_v13 = vpop.permute.xlu1 %1540 }
  0xdd   : > { %1716 = vst.msk [vmem:[#allocation3 + $0xf8] sm:$0xf] %vm1684_vm4, %v1537_v11  ;;  %1715 = vst.msk [vmem:[#allocation3 + $0xf0] sm:$0xf] %vm1684_vm4, %v1535_v14  ;;  %v1971_v16 = vrot.slane %v1779_v8, 5  ;;  %v1966_v17 = vsel %vm8829_vm7, %v1964_v4, %v1965_v6  ;;  %v1974_v20 = vrot.slane %v1780_v12, 5 }
  0xde   : > { %v1781_v5 = vld [vmem:[#allocation2 + $0x68] sm:$0xf]  ;;  %v1970_v18 = vrot.slane %v1968_v10, 4  ;;  %v1963_v9 = vsel %vm8829_vm7, %v1961_v55, %v1962_v61  ;;  %v1967_v15 = vrot.slane %v1965_v6, 4  ;;  %v1782_v22 = vld [vmem:[#allocation2 + $0x6c] sm:$0xf]  ;;  %v1539_v23 = vpop.permute.xlu0 %1538 }
  0xdf   : > { %2149 = vrot.lane.b32.xlu1 %v1960_v2, %s8098_s6  ;;  %1718 = vst.msk [vmem:[#allocation3 + $0x108] sm:$0xf] %vm1684_vm4, %v1541_v13  ;;  %1717 = vst.msk [vmem:[#allocation3 + $0x100] sm:$0xf] %vm1684_vm4, %v1539_v23  ;;  %v1976_v7 = vrot.slane %v1974_v20, 4  ;;  %v1977_v27 = vrot.slane %v1781_v5, 5 }
  0xe0   : > { %2147 = vrot.lane.b32.xlu0 %v1957_v3, %s8098_s6  ;;  %v1972_v25 = vsel %vm8829_vm7, %v1970_v18, %v1971_v16  ;;  %v1980_v19 = vrot.slane %v1782_v22, 5  ;;  %v1545_v28 = vpop.permute.xlu1 %1544  ;;  %v1969_v29 = vsel %vm8829_vm7, %v1967_v15, %v1968_v10  ;;  %v1973_v30 = vrot.slane %v1971_v16, 4  ;;  %v1783_v32 = vld [vmem:[#allocation2 + $0x70] sm:$0xf]  ;;  %v1784_v26 = vld [vmem:[#allocation2 + $0x74] sm:$0xf] }
  0xe1   : > { %1720 = vst.msk [vmem:[#allocation3 + $0x118] sm:$0xf] %vm1684_vm4, %v1545_v28  ;;  %v1978_v34 = vsel %vm8829_vm7, %v1976_v7, %v1977_v27  ;;  %v1983_v31 = vrot.slane %v1783_v32, 5  ;;  %v1986_v24 = vrot.slane %v1784_v26, 5  ;;  %v1979_v41 = vrot.slane %v1977_v27, 4  ;;  %s8102_s25 = smov 80  }
  0xe2   : > { %v1543_v33 = vpop.permute.xlu0 %1542  ;;  %v1982_v35 = vrot.slane %v1980_v19, 4  ;;  %v1975_v40 = vsel %vm8829_vm7, %v1973_v30, %v1974_v20  ;;  %v1785_v38 = vld [vmem:[#allocation2 + $0x78] sm:$0xf]  ;;  %v1786_v43 = vld [vmem:[#allocation2 + $0x7c] sm:$0xf] }
  0xe3   : > { %2153 = vrot.lane.b32.xlu1 %v1966_v17, %s8098_s6  ;;  %1719 = vst.msk [vmem:[#allocation3 + $0x110] sm:$0xf] %vm1684_vm4, %v1543_v33  ;;  %v1988_v21 = vrot.slane %v1986_v24, 4  ;;  %v1989_v46 = vrot.slane %v1785_v38, 5  ;;  %v1992_v48 = vrot.slane %v1786_v43, 5  ;;  %v1981_v49 = vsel %vm8829_vm7, %v1979_v41, %v1980_v19 }
  0xe4   : > { %2151 = vrot.lane.b32.xlu0 %v1963_v9, %s8098_s6  ;;  %v1984_v45 = vsel %vm8829_vm7, %v1982_v35, %v1983_v31  ;;  %v1985_v37 = vrot.slane %v1983_v31, 4  ;;  %v1787_v50 = vld [vmem:[#allocation2 + $0x80] sm:$0xf]  ;;  %v1788_v52 = vld [vmem:[#allocation2 + $0x84] sm:$0xf] }
  0xe5   : > { %v1990_v54 = vsel %vm8829_vm7, %v1988_v21, %v1989_v46  ;;  %v1994_v56 = vrot.slane %v1992_v48, 4  ;;  %v1995_v57 = vrot.slane %v1787_v50, 5  ;;  %v1998_v58 = vrot.slane %v1788_v52, 5  ;;  %v1789_v47 = vld [vmem:[#allocation2 + $0x88] sm:$0xf] }
  0xe6   : > { %v1549_v36 = vpop.permute.xlu1 %1548  ;;  %v1547_v44 = vpop.permute.xlu0 %1546  ;;  %v1987_v61 = vsel %vm8829_vm7, %v1985_v37, %v1986_v24  ;;  %v1991_v60 = vrot.slane %v1989_v46, 4  ;;  %v1790_v0 = vld [vmem:[#allocation2 + $0x8c] sm:$0xf]  ;;  %v2001_v2 = vrot.slane %v1789_v47, 5  ;;  %v1791_v11 = vld [vmem:[#allocation2 + $0x90] sm:$0xf] }
  0xe7   : > { %2157 = vrot.lane.b32.xlu1 %v1972_v25, %s8098_s6  ;;  %1722 = vst.msk [vmem:[#allocation3 + $0x128] sm:$0xf] %vm1684_vm4, %v1549_v36  ;;  %1721 = vst.msk [vmem:[#allocation3 + $0x120] sm:$0xf] %vm1684_vm4, %v1547_v44  ;;  %v1996_v1 = vsel %vm8829_vm7, %v1994_v56, %v1995_v57  ;;  %v2000_v63 = vrot.slane %v1998_v58, 4  ;;  %v2004_v4 = vrot.slane %v1790_v0, 5 }
  0xe8   : > { %2155 = vrot.lane.b32.xlu0 %v1969_v29, %s8098_s6  ;;  %v1993_v8 = vsel %vm8829_vm7, %v1991_v60, %v1992_v48  ;;  %v1997_v10 = vrot.slane %v1995_v57, 4  ;;  %v1792_v3 = vld [vmem:[#allocation2 + $0x94] sm:$0xf]  ;;  %v2007_v16 = vrot.slane %v1791_v11, 5  ;;  %v2003_v20 = vrot.slane %v2001_v2, 4 }
  0xe9   : > { %v2002_v12 = vsel %vm8829_vm7, %v2000_v63, %v2001_v2  ;;  %v2006_v14 = vrot.slane %v2004_v4, 4  ;;  %v2010_v5 = vrot.slane %v1792_v3, 5  ;;  %v1793_v13 = vld [vmem:[#allocation2 + $0x98] sm:$0xf]  ;;  %v1794_v9 = vld [vmem:[#allocation2 + $0x9c] sm:$0xf] }
  0xea   : > { %v1553_v42 = vpop.permute.xlu1 %1552  ;;  %v1999_v18 = vsel %vm8829_vm7, %v1997_v10, %v1998_v58  ;;  %v2013_v25 = vrot.slane %v1793_v13, 5  ;;  %v2016_v7 = vrot.slane %v1794_v9, 5  ;;  %v2005_v19 = vsel %vm8829_vm7, %v2003_v20, %v2004_v4  ;;  %v1795_v29 = vld [vmem:[#allocation2 + $0xa0] sm:$0xf]  ;;  %v1796_v30 = vld [vmem:[#allocation2 + $0xa4] sm:$0xf] }
  0xeb   : > { %2161 = vrot.lane.b32.xlu1 %v1978_v34, %s8098_s6  ;;  %1724 = vst.msk [vmem:[#allocation3 + $0x138] sm:$0xf] %vm1684_vm4, %v1553_v42  ;;  %v1551_v39 = vpop.permute.xlu0 %1550  ;;  %v2008_v22 = vsel %vm8829_vm7, %v2006_v14, %v2007_v16  ;;  %v2012_v23 = vrot.slane %v2010_v5, 4  ;;  %v2009_v28 = vrot.slane %v2007_v16, 4  ;;  %v2019_v34 = vrot.slane %v1795_v29, 5 }
  0xec   : > { %2159 = vrot.lane.b32.xlu0 %v1975_v40, %s8098_s6  ;;  %1723 = vst.msk [vmem:[#allocation3 + $0x130] sm:$0xf] %vm1684_vm4, %v1551_v39  ;;  %v2018_v33 = vrot.slane %v2016_v7, 4  ;;  %v2022_v35 = vrot.slane %v1796_v30, 5  ;;  %v2015_v36 = vrot.slane %v2013_v25, 4 }
  0xed   : > { %v2014_v26 = vsel %vm8829_vm7, %v2012_v23, %v2013_v25  ;;  %v2011_v24 = vsel %vm8829_vm7, %v2009_v28, %v2010_v5  ;;  %v1797_v40 = vld [vmem:[#allocation2 + $0xa8] sm:$0xf]  ;;  %v1798_v41 = vld [vmem:[#allocation2 + $0xac] sm:$0xf]  ;;  %v2021_v42 = vrot.slane %v2019_v34, 4 }
  0xee   : > { %v1557_v59 = vpop.permute.xlu1 %1556  ;;  %v2020_v43 = vsel %vm8829_vm7, %v2018_v33, %v2019_v34  ;;  %v2024_v44 = vrot.slane %v2022_v35, 4  ;;  %v2028_v21 = vrot.slane %v1798_v41, 5  ;;  %v2017_v48 = vsel %vm8829_vm7, %v2015_v36, %v2016_v7  ;;  %v1800_v37 = vld [vmem:[#allocation2 + $0xb4] sm:$0xf]  ;;  %v1802_v60 = vld [vmem:[#allocation2 + $0xbc] sm:$0xf] }
  0xef   : > { %2165 = vrot.lane.b32.xlu1 %v1984_v45, %s8098_s6  ;;  %1726 = vst.msk [vmem:[#allocation3 + $0x148] sm:$0xf] %vm1684_vm4, %v1557_v59  ;;  %v1555_v62 = vpop.permute.xlu0 %1554  ;;  %v2025_v45 = vrot.slane %v1797_v40, 5  ;;  %v2034_v56 = vrot.slane %v1800_v37, 5  ;;  %v2023_v58 = vsel %vm8829_vm7, %v2021_v42, %v2022_v35  ;;  %v2040_v63 = vrot.slane %v1802_v60, 5 }
  0xf0   : > { %2163 = vrot.lane.b32.xlu0 %v1981_v49, %s8098_s6  ;;  %1725 = vst.msk [vmem:[#allocation3 + $0x140] sm:$0xf] %vm1684_vm4, %v1555_v62  ;;  %v1799_v49 = vld [vmem:[#allocation2 + $0xb0] sm:$0xf]  ;;  %v2030_v39 = vrot.slane %v2028_v21, 4 }
  0xf1   : > { %v2026_v52 = vsel %vm8829_vm7, %v2024_v44, %v2025_v45  ;;  %v2027_v59 = vrot.slane %v2025_v45, 4  ;;  %v2036_v62 = vrot.slane %v2034_v56, 4  ;;  %v1804_v10 = vld [vmem:[#allocation2 + $0xc4] sm:$0xf]  ;;  %v1806_v20 = vld [vmem:[#allocation2 + $0xcc] sm:$0xf] }
  0xf2   : > { %v1561_v6 = vpop.permute.xlu1 %1560  ;;  %v2046_v14 = vrot.slane %v1804_v10, 5  ;;  %v2052_v23 = vrot.slane %v1806_v20, 5  ;;  %v1808_v28 = vld [vmem:[#allocation2 + $0xd4] sm:$0xf]  ;;  %v1810_v36 = vld [vmem:[#allocation2 + $0xdc] sm:$0xf] }
  0xf3   : > { %2169 = vrot.lane.b32.xlu1 %v1990_v54, %s8098_s6  ;;  %1728 = vst.msk [vmem:[#allocation3 + $0x158] sm:$0xf] %vm1684_vm4, %v1561_v6  ;;  %v1559_v55 = vpop.permute.xlu0 %1558  ;;  %v2031_v54 = vrot.slane %v1799_v49, 5  ;;  %v2029_v4 = vsel %vm8829_vm7, %v2027_v59, %v2028_v21  ;;  %v2058_v33 = vrot.slane %v1808_v28, 5  ;;  %v2064_v44 = vrot.slane %v1810_v36, 5 }
  0xf4   : > { %2167 = vrot.lane.b32.xlu0 %v1987_v61, %s8098_s6  ;;  %1727 = vst.msk [vmem:[#allocation3 + $0x150] sm:$0xf] %vm1684_vm4, %v1559_v55  ;;  %v1801_v61 = vld [vmem:[#allocation2 + $0xb8] sm:$0xf]  ;;  %v2042_v55 = vrot.slane %v2040_v63, 4 }
  0xf5   : > { %v2032_v0 = vsel %vm8829_vm7, %v2030_v39, %v2031_v54  ;;  %v2033_v6 = vrot.slane %v2031_v54, 4  ;;  %v1812_v42 = vld [vmem:[#allocation2 + $0xe4] sm:$0xf]  ;;  %v1814_v59 = vld [vmem:[#allocation2 + $0xec] sm:$0xf] }
  0xf6   : > { %v1565_v17 = vpop.permute.xlu1 %1564  ;;  %v2070_v39 = vrot.slane %v1812_v42, 5 }
  0xf7   : > { %2173 = vrot.lane.b32.xlu1 %v1996_v1, %s8098_s6  ;;  %1730 = vst.msk [vmem:[#allocation3 + $0x168] sm:$0xf] %vm1684_vm4, %v1565_v17  ;;  %v1563_v15 = vpop.permute.xlu0 %1562  ;;  %v2037_v1 = vrot.slane %v1801_v61, 5  ;;  %v2035_v5 = vsel %vm8829_vm7, %v2033_v6, %v2034_v56  ;;  %v1816_v6 = vld [vmem:[#allocation2 + $0xf4] sm:$0xf] }
  0xf8   : > { %2171 = vrot.lane.b32.xlu0 %v1993_v8, %s8098_s6  ;;  %1729 = vst.msk [vmem:[#allocation3 + $0x160] sm:$0xf] %vm1684_vm4, %v1563_v15  ;;  %v1803_v8 = vld [vmem:[#allocation2 + $0xc0] sm:$0xf]  ;;  %v2048_v15 = vrot.slane %v2046_v14, 4 }
  0xf9   : > { %v2038_v3 = vsel %vm8829_vm7, %v2036_v62, %v2037_v1  ;;  %v2039_v17 = vrot.slane %v2037_v1, 4  ;;  %v2076_v62 = vrot.slane %v1814_v59, 5 }
  0xfb   : > { %2177 = vrot.lane.b32.xlu1 %v2002_v12, %s8098_s6  ;;  %v1569_v27 = vpop.permute.xlu1 %1568  ;;  %v2043_v12 = vrot.slane %v1803_v8, 5  ;;  %v2041_v7 = vsel %vm8829_vm7, %v2039_v17, %v2040_v63  ;;  %v1818_v17 = vld [vmem:[#allocation2 + $0xfc] sm:$0xf] }
  0xfc   : > { %2175 = vrot.lane.b32.xlu0 %v1999_v18, %s8098_s6  ;;  %1732 = vst.msk [vmem:[#allocation3 + $0x178] sm:$0xf] %vm1684_vm4, %v1569_v27  ;;  %v1805_v18 = vld [vmem:[#allocation2 + $0xc8] sm:$0xf] }
  0xfd   : > { %v1567_v32 = vpop.permute.xlu0 %1566  ;;  %v2044_v9 = vsel %vm8829_vm7, %v2042_v55, %v2043_v12  ;;  %v2045_v27 = vrot.slane %v2043_v12, 4  ;;  %v2082_v55 = vrot.slane %v1816_v6, 5  ;;  %v537_v6 = vld [vmem:[%s8625_s30 + $0x4] sm:$0xf] }
  0xfe   : > { %1731 = vst.msk [vmem:[#allocation3 + $0x170] sm:$0xf] %vm1684_vm4, %v1567_v32  ;;  %v2054_v32 = vrot.slane %v2052_v23, 4 }
  0xff   : > { %2181 = vrot.lane.b32.xlu1 %v2008_v22, %s8098_s6  ;;  %v1573_v31 = vpop.permute.xlu1 %1572  ;;  %v2049_v22 = vrot.slane %v1805_v18, 5  ;;  %v2047_v35 = vsel %vm8829_vm7, %v2045_v27, %v2046_v14  ;;  %v1820_v27 = vld [vmem:[#allocation2 + $0x104] sm:$0xf]  ;;  %547 = vst.msk [vmem:[#allocation2 + $0x11c] sm:$0xf] %vm465_vm0, %v537_v6 }
 0x100   : > { %2179 = vrot.lane.b32.xlu0 %v2005_v19, %s8098_s6  ;;  %1734 = vst.msk [vmem:[#allocation3 + $0x188] sm:$0xf] %vm1684_vm4, %v1573_v31  ;;  %v1807_v19 = vld [vmem:[#allocation2 + $0xd0] sm:$0xf] }
 0x101   : > { %v1571_v38 = vpop.permute.xlu0 %1570  ;;  %v2050_v30 = vsel %vm8829_vm7, %v2048_v15, %v2049_v22  ;;  %v2051_v31 = vrot.slane %v2049_v22, 4  ;;  %v2088_v15 = vrot.slane %v1818_v17, 5 }
 0x102   : > { %1733 = vst.msk [vmem:[#allocation3 + $0x180] sm:$0xf] %vm1684_vm4, %v1571_v38  ;;  %v2060_v38 = vrot.slane %v2058_v33, 4 }
 0x103   : > { %2185 = vrot.lane.b32.xlu1 %v2014_v26, %s8098_s6  ;;  %v1577_v46 = vpop.permute.xlu1 %1576  ;;  %v2055_v26 = vrot.slane %v1807_v19, 5  ;;  %v2053_v21 = vsel %vm8829_vm7, %v2051_v31, %v2052_v23  ;;  %v1822_v31 = vld [vmem:[#allocation2 + $0x10c] sm:$0xf] }
 0x104   : > { %2183 = vrot.lane.b32.xlu0 %v2011_v24, %s8098_s6  ;;  %1736 = vst.msk [vmem:[#allocation3 + $0x198] sm:$0xf] %vm1684_vm4, %v1577_v46  ;;  %v1809_v24 = vld [vmem:[#allocation2 + $0xd8] sm:$0xf] }
 0x105   : > { %v1575_v50 = vpop.permute.xlu0 %1574  ;;  %v2056_v41 = vsel %vm8829_vm7, %v2054_v32, %v2055_v26  ;;  %v2057_v46 = vrot.slane %v2055_v26, 4  ;;  %v2094_v32 = vrot.slane %v1820_v27, 5 }
 0x106   : > { %1735 = vst.msk [vmem:[#allocation3 + $0x190] sm:$0xf] %vm1684_vm4, %v1575_v50  ;;  %v2066_v50 = vrot.slane %v2064_v44, 4 }
 0x107   : > { %2189 = vrot.lane.b32.xlu1 %v2020_v43, %s8098_s6  ;;  %v1581_v57 = vpop.permute.xlu1 %1580  ;;  %v2061_v43 = vrot.slane %v1809_v24, 5  ;;  %v2059_v56 = vsel %vm8829_vm7, %v2057_v46, %v2058_v33  ;;  %v1824_v46 = vld [vmem:[#allocation2 + $0x114] sm:$0xf] }
 0x108   : > { %2187 = vrot.lane.b32.xlu0 %v2017_v48, %s8098_s6  ;;  %1738 = vst.msk [vmem:[#allocation3 + $0x1a8] sm:$0xf] %vm1684_vm4, %v1581_v57  ;;  %v1811_v48 = vld [vmem:[#allocation2 + $0xe0] sm:$0xf] }
 0x109   : > { %v1579_v47 = vpop.permute.xlu0 %1578  ;;  %v2062_v37 = vsel %vm8829_vm7, %v2060_v38, %v2061_v43  ;;  %v2063_v57 = vrot.slane %v2061_v43, 4  ;;  %v2100_v38 = vrot.slane %v1822_v31, 5 }
 0x10a   : > { %1737 = vst.msk [vmem:[#allocation3 + $0x1a0] sm:$0xf] %vm1684_vm4, %v1579_v47  ;;  %v2072_v47 = vrot.slane %v2070_v39, 4 }
 0x10b   : > { %2193 = vrot.lane.b32.xlu1 %v2026_v52, %s8098_s6  ;;  %v1585_v2 = vpop.permute.xlu1 %1584  ;;  %v2067_v52 = vrot.slane %v1811_v48, 5  ;;  %v2065_v63 = vsel %vm8829_vm7, %v2063_v57, %v2064_v44 }
 0x10c   : > { %2191 = vrot.lane.b32.xlu0 %v2023_v58, %s8098_s6  ;;  %1740 = vst.msk [vmem:[#allocation3 + $0x1b8] sm:$0xf] %vm1684_vm4, %v1585_v2  ;;  %v1813_v58 = vld [vmem:[#allocation2 + $0xe8] sm:$0xf] }
 0x10d   : > { %v1583_v11 = vpop.permute.xlu0 %1582  ;;  %v2068_v60 = vsel %vm8829_vm7, %v2066_v50, %v2067_v52  ;;  %v2069_v2 = vrot.slane %v2067_v52, 4  ;;  %v2106_v50 = vrot.slane %v1824_v46, 5 }
 0x10e   : > { %1739 = vst.msk [vmem:[#allocation3 + $0x1b0] sm:$0xf] %vm1684_vm4, %v1583_v11  ;;  %v2078_v11 = vrot.slane %v2076_v62, 4 }
 0x10f   : > { %2197 = vrot.lane.b32.xlu1 %v2032_v0, %s8098_s6  ;;  %v1589_v16 = vpop.permute.xlu1 %1588  ;;  %v2073_v0 = vrot.slane %v1813_v58, 5  ;;  %v2071_v14 = vsel %vm8829_vm7, %v2069_v2, %v2070_v39  ;;  %v2108_v59 = vrot.slane %v2106_v50, 4 }
 0x110   : > { %2195 = vrot.lane.b32.xlu0 %v2029_v4, %s8098_s6  ;;  %1742 = vst.msk [vmem:[#allocation3 + $0x1c8] sm:$0xf] %vm1684_vm4, %v1589_v16  ;;  %v1815_v4 = vld [vmem:[#allocation2 + $0xf0] sm:$0xf] }
 0x111   : > { %v1587_v13 = vpop.permute.xlu0 %1586  ;;  %v2074_v10 = vsel %vm8829_vm7, %v2072_v47, %v2073_v0  ;;  %v2075_v16 = vrot.slane %v2073_v0, 4 }
 0x112   : > { %1741 = vst.msk [vmem:[#allocation3 + $0x1c0] sm:$0xf] %vm1684_vm4, %v1587_v13  ;;  %v2084_v13 = vrot.slane %v2082_v55, 4 }
 0x113   : > { %2201 = vrot.lane.b32.xlu1 %v2038_v3, %s8098_s6  ;;  %v1593_v25 = vpop.permute.xlu1 %1592  ;;  %v2079_v3 = vrot.slane %v1815_v4, 5  ;;  %v2077_v23 = vsel %vm8829_vm7, %v2075_v16, %v2076_v62 }
 0x114   : > { %2199 = vrot.lane.b32.xlu0 %v2035_v5, %s8098_s6  ;;  %1744 = vst.msk [vmem:[#allocation3 + $0x1d8] sm:$0xf] %vm1684_vm4, %v1593_v25  ;;  %v1817_v5 = vld [vmem:[#allocation2 + $0xf8] sm:$0xf] }
 0x115   : > { %v1591_v29 = vpop.permute.xlu0 %1590  ;;  %v2080_v20 = vsel %vm8829_vm7, %v2078_v11, %v2079_v3  ;;  %v2081_v25 = vrot.slane %v2079_v3, 4  ;;  %v2392_v11 = vld [vmem:[#allocation2 + $0x10] sm:$0xf] }
 0x116   : > { %1743 = vst.msk [vmem:[#allocation3 + $0x1d0] sm:$0xf] %vm1684_vm4, %v1591_v29  ;;  %v2090_v29 = vrot.slane %v2088_v15, 4 }
 0x117   : > { %2205 = vrot.lane.b32.xlu1 %v2044_v9, %s8098_s6  ;;  %v1597_v34 = vpop.permute.xlu1 %1596  ;;  %v2085_v9 = vrot.slane %v1817_v5, 5  ;;  %v2083_v33 = vsel %vm8829_vm7, %v2081_v25, %v2082_v55  ;;  %v539_v55 = vld [vmem:[%s8625_s30 + $0xc] sm:$0xf]  ;;  %v2394_v5 = vld [vmem:[#allocation2 + $0x18] sm:$0xf] }
 0x118   : > { %2203 = vrot.lane.b32.xlu0 %v2041_v7, %s8098_s6  ;;  %1746 = vst.msk [vmem:[#allocation3 + $0x1e8] sm:$0xf] %vm1684_vm4, %v1597_v34  ;;  %v1819_v7 = vld [vmem:[#allocation2 + $0x100] sm:$0xf] }
 0x119   : > { %v1595_v40 = vpop.permute.xlu0 %1594  ;;  %v2086_v28 = vsel %vm8829_vm7, %v2084_v13, %v2085_v9  ;;  %v2087_v34 = vrot.slane %v2085_v9, 4  ;;  %549 = vst.msk [vmem:[#allocation2 + $0x124] sm:$0xf] %vm465_vm0, %v539_v55  ;;  %v2396_v13 = vld [vmem:[#allocation2 + $0x20] sm:$0xf] }
 0x11a   : > { %1745 = vst.msk [vmem:[#allocation3 + $0x1e0] sm:$0xf] %vm1684_vm4, %v1595_v40  ;;  %v2096_v40 = vrot.slane %v2094_v32, 4  ;;  %v2425_v55 = vld [vmem:[#allocation2 + $0x94] sm:$0xf] }
 0x11b   : > { %2209 = vrot.lane.b32.xlu1 %v2050_v30, %s8098_s6  ;;  %v1601_v45 = vpop.permute.xlu1 %1600  ;;  %v2091_v30 = vrot.slane %v1819_v7, 5  ;;  %v2089_v44 = vsel %vm8829_vm7, %v2087_v34, %v2088_v15  ;;  %v2399_v15 = vld [vmem:[#allocation2 + $0x2c] sm:$0xf]  ;;  %v2401_v7 = vld [vmem:[#allocation2 + $0x34] sm:$0xf] }
 0x11c   : > { %2207 = vrot.lane.b32.xlu0 %v2047_v35, %s8098_s6  ;;  %1748 = vst.msk [vmem:[#allocation3 + $0x1f8] sm:$0xf] %vm1684_vm4, %v1601_v45  ;;  %v1821_v35 = vld [vmem:[#allocation2 + $0x108] sm:$0xf] }
 0x11d   : > { %v1599_v49 = vpop.permute.xlu0 %1598  ;;  %v2092_v36 = vsel %vm8829_vm7, %v2090_v29, %v2091_v30  ;;  %v2093_v45 = vrot.slane %v2091_v30, 4  ;;  %v2403_v29 = vld [vmem:[#allocation2 + $0x3c] sm:$0xf] }
 0x11e   : > { %1747 = vst.msk [vmem:[#allocation3 + $0x1f0] sm:$0xf] %vm1684_vm4, %v1599_v49  ;;  %v2102_v49 = vrot.slane %v2100_v38, 4 }
 0x11f   : > { %2213 = vrot.lane.b32.xlu1 %v2056_v41, %s8098_s6  ;;  %v1605_v54 = vpop.permute.xlu1 %1604  ;;  %v2097_v41 = vrot.slane %v1821_v35, 5  ;;  %v2095_v39 = vsel %vm8829_vm7, %v2093_v45, %v2094_v32  ;;  %v2402_v32 = vld [vmem:[#allocation2 + $0x38] sm:$0xf]  ;;  %v2404_v35 = vld [vmem:[#allocation2 + $0x40] sm:$0xf] }
 0x120   : > { %2211 = vrot.lane.b32.xlu0 %v2053_v21, %s8098_s6  ;;  %1750 = vst.msk [vmem:[#allocation3 + $0x208] sm:$0xf] %vm1684_vm4, %v1605_v54  ;;  %v1823_v21 = vld [vmem:[#allocation2 + $0x110] sm:$0xf] }
 0x121   : > { %v1603_v61 = vpop.permute.xlu0 %1602  ;;  %v2098_v42 = vsel %vm8829_vm7, %v2096_v40, %v2097_v41  ;;  %v2099_v54 = vrot.slane %v2097_v41, 4  ;;  %v2406_v40 = vld [vmem:[#allocation2 + $0x48] sm:$0xf] }
 0x122   : > { %1749 = vst.msk [vmem:[#allocation3 + $0x200] sm:$0xf] %vm1684_vm4, %v1603_v61 }
 0x123   : > { %2217 = vrot.lane.b32.xlu1 %v2062_v37, %s8098_s6  ;;  %v1609_v1 = vpop.permute.xlu1 %1608  ;;  %v2103_v37 = vrot.slane %v1823_v21, 5  ;;  %v2101_v47 = vsel %vm8829_vm7, %v2099_v54, %v2100_v38  ;;  %v2409_v38 = vld [vmem:[#allocation2 + $0x54] sm:$0xf]  ;;  %v2411_v21 = vld [vmem:[#allocation2 + $0x5c] sm:$0xf] }
 0x124   : > { %2215 = vrot.lane.b32.xlu0 %v2059_v56, %s8098_s6  ;;  %1752 = vst.msk [vmem:[#allocation3 + $0x218] sm:$0xf] %vm1684_vm4, %v1609_v1  ;;  %v1825_v56 = vld [vmem:[#allocation2 + $0x118] sm:$0x1] }
 0x125   : > { %v1607_v8 = vpop.permute.xlu0 %1606  ;;  %v2104_v58 = vsel %vm8829_vm7, %v2102_v49, %v2103_v37  ;;  %v2109_v61 = vrot.slane %v1825_v56, 5  ;;  %v2105_v0 = vrot.slane %v2103_v37, 4  ;;  %v2413_v49 = vld [vmem:[#allocation2 + $0x64] sm:$0xf]  ;;  %v2414_v56 = vld [vmem:[#allocation2 + $0x68] sm:$0xf] }
 0x126   : > { %1751 = vst.msk [vmem:[#allocation3 + $0x210] sm:$0xf] %vm1684_vm4, %v1607_v8  ;;  %v2393_v8 = vld [vmem:[#allocation2 + $0x14] sm:$0xf] }
 0x127   : > { %2221 = vrot.lane.b32.xlu1 %v2068_v60, %s8098_s6  ;;  %v1613_v12 = vpop.permute.xlu1 %1612  ;;  %v2110_v1 = vsel %vm8829_vm7, %v2108_v59, %v2109_v61  ;;  %v2107_v2 = vsel %vm8829_vm7, %v2105_v0, %v2106_v50  ;;  %v2412_v50 = vld [vmem:[#allocation2 + $0x60] sm:$0xf]  ;;  %v2416_v61 = vld [vmem:[#allocation2 + $0x70] sm:$0xf] }
 0x128   : > { %2219 = vrot.lane.b32.xlu0 %v2065_v63, %s8098_s6  ;;  %1754 = vst.msk [vmem:[#allocation3 + $0x228] sm:$0xf] %vm1684_vm4, %v1613_v12  ;;  %v2395_v12 = vld [vmem:[#allocation2 + $0x1c] sm:$0xf] }
 0x129   : > { %v1611_v18 = vpop.permute.xlu0 %1610 }
 0x12a   : > { %1753 = vst.msk [vmem:[#allocation3 + $0x220] sm:$0xf] %vm1684_vm4, %v1611_v18  ;;  %v2397_v18 = vld [vmem:[#allocation2 + $0x24] sm:$0xf] }
 0x12b   : > { %2225 = vrot.lane.b32.xlu1 %v2074_v10, %s8098_s6  ;;  %v2114_v22 = vpop.permute.xlu1 %2113 }
 0x12c   : > { %2223 = vrot.lane.b32.xlu0 %v2071_v14, %s8098_s6  ;;  %2323 = vst.msk [vmem:[#allocation3 + $0x8] sm:$0xf] %vm2321_vm8, %v2114_v22  ;;  %v538_v14 = vld [vmem:[%s8625_s30 + $0x8] sm:$0xf] }
 0x12d   : > { %v2112_v19 = vpop.permute.xlu0 %2111  ;;  %548 = vst.msk [vmem:[#allocation2 + $0x120] sm:$0xf] %vm465_vm0, %v538_v14  ;;  %v2424_v14 = vld [vmem:[#allocation2 + $0x90] sm:$0xf] }
 0x12e   : > { %2322 = vst.msk [vmem:[#allocation3] sm:$0xf] %vm2321_vm8, %v2112_v19  ;;  %v2400_v19 = vld [vmem:[#allocation2 + $0x30] sm:$0xf] }
 0x12f   : > { %2229 = vrot.lane.b32.xlu1 %v2080_v20, %s8098_s6  ;;  %v2118_v26 = vpop.permute.xlu1 %2117 }
 0x130   : > { %2227 = vrot.lane.b32.xlu0 %v2077_v23, %s8098_s6  ;;  %2325 = vst.msk [vmem:[#allocation3 + $0x18] sm:$0xf] %vm2321_vm8, %v2118_v26  ;;  %v2398_v23 = vld [vmem:[#allocation2 + $0x28] sm:$0xf] }
 0x131   : > { %v2116_v24 = vpop.permute.xlu0 %2115 }
 0x132   : > { %2324 = vst.msk [vmem:[#allocation3 + $0x10] sm:$0xf] %vm2321_vm8, %v2116_v24  ;;  %v2407_v24 = vld [vmem:[#allocation2 + $0x4c] sm:$0xf] }
 0x133   : > { %2233 = vrot.lane.b32.xlu1 %v2086_v28, %s8098_s6  ;;  %v2122_v43 = vpop.permute.xlu1 %2121 }
 0x134   : > { %2231 = vrot.lane.b32.xlu0 %v2083_v33, %s8098_s6  ;;  %2327 = vst.msk [vmem:[#allocation3 + $0x28] sm:$0xf] %vm2321_vm8, %v2122_v43  ;;  %v2405_v33 = vld [vmem:[#allocation2 + $0x44] sm:$0xf] }
 0x135   : > { %v2120_v48 = vpop.permute.xlu0 %2119 }
 0x136   : > { %2326 = vst.msk [vmem:[#allocation3 + $0x20] sm:$0xf] %vm2321_vm8, %v2120_v48  ;;  %v2410_v48 = vld [vmem:[#allocation2 + $0x58] sm:$0xf] }
 0x137   : > { %2237 = vrot.lane.b32.xlu1 %v2092_v36, %s8098_s6  ;;  %v2126_v52 = vpop.permute.xlu1 %2125 }
 0x138   : > { %2235 = vrot.lane.b32.xlu0 %v2089_v44, %s8098_s6  ;;  %2329 = vst.msk [vmem:[#allocation3 + $0x38] sm:$0xf] %vm2321_vm8, %v2126_v52  ;;  %v2408_v44 = vld [vmem:[#allocation2 + $0x50] sm:$0xf] }
 0x139   : > { %v2124_v57 = vpop.permute.xlu0 %2123 }
 0x13a   : > { %2328 = vst.msk [vmem:[#allocation3 + $0x30] sm:$0xf] %vm2321_vm8, %v2124_v57 }
 0x13b   : > { %2241 = vrot.lane.b32.xlu1 %v2098_v42, %s8098_s6 }
 0x13c   : > { %2239 = vrot.lane.b32.xlu0 %v2095_v39, %s8098_s6  ;;  %v2130_v60 = vpop.permute.xlu1 %2129  ;;  %v2415_v39 = vld [vmem:[#allocation2 + $0x6c] sm:$0xf] }
 0x13d   : > { %2331 = vst.msk [vmem:[#allocation3 + $0x48] sm:$0xf] %vm2321_vm8, %v2130_v60  ;;  %v2128_v62 = vpop.permute.xlu0 %2127 }
 0x13e   : > { %2330 = vst.msk [vmem:[#allocation3 + $0x40] sm:$0xf] %vm2321_vm8, %v2128_v62  ;;  %v2418_v62 = vld [vmem:[#allocation2 + $0x78] sm:$0xf] }
 0x13f   : > { %2245 = vrot.lane.b32.xlu1 %v2104_v58, %s8098_s6  ;;  %v2417_v58 = vld [vmem:[#allocation2 + $0x74] sm:$0xf] }
 0x140   : > { %2243 = vrot.lane.b32.xlu0 %v2101_v47, %s8098_s6  ;;  %v2134_v63 = vpop.permute.xlu1 %2133  ;;  %v2419_v47 = vld [vmem:[#allocation2 + $0x7c] sm:$0xf] }
 0x141   : > { %2333 = vst.msk [vmem:[#allocation3 + $0x58] sm:$0xf] %vm2321_vm8, %v2134_v63  ;;  %v2132_v4 = vpop.permute.xlu0 %2131  ;;  %v2421_v63 = vld [vmem:[#allocation2 + $0x84] sm:$0xf] }
 0x142   : > { %2332 = vst.msk [vmem:[#allocation3 + $0x50] sm:$0xf] %vm2321_vm8, %v2132_v4  ;;  %v2420_v4 = vld [vmem:[#allocation2 + $0x80] sm:$0xf] }
 0x143   : > { %2249 = vrot.lane.b32.xlu1 %v2110_v1, %s8098_s6 }
 0x144   : > { %2247 = vrot.lane.b32.xlu0 %v2107_v2, %s8098_s6 }
 0x145   : > { %v2138_v10 = vpop.permute.xlu1 %2137  ;;  %v2136_v3 = vpop.permute.xlu0 %2135 }
 0x146   : > { %2335 = vst.msk [vmem:[#allocation3 + $0x68] sm:$0xf] %vm2321_vm8, %v2138_v10  ;;  %2334 = vst.msk [vmem:[#allocation3 + $0x60] sm:$0xf] %vm2321_vm8, %v2136_v3 }
 0x147   : > { %2534 = vrot.lane.b32.xlu1 %v2393_v8, %s8099_s7  ;;  %v2423_v8 = vld [vmem:[#allocation2 + $0x8c] sm:$0xf] }
 0x148   : > { %2532 = vrot.lane.b32.xlu0 %v2392_v11, %s8099_s7  ;;  %v2422_v11 = vld [vmem:[#allocation2 + $0x88] sm:$0xf] }
 0x149   : > { %v2142_v16 = vpop.permute.xlu1 %2141 }
 0x14a   : > { %2337 = vst.msk [vmem:[#allocation3 + $0x78] sm:$0xf] %vm2321_vm8, %v2142_v16  ;;  %v2140_v17 = vpop.permute.xlu0 %2139 }
 0x14b   : > { %2336 = vst.msk [vmem:[#allocation3 + $0x70] sm:$0xf] %vm2321_vm8, %v2140_v17  ;;  %2538 = vrot.lane.b32.xlu1 %v2395_v12, %s8099_s7 }
 0x14c   : > { %2536 = vrot.lane.b32.xlu0 %v2394_v5, %s8099_s7  ;;  %v2427_v5 = vld [vmem:[#allocation2 + $0x9c] sm:$0xf] }
 0x14d   : > { %v2146_v20 = vpop.permute.xlu1 %2145 }
 0x14e   : > { %2339 = vst.msk [vmem:[#allocation3 + $0x88] sm:$0xf] %vm2321_vm8, %v2146_v20  ;;  %v2144_v9 = vpop.permute.xlu0 %2143 }
 0x14f   : > { %2338 = vst.msk [vmem:[#allocation3 + $0x80] sm:$0xf] %vm2321_vm8, %v2144_v9  ;;  %2542 = vrot.lane.b32.xlu1 %v2397_v18, %s8099_s7  ;;  %v2426_v18 = vld [vmem:[#allocation2 + $0x98] sm:$0xf] }
 0x150   : > { %2540 = vrot.lane.b32.xlu0 %v2396_v13, %s8099_s7  ;;  %v2429_v13 = vld [vmem:[#allocation2 + $0xa4] sm:$0xf] }
 0x151   : > { %v2150_v22 = vpop.permute.xlu1 %2149 }
 0x152   : > { %2341 = vst.msk [vmem:[#allocation3 + $0x98] sm:$0xf] %vm2321_vm8, %v2150_v22  ;;  %v2148_v25 = vpop.permute.xlu0 %2147 }
 0x153   : > { %2340 = vst.msk [vmem:[#allocation3 + $0x90] sm:$0xf] %vm2321_vm8, %v2148_v25  ;;  %2546 = vrot.lane.b32.xlu1 %v2399_v15, %s8099_s7  ;;  %v2428_v15 = vld [vmem:[#allocation2 + $0xa0] sm:$0xf] }
 0x154   : > { %2544 = vrot.lane.b32.xlu0 %v2398_v23, %s8099_s7  ;;  %v2431_v23 = vld [vmem:[#allocation2 + $0xac] sm:$0xf] }
 0x155   : > { %v2154_v27 = vpop.permute.xlu1 %2153 }
 0x156   : > { %2343 = vst.msk [vmem:[#allocation3 + $0xa8] sm:$0xf] %vm2321_vm8, %v2154_v27  ;;  %v2152_v28 = vpop.permute.xlu0 %2151 }
 0x157   : > { %2342 = vst.msk [vmem:[#allocation3 + $0xa0] sm:$0xf] %vm2321_vm8, %v2152_v28  ;;  %2550 = vrot.lane.b32.xlu1 %v2401_v7, %s8099_s7  ;;  %v2430_v7 = vld [vmem:[#allocation2 + $0xa8] sm:$0xf] }
 0x158   : > { %2548 = vrot.lane.b32.xlu0 %v2400_v19, %s8099_s7  ;;  %v2433_v19 = vld [vmem:[#allocation2 + $0xb4] sm:$0xf] }
 0x159   : > { %v2158_v30 = vpop.permute.xlu1 %2157 }
 0x15a   : > { %2345 = vst.msk [vmem:[#allocation3 + $0xb8] sm:$0xf] %vm2321_vm8, %v2158_v30  ;;  %v2156_v26 = vpop.permute.xlu0 %2155 }
 0x15b   : > { %2344 = vst.msk [vmem:[#allocation3 + $0xb0] sm:$0xf] %vm2321_vm8, %v2156_v26  ;;  %2554 = vrot.lane.b32.xlu1 %v2403_v29, %s8099_s7  ;;  %v2432_v29 = vld [vmem:[#allocation2 + $0xb0] sm:$0xf] }
 0x15c   : > { %2552 = vrot.lane.b32.xlu0 %v2402_v32, %s8099_s7  ;;  %v2435_v32 = vld [vmem:[#allocation2 + $0xbc] sm:$0xf] }
 0x15d   : > { %v2162_v34 = vpop.permute.xlu1 %2161 }
 0x15e   : > { %2347 = vst.msk [vmem:[#allocation3 + $0xc8] sm:$0xf] %vm2321_vm8, %v2162_v34  ;;  %v2160_v31 = vpop.permute.xlu0 %2159 }
 0x15f   : > { %2346 = vst.msk [vmem:[#allocation3 + $0xc0] sm:$0xf] %vm2321_vm8, %v2160_v31  ;;  %2558 = vrot.lane.b32.xlu1 %v2405_v33, %s8099_s7  ;;  %v2434_v33 = vld [vmem:[#allocation2 + $0xb8] sm:$0xf] }
 0x160   : > { %2556 = vrot.lane.b32.xlu0 %v2404_v35, %s8099_s7  ;;  %v2437_v35 = vld [vmem:[#allocation2 + $0xc4] sm:$0xf] }
 0x161   : > { %v2166_v36 = vpop.permute.xlu1 %2165 }
 0x162   : > { %2349 = vst.msk [vmem:[#allocation3 + $0xd8] sm:$0xf] %vm2321_vm8, %v2166_v36  ;;  %v2164_v41 = vpop.permute.xlu0 %2163 }
 0x163   : > { %2348 = vst.msk [vmem:[#allocation3 + $0xd0] sm:$0xf] %vm2321_vm8, %v2164_v41  ;;  %2562 = vrot.lane.b32.xlu1 %v2407_v24, %s8099_s7  ;;  %v2436_v24 = vld [vmem:[#allocation2 + $0xc0] sm:$0xf] }
 0x164   : > { %2560 = vrot.lane.b32.xlu0 %v2406_v40, %s8099_s7  ;;  %v2439_v40 = vld [vmem:[#allocation2 + $0xcc] sm:$0xf] }
 0x165   : > { %v2170_v43 = vpop.permute.xlu1 %2169 }
 0x166   : > { %2351 = vst.msk [vmem:[#allocation3 + $0xe8] sm:$0xf] %vm2321_vm8, %v2170_v43  ;;  %v2168_v45 = vpop.permute.xlu0 %2167 }
 0x167   : > { %2350 = vst.msk [vmem:[#allocation3 + $0xe0] sm:$0xf] %vm2321_vm8, %v2168_v45  ;;  %2566 = vrot.lane.b32.xlu1 %v2409_v38, %s8099_s7  ;;  %v2438_v38 = vld [vmem:[#allocation2 + $0xc8] sm:$0xf] }
 0x168   : > { %2564 = vrot.lane.b32.xlu0 %v2408_v44, %s8099_s7  ;;  %v2441_v44 = vld [vmem:[#allocation2 + $0xd4] sm:$0xf] }
 0x169   : > { %v2174_v46 = vpop.permute.xlu1 %2173 }
 0x16a   : > { %2353 = vst.msk [vmem:[#allocation3 + $0xf8] sm:$0xf] %vm2321_vm8, %v2174_v46  ;;  %v2172_v42 = vpop.permute.xlu0 %2171 }
 0x16b   : > { %2352 = vst.msk [vmem:[#allocation3 + $0xf0] sm:$0xf] %vm2321_vm8, %v2172_v42  ;;  %2570 = vrot.lane.b32.xlu1 %v2411_v21, %s8099_s7  ;;  %v2440_v21 = vld [vmem:[#allocation2 + $0xd0] sm:$0xf] }
 0x16c   : > { %2568 = vrot.lane.b32.xlu0 %v2410_v48, %s8099_s7  ;;  %v2443_v48 = vld [vmem:[#allocation2 + $0xdc] sm:$0xf] }
 0x16d   : > { %v2178_v37 = vpop.permute.xlu1 %2177 }
 0x16e   : > { %2355 = vst.msk [vmem:[#allocation3 + $0x108] sm:$0xf] %vm2321_vm8, %v2178_v37  ;;  %v2176_v52 = vpop.permute.xlu0 %2175 }
 0x16f   : > { %2354 = vst.msk [vmem:[#allocation3 + $0x100] sm:$0xf] %vm2321_vm8, %v2176_v52  ;;  %2574 = vrot.lane.b32.xlu1 %v2413_v49, %s8099_s7  ;;  %v2442_v49 = vld [vmem:[#allocation2 + $0xd8] sm:$0xf] }
 0x170   : > { %2572 = vrot.lane.b32.xlu0 %v2412_v50, %s8099_s7  ;;  %v2445_v50 = vld [vmem:[#allocation2 + $0xe4] sm:$0xf] }
 0x171   : > { %v2182_v54 = vpop.permute.xlu1 %2181 }
 0x172   : > { %2357 = vst.msk [vmem:[#allocation3 + $0x118] sm:$0xf] %vm2321_vm8, %v2182_v54  ;;  %v2180_v57 = vpop.permute.xlu0 %2179 }
 0x173   : > { %2356 = vst.msk [vmem:[#allocation3 + $0x110] sm:$0xf] %vm2321_vm8, %v2180_v57  ;;  %2578 = vrot.lane.b32.xlu1 %v2415_v39, %s8099_s7  ;;  %v2444_v39 = vld [vmem:[#allocation2 + $0xe0] sm:$0xf] }
 0x174   : > { %2576 = vrot.lane.b32.xlu0 %v2414_v56, %s8099_s7  ;;  %v2447_v56 = vld [vmem:[#allocation2 + $0xec] sm:$0xf] }
 0x175   : > { %v2186_v59 = vpop.permute.xlu1 %2185 }
 0x176   : > { %2359 = vst.msk [vmem:[#allocation3 + $0x128] sm:$0xf] %vm2321_vm8, %v2186_v59  ;;  %v2184_v60 = vpop.permute.xlu0 %2183 }
 0x177   : > { %2358 = vst.msk [vmem:[#allocation3 + $0x120] sm:$0xf] %vm2321_vm8, %v2184_v60  ;;  %2582 = vrot.lane.b32.xlu1 %v2417_v58, %s8099_s7  ;;  %v2446_v58 = vld [vmem:[#allocation2 + $0xe8] sm:$0xf] }
 0x178   : > { %2580 = vrot.lane.b32.xlu0 %v2416_v61, %s8099_s7  ;;  %v2449_v61 = vld [vmem:[#allocation2 + $0xf4] sm:$0xf] }
 0x179   : > { %v2190_v0 = vpop.permute.xlu1 %2189 }
 0x17a   : > { %2361 = vst.msk [vmem:[#allocation3 + $0x138] sm:$0xf] %vm2321_vm8, %v2190_v0  ;;  %v2188_v1 = vpop.permute.xlu0 %2187 }
 0x17b   : > { %2360 = vst.msk [vmem:[#allocation3 + $0x130] sm:$0xf] %vm2321_vm8, %v2188_v1  ;;  %2586 = vrot.lane.b32.xlu1 %v2419_v47, %s8099_s7  ;;  %v2448_v47 = vld [vmem:[#allocation2 + $0xf0] sm:$0xf] }
 0x17c   : > { %2584 = vrot.lane.b32.xlu0 %v2418_v62, %s8099_s7  ;;  %v2451_v62 = vld [vmem:[#allocation2 + $0xfc] sm:$0xf] }
 0x17d   : > { %v2194_v2 = vpop.permute.xlu1 %2193 }
 0x17e   : > { %2363 = vst.msk [vmem:[#allocation3 + $0x148] sm:$0xf] %vm2321_vm8, %v2194_v2  ;;  %v2192_v6 = vpop.permute.xlu0 %2191 }
 0x17f   : > { %2362 = vst.msk [vmem:[#allocation3 + $0x140] sm:$0xf] %vm2321_vm8, %v2192_v6  ;;  %2590 = vrot.lane.b32.xlu1 %v2421_v63, %s8099_s7  ;;  %v2450_v63 = vld [vmem:[#allocation2 + $0xf8] sm:$0xf]  ;;  %v2453_v6 = vld [vmem:[#allocation2 + $0x104] sm:$0xf] }
 0x180   : > { %2588 = vrot.lane.b32.xlu0 %v2420_v4, %s8099_s7  ;;  %v2814_v4 = vld [vmem:[#allocation2 + $0x14] sm:$0xf] }
 0x181   : > { %v2198_v10 = vpop.permute.xlu1 %2197 }
 0x182   : > { %2365 = vst.msk [vmem:[#allocation3 + $0x158] sm:$0xf] %vm2321_vm8, %v2198_v10  ;;  %v2196_v3 = vpop.permute.xlu0 %2195 }
 0x183   : > { %2364 = vst.msk [vmem:[#allocation3 + $0x150] sm:$0xf] %vm2321_vm8, %v2196_v3  ;;  %2594 = vrot.lane.b32.xlu1 %v2423_v8, %s8099_s7  ;;  %v2813_v8 = vld [vmem:[#allocation2 + $0x10] sm:$0xf]  ;;  %v2816_v3 = vld [vmem:[#allocation2 + $0x1c] sm:$0xf] }
 0x184   : > { %2592 = vrot.lane.b32.xlu0 %v2422_v11, %s8099_s7  ;;  %v2452_v11 = vld [vmem:[#allocation2 + $0x100] sm:$0xf] }
 0x185   : > { %v2202_v12 = vpop.permute.xlu1 %2201 }
 0x186   : > { %2367 = vst.msk [vmem:[#allocation3 + $0x168] sm:$0xf] %vm2321_vm8, %v2202_v12  ;;  %v2200_v16 = vpop.permute.xlu0 %2199  ;;  %v2894_v12 = vshll.u32 %v2814_v4, 16 }
 0x187   : > { %2366 = vst.msk [vmem:[#allocation3 + $0x160] sm:$0xf] %vm2321_vm8, %v2200_v16  ;;  %2598 = vrot.lane.b32.xlu1 %v2425_v55, %s8099_s7  ;;  %v2885_v16 = vshrl.u32 %v2813_v8, 16 }
 0x188   : > { %2596 = vrot.lane.b32.xlu0 %v2424_v14, %s8099_s7  ;;  %v2898_v14 = vshrl.u32 %v2814_v4, 16  ;;  %v2460_v4 = vld [vmem:[#allocation2 + $0x120] sm:$0xf] }
 0x189   : > { %v2206_v17 = vpop.permute.xlu1 %2205 }
 0x18a   : > { %2369 = vst.msk [vmem:[#allocation3 + $0x178] sm:$0xf] %vm2321_vm8, %v2206_v17  ;;  %v2204_v20 = vpop.permute.xlu0 %2203  ;;  %v2455_v17 = vld [vmem:[#allocation2 + $0x10c] sm:$0xf] }
 0x18b   : > { %2368 = vst.msk [vmem:[#allocation3 + $0x170] sm:$0xf] %vm2321_vm8, %v2204_v20  ;;  %2602 = vrot.lane.b32.xlu1 %v2427_v5, %s8099_s7  ;;  %v2888_v5 = vshll.u32 %v2813_v8, 16  ;;  %v2914_v20 = vshll.u32 %v2816_v3, 16 }
 0x18c   : > { %2600 = vrot.lane.b32.xlu0 %v2426_v18, %s8099_s7  ;;  %v2815_v18 = vld [vmem:[#allocation2 + $0x18] sm:$0xf] }
 0x18d   : > { %v2210_v9 = vpop.permute.xlu1 %2209 }
 0x18e   : > { %2371 = vst.msk [vmem:[#allocation3 + $0x188] sm:$0xf] %vm2321_vm8, %v2210_v9  ;;  %v2208_v22 = vpop.permute.xlu0 %2207 }
 0x18f   : > { %2370 = vst.msk [vmem:[#allocation3 + $0x180] sm:$0xf] %vm2321_vm8, %v2208_v22  ;;  %2606 = vrot.lane.b32.xlu1 %v2429_v13, %s8099_s7  ;;  %v2918_v13 = vshrl.u32 %v2816_v3, 16  ;;  %v2817_v22 = vld [vmem:[#allocation2 + $0x20] sm:$0xf] }
 0x190   : > { %2604 = vrot.lane.b32.xlu0 %v2428_v15, %s8099_s7  ;;  %v2454_v15 = vld [vmem:[#allocation2 + $0x108] sm:$0xf]  ;;  %v2824_v3 = vld [vmem:[#allocation2 + $0x3c] sm:$0xf] }
 0x191   : > { %v2214_v25 = vpop.permute.xlu1 %2213 }
 0x192   : > { %2373 = vst.msk [vmem:[#allocation3 + $0x198] sm:$0xf] %vm2321_vm8, %v2214_v25  ;;  %v2212_v27 = vpop.permute.xlu0 %2211  ;;  %v9291_v25 = vrot.slane %v2894_v12, 5 }
 0x193   : > { %2372 = vst.msk [vmem:[#allocation3 + $0x190] sm:$0xf] %vm2321_vm8, %v2212_v27  ;;  %2610 = vrot.lane.b32.xlu1 %v2431_v23, %s8099_s7  ;;  %v2900_v27 = vrot.slane %v2898_v14, 4 }
 0x194   : > { %2608 = vrot.lane.b32.xlu0 %v2430_v7, %s8099_s7  ;;  %v2818_v7 = vld [vmem:[#allocation2 + $0x24] sm:$0xf] }
 0x195   : > { %v2218_v28 = vpop.permute.xlu1 %2217 }
 0x196   : > { %2375 = vst.msk [vmem:[#allocation3 + $0x1a8] sm:$0xf] %vm2321_vm8, %v2218_v28  ;;  %v2216_v30 = vpop.permute.xlu0 %2215  ;;  %v2887_v28 = vrot.slane %v2885_v16, 4 }
 0x197   : > { %2374 = vst.msk [vmem:[#allocation3 + $0x1a0] sm:$0xf] %vm2321_vm8, %v2216_v30  ;;  %2614 = vrot.lane.b32.xlu1 %v2433_v19, %s8099_s7  ;;  %v2904_v19 = vshll.u32 %v2815_v18, 16  ;;  %v2457_v30 = vld [vmem:[#allocation2 + $0x114] sm:$0xf] }
 0x198   : > { %2612 = vrot.lane.b32.xlu0 %v2432_v29, %s8099_s7  ;;  %v2890_v29 = vrot.slane %v2888_v5, 5 }
 0x199   : > { %v2222_v26 = vpop.permute.xlu1 %2221 }
 0x19a   : > { %2377 = vst.msk [vmem:[#allocation3 + $0x1b8] sm:$0xf] %vm2321_vm8, %v2222_v26  ;;  %v2220_v34 = vpop.permute.xlu0 %2219  ;;  %v9296_v26 = vrot.slane %v2914_v20, 5 }
 0x19b   : > { %2376 = vst.msk [vmem:[#allocation3 + $0x1b0] sm:$0xf] %vm2321_vm8, %v2220_v34  ;;  %2618 = vrot.lane.b32.xlu1 %v2435_v32, %s8099_s7  ;;  %v2908_v32 = vshrl.u32 %v2815_v18, 16  ;;  %v2924_v34 = vshll.u32 %v2817_v22, 16 }
 0x19c   : > { %2616 = vrot.lane.b32.xlu0 %v2434_v33, %s8099_s7  ;;  %v2920_v33 = vrot.slane %v2918_v13, 4  ;;  %v540_v13 = vld [vmem:[%s8625_s30 + $0x10] sm:$0xf] }
 0x19d   : > { %v2226_v31 = vpop.permute.xlu1 %2225  ;;  %550 = vst.msk [vmem:[#allocation2 + $0x128] sm:$0xf] %vm465_vm0, %v540_v13 }
 0x19e   : > { %2379 = vst.msk [vmem:[#allocation3 + $0x1c8] sm:$0xf] %vm2321_vm8, %v2226_v31  ;;  %v2224_v36 = vpop.permute.xlu0 %2223  ;;  %v2456_v31 = vld [vmem:[#allocation2 + $0x110] sm:$0xf] }
 0x19f   : > { %2378 = vst.msk [vmem:[#allocation3 + $0x1c0] sm:$0xf] %vm2321_vm8, %v2224_v36  ;;  %2622 = vrot.lane.b32.xlu1 %v2437_v35, %s8099_s7  ;;  %v2934_v36 = vshll.u32 %v2818_v7, 16 }
 0x1a0   : > { %2620 = vrot.lane.b32.xlu0 %v2436_v24, %s8099_s7  ;;  %v2928_v24 = vshrl.u32 %v2817_v22, 16  ;;  %v2994_v22 = vshll.u32 %v2824_v3, 16 }
 0x1a1   : > { %v2230_v41 = vpop.permute.xlu1 %2229 }
 0x1a2   : > { %2381 = vst.msk [vmem:[#allocation3 + $0x1d8] sm:$0xf] %vm2321_vm8, %v2230_v41  ;;  %v2228_v43 = vpop.permute.xlu0 %2227 }
 0x1a3   : > { %2380 = vst.msk [vmem:[#allocation3 + $0x1d0] sm:$0xf] %vm2321_vm8, %v2228_v43  ;;  %2626 = vrot.lane.b32.xlu1 %v2439_v40, %s8099_s7  ;;  %v2938_v40 = vshrl.u32 %v2818_v7, 16  ;;  %v2901_v43 = vor.u32 %v2900_v27, %v9291_v25 }
 0x1a4   : > { %2624 = vrot.lane.b32.xlu0 %v2438_v38, %s8099_s7  ;;  %v2819_v38 = vld [vmem:[#allocation2 + $0x28] sm:$0xf] }
 0x1a5   : > { %v2234_v45 = vpop.permute.xlu1 %2233 }
 0x1a6   : > { %2383 = vst.msk [vmem:[#allocation3 + $0x1e8] sm:$0xf] %vm2321_vm8, %v2234_v45  ;;  %v2232_v46 = vpop.permute.xlu0 %2231  ;;  %v2820_v45 = vld [vmem:[#allocation2 + $0x2c] sm:$0xf] }
 0x1a7   : > { %2382 = vst.msk [vmem:[#allocation3 + $0x1e0] sm:$0xf] %vm2321_vm8, %v2232_v46  ;;  %2630 = vrot.lane.b32.xlu1 %v2441_v44, %s8099_s7  ;;  %v2891_v44 = vor.u32 %v2890_v29, %v2887_v28  ;;  %v9303_v46 = vrot.slane %v2904_v19, 5 }
 0x1a8   : > { %2628 = vrot.lane.b32.xlu0 %v2440_v21, %s8099_s7  ;;  %v2459_v21 = vld [vmem:[#allocation2 + $0x11c] sm:$0xf] }
 0x1a9   : > { %v2238_v42 = vpop.permute.xlu1 %2237 }
 0x1aa   : > { %2385 = vst.msk [vmem:[#allocation3 + $0x1f8] sm:$0xf] %vm2321_vm8, %v2238_v42  ;;  %v2236_v37 = vpop.permute.xlu0 %2235  ;;  %v9306_v42 = vrot.slane %v2924_v34, 5 }
 0x1ab   : > { %2384 = vst.msk [vmem:[#allocation3 + $0x1f0] sm:$0xf] %vm2321_vm8, %v2236_v37  ;;  %2634 = vrot.lane.b32.xlu1 %v2443_v48, %s8099_s7  ;;  %v2921_v48 = vor.u32 %v2920_v33, %v9296_v26 }
 0x1ac   : > { %2632 = vrot.lane.b32.xlu0 %v2442_v49, %s8099_s7  ;;  %v2910_v49 = vrot.slane %v2908_v32, 4 }
 0x1ad   : > { %v2242_v52 = vpop.permute.xlu1 %2241 }
 0x1ae   : > { %2387 = vst.msk [vmem:[#allocation3 + $0x208] sm:$0xf] %vm2321_vm8, %v2242_v52  ;;  %v2240_v54 = vpop.permute.xlu0 %2239  ;;  %v9308_v52 = vrot.slane %v2934_v36, 5 }
 0x1af   : > { %2386 = vst.msk [vmem:[#allocation3 + $0x200] sm:$0xf] %vm2321_vm8, %v2240_v54  ;;  %2638 = vrot.lane.b32.xlu1 %v2445_v50, %s8099_s7  ;;  %v2458_v50 = vld [vmem:[#allocation2 + $0x118] sm:$0xf]  ;;  %v2944_v54 = vshll.u32 %v2819_v38, 16 }
 0x1b0   : > { %2636 = vrot.lane.b32.xlu0 %v2444_v39, %s8099_s7  ;;  %v2940_v39 = vrot.slane %v2938_v40, 4 }
 0x1b1   : > { %v2246_v57 = vpop.permute.xlu1 %2245 }
 0x1b2   : > { %2389 = vst.msk [vmem:[#allocation3 + $0x218] sm:$0xf] %vm2321_vm8, %v2246_v57  ;;  %v2244_v59 = vpop.permute.xlu0 %2243  ;;  %v2941_v8 = vor.u32 %v2940_v39, %v9308_v52 }
 0x1b3   : > { %2388 = vst.msk [vmem:[#allocation3 + $0x210] sm:$0xf] %vm2321_vm8, %v2244_v59  ;;  %2642 = vrot.lane.b32.xlu1 %v2447_v56, %s8099_s7  ;;  %v2930_v56 = vrot.slane %v2928_v24, 4  ;;  %v2954_v59 = vshll.u32 %v2820_v45, 16  ;;  %v2826_v24 = vld [vmem:[#allocation2 + $0x44] sm:$0xf] }
 0x1b4   : > { %2640 = vrot.lane.b32.xlu0 %v2446_v58, %s8099_s7  ;;  %v2948_v58 = vshrl.u32 %v2819_v38, 16  ;;  %v2942_v33 = vrot.slane %v2941_v8, 4 }
 0x1b5   : > { %v2250_v60 = vpop.permute.xlu1 %2249  ;;  %v9320_v12 = vrot.slane %v2954_v59, 5  ;;  %v2828_v59 = vld [vmem:[#allocation2 + $0x4c] sm:$0xf] }
 0x1b6   : > { %2391 = vst.msk [vmem:[#allocation3 + $0x228] sm:$0xf] %vm2321_vm8, %v2250_v60  ;;  %v2248_v0 = vpop.permute.xlu0 %2247  ;;  %v2821_v60 = vld [vmem:[#allocation2 + $0x30] sm:$0xf]  ;;  %v2950_v5 = vrot.slane %v2948_v58, 4  ;;  %v3034_v8 = vshll.u32 %v2828_v59, 16 }
 0x1b7   : > { %2390 = vst.msk [vmem:[#allocation3 + $0x220] sm:$0xf] %vm2321_vm8, %v2248_v0  ;;  %2646 = vrot.lane.b32.xlu1 %v2449_v61, %s8099_s7  ;;  %v2958_v61 = vshrl.u32 %v2820_v45, 16  ;;  %v2902_v0 = vrot.slane %v2901_v43, 4  ;;  %v2964_v16 = vshll.u32 %v2821_v60, 16  ;;  %v9346_v43 = vrot.slane %v2994_v22, 5 }
 0x1b8   : > { %2644 = vrot.lane.b32.xlu0 %v2448_v47, %s8099_s7  ;;  %v2461_v47 = vld [vmem:[#allocation2 + $0x124] sm:$0xf] }
 0x1b9   : > { %v2535_v1 = vpop.permute.xlu1 %2534  ;;  %v2960_v14 = vrot.slane %v2958_v61, 4 }
 0x1ba   : > { %2744 = vst.msk [vmem:[#allocation3 + $0x8] sm:$0xf] %vm2742_vm9, %v2535_v1  ;;  %v2533_v2 = vpop.permute.xlu0 %2532  ;;  %v2911_v1 = vor.u32 %v2910_v49, %v9303_v46  ;;  %v3018_v49 = vshrl.u32 %v2826_v24, 16 }
 0x1bb   : > { %2743 = vst.msk [vmem:[#allocation3] sm:$0xf] %vm2742_vm9, %v2533_v2  ;;  %2650 = vrot.lane.b32.xlu1 %v2451_v62, %s8099_s7  ;;  %v2892_v62 = vrot.slane %v2891_v44, 4  ;;  %v2961_v34 = vor.u32 %v2960_v14, %v9320_v12 }
 0x1bc   : > { %2648 = vrot.lane.b32.xlu0 %v2450_v63, %s8099_s7  ;;  %v2822_v63 = vld [vmem:[#allocation2 + $0x34] sm:$0xf]  ;;  %v2912_v28 = vrot.slane %v2911_v1, 4  ;;  %v3020_v1 = vrot.slane %v3018_v49, 4 }
 0x1bd   : > { %v2539_v10 = vpop.permute.xlu1 %2538  ;;  %v2974_v18 = vshll.u32 %v2822_v63, 16  ;;  %v2978_v20 = vshrl.u32 %v2822_v63, 16  ;;  %v2897_v27 = vsel %vm8213_vm3, %v2892_v62, %v9291_v25 }
 0x1be   : > { %2746 = vst.msk [vmem:[#allocation3 + $0x18] sm:$0xf] %vm2742_vm9, %v2539_v10  ;;  %v2537_v55 = vpop.permute.xlu0 %2536  ;;  %v9316_v10 = vrot.slane %v2944_v54, 5  ;;  %v2827_v54 = vld [vmem:[#allocation2 + $0x48] sm:$0xf] }
 0x1bf   : > { %2745 = vst.msk [vmem:[#allocation3 + $0x10] sm:$0xf] %vm2742_vm9, %v2537_v55  ;;  %2654 = vrot.lane.b32.xlu1 %v2453_v6, %s8099_s7  ;;  %v2922_v6 = vrot.slane %v2921_v48, 4  ;;  %v9343_v25 = vrot.slane %v2974_v18, 5  ;;  %v2980_v36 = vrot.slane %v2978_v20, 4  ;;  %v3024_v63 = vshll.u32 %v2827_v54, 16 }
 0x1c0   : > { %2652 = vrot.lane.b32.xlu0 %v2452_v11, %s8099_s7  ;;  %v2931_v11 = vor.u32 %v2930_v56, %v9306_v42 }
 0x1c1   : > { %v2543_v9 = vpop.permute.xlu1 %2542  ;;  %v2927_v19 = vsel %vm8213_vm3, %v2922_v6, %v9306_v42  ;;  %v3014_v42 = vshll.u32 %v2826_v24, 16  ;;  %v3028_v6 = vshrl.u32 %v2827_v54, 16 }
 0x1c2   : > { %2748 = vst.msk [vmem:[#allocation3 + $0x28] sm:$0xf] %vm2742_vm9, %v2543_v9  ;;  %v2541_v23 = vpop.permute.xlu0 %2540  ;;  %v2907_v9 = vsel %vm8213_vm3, %v2902_v0, %v9303_v46  ;;  %v2932_v29 = vrot.slane %v2931_v11, 4  ;;  %v2917_v46 = vsel %vm8213_vm3, %v2912_v28, %v9296_v26  ;;  %v2962_v26 = vrot.slane %v2961_v34, 4 }
 0x1c3   : > { %2747 = vst.msk [vmem:[#allocation3 + $0x20] sm:$0xf] %vm2742_vm9, %v2541_v23  ;;  %2658 = vrot.lane.b32.xlu1 %v2455_v17, %s8099_s7  ;;  %v2968_v17 = vshrl.u32 %v2821_v60, 16  ;;  %v2998_v23 = vshrl.u32 %v2824_v3, 16  ;;  %v9366_v62 = vrot.slane %v3014_v42, 5 }
 0x1c4   : > { %2656 = vrot.lane.b32.xlu0 %v2454_v15, %s8099_s7  ;;  %v2823_v15 = vld [vmem:[#allocation2 + $0x38] sm:$0xf]  ;;  %v2937_v39 = vsel %vm8213_vm3, %v2932_v29, %v9308_v52  ;;  %v2829_v3 = vld [vmem:[#allocation2 + $0x50] sm:$0xf]  ;;  %v2834_v42 = vld [vmem:[#allocation2 + $0x64] sm:$0xf] }
 0x1c5   : > { %v2547_v35 = vpop.permute.xlu1 %2546  ;;  %v2984_v40 = vshll.u32 %v2823_v15, 16  ;;  %v2988_v38 = vshrl.u32 %v2823_v15, 16  ;;  %v3000_v44 = vrot.slane %v2998_v23, 4  ;;  %v3021_v13 = vor.u32 %v3020_v1, %v9366_v62  ;;  %v2835_v1 = vld [vmem:[#allocation2 + $0x68] sm:$0xf] }
 0x1c6   : > { %2750 = vst.msk [vmem:[#allocation3 + $0x38] sm:$0xf] %vm2742_vm9, %v2547_v35  ;;  %v2545_v41 = vpop.permute.xlu0 %2544  ;;  %v9338_v35 = vrot.slane %v2964_v16, 5  ;;  %v9383_v23 = vrot.slane %v3034_v8, 5  ;;  %v3048_v28 = vshrl.u32 %v2829_v3, 16 }
 0x1c7   : > { %2749 = vst.msk [vmem:[#allocation3 + $0x30] sm:$0xf] %vm2742_vm9, %v2545_v41  ;;  %2662 = vrot.lane.b32.xlu1 %v2457_v30, %s8099_s7  ;;  %v2825_v30 = vld [vmem:[#allocation2 + $0x40] sm:$0xf]  ;;  %v2970_v41 = vrot.slane %v2968_v17, 4  ;;  %v2986_v61 = vrot.slane %v2984_v40, 5  ;;  %v3001_v60 = vor.u32 %v3000_v44, %v9346_v43 }
 0x1c8   : > { %2660 = vrot.lane.b32.xlu0 %v2456_v31, %s8099_s7  ;;  %v2951_v31 = vor.u32 %v2950_v5, %v9316_v10  ;;  %v3004_v45 = vshll.u32 %v2825_v30, 16  ;;  %v3008_v48 = vshrl.u32 %v2825_v30, 16  ;;  %v2990_v52 = vrot.slane %v2988_v38, 4  ;;  %v2830_v17 = vld [vmem:[#allocation2 + $0x54] sm:$0xf] }
 0x1c9   : > { %v2551_v37 = vpop.permute.xlu1 %2550  ;;  %v2971_v58 = vor.u32 %v2970_v41, %v9338_v35  ;;  %v3002_v20 = vrot.slane %v3001_v60, 4  ;;  %v3054_v29 = vshll.u32 %v2830_v17, 16  ;;  %v3058_v30 = vshrl.u32 %v2830_v17, 16  ;;  %v2833_v38 = vld [vmem:[#allocation2 + $0x60] sm:$0xf] }
 0x1ca   : > { %2752 = vst.msk [vmem:[#allocation3 + $0x48] sm:$0xf] %vm2742_vm9, %v2551_v37  ;;  %v2549_v57 = vpop.permute.xlu0 %2548  ;;  %v2952_v56 = vrot.slane %v2951_v31, 4  ;;  %v2991_v5 = vor.u32 %v2990_v52, %v2986_v61  ;;  %v3098_v60 = vshrl.u32 %v2834_v42, 16 }
 0x1cb   : > { %2751 = vst.msk [vmem:[#allocation3 + $0x40] sm:$0xf] %vm2742_vm9, %v2549_v57  ;;  %2666 = vrot.lane.b32.xlu1 %v2459_v21, %s8099_s7  ;;  %v2981_v57 = vor.u32 %v2980_v36, %v9343_v25  ;;  %v2972_v16 = vrot.slane %v2971_v58, 4  ;;  %v3060_v49 = vrot.slane %v3058_v30, 4 }
 0x1cc   : > { %2664 = vrot.lane.b32.xlu0 %v2458_v50, %s8099_s7  ;;  %v2947_v50 = vsel %vm8213_vm3, %v2942_v33, %v9316_v10  ;;  %v3038_v10 = vshrl.u32 %v2828_v59, 16  ;;  %v2957_v11 = vsel %vm8213_vm3, %v2952_v56, %v9320_v12  ;;  %v2832_v12 = vld [vmem:[#allocation2 + $0x5c] sm:$0xf]  ;;  %v2831_v33 = vld [vmem:[#allocation2 + $0x58] sm:$0xf]  ;;  %v2992_v40 = vrot.slane %v2991_v5, 4 }
 0x1cd   : > { %v2555_v2 = vpop.permute.xlu1 %2554  ;;  %v2982_v14 = vrot.slane %v2981_v57, 4  ;;  %v3074_v34 = vshll.u32 %v2832_v12, 16  ;;  %v2977_v24 = vsel %vm8213_vm3, %v2972_v16, %v9343_v25  ;;  %v9403_v25 = vrot.slane %v3054_v29, 5 }
 0x1ce   : > { %2754 = vst.msk [vmem:[#allocation3 + $0x58] sm:$0xf] %vm2742_vm9, %v2555_v2  ;;  %v2553_v55 = vpop.permute.xlu0 %2552  ;;  %v3010_v2 = vrot.slane %v3008_v48, 4  ;;  %v3084_v56 = vshll.u32 %v2833_v38, 16  ;;  %v2997_v58 = vsel %vm8213_vm3, %v2992_v40, %v9346_v43  ;;  %v3088_v59 = vshrl.u32 %v2833_v38, 16 }
 0x1cf   : > { %2753 = vst.msk [vmem:[#allocation3 + $0x50] sm:$0xf] %vm2742_vm9, %v2553_v55  ;;  %2670 = vrot.lane.b32.xlu1 %v2461_v47, %s8099_s7  ;;  %v9364_v47 = vrot.slane %v3004_v45, 5  ;;  %v2967_v55 = vsel %vm8213_vm3, %v2962_v26, %v9338_v35  ;;  %v3078_v35 = vshrl.u32 %v2832_v12, 16  ;;  %v3022_v45 = vrot.slane %v3021_v13, 4 }
 0x1d0   : > { %2668 = vrot.lane.b32.xlu0 %v2460_v4, %s8099_s7  ;;  %v9406_v54 = vrot.slane %v3074_v34, 5  ;;  %v3104_v16 = vshll.u32 %v2835_v1, 16  ;;  %v3090_v5 = vrot.slane %v3088_v59, 4 }
 0x1d1   : > { %v2559_v7 = vpop.permute.xlu1 %2558  ;;  %v3011_v15 = vor.u32 %v3010_v2, %v9364_v47  ;;  %v3007_v36 = vsel %vm8213_vm3, %v3002_v20, %v9364_v47  ;;  %v3080_v26 = vrot.slane %v3078_v35, 4  ;;  %v3061_v2 = vor.u32 %v3060_v49, %v9403_v25 }
 0x1d2   : > { %2756 = vst.msk [vmem:[#allocation3 + $0x68] sm:$0xf] %vm2742_vm9, %v2559_v7  ;;  %v2557_v32 = vpop.permute.xlu0 %2556  ;;  %v3040_v7 = vrot.slane %v3038_v10, 4 }
 0x1d3   : > { %2755 = vst.msk [vmem:[#allocation3 + $0x60] sm:$0xf] %vm2742_vm9, %v2557_v32  ;;  %3590 = vrot.lane.b32.xlu1 %v2907_v9, %s8100_s8  ;;  %v9379_v9 = vrot.slane %v3024_v63, 5  ;;  %v2987_v32 = vsel %vm8213_vm3, %v2982_v14, %v2986_v61  ;;  %v3012_v41 = vrot.slane %v3011_v15, 4  ;;  %v3094_v61 = vshll.u32 %v2834_v42, 16 }
 0x1d4   : > { %3588 = vrot.lane.b32.xlu0 %v2897_v27, %s8100_s8  ;;  %v3044_v27 = vshll.u32 %v2829_v3, 16  ;;  %v3081_v10 = vor.u32 %v3080_v26, %v9406_v54  ;;  %v3100_v14 = vrot.slane %v3098_v60, 4  ;;  %v2837_v15 = vld [vmem:[#allocation2 + $0x70] sm:$0xf] }
 0x1d5   : > { %v2563_v21 = vpop.permute.xlu1 %2562  ;;  %v3027_v52 = vsel %vm8213_vm3, %v3022_v45, %v9379_v9  ;;  %v3128_v40 = vshrl.u32 %v2837_v15, 16  ;;  %v2839_v45 = vld [vmem:[#allocation2 + $0x78] sm:$0xf] }
 0x1d6   : > { %2758 = vst.msk [vmem:[#allocation3 + $0x78] sm:$0xf] %vm2742_vm9, %v2563_v21  ;;  %v2561_v37 = vpop.permute.xlu0 %2560  ;;  %v3041_v21 = vor.u32 %v3040_v7, %v9383_v23  ;;  %v3082_v29 = vrot.slane %v3081_v10, 4 }
 0x1d7   : > { %2757 = vst.msk [vmem:[#allocation3 + $0x70] sm:$0xf] %vm2742_vm9, %v2561_v37  ;;  %3594 = vrot.lane.b32.xlu1 %v2927_v19, %s8100_s8  ;;  %v3030_v19 = vrot.slane %v3028_v6, 4  ;;  %v3064_v37 = vshll.u32 %v2831_v33, 16  ;;  %v2836_v6 = vld [vmem:[#allocation2 + $0x6c] sm:$0xf] }
 0x1d8   : > { %3592 = vrot.lane.b32.xlu0 %v2917_v46, %s8100_s8  ;;  %v9398_v46 = vrot.slane %v3044_v27, 5  ;;  %v3042_v43 = vrot.slane %v3041_v21, 4  ;;  %v3114_v20 = vshll.u32 %v2836_v6, 16  ;;  %v3118_v13 = vshrl.u32 %v2836_v6, 16 }
 0x1d9   : > { %v2567_v0 = vpop.permute.xlu1 %2566  ;;  %v3031_v48 = vor.u32 %v3030_v19, %v9379_v9  ;;  %v3066_v8 = vrot.slane %v3064_v37, 5  ;;  %v2838_v19 = vld [vmem:[#allocation2 + $0x74] sm:$0xf] }
 0x1da   : > { %2760 = vst.msk [vmem:[#allocation3 + $0x88] sm:$0xf] %vm2742_vm9, %v2567_v0  ;;  %v2565_v4 = vpop.permute.xlu0 %2564  ;;  %v3017_v0 = vsel %vm8213_vm3, %v3012_v41, %v9366_v62  ;;  %v3047_v12 = vsel %vm8213_vm3, %v3042_v43, %v9398_v46  ;;  %v9443_v35 = vrot.slane %v3114_v20, 5  ;;  %v3134_v41 = vshll.u32 %v2838_v19, 16 }
 0x1db   : > { %2759 = vst.msk [vmem:[#allocation3 + $0x80] sm:$0xf] %vm2742_vm9, %v2565_v4  ;;  %3598 = vrot.lane.b32.xlu1 %v2947_v50, %s8100_s8  ;;  %v3050_v50 = vrot.slane %v3048_v28, 4  ;;  %v3032_v63 = vrot.slane %v3031_v48, 4  ;;  %v3138_v38 = vshrl.u32 %v2838_v19, 16 }
 0x1dc   : > { %3596 = vrot.lane.b32.xlu0 %v2937_v39, %s8100_s8  ;;  %v3068_v39 = vshrl.u32 %v2831_v33, 16 }
 0x1dd   : > { %v2571_v18 = vpop.permute.xlu1 %2570  ;;  %v3051_v4 = vor.u32 %v3050_v50, %v9398_v46  ;;  %v3037_v9 = vsel %vm8213_vm3, %v3032_v63, %v9383_v23  ;;  %v2840_v23 = vld [vmem:[#allocation2 + $0x7c] sm:$0xf]  ;;  %v3140_v60 = vrot.slane %v3138_v38, 4 }
 0x1de   : > { %2762 = vst.msk [vmem:[#allocation3 + $0x98] sm:$0xf] %vm2742_vm9, %v2571_v18  ;;  %v2569_v22 = vpop.permute.xlu0 %2568  ;;  %v3070_v62 = vrot.slane %v3068_v39, 4  ;;  %v3108_v18 = vshrl.u32 %v2835_v1, 16  ;;  %v3154_v21 = vshll.u32 %v2840_v23, 16  ;;  %v3158_v46 = vshrl.u32 %v2840_v23, 16 }
 0x1df   : > { %2761 = vst.msk [vmem:[#allocation3 + $0x90] sm:$0xf] %vm2742_vm9, %v2569_v22  ;;  %3602 = vrot.lane.b32.xlu1 %v2967_v55, %s8100_s8  ;;  %v9426_v55 = vrot.slane %v3094_v61, 5  ;;  %v3062_v22 = vrot.slane %v3061_v2, 4  ;;  %v3052_v7 = vrot.slane %v3051_v4, 4 }
 0x1e0   : > { %3600 = vrot.lane.b32.xlu0 %v2957_v11, %s8100_s8  ;;  %v9424_v11 = vrot.slane %v3084_v56, 5  ;;  %v3071_v27 = vor.u32 %v3070_v62, %v3066_v8  ;;  %v2841_v39 = vld [vmem:[#allocation2 + $0x80] sm:$0xf]  ;;  %v2842_v61 = vld [vmem:[#allocation2 + $0x84] sm:$0xf]  ;;  %v9466_v1 = vrot.slane %v3154_v21, 5 }
 0x1e1   : > { %v2575_v31 = vpop.permute.xlu1 %2574  ;;  %v3101_v30 = vor.u32 %v3100_v14, %v9426_v55  ;;  %v3057_v42 = vsel %vm8213_vm3, %v3052_v7, %v9403_v25  ;;  %v9463_v25 = vrot.slane %v3134_v41, 5  ;;  %v3160_v43 = vrot.slane %v3158_v46, 4  ;;  %v2843_v14 = vld [vmem:[#allocation2 + $0x88] sm:$0xf] }
 0x1e2   : > { %2764 = vst.msk [vmem:[#allocation3 + $0xa8] sm:$0xf] %vm2742_vm9, %v2575_v31  ;;  %v2573_v44 = vpop.permute.xlu0 %2572  ;;  %v3091_v33 = vor.u32 %v3090_v5, %v9424_v11  ;;  %v3120_v31 = vrot.slane %v3118_v13, 4  ;;  %v3087_v49 = vsel %vm8213_vm3, %v3082_v29, %v9424_v11  ;;  %v3072_v37 = vrot.slane %v3071_v27, 4 }
 0x1e3   : > { %2763 = vst.msk [vmem:[#allocation3 + $0xa0] sm:$0xf] %vm2742_vm9, %v2573_v44  ;;  %3606 = vrot.lane.b32.xlu1 %v2987_v32, %s8100_s8  ;;  %v9439_v32 = vrot.slane %v3104_v16, 5  ;;  %v3067_v44 = vsel %vm8213_vm3, %v3062_v22, %v3066_v8  ;;  %v3102_v56 = vrot.slane %v3101_v30, 4  ;;  %v3164_v63 = vshll.u32 %v2841_v39, 16 }
 0x1e4   : > { %3604 = vrot.lane.b32.xlu0 %v2977_v24, %s8100_s8  ;;  %v3124_v24 = vshll.u32 %v2837_v15, 16  ;;  %v3092_v50 = vrot.slane %v3091_v33, 4  ;;  %v3077_v4 = vsel %vm8213_vm3, %v3072_v37, %v9406_v54  ;;  %v3168_v6 = vshrl.u32 %v2841_v39, 16  ;;  %v2845_v33 = vld [vmem:[#allocation2 + $0x90] sm:$0xf] }
 0x1e5   : > { %v2579_v57 = vpop.permute.xlu1 %2578  ;;  %v3174_v8 = vshll.u32 %v2842_v61, 16  ;;  %v3178_v10 = vshrl.u32 %v2842_v61, 16  ;;  %v3107_v62 = vsel %vm8213_vm3, %v3102_v56, %v9439_v32  ;;  %v3141_v5 = vor.u32 %v3140_v60, %v9463_v25  ;;  %v2847_v56 = vld [vmem:[#allocation2 + $0x98] sm:$0xf] }
 0x1e6   : > { %2766 = vst.msk [vmem:[#allocation3 + $0xb8] sm:$0xf] %vm2742_vm9, %v2579_v57  ;;  %v2577_v47 = vpop.permute.xlu0 %2576  ;;  %v3121_v57 = vor.u32 %v3120_v31, %v9443_v35  ;;  %v3161_v13 = vor.u32 %v3160_v43, %v9466_v1  ;;  %v3184_v7 = vshll.u32 %v2843_v14, 16  ;;  %v3170_v27 = vrot.slane %v3168_v6, 4 }
 0x1e7   : > { %2765 = vst.msk [vmem:[#allocation3 + $0xb0] sm:$0xf] %vm2742_vm9, %v2577_v47  ;;  %3610 = vrot.lane.b32.xlu1 %v3007_v36, %s8100_s8  ;;  %v3110_v36 = vrot.slane %v3108_v18, 4  ;;  %v3144_v47 = vshll.u32 %v2839_v45, 16  ;;  %v2844_v18 = vld [vmem:[#allocation2 + $0x8c] sm:$0xf] }
 0x1e8   : > { %3608 = vrot.lane.b32.xlu0 %v2997_v58, %s8100_s8  ;;  %v9458_v58 = vrot.slane %v3124_v24, 5  ;;  %v3122_v54 = vrot.slane %v3121_v57, 4  ;;  %v3180_v22 = vrot.slane %v3178_v10, 4  ;;  %v3194_v29 = vshll.u32 %v2844_v18, 16 }
 0x1e9   : > { %v2583_v3 = vpop.permute.xlu1 %2582  ;;  %v3111_v59 = vor.u32 %v3110_v36, %v9439_v32  ;;  %v3146_v20 = vrot.slane %v3144_v47, 5  ;;  %v3198_v30 = vshrl.u32 %v2844_v18, 16  ;;  %v2846_v36 = vld [vmem:[#allocation2 + $0x94] sm:$0xf]  ;;  %v3162_v41 = vrot.slane %v3161_v13, 4 }
 0x1ea   : > { %2768 = vst.msk [vmem:[#allocation3 + $0xc8] sm:$0xf] %vm2742_vm9, %v2583_v3  ;;  %v2581_v17 = vpop.permute.xlu0 %2580  ;;  %v3097_v3 = vsel %vm8213_vm3, %v3092_v50, %v9426_v55  ;;  %v3127_v23 = vsel %vm8213_vm3, %v3122_v54, %v9458_v58  ;;  %v9503_v46 = vrot.slane %v3194_v29, 5  ;;  %v3208_v37 = vshrl.u32 %v2845_v33, 16 }
 0x1eb   : > { %2767 = vst.msk [vmem:[#allocation3 + $0xc0] sm:$0xf] %vm2742_vm9, %v2581_v17  ;;  %3614 = vrot.lane.b32.xlu1 %v3027_v52, %s8100_s8  ;;  %v3130_v52 = vrot.slane %v3128_v40, 4  ;;  %v3112_v16 = vrot.slane %v3111_v59, 4  ;;  %v3214_v50 = vshll.u32 %v2846_v36, 16  ;;  %v3218_v39 = vshrl.u32 %v2846_v36, 16 }
 0x1ec   : > { %3612 = vrot.lane.b32.xlu0 %v3017_v0, %s8100_s8  ;;  %v3148_v0 = vshrl.u32 %v2839_v45, 16 }
 0x1ed   : > { %v2587_v28 = vpop.permute.xlu1 %2586  ;;  %v3131_v17 = vor.u32 %v3130_v52, %v9458_v58  ;;  %v3117_v32 = vsel %vm8213_vm3, %v3112_v16, %v9443_v35  ;;  %v2848_v35 = vld [vmem:[#allocation2 + $0x9c] sm:$0xf]  ;;  %v3220_v10 = vrot.slane %v3218_v39, 4 }
 0x1ee   : > { %2770 = vst.msk [vmem:[#allocation3 + $0xd8] sm:$0xf] %vm2742_vm9, %v2587_v28  ;;  %v2585_v34 = vpop.permute.xlu0 %2584  ;;  %v3150_v55 = vrot.slane %v3148_v0, 4  ;;  %v3188_v28 = vshrl.u32 %v2843_v14, 16  ;;  %v3234_v57 = vshll.u32 %v2848_v35, 16  ;;  %v3238_v58 = vshrl.u32 %v2848_v35, 16 }
 0x1ef   : > { %2769 = vst.msk [vmem:[#allocation3 + $0xd0] sm:$0xf] %vm2742_vm9, %v2585_v34  ;;  %3618 = vrot.lane.b32.xlu1 %v3047_v12, %s8100_s8  ;;  %v9486_v12 = vrot.slane %v3174_v8, 5  ;;  %v3142_v34 = vrot.slane %v3141_v5, 4  ;;  %v3132_v31 = vrot.slane %v3131_v17, 4 }
 0x1f0   : > { %3616 = vrot.lane.b32.xlu0 %v3037_v9, %s8100_s8  ;;  %v9484_v9 = vrot.slane %v3164_v63, 5  ;;  %v3151_v24 = vor.u32 %v3150_v55, %v3146_v20  ;;  %v2849_v0 = vld [vmem:[#allocation2 + $0xa0] sm:$0xf]  ;;  %v2850_v8 = vld [vmem:[#allocation2 + $0xa4] sm:$0xf]  ;;  %v9526_v14 = vrot.slane %v3234_v57, 5 }
 0x1f1   : > { %v2591_v48 = vpop.permute.xlu1 %2590  ;;  %v3181_v38 = vor.u32 %v3180_v22, %v9486_v12  ;;  %v3137_v61 = vsel %vm8213_vm3, %v3132_v31, %v9463_v25  ;;  %v9523_v25 = vrot.slane %v3214_v50, 5  ;;  %v3240_v54 = vrot.slane %v3238_v58, 4  ;;  %v2851_v22 = vld [vmem:[#allocation2 + $0xa8] sm:$0xf] }
 0x1f2   : > { %2772 = vst.msk [vmem:[#allocation3 + $0xe8] sm:$0xf] %vm2742_vm9, %v2591_v48  ;;  %v2589_v26 = vpop.permute.xlu0 %2588  ;;  %v3171_v45 = vor.u32 %v3170_v27, %v9484_v9  ;;  %v3200_v48 = vrot.slane %v3198_v30, 4  ;;  %v3167_v60 = vsel %vm8213_vm3, %v3162_v41, %v9484_v9  ;;  %v3152_v47 = vrot.slane %v3151_v24, 4 }
 0x1f3   : > { %2771 = vst.msk [vmem:[#allocation3 + $0xe0] sm:$0xf] %vm2742_vm9, %v2589_v26  ;;  %3622 = vrot.lane.b32.xlu1 %v3067_v44, %s8100_s8  ;;  %v9499_v44 = vrot.slane %v3184_v7, 5  ;;  %v3147_v26 = vsel %vm8213_vm3, %v3142_v34, %v3146_v20  ;;  %v3182_v63 = vrot.slane %v3181_v38, 4  ;;  %v3244_v16 = vshll.u32 %v2849_v0, 16 }
 0x1f4   : > { %3620 = vrot.lane.b32.xlu0 %v3057_v42, %s8100_s8  ;;  %v3204_v42 = vshll.u32 %v2845_v33, 16  ;;  %v3172_v52 = vrot.slane %v3171_v45, 4  ;;  %v3157_v17 = vsel %vm8213_vm3, %v3152_v47, %v9466_v1  ;;  %v3248_v18 = vshrl.u32 %v2849_v0, 16  ;;  %v2853_v45 = vld [vmem:[#allocation2 + $0xb0] sm:$0xf] }
 0x1f5   : > { %v2595_v2 = vpop.permute.xlu1 %2594  ;;  %v3254_v20 = vshll.u32 %v2850_v8, 16  ;;  %v3258_v13 = vshrl.u32 %v2850_v8, 16  ;;  %v3187_v55 = vsel %vm8213_vm3, %v3182_v63, %v9499_v44  ;;  %v3221_v27 = vor.u32 %v3220_v10, %v9523_v25  ;;  %v2855_v63 = vld [vmem:[#allocation2 + $0xb8] sm:$0xf] }
 0x1f6   : > { %2774 = vst.msk [vmem:[#allocation3 + $0xf8] sm:$0xf] %vm2742_vm9, %v2595_v2  ;;  %v2593_v11 = vpop.permute.xlu0 %2592  ;;  %v3201_v2 = vor.u32 %v3200_v48, %v9503_v46  ;;  %v3241_v30 = vor.u32 %v3240_v54, %v9526_v14  ;;  %v3264_v31 = vshll.u32 %v2851_v22, 16  ;;  %v3250_v24 = vrot.slane %v3248_v18, 4 }
 0x1f7   : > { %2773 = vst.msk [vmem:[#allocation3 + $0xf0] sm:$0xf] %vm2742_vm9, %v2593_v11  ;;  %3626 = vrot.lane.b32.xlu1 %v3087_v49, %s8100_s8  ;;  %v3190_v49 = vrot.slane %v3188_v28, 4  ;;  %v3224_v11 = vshll.u32 %v2847_v56, 16  ;;  %v2852_v28 = vld [vmem:[#allocation2 + $0xac] sm:$0xf] }
 0x1f8   : > { %3624 = vrot.lane.b32.xlu0 %v3077_v4, %s8100_s8  ;;  %v9518_v4 = vrot.slane %v3204_v42, 5  ;;  %v3202_v1 = vrot.slane %v3201_v2, 4  ;;  %v3260_v34 = vrot.slane %v3258_v13, 4  ;;  %v3274_v41 = vshll.u32 %v2852_v28, 16 }
 0x1f9   : > { %v2599_v15 = vpop.permute.xlu1 %2598  ;;  %v3191_v6 = vor.u32 %v3190_v49, %v9499_v44  ;;  %v3226_v29 = vrot.slane %v3224_v11, 5  ;;  %v3278_v38 = vshrl.u32 %v2852_v28, 16  ;;  %v2854_v49 = vld [vmem:[#allocation2 + $0xb4] sm:$0xf]  ;;  %v3242_v50 = vrot.slane %v3241_v30, 4 }
 0x1fa   : > { %2776 = vst.msk [vmem:[#allocation3 + $0x108] sm:$0xf] %vm2742_vm9, %v2599_v15  ;;  %v2597_v19 = vpop.permute.xlu0 %2596  ;;  %v3177_v15 = vsel %vm8213_vm3, %v3172_v52, %v9486_v12  ;;  %v3207_v35 = vsel %vm8213_vm3, %v3202_v1, %v9518_v4  ;;  %v9563_v58 = vrot.slane %v3274_v41, 5  ;;  %v3288_v47 = vshrl.u32 %v2853_v45, 16 }
 0x1fb   : > { %2775 = vst.msk [vmem:[#allocation3 + $0x100] sm:$0xf] %vm2742_vm9, %v2597_v19  ;;  %3630 = vrot.lane.b32.xlu1 %v3107_v62, %s8100_s8  ;;  %v3210_v62 = vrot.slane %v3208_v37, 4  ;;  %v3192_v7 = vrot.slane %v3191_v6, 4  ;;  %v3294_v52 = vshll.u32 %v2854_v49, 16  ;;  %v3298_v0 = vshrl.u32 %v2854_v49, 16 }
 0x1fc   : > { %3628 = vrot.lane.b32.xlu0 %v3097_v3, %s8100_s8  ;;  %v3228_v3 = vshrl.u32 %v2847_v56, 16 }
 0x1fd   : > { %v2603_v40 = vpop.permute.xlu1 %2602  ;;  %v3211_v19 = vor.u32 %v3210_v62, %v9518_v4  ;;  %v3197_v44 = vsel %vm8213_vm3, %v3192_v7, %v9503_v46  ;;  %v2856_v46 = vld [vmem:[#allocation2 + $0xbc] sm:$0xf]  ;;  %v3300_v13 = vrot.slane %v3298_v0, 4 }
 0x1fe   : > { %2778 = vst.msk [vmem:[#allocation3 + $0x118] sm:$0xf] %vm2742_vm9, %v2603_v40  ;;  %v2601_v21 = vpop.permute.xlu0 %2600  ;;  %v3230_v12 = vrot.slane %v3228_v3, 4  ;;  %v3268_v40 = vshrl.u32 %v2851_v22, 16  ;;  %v3314_v2 = vshll.u32 %v2856_v46, 16  ;;  %v3318_v4 = vshrl.u32 %v2856_v46, 16 }
 0x1ff   : > { %2777 = vst.msk [vmem:[#allocation3 + $0x110] sm:$0xf] %vm2742_vm9, %v2601_v21  ;;  %3634 = vrot.lane.b32.xlu1 %v3127_v23, %s8100_s8  ;;  %v9546_v23 = vrot.slane %v3254_v20, 5  ;;  %v3222_v21 = vrot.slane %v3221_v27, 4  ;;  %v3212_v48 = vrot.slane %v3211_v19, 4 }
 0x200   : > { %3632 = vrot.lane.b32.xlu0 %v3117_v32, %s8100_s8  ;;  %v9544_v32 = vrot.slane %v3244_v16, 5  ;;  %v3231_v42 = vor.u32 %v3230_v12, %v3226_v29  ;;  %v2857_v3 = vld [vmem:[#allocation2 + $0xc0] sm:$0xf]  ;;  %v2858_v20 = vld [vmem:[#allocation2 + $0xc4] sm:$0xf]  ;;  %v9586_v22 = vrot.slane %v3314_v2, 5 }
 0x201   : > { %v2607_v59 = vpop.permute.xlu1 %2606  ;;  %v3261_v39 = vor.u32 %v3260_v34, %v9546_v23  ;;  %v3217_v8 = vsel %vm8213_vm3, %v3212_v48, %v9523_v25  ;;  %v9583_v25 = vrot.slane %v3294_v52, 5  ;;  %v3320_v1 = vrot.slane %v3318_v4, 4  ;;  %v2859_v34 = vld [vmem:[#allocation2 + $0xc8] sm:$0xf] }
 0x202   : > { %2780 = vst.msk [vmem:[#allocation3 + $0x128] sm:$0xf] %vm2742_vm9, %v2607_v59  ;;  %v2605_v43 = vpop.permute.xlu0 %2604  ;;  %v3251_v56 = vor.u32 %v3250_v24, %v9544_v32  ;;  %v3280_v59 = vrot.slane %v3278_v38, 4  ;;  %v3247_v10 = vsel %vm8213_vm3, %v3242_v50, %v9544_v32  ;;  %v3232_v11 = vrot.slane %v3231_v42, 4 }
 0x203   : > { %2779 = vst.msk [vmem:[#allocation3 + $0x120] sm:$0xf] %vm2742_vm9, %v2605_v43  ;;  %3638 = vrot.lane.b32.xlu1 %v3147_v26, %s8100_s8  ;;  %v9559_v26 = vrot.slane %v3264_v31, 5  ;;  %v3227_v43 = vsel %vm8213_vm3, %v3222_v21, %v3226_v29  ;;  %v3262_v16 = vrot.slane %v3261_v39, 4  ;;  %v3324_v7 = vshll.u32 %v2857_v3, 16 }
 0x204   : > { %3636 = vrot.lane.b32.xlu0 %v3137_v61, %s8100_s8  ;;  %v3284_v61 = vshll.u32 %v2853_v45, 16  ;;  %v3252_v62 = vrot.slane %v3251_v56, 4  ;;  %v3237_v19 = vsel %vm8213_vm3, %v3232_v11, %v9526_v14  ;;  %v3328_v28 = vshrl.u32 %v2857_v3, 16  ;;  %v2861_v56 = vld [vmem:[#allocation2 + $0xd0] sm:$0xf] }
 0x205   : > { %v2611_v5 = vpop.permute.xlu1 %2610  ;;  %v3334_v29 = vshll.u32 %v2858_v20, 16  ;;  %v3338_v30 = vshrl.u32 %v2858_v20, 16  ;;  %v3267_v12 = vsel %vm8213_vm3, %v3262_v16, %v9559_v26  ;;  %v3301_v24 = vor.u32 %v3300_v13, %v9583_v25  ;;  %v2863_v16 = vld [vmem:[#allocation2 + $0xd8] sm:$0xf] }
 0x206   : > { %2782 = vst.msk [vmem:[#allocation3 + $0x138] sm:$0xf] %vm2742_vm9, %v2611_v5  ;;  %v2609_v9 = vpop.permute.xlu0 %2608  ;;  %v3281_v5 = vor.u32 %v3280_v59, %v9563_v58  ;;  %v3321_v38 = vor.u32 %v3320_v1, %v9586_v22  ;;  %v3344_v48 = vshll.u32 %v2859_v34, 16  ;;  %v3330_v42 = vrot.slane %v3328_v28, 4 }
 0x207   : > { %2781 = vst.msk [vmem:[#allocation3 + $0x130] sm:$0xf] %vm2742_vm9, %v2609_v9  ;;  %3642 = vrot.lane.b32.xlu1 %v3167_v60, %s8100_s8  ;;  %v3270_v60 = vrot.slane %v3268_v40, 4  ;;  %v3304_v9 = vshll.u32 %v2855_v63, 16  ;;  %v2860_v40 = vld [vmem:[#allocation2 + $0xcc] sm:$0xf] }
 0x208   : > { %3640 = vrot.lane.b32.xlu0 %v3157_v17, %s8100_s8  ;;  %v9578_v17 = vrot.slane %v3284_v61, 5  ;;  %v3282_v14 = vrot.slane %v3281_v5, 4  ;;  %v3340_v21 = vrot.slane %v3338_v30, 4  ;;  %v3354_v50 = vshll.u32 %v2860_v40, 16 }
 0x209   : > { %v2615_v33 = vpop.permute.xlu1 %2614  ;;  %v3271_v18 = vor.u32 %v3270_v60, %v9559_v26  ;;  %v3306_v41 = vrot.slane %v3304_v9, 5  ;;  %v3358_v39 = vshrl.u32 %v2860_v40, 16  ;;  %v2862_v60 = vld [vmem:[#allocation2 + $0xd4] sm:$0xf]  ;;  %v3322_v52 = vrot.slane %v3321_v38, 4 }
 0x20a   : > { %2784 = vst.msk [vmem:[#allocation3 + $0x148] sm:$0xf] %vm2742_vm9, %v2615_v33  ;;  %v2613_v36 = vpop.permute.xlu0 %2612  ;;  %v3257_v33 = vsel %vm8213_vm3, %v3252_v62, %v9546_v23  ;;  %v3287_v46 = vsel %vm8213_vm3, %v3282_v14, %v9578_v17  ;;  %v9623_v4 = vrot.slane %v3354_v50, 5  ;;  %v3368_v11 = vshrl.u32 %v2861_v56, 16 }
 0x20b   : > { %2783 = vst.msk [vmem:[#allocation3 + $0x140] sm:$0xf] %vm2742_vm9, %v2613_v36  ;;  %3646 = vrot.lane.b32.xlu1 %v3187_v55, %s8100_s8  ;;  %v3290_v55 = vrot.slane %v3288_v47, 4  ;;  %v3272_v31 = vrot.slane %v3271_v18, 4  ;;  %v3374_v62 = vshll.u32 %v2862_v60, 16  ;;  %v3378_v3 = vshrl.u32 %v2862_v60, 16 }
 0x20c   : > { %3644 = vrot.lane.b32.xlu0 %v3177_v15, %s8100_s8  ;;  %v3308_v15 = vshrl.u32 %v2855_v63, 16 }
 0x20d   : > { %v2619_v37 = vpop.permute.xlu1 %2618  ;;  %v3291_v36 = vor.u32 %v3290_v55, %v9578_v17  ;;  %v3277_v26 = vsel %vm8213_vm3, %v3272_v31, %v9563_v58  ;;  %v2864_v58 = vld [vmem:[#allocation2 + $0xdc] sm:$0xf]  ;;  %v3380_v30 = vrot.slane %v3378_v3, 4 }
 0x20e   : > { %2786 = vst.msk [vmem:[#allocation3 + $0x158] sm:$0xf] %vm2742_vm9, %v2619_v37  ;;  %v2617_v57 = vpop.permute.xlu0 %2616  ;;  %v3310_v23 = vrot.slane %v3308_v15, 4  ;;  %v3348_v37 = vshrl.u32 %v2859_v34, 16  ;;  %v3394_v5 = vshll.u32 %v2864_v58, 16  ;;  %v3398_v17 = vshrl.u32 %v2864_v58, 16 }
 0x20f   : > { %2785 = vst.msk [vmem:[#allocation3 + $0x150] sm:$0xf] %vm2742_vm9, %v2617_v57  ;;  %3650 = vrot.lane.b32.xlu1 %v3207_v35, %s8100_s8  ;;  %v9606_v35 = vrot.slane %v3334_v29, 5  ;;  %v3302_v57 = vrot.slane %v3301_v24, 4  ;;  %v3292_v59 = vrot.slane %v3291_v36, 4 }
 0x210   : > { %3648 = vrot.lane.b32.xlu0 %v3197_v44, %s8100_s8  ;;  %v9604_v44 = vrot.slane %v3324_v7, 5  ;;  %v3311_v61 = vor.u32 %v3310_v23, %v3306_v41  ;;  %v2865_v15 = vld [vmem:[#allocation2 + $0xe0] sm:$0xf]  ;;  %v2866_v29 = vld [vmem:[#allocation2 + $0xe4] sm:$0xf]  ;;  %v9646_v34 = vrot.slane %v3394_v5, 5 }
 0x211   : > { %v2623_v6 = vpop.permute.xlu1 %2622  ;;  %v3341_v0 = vor.u32 %v3340_v21, %v9606_v35  ;;  %v3297_v20 = vsel %vm8213_vm3, %v3292_v59, %v9583_v25  ;;  %v9643_v25 = vrot.slane %v3374_v62, 5  ;;  %v3400_v14 = vrot.slane %v3398_v17, 4  ;;  %v2867_v21 = vld [vmem:[#allocation2 + $0xe8] sm:$0xf] }
 0x212   : > { %2788 = vst.msk [vmem:[#allocation3 + $0x168] sm:$0xf] %vm2742_vm9, %v2623_v6  ;;  %v2621_v54 = vpop.permute.xlu0 %2620  ;;  %v3331_v63 = vor.u32 %v3330_v42, %v9604_v44  ;;  %v3360_v6 = vrot.slane %v3358_v39, 4  ;;  %v3327_v13 = vsel %vm8213_vm3, %v3322_v52, %v9604_v44  ;;  %v3312_v9 = vrot.slane %v3311_v61, 4 }
 0x213   : > { %2787 = vst.msk [vmem:[#allocation3 + $0x160] sm:$0xf] %vm2742_vm9, %v2621_v54  ;;  %3654 = vrot.lane.b32.xlu1 %v3227_v43, %s8100_s8  ;;  %v9619_v43 = vrot.slane %v3344_v48, 5  ;;  %v3307_v54 = vsel %vm8213_vm3, %v3302_v57, %v3306_v41  ;;  %v3342_v7 = vrot.slane %v3341_v0, 4  ;;  %v3404_v31 = vshll.u32 %v2865_v15, 16 }
 0x214   : > { %3652 = vrot.lane.b32.xlu0 %v3217_v8, %s8100_s8  ;;  %v3364_v8 = vshll.u32 %v2861_v56, 16  ;;  %v3332_v55 = vrot.slane %v3331_v63, 4  ;;  %v3317_v36 = vsel %vm8213_vm3, %v3312_v9, %v9586_v22  ;;  %v3408_v40 = vshrl.u32 %v2865_v15, 16  ;;  %v2869_v63 = vld [vmem:[#allocation2 + $0xf0] sm:$0xf] }
 0x215   : > { %v2627_v27 = vpop.permute.xlu1 %2626  ;;  %v3414_v41 = vshll.u32 %v2866_v29, 16  ;;  %v3418_v38 = vshrl.u32 %v2866_v29, 16  ;;  %v3347_v23 = vsel %vm8213_vm3, %v3342_v7, %v9619_v43  ;;  %v3381_v42 = vor.u32 %v3380_v30, %v9643_v25  ;;  %v2872_v30 = vld [vmem:[#allocation2 + $0xfc] sm:$0xf] }
 0x216   : > { %2790 = vst.msk [vmem:[#allocation3 + $0x178] sm:$0xf] %vm2742_vm9, %v2627_v27  ;;  %v2625_v32 = vpop.permute.xlu0 %2624  ;;  %v3361_v27 = vor.u32 %v3360_v6, %v9623_v4  ;;  %v3401_v39 = vor.u32 %v3400_v14, %v9646_v34  ;;  %v3424_v59 = vshll.u32 %v2867_v21, 16  ;;  %v3410_v61 = vrot.slane %v3408_v40, 4 }
 0x217   : > { %2789 = vst.msk [vmem:[#allocation3 + $0x170] sm:$0xf] %vm2742_vm9, %v2625_v32  ;;  %3658 = vrot.lane.b32.xlu1 %v3247_v10, %s8100_s8  ;;  %v3350_v10 = vrot.slane %v3348_v37, 4  ;;  %v3384_v32 = vshll.u32 %v2863_v16, 16  ;;  %v2868_v37 = vld [vmem:[#allocation2 + $0xec] sm:$0xf] }
 0x218   : > { %3656 = vrot.lane.b32.xlu0 %v3237_v19, %s8100_s8  ;;  %v9638_v19 = vrot.slane %v3364_v8, 5  ;;  %v3362_v22 = vrot.slane %v3361_v27, 4  ;;  %v3420_v57 = vrot.slane %v3418_v38, 4  ;;  %v3434_v52 = vshll.u32 %v2868_v37, 16 }
 0x219   : > { %v2631_v45 = vpop.permute.xlu1 %2630  ;;  %v3351_v28 = vor.u32 %v3350_v10, %v9619_v43  ;;  %v3386_v50 = vrot.slane %v3384_v32, 5  ;;  %v3438_v0 = vshrl.u32 %v2868_v37, 16  ;;  %v2870_v10 = vld [vmem:[#allocation2 + $0xf4] sm:$0xf]  ;;  %v3402_v62 = vrot.slane %v3401_v39, 4 }
 0x21a   : > { %2792 = vst.msk [vmem:[#allocation3 + $0x188] sm:$0xf] %vm2742_vm9, %v2631_v45  ;;  %v2629_v49 = vpop.permute.xlu0 %2628  ;;  %v3337_v45 = vsel %vm8213_vm3, %v3332_v55, %v9606_v35  ;;  %v3367_v58 = vsel %vm8213_vm3, %v3362_v22, %v9638_v19  ;;  %v9683_v5 = vrot.slane %v3434_v52, 5  ;;  %v3454_v9 = vshll.u32 %v2870_v10, 16  ;;  %v2873_v32 = vld [vmem:[#allocation2 + $0x100] sm:$0xf] }
 0x21b   : > { %2791 = vst.msk [vmem:[#allocation3 + $0x180] sm:$0xf] %vm2742_vm9, %v2629_v49  ;;  %3662 = vrot.lane.b32.xlu1 %v3267_v12, %s8100_s8  ;;  %v3370_v12 = vrot.slane %v3368_v11, 4  ;;  %v3352_v48 = vrot.slane %v3351_v28, 4  ;;  %v3440_v17 = vrot.slane %v3438_v0, 4  ;;  %v3458_v55 = vshrl.u32 %v2870_v10, 16 }
 0x21c   : > { %3660 = vrot.lane.b32.xlu0 %v3257_v33, %s8100_s8  ;;  %v3388_v33 = vshrl.u32 %v2863_v16, 16 }
 0x21d   : > { %v2635_v47 = vpop.permute.xlu1 %2634  ;;  %v3371_v49 = vor.u32 %v3370_v12, %v9638_v19  ;;  %v3357_v43 = vsel %vm8213_vm3, %v3352_v48, %v9623_v4  ;;  %v3441_v14 = vor.u32 %v3440_v17, %v9683_v5  ;;  %v3460_v40 = vrot.slane %v3458_v55, 4 }
 0x21e   : > { %2794 = vst.msk [vmem:[#allocation3 + $0x198] sm:$0xf] %vm2742_vm9, %v2635_v47  ;;  %v2633_v2 = vpop.permute.xlu0 %2632  ;;  %v3390_v35 = vrot.slane %v3388_v33, 4  ;;  %v3428_v47 = vshrl.u32 %v2867_v21, 16  ;;  %v3484_v21 = vshll.u32 %v2873_v32, 16 }
 0x21f   : > { %2793 = vst.msk [vmem:[#allocation3 + $0x190] sm:$0xf] %vm2742_vm9, %v2633_v2  ;;  %3666 = vrot.lane.b32.xlu1 %v3287_v46, %s8100_s8  ;;  %v9666_v46 = vrot.slane %v3414_v41, 5  ;;  %v3382_v2 = vrot.slane %v3381_v42, 4  ;;  %v3372_v6 = vrot.slane %v3371_v49, 4  ;;  %v3488_v42 = vshrl.u32 %v2873_v32, 16 }
 0x220   : > { %3664 = vrot.lane.b32.xlu0 %v3277_v26, %s8100_s8  ;;  %v9664_v26 = vrot.slane %v3404_v31, 5  ;;  %v3391_v8 = vor.u32 %v3390_v35, %v3386_v50  ;;  %v9723_v0 = vrot.slane %v3484_v21, 5  ;;  %v2879_v21 = vld [vmem:[#allocation2 + $0x118] sm:$0xf] }
 0x221   : > { %v2639_v18 = vpop.permute.xlu1 %2638  ;;  %v3421_v3 = vor.u32 %v3420_v57, %v9666_v46  ;;  %v3387_v15 = vsel %vm8213_vm3, %v3382_v2, %v3386_v50  ;;  %v3377_v27 = vsel %vm8213_vm3, %v3372_v6, %v9643_v25  ;;  %v9703_v25 = vrot.slane %v3454_v9, 5 }
 0x222   : > { %2796 = vst.msk [vmem:[#allocation3 + $0x1a8] sm:$0xf] %vm2742_vm9, %v2639_v18  ;;  %v2637_v1 = vpop.permute.xlu0 %2636  ;;  %v3411_v16 = vor.u32 %v3410_v61, %v9664_v26  ;;  %v3444_v18 = vshll.u32 %v2869_v63, 16  ;;  %v3407_v19 = vsel %vm8213_vm3, %v3402_v62, %v9664_v26  ;;  %v3392_v28 = vrot.slane %v3391_v8, 4 }
 0x223   : > { %2795 = vst.msk [vmem:[#allocation3 + $0x1a0] sm:$0xf] %vm2742_vm9, %v2637_v1  ;;  %3670 = vrot.lane.b32.xlu1 %v3307_v54, %s8100_s8  ;;  %v9679_v54 = vrot.slane %v3424_v59, 5  ;;  %v2871_v1 = vld [vmem:[#allocation2 + $0xf8] sm:$0xf]  ;;  %v3422_v33 = vrot.slane %v3421_v3, 4  ;;  %v3461_v57 = vor.u32 %v3460_v40, %v9703_v25 }
 0x224   : > { %3668 = vrot.lane.b32.xlu0 %v3297_v20, %s8100_s8  ;;  %v3430_v20 = vrot.slane %v3428_v47, 4  ;;  %v3412_v29 = vrot.slane %v3411_v16, 4  ;;  %v9698_v31 = vrot.slane %v3444_v18, 5  ;;  %v3464_v41 = vshll.u32 %v2871_v1, 16 }
 0x225   : > { %v2643_v24 = vpop.permute.xlu1 %2642  ;;  %v3397_v48 = vsel %vm8213_vm3, %v3392_v28, %v9646_v34  ;;  %v3427_v39 = vsel %vm8213_vm3, %v3422_v33, %v9679_v54  ;;  %v3442_v34 = vrot.slane %v3441_v14, 4  ;;  %v3490_v6 = vrot.slane %v3488_v42, 4  ;;  %v2880_v14 = vld [vmem:[#allocation2 + $0x11c] sm:$0xf] }
 0x226   : > { %2798 = vst.msk [vmem:[#allocation3 + $0x1b8] sm:$0xf] %vm2742_vm9, %v2643_v24  ;;  %v2641_v44 = vpop.permute.xlu0 %2640  ;;  %v3431_v24 = vor.u32 %v3430_v20, %v9679_v54  ;;  %v3417_v26 = vsel %vm8213_vm3, %v3412_v29, %v9666_v46  ;;  %v3466_v59 = vrot.slane %v3464_v41, 5  ;;  %v2877_v54 = vld [vmem:[#allocation2 + $0x110] sm:$0xf]  ;;  %v3554_v42 = vshll.u32 %v2880_v14, 16 }
 0x227   : > { %2797 = vst.msk [vmem:[#allocation3 + $0x1b0] sm:$0xf] %vm2742_vm9, %v2641_v44  ;;  %3674 = vrot.lane.b32.xlu1 %v3327_v13, %s8100_s8  ;;  %v3448_v13 = vshrl.u32 %v2869_v63, 16  ;;  %v3468_v44 = vshrl.u32 %v2871_v1, 16  ;;  %v3447_v16 = vsel %vm8213_vm3, %v3442_v34, %v9698_v31  ;;  %v2878_v20 = vld [vmem:[#allocation2 + $0x114] sm:$0xf] }
 0x228   : > { %3672 = vrot.lane.b32.xlu0 %v3317_v36, %s8100_s8  ;;  %v2874_v36 = vld [vmem:[#allocation2 + $0x104] sm:$0xf]  ;;  %v3432_v35 = vrot.slane %v3431_v24, 4  ;;  %v3528_v29 = vshrl.u32 %v2877_v54, 16  ;;  %v3538_v32 = vshrl.u32 %v2878_v20, 16 }
 0x229   : > { %v2647_v56 = vpop.permute.xlu1 %2646  ;;  %v3450_v38 = vrot.slane %v3448_v13, 4  ;;  %v3494_v49 = vshll.u32 %v2874_v36, 16  ;;  %v3498_v37 = vshrl.u32 %v2874_v36, 16  ;;  %v3470_v46 = vrot.slane %v3468_v44, 4 }
 0x22a   : > { %2800 = vst.msk [vmem:[#allocation3 + $0x1c8] sm:$0xf] %vm2742_vm9, %v2647_v56  ;;  %v2645_v60 = vpop.permute.xlu0 %2644  ;;  %v2875_v56 = vld [vmem:[#allocation2 + $0x108] sm:$0xf]  ;;  %v3437_v3 = vsel %vm8213_vm3, %v3432_v35, %v9683_v5  ;;  %v3491_v5 = vor.u32 %v3490_v6, %v9723_v0  ;;  %v3548_v35 = vshrl.u32 %v2879_v21, 16 }
 0x22b   : > { %2799 = vst.msk [vmem:[#allocation3 + $0x1c0] sm:$0xf] %vm2742_vm9, %v2645_v60  ;;  %3678 = vrot.lane.b32.xlu1 %v3347_v23, %s8100_s8  ;;  %v3474_v23 = vshll.u32 %v2872_v30, 16  ;;  %v3451_v61 = vor.u32 %v3450_v38, %v9698_v31  ;;  %v2876_v60 = vld [vmem:[#allocation2 + $0x10c] sm:$0xf]  ;;  %v9725_v63 = vrot.slane %v3494_v49, 5  ;;  %v3471_v9 = vor.u32 %v3470_v46, %v3466_v59 }
 0x22c   : > { %3676 = vrot.lane.b32.xlu0 %v3337_v45, %s8100_s8  ;;  %v3478_v45 = vshrl.u32 %v2872_v30, 16  ;;  %v3504_v2 = vshll.u32 %v2875_v56, 16  ;;  %v3508_v10 = vshrl.u32 %v2875_v56, 16  ;;  %v3518_v62 = vshrl.u32 %v2876_v60, 16  ;;  %v2882_v56 = vld [vmem:[#allocation2 + $0x124] sm:$0xf] }
 0x22d   : > { %v2651_v11 = vpop.permute.xlu1 %2650  ;;  %v9721_v47 = vrot.slane %v3474_v23, 5  ;;  %v3452_v17 = vrot.slane %v3451_v61, 4  ;;  %v3534_v30 = vshll.u32 %v2878_v20, 16  ;;  %v3472_v36 = vrot.slane %v3471_v9, 4  ;;  %v7989_v9 = vld [vmem:[%s12042_s2 + $0x30] sm:$0xff]  }
 0x22e   : > { %2802 = vst.msk [vmem:[#allocation3 + $0x1d8] sm:$0xf] %vm2742_vm9, %v2651_v11  ;;  %v2649_v4 = vpop.permute.xlu0 %2648  ;;  %v3480_v52 = vrot.slane %v3478_v45, 4  ;;  %v3514_v11 = vshll.u32 %v2876_v60, 16  ;;  %v3510_v28 = vrot.slane %v3508_v10, 4  ;;  %v3492_v40 = vrot.slane %v3491_v5, 4 }
 0x22f   : > { %2801 = vst.msk [vmem:[#allocation3 + $0x1d0] sm:$0xf] %vm2742_vm9, %v2649_v4  ;;  %3682 = vrot.lane.b32.xlu1 %v3367_v58, %s8100_s8  ;;  %v3500_v58 = vrot.slane %v3498_v37, 4  ;;  %v3462_v4 = vrot.slane %v3461_v57, 4  ;;  %v3457_v24 = vsel %vm8213_vm3, %v3452_v17, %v9703_v25  ;;  %v3540_v25 = vrot.slane %v3538_v32, 4 }
 0x230   : > { %3680 = vrot.lane.b32.xlu0 %v3357_v43, %s8100_s8  ;;  %v3481_v18 = vor.u32 %v3480_v52, %v9721_v47  ;;  %v3558_v37 = vshrl.u32 %v2880_v14, 16  ;;  %v2881_v60 = vld [vmem:[#allocation2 + $0x120] sm:$0xf]  ;;  %v9780_v46 = vrot.slane %v3554_v42, 5  ;;  %v3871_v42 = vld [vmem:[#allocation2 + $0x18] sm:$0xf] }
 0x231   : > { %v2655_v7 = vpop.permute.xlu1 %2654  ;;  %v3501_v55 = vor.u32 %v3500_v58, %v9725_v63  ;;  %v3574_v58 = vshll.u32 %v2882_v56, 16  ;;  %v3564_v10 = vshll.u32 %v2881_v60, 16 }
 0x232   : > { %2804 = vst.msk [vmem:[#allocation3 + $0x1e8] sm:$0xf] %vm2742_vm9, %v2655_v7  ;;  %v2653_v12 = vpop.permute.xlu0 %2652  ;;  %v9743_v7 = vrot.slane %v3514_v11, 5  ;;  %v3482_v33 = vrot.slane %v3481_v18, 4  ;;  %v3568_v11 = vshrl.u32 %v2881_v60, 16 }
 0x233   : > { %2803 = vst.msk [vmem:[#allocation3 + $0x1e0] sm:$0xf] %vm2742_vm9, %v2653_v12  ;;  %3686 = vrot.lane.b32.xlu1 %v3387_v15, %s8100_s8  ;;  %v9739_v15 = vrot.slane %v3504_v2, 5  ;;  %v3467_v12 = vsel %vm8213_vm3, %v3462_v4, %v3466_v59  ;;  %v3502_v38 = vrot.slane %v3501_v55, 4  ;;  %v3497_v59 = vsel %vm8213_vm3, %v3492_v40, %v9725_v63  ;;  %v7988_v63 = vld [vmem:[%s12042_s2 + $0x38] sm:$0xff]  }
 0x234   : > { %3684 = vrot.lane.b32.xlu0 %v3377_v27, %s8100_s8  ;;  %v3520_v27 = vrot.slane %v3518_v62, 4  ;;  %v3487_v49 = vsel %vm8213_vm3, %v3482_v33, %v9723_v0  ;;  %v3578_v2 = vshrl.u32 %v2882_v56, 16  ;;  %v3550_v62 = vrot.slane %v3548_v35, 4  ;;  %v7990_v33 = vld [vmem:[%s12042_s2 + $0x28] sm:$0xff]   ;;  %v3873_v56 = vld [vmem:[#allocation2 + $0x20] sm:$0xf] }
 0x235   : > { %v2659_v22 = vpop.permute.xlu1 %2658  ;;  %v3511_v45 = vor.u32 %v3510_v28, %v9739_v15  ;;  %v3507_v57 = vsel %vm8213_vm3, %v3502_v38, %v9739_v15  ;;  %v9800_v20 = vrot.slane %v3574_v58, 5  ;;  %v3566_v5 = vrot.slane %v3564_v10, 5  ;;  %v7993_v10 = vld [vmem:[%s12042_s2 + $0x10] sm:$0xff]  }
 0x236   : > { %2806 = vst.msk [vmem:[#allocation3 + $0x1f8] sm:$0xf] %vm2742_vm9, %v2659_v22  ;;  %v2657_v50 = vpop.permute.xlu0 %2656  ;;  %v3521_v44 = vor.u32 %v3520_v27, %v9743_v7  ;;  %v9760_v22 = vrot.slane %v3534_v30, 5  ;;  %v3570_v27 = vrot.slane %v3568_v11, 4  ;;  %v4016_v35 = vrot.slane %v3871_v42, 5 }
 0x237   : > { %2805 = vst.msk [vmem:[#allocation3 + $0x1f0] sm:$0xf] %vm2742_vm9, %v2657_v50  ;;  %3690 = vrot.lane.b32.xlu1 %v3407_v19, %s8100_s8  ;;  %v3524_v19 = vshll.u32 %v2877_v54, 16  ;;  %v3512_v61 = vrot.slane %v3511_v45, 4  ;;  %v9831_v45 = vld [vmem:[#allocation2 + $0x1c] sm:$0xf] }
 0x238   : > { %3688 = vrot.lane.b32.xlu0 %v3397_v48, %s8100_s8  ;;  %v3530_v48 = vrot.slane %v3528_v29, 4  ;;  %v3541_v52 = vor.u32 %v3540_v25, %v9760_v22  ;;  %v4018_v58 = vrot.slane %v4016_v35, 4  ;;  %v9920_v42 = vld [vmem:[#allocation2 + $0xa0] sm:$0xf] }
 0x239   : > { %v2663_v43 = vpop.permute.xlu1 %2662  ;;  %v9755_v23 = vrot.slane %v3524_v19, 5  ;;  %v3517_v4 = vsel %vm8213_vm3, %v3512_v61, %v9743_v7  ;;  %v2883_v7 = vld [vmem:[#allocation2 + $0x128] sm:$0x1] }
 0x23a   : > { %2808 = vst.msk [vmem:[#allocation3 + $0x208] sm:$0xf] %vm2742_vm9, %v2663_v43  ;;  %v2661_v8 = vpop.permute.xlu0 %2660  ;;  %v3560_v43 = vrot.slane %v3558_v37, 4  ;;  %v3542_v17 = vrot.slane %v3541_v52, 4  ;;  %v3584_v32 = vshll.u32 %v2883_v7, 16 }
 0x23b   : > { %2807 = vst.msk [vmem:[#allocation3 + $0x200] sm:$0xf] %vm2742_vm9, %v2661_v8  ;;  %3694 = vrot.lane.b32.xlu1 %v3427_v39, %s8100_s8  ;;  %v3477_v39 = vsel %vm8213_vm3, %v3472_v36, %v9721_v47  ;;  %v3522_v47 = vrot.slane %v3521_v44, 4  ;;  %v3531_v0 = vor.u32 %v3530_v48, %v9755_v23  ;;  %v3571_v36 = vor.u32 %v3570_v27, %v3566_v5  ;;  %v3869_v37 = vld [vmem:[#allocation2 + $0x10] sm:$0xe] }
 0x23c   : > { %3692 = vrot.lane.b32.xlu0 %v3417_v26, %s8100_s8  ;;  %v3544_v26 = vshll.u32 %v2879_v21, 16  ;;  %v3561_v18 = vor.u32 %v3560_v43, %v9780_v46  ;;  %v7991_v21 = vld [vmem:[%s12042_s2 + $0x20] sm:$0xff]   ;;  %v7812_v60 = vrot.slane %v3869_v37, 9  ;;  %v4022_v43 = vrot.slane %v3873_v56, 5 }
 0x23d   : > { %v2667_v13 = vpop.permute.xlu1 %2666  ;;  %v3532_v15 = vrot.slane %v3531_v0, 4  ;;  %v3572_v48 = vrot.slane %v3571_v36, 4  ;;  %v4924_v0 = vld [vmem:[#allocation2 + $0x20] sm:$0xf] }
 0x23e   : > { %2810 = vst.msk [vmem:[#allocation3 + $0x218] sm:$0xf] %vm2742_vm9, %v2667_v13  ;;  %v2665_v1 = vpop.permute.xlu0 %2664  ;;  %v3546_v8 = vrot.slane %v3544_v26, 5  ;;  %v3580_v13 = vrot.slane %v3578_v2, 4  ;;  %v3562_v29 = vrot.slane %v3561_v18, 4 }
 0x23f   : > { %2809 = vst.msk [vmem:[#allocation3 + $0x210] sm:$0xf] %vm2742_vm9, %v2665_v1  ;;  %3698 = vrot.lane.b32.xlu1 %v3447_v16, %s8100_s8  ;;  %v3527_v16 = vsel %vm8213_vm3, %v3522_v47, %v9755_v23  ;;  %v3586_v23 = vrot.slane %v3584_v32, 5  ;;  %v3577_v61 = vsel %vm8213_vm3, %v3572_v48, %v9800_v20  ;;  %v4925_v47 = vld [vmem:[#allocation2 + $0x24] sm:$0xf] }
 0x240   : > { %3696 = vrot.lane.b32.xlu0 %v3437_v3, %s8100_s8  ;;  %v8101_v3 = vmov 0   ;;  %v3551_v1 = vor.u32 %v3550_v62, %v3546_v8  ;;  %v3547_v28 = vsel %vm8213_vm3, %v3542_v17, %v3546_v8  ;;  %v3581_v30 = vor.u32 %v3580_v13, %v9800_v20  ;;  %v5981_v17 = vld [vmem:[#allocation2 + $0x24] sm:$0xf]  ;;  %v9891_v32 = vld [vmem:[#allocation2 + $0x28] sm:$0xf] }
 0x241   : > { %v2671_v31 = vpop.permute.xlu1 %2670  ;;  %7036 = vmatprep.subr.bf16.mxu0 %v8101_v3  ;;  %7934 = vmatprep.subr.bf16.mxu1 %v8101_v3  ;;  %v3567_v38 = vsel %vm8213_vm3, %v3562_v29, %v3566_v5  ;;  %v5009_v8 = vshrl.u32 %v4925_v47, 16  ;;  %v6124_v20 = vrot.slane %v5981_v17, 5  ;;  %v9881_v5 = vld [vmem:[#allocation2 + $0x28] sm:$0xf] }
 0x242   : > { %2812 = vst.msk [vmem:[#allocation3 + $0x228] sm:$0xf] %vm2742_vm9, %v2671_v31  ;;  %v2669_v41 = vpop.permute.xlu0 %2668  ;;  %7037 = vmatpush1.bf16.msra.mxu0 %v7988_v63  ;;  %7943 = vmatpush1.bf16.msra.mxu1 %v7988_v63  ;;  %v3537_v31 = vsel %vm8213_vm3, %v3532_v15, %v9760_v22  ;;  %v3582_v44 = vrot.slane %v3581_v30, 4  ;;  %v5980_v15 = vld [vmem:[#allocation2 + $0x20] sm:$0xe]  ;;  %v4024_v30 = vrot.slane %v4022_v43, 4 }
 0x243   : > { %2811 = vst.msk [vmem:[#allocation3 + $0x220] sm:$0xf] %vm2742_vm9, %v2669_v41  ;;  %3702 = vrot.lane.b32.xlu1 %v3467_v12, %s8100_s8  ;;  %7038 = vmatprep.subr.bf16.mxu0 %v8101_v3  ;;  %v9814_v12 = vld [vmem:[#allocation2 + $0x14] sm:$0xf]  ;;  %v5011_v27 = vrot.slane %v5009_v8, 4  ;;  %v6127_v36 = vrot.slane %v9881_v5, 5 }
 0x244   : > { %3700 = vrot.lane.b32.xlu0 %v3457_v24, %s8100_s8  ;;  %7935 = vmatprep.subr.bf16.mxu1 %v8101_v3  ;;  %v3552_v24 = vrot.slane %v3551_v1, 4  ;;  %v4013_v41 = vrot.slane %v9814_v12, 5  ;;  %v3587_v26 = vsel %vm8213_vm3, %v3582_v44, %v3586_v23  ;;  %v7995_v44 = vld [vmem:[%s12042_s2] sm:$0xff]   ;;  %v5983_v8 = vld [vmem:[#allocation2 + $0x2c] sm:$0xf] }
 0x245   : > { %v3591_v50 = vpop.permute.xlu1 %3590 }
 0x246   : > { %3800 = vst.msk [vmem:[#allocation3 + $0x8] sm:$0xf] %vm3798_vm10, %v3591_v50  ;;  %v3589_v34 = vpop.permute.xlu0 %3588  ;;  %7039 = vmatpush1.bf16.msra.mxu0 %v7989_v9  ;;  %7944 = vmatpush1.bf16.msra.mxu1 %v7989_v9  ;;  %v3557_v25 = vsel %vm8213_vm3, %v3552_v24, %v9780_v46  ;;  %v4015_v50 = vrot.slane %v4013_v41, 4  ;;  %v4014_v62 = vsel %vm8829_vm7, %v7812_v60, %v4013_v41 }
 0x247   : > { %3799 = vst.msk [vmem:[#allocation3] sm:$0xf] %vm3798_vm10, %v3589_v34  ;;  %3706 = vrot.lane.b32.xlu1 %v3487_v49, %s8100_s8  ;;  %7040 = vmatprep.subr.bf16.mxu0 %v8101_v3  ;;  %v9848_v34 = vld [vmem:[#allocation2 + $0x24] sm:$0xf] }
 0x248   : > { %3704 = vrot.lane.b32.xlu0 %v3477_v39, %s8100_s8  ;;  %7936 = vmatprep.subr.bf16.mxu1 %v8101_v3  ;;  %v4019_v39 = vrot.slane %v9831_v45, 5  ;;  %v4025_v2 = vrot.slane %v9848_v34, 5  ;;  %v4017_v63 = vsel %vm8829_vm7, %v4015_v50, %v4016_v35  ;;  %v7996_v35 = vld [vmem:[%s12042_s2 + $0x40] sm:$0xff]  }
 0x249   : > { %v3595_v6 = vpop.permute.xlu1 %3594  ;;  %v4503_v34 = vld [vmem:[#allocation2 + $0x20] sm:$0xf] }
 0x24a   : > { %3802 = vst.msk [vmem:[#allocation3 + $0x18] sm:$0xf] %vm3798_vm10, %v3595_v6  ;;  %v3593_v54 = vpop.permute.xlu0 %3592  ;;  %7041 = vmatpush1.bf16.msra.mxu0 %v7990_v33  ;;  %7945 = vmatpush1.bf16.msra.mxu1 %v7990_v33  ;;  %v4021_v46 = vrot.slane %v4019_v39, 4  ;;  %v5005_v6 = vshll.u32 %v4925_v47, 16  ;;  %v4020_v9 = vsel %vm8829_vm7, %v4018_v58, %v4019_v39  ;;  %v5019_v47 = vshrl.u32 %v9891_v32, 16 }
 0x24b   : > { %3801 = vst.msk [vmem:[#allocation3 + $0x10] sm:$0xf] %vm3798_vm10, %v3593_v54  ;;  %3710 = vrot.lane.b32.xlu1 %v3507_v57, %s8100_s8  ;;  %7042 = vmatprep.subr.bf16.mxu0 %v8101_v3  ;;  %v7992_v57 = vld [vmem:[%s12042_s2 + $0x18] sm:$0xff]   ;;  %v9871_v54 = vld [vmem:[#allocation2 + $0x28] sm:$0xf] }
 0x24c   : > { %3708 = vrot.lane.b32.xlu0 %v3497_v59, %s8100_s8  ;;  %7937 = vmatprep.subr.bf16.mxu1 %v8101_v3  ;;  %v4023_v13 = vsel %vm8829_vm7, %v4021_v46, %v4022_v43  ;;  %v4028_v1 = vrot.slane %v9871_v54, 5  ;;  %v9885_v7 = vrot.slane %v5005_v6, 5  ;;  %v4961_v6 = vld [vmem:[#allocation2 + $0xb4] sm:$0xf] }
 0x24d   : > { %v3599_v55 = vpop.permute.xlu1 %3598 }
 0x24e   : > { %3804 = vst.msk [vmem:[#allocation3 + $0x28] sm:$0xf] %vm3798_vm10, %v3599_v55  ;;  %v3597_v19 = vpop.permute.xlu0 %3596  ;;  %7043 = vmatpush1.bf16.msra.mxu0 %v7991_v21  ;;  %7946 = vmatpush1.bf16.msra.mxu1 %v7991_v21  ;;  %v4027_v55 = vrot.slane %v4025_v2, 4  ;;  %v5012_v41 = vor.u32 %v5011_v27, %v9885_v7  ;;  %v4026_v21 = vsel %vm8829_vm7, %v4024_v30, %v4025_v2 }
 0x24f   : > { %3803 = vst.msk [vmem:[#allocation3 + $0x20] sm:$0xf] %vm3798_vm10, %v3597_v19  ;;  %3714 = vrot.lane.b32.xlu1 %v3527_v16, %s8100_s8  ;;  %7044 = vmatprep.subr.bf16.mxu0 %v8101_v3  ;;  %v4996_v16 = vshrl.u32 %v4924_v0, 16  ;;  %v7994_v19 = vld [vmem:[%s12042_s2 + $0x8] sm:$0xff]  }
 0x250   : > { %3712 = vrot.lane.b32.xlu0 %v3517_v4, %s8100_s8  ;;  %7938 = vmatprep.subr.bf16.mxu1 %v8101_v3  ;;  %v4999_v4 = vshll.u32 %v4924_v0, 16  ;;  %v5013_v37 = vrot.slane %v5012_v41, 4  ;;  %v4505_v41 = vld [vmem:[#allocation2 + $0x28] sm:$0xf] }
 0x251   : > { %v3603_v14 = vpop.permute.xlu1 %3602  ;;  %v4998_v12 = vrot.slane %v4996_v16, 4  ;;  %v6130_v16 = vrot.slane %v5983_v8, 5 }
 0x252   : > { %3806 = vst.msk [vmem:[#allocation3 + $0x38] sm:$0xf] %vm3798_vm10, %v3603_v14  ;;  %v3601_v40 = vpop.permute.xlu0 %3600  ;;  %7045 = vmatpush1.bf16.msra.mxu0 %v7992_v57  ;;  %7947 = vmatpush1.bf16.msra.mxu1 %v7992_v57  ;;  %v5001_v33 = vrot.slane %v4999_v4, 5  ;;  %v6126_v14 = vrot.slane %v6124_v20, 4  ;;  %v9953_v4 = vld [vmem:[#allocation2 + $0x30] sm:$0xf] }
 0x253   : > { %3805 = vst.msk [vmem:[#allocation3 + $0x30] sm:$0xf] %vm3798_vm10, %v3601_v40  ;;  %3718 = vrot.lane.b32.xlu1 %v3547_v28, %s8100_s8  ;;  %7046 = vmatprep.subr.bf16.mxu0 %v8101_v3  ;;  %v7813_v28 = vrot.slane %v5980_v15, 9  ;;  %v4029_v40 = vsel %vm8829_vm7, %v4027_v55, %v4028_v1  ;;  %v5369_v55 = vshrl.u32 %v4961_v6, 16  ;;  %v9962_v15 = vld [vmem:[#allocation2 + $0x30] sm:$0xf] }
 0x254   : > { %3716 = vrot.lane.b32.xlu0 %v3537_v31, %s8100_s8  ;;  %7939 = vmatprep.subr.bf16.mxu1 %v8101_v3  ;;  %v6128_v23 = vsel %vm8829_vm7, %v6126_v14, %v6127_v36  ;;  %v6132_v5 = vrot.slane %v6130_v16, 4 }
 0x255   : > { %v3607_v22 = vpop.permute.xlu1 %3606  ;;  %v6125_v24 = vsel %vm8829_vm7, %v7813_v28, %v6124_v20  ;;  %6404 = vst.msk [vmem:[#allocation3 + $0xc] sm:$0xf] %vm465_vm0, %v6128_v23  ;;  %v5021_v20 = vrot.slane %v5019_v47, 4  ;;  %v3908_v47 = vld [vmem:[#allocation2 + $0xac] sm:$0xf] }
 0x256   : > { %3808 = vst.msk [vmem:[#allocation3 + $0x48] sm:$0xf] %vm3798_vm10, %v3607_v22  ;;  %v3605_v49 = vpop.permute.xlu0 %3604  ;;  %7047 = vmatpush1.bf16.msra.mxu0 %v7993_v10  ;;  %7948 = vmatpush1.bf16.msra.mxu1 %v7993_v10  ;;  %v5002_v22 = vor.u32 %v5001_v33, %v4998_v12  ;;  %v6133_v33 = vrot.slane %v9962_v15, 5 }
 0x257   : > { %3807 = vst.msk [vmem:[#allocation3 + $0x40] sm:$0xf] %vm3798_vm10, %v3605_v49  ;;  %3722 = vrot.lane.b32.xlu1 %v3567_v38, %s8100_s8  ;;  %7048 = vmatprep.subr.bf16.mxu0 %v8101_v3  ;;  %v5015_v38 = vshll.u32 %v9891_v32, 16  ;;  %v4504_v49 = vld [vmem:[#allocation2 + $0x24] sm:$0xf] }
 0x258   : > { %3720 = vrot.lane.b32.xlu0 %v3557_v25, %s8100_s8  ;;  %7940 = vmatprep.subr.bf16.mxu1 %v8101_v3  ;;  %6403 = vst.msk [vmem:[#allocation3 + $0x4] sm:$0xf] %vm465_vm0, %v6125_v24  ;;  %v9916_v25 = vld [vmem:[#allocation2 + $0xa4] sm:$0xf]  ;;  %v5003_v57 = vrot.slane %v5002_v22, 4  ;;  %v6134_v23 = vsel %vm8829_vm7, %v6132_v5, %v6133_v33 }
 0x259   : > { %v3611_v59 = vpop.permute.xlu1 %3610  ;;  %v9926_v50 = vrot.slane %v5015_v38, 5  ;;  %v4121_v39 = vrot.slane %v9916_v25, 5  ;;  %v4506_v32 = vld [vmem:[#allocation2 + $0x2c] sm:$0xf]  ;;  %v9988_v22 = vld [vmem:[#allocation2 + $0xb8] sm:$0xf] }
 0x25a   : > { %3810 = vst.msk [vmem:[#allocation3 + $0x58] sm:$0xf] %vm3798_vm10, %v3611_v59  ;;  %v3609_v52 = vpop.permute.xlu0 %3608  ;;  %7049 = vmatpush1.bf16.msra.mxu0 %v7994_v19  ;;  %7949 = vmatpush1.bf16.msra.mxu1 %v7994_v19  ;;  %v9933_v59 = vld [vmem:[#allocation2 + $0xa8] sm:$0xf]  ;;  %v5008_v2 = vsel %vm8213_vm3, %v5003_v57, %v9885_v7 }
 0x25b   : > { %3809 = vst.msk [vmem:[#allocation3 + $0x50] sm:$0xf] %vm3798_vm10, %v3609_v52  ;;  %3726 = vrot.lane.b32.xlu1 %v3587_v26, %s8100_s8  ;;  %7050 = vmatprep.subr.bf16.mxu0 %v8101_v3  ;;  %v4927_v26 = vld [vmem:[#allocation2 + $0x2c] sm:$0xf]  ;;  %v5018_v0 = vsel %vm8213_vm3, %v5013_v37, %v9926_v50  ;;  %v4123_v46 = vrot.slane %v4121_v39, 4  ;;  %v4124_v43 = vrot.slane %v9933_v59, 5  ;;  %v5022_v24 = vor.u32 %v5021_v20, %v9926_v50 }
 0x25c   : > { %3724 = vrot.lane.b32.xlu0 %v3577_v61, %s8100_s8  ;;  %7941 = vmatprep.subr.bf16.mxu1 %v8101_v3  ;;  %v4118_v61 = vrot.slane %v9920_v42, 5  ;;  %s8103_s8 = smov 96   ;;  %v5029_v52 = vshrl.u32 %v4927_v26, 16  ;;  %6406 = vst.msk [vmem:[#allocation3 + $0x1c] sm:$0xf] %vm465_vm0, %v6134_v23  ;;  %v6135_v23 = vrot.slane %v6133_v33, 4 }
 0x25d   : > { %v3615_v11 = vpop.permute.xlu1 %3614 }
 0x25e   : > { %3812 = vst.msk [vmem:[#allocation3 + $0x68] sm:$0xf] %vm3798_vm10, %v3615_v11  ;;  %v3613_v18 = vpop.permute.xlu0 %3612  ;;  %7051 = vmatpush1.bf16.msra.mxu0 %v7995_v44  ;;  %7950 = vmatpush1.bf16.msra.mxu1 %v7995_v44  ;;  %v4960_v11 = vld [vmem:[#allocation2 + $0xb0] sm:$0xf]  ;;  %v5371_v44 = vrot.slane %v5369_v55, 4 }
 0x25f   : > { %3811 = vst.msk [vmem:[#allocation3 + $0x60] sm:$0xf] %vm3798_vm10, %v3613_v18  ;;  %4224 = vrot.lane.b32.xlu1 %v4017_v63, %s8102_s25  ;;  %7066 = vmatprep.subr.bf16.mxu0 %v8101_v3  ;;  %v4120_v63 = vrot.slane %v4118_v61, 4  ;;  %v5031_v18 = vrot.slane %v5029_v52, 4  ;;  %v5355_v19 = vshll.u32 %v4960_v11, 16  ;;  %v5359_v28 = vshrl.u32 %v4960_v11, 16 }
 0x260   : > { %4222 = vrot.lane.b32.xlu0 %v4014_v62, %s8102_s25  ;;  %7942 = vmatprep.subr.bf16.mxu1 %v8101_v3  ;;  %v5025_v3 = vshll.u32 %v4927_v26, 16  ;;  %v6129_v62 = vrot.slane %v6127_v36, 4  ;;  %v6017_v36 = vld [vmem:[#allocation2 + $0xb4] sm:$0xf] }
 0x261   : > { %v3619_v29 = vpop.permute.xlu1 %3618  ;;  %v4122_v27 = vsel %vm8829_vm7, %v4120_v63, %v4121_v39  ;;  %v9990_v25 = vrot.slane %v5355_v19, 5 }
 0x262   : > { %3814 = vst.msk [vmem:[#allocation3 + $0x78] sm:$0xf] %vm3798_vm10, %v3619_v29  ;;  %v3617_v31 = vpop.permute.xlu0 %3616  ;;  %7067 = vmatpush2.bf16.msra.mxu0 %v7996_v35  ;;  %7951 = vmatpush2.bf16.msra.mxu1 %v7996_v35  ;;  %v9955_v17 = vrot.slane %v5025_v3, 5  ;;  %v9966_v29 = vld [vmem:[#allocation2 + $0xb0] sm:$0xf]  ;;  %v6131_v12 = vsel %vm8829_vm7, %v6129_v62, %v6130_v16 }
 0x263   : > { %3813 = vst.msk [vmem:[#allocation3 + $0x70] sm:$0xf] %vm3798_vm10, %v3617_v31  ;;  %4228 = vrot.lane.b32.xlu1 %v4023_v13, %s8102_s25  ;;  %v4125_v13 = vsel %vm8829_vm7, %v4123_v46, %v4124_v43  ;;  %v5035_v31 = vshll.u32 %v9953_v4, 16  ;;  %v5023_v46 = vrot.slane %v5022_v24, 4  ;;  %v10022_v62 = vld [vmem:[#allocation2 + $0xb0] sm:$0xf] }
 0x264   : > { %4226 = vrot.lane.b32.xlu0 %v4020_v9, %s8102_s25  ;;  %v5365_v9 = vshll.u32 %v4961_v6, 16  ;;  %v5032_v14 = vor.u32 %v5031_v18, %v9955_v17  ;;  %6405 = vst.msk [vmem:[#allocation3 + $0x14] sm:$0xf] %vm465_vm0, %v6131_v12  ;;  %v4127_v6 = vrot.slane %v3908_v47, 5  ;;  %v4929_v16 = vld [vmem:[#allocation2 + $0x34] sm:$0xf] }
 0x265   : > { %v3623_v45 = vpop.permute.xlu1 %3622  ;;  %v5028_v20 = vsel %vm8213_vm3, %v5023_v46, %v9955_v17  ;;  %v4130_v5 = vrot.slane %v10022_v62, 5  ;;  %v5039_v17 = vshrl.u32 %v9953_v4, 16  ;;  %v4963_v12 = vld [vmem:[#allocation2 + $0xbc] sm:$0xf] }
 0x266   : > { %3816 = vst.msk [vmem:[#allocation3 + $0x88] sm:$0xf] %vm3798_vm10, %v3623_v45  ;;  %v3621_v48 = vpop.permute.xlu0 %3620  ;;  %v9981_v38 = vrot.slane %v5365_v9, 5  ;;  %v6229_v45 = vrot.slane %v9966_v29, 5  ;;  %v5033_v26 = vrot.slane %v5032_v14, 4  ;;  %v4129_v55 = vrot.slane %v4127_v6, 4 }
 0x267   : > { %3815 = vst.msk [vmem:[#allocation3 + $0x80] sm:$0xf] %vm3798_vm10, %v3621_v48  ;;  %4232 = vrot.lane.b32.xlu1 %v4029_v40, %s8102_s25  ;;  %v9978_v40 = vld [vmem:[#allocation2 + $0xb8] sm:$0xf]  ;;  %v5361_v48 = vrot.slane %v5359_v28, 4 }
 0x268   : > { %4230 = vrot.lane.b32.xlu0 %v4026_v21, %s8102_s25  ;;  %v6235_v37 = vrot.slane %v9978_v40, 5  ;;  %v6231_v39 = vrot.slane %v6229_v45, 4  ;;  %v5372_v57 = vor.u32 %v5371_v44, %v9981_v38  ;;  %v5985_v14 = vld [vmem:[#allocation2 + $0x34] sm:$0xf]  ;;  %v4131_v4 = vsel %vm8829_vm7, %v4129_v55, %v4130_v5  ;;  %v10053_v44 = vld [vmem:[#allocation2 + $0x38] sm:$0xf] }
 0x269   : > { %v3627_v56 = vpop.permute.xlu1 %3626  ;;  %v6136_v24 = vrot.slane %v5985_v14, 5 }
 0x26a   : > { %3818 = vst.msk [vmem:[#allocation3 + $0x98] sm:$0xf] %vm3798_vm10, %v3627_v56  ;;  %v3625_v60 = vpop.permute.xlu0 %3624  ;;  %v4540_v56 = vld [vmem:[#allocation2 + $0xb4] sm:$0xf] }
 0x26b   : > { %3817 = vst.msk [vmem:[#allocation3 + $0x90] sm:$0xf] %vm3798_vm10, %v3625_v60  ;;  %4645 = vrot.lane.b32.xlu1 %v4504_v49, %s8103_s8  ;;  %v6232_v49 = vrot.slane %v6017_v36, 5  ;;  %v5375_v60 = vshll.u32 %v9988_v22, 16  ;;  %v10048_v36 = vld [vmem:[#allocation2 + $0x38] sm:$0xf]  ;;  %v6137_v15 = vsel %vm8829_vm7, %v6135_v23, %v6136_v24 }
 0x26c   : > { %4643 = vrot.lane.b32.xlu0 %v4503_v34, %s8103_s8  ;;  %v10000_v34 = vrot.slane %v5035_v31, 5  ;;  %v5055_v47 = vshll.u32 %v10048_v36, 16  ;;  %6407 = vst.msk [vmem:[#allocation3 + $0x24] sm:$0xf] %vm465_vm0, %v6137_v15 }
 0x26d   : > { %v3631_v58 = vpop.permute.xlu1 %3630  ;;  %v6234_v35 = vrot.slane %v6232_v49, 4  ;;  %v6233_v3 = vsel %vm8829_vm7, %v6231_v39, %v6232_v49  ;;  %v10020_v11 = vrot.slane %v5375_v60, 5  ;;  %v5041_v39 = vrot.slane %v5039_v17, 4 }
 0x26e   : > { %3820 = vst.msk [vmem:[#allocation3 + $0xa8] sm:$0xf] %vm3798_vm10, %v3631_v58  ;;  %v3629_v10 = vpop.permute.xlu0 %3628  ;;  %v5362_v58 = vor.u32 %v5361_v48, %v9990_v25  ;;  %v5038_v8 = vsel %vm8213_vm3, %v5033_v26, %v10000_v34  ;;  %v5379_v48 = vshrl.u32 %v9988_v22, 16  ;;  %v6139_v26 = vrot.slane %v10053_v44, 5  ;;  %v4508_v22 = vld [vmem:[#allocation2 + $0x34] sm:$0xf] }
 0x26f   : > { %3819 = vst.msk [vmem:[#allocation3 + $0xa0] sm:$0xf] %vm3798_vm10, %v3629_v10  ;;  %5701 = vrot.lane.b32.xlu1 %v5018_v0, %s8104_s9  ;;  %v4539_v0 = vld [vmem:[#allocation2 + $0xb0] sm:$0xf]  ;;  %v5373_v10 = vrot.slane %v5372_v57, 4  ;;  %v6237_v57 = vrot.slane %v6235_v37, 4 }
 0x270   : > { %5699 = vrot.lane.b32.xlu0 %v5008_v2, %s8104_s9  ;;  %v6236_v2 = vsel %vm8829_vm7, %v6234_v35, %v6235_v37  ;;  %6439 = vst.msk [vmem:[#allocation3 + $0x124] sm:$0xf] %vm465_vm0, %v6233_v3  ;;  %v6019_v35 = vld [vmem:[#allocation2 + $0xbc] sm:$0xf] }
 0x271   : > { %v3635_v7 = vpop.permute.xlu1 %3634  ;;  %6440 = vst.msk [vmem:[#allocation3 + $0x12c] sm:$0xf] %vm465_vm0, %v6236_v2  ;;  %v5378_v19 = vsel %vm8213_vm3, %v5373_v10, %v10020_v11  ;;  %v6238_v33 = vrot.slane %v6019_v35, 5  ;;  %v5042_v2 = vor.u32 %v5041_v39, %v10000_v34  ;;  %v4542_v34 = vld [vmem:[#allocation2 + $0xbc] sm:$0xf]  ;;  %v4030_v35 = vrot.slane %v4028_v1, 4 }
 0x272   : > { %3822 = vst.msk [vmem:[#allocation3 + $0xb8] sm:$0xf] %vm3798_vm10, %v3635_v7  ;;  %v3633_v30 = vpop.permute.xlu0 %3632  ;;  %v5045_v7 = vshll.u32 %v4929_v16, 16  ;;  %v4510_v44 = vld [vmem:[#allocation2 + $0x3c] sm:$0xf] }
 0x273   : > { %3821 = vst.msk [vmem:[#allocation3 + $0xb0] sm:$0xf] %vm3798_vm10, %v3633_v30  ;;  %4296 = vrot.lane.b32.xlu1 %v4125_v13, %s8102_s25  ;;  %v5363_v13 = vrot.slane %v5362_v58, 4  ;;  %v4507_v58 = vld [vmem:[#allocation2 + $0x30] sm:$0xf]  ;;  %v6239_v10 = vsel %vm8829_vm7, %v6237_v57, %v6238_v33 }
 0x274   : > { %4294 = vrot.lane.b32.xlu0 %v4122_v27, %s8102_s25  ;;  %v5049_v27 = vshrl.u32 %v4929_v16, 16  ;;  %6441 = vst.msk [vmem:[#allocation3 + $0x134] sm:$0xf] %vm465_vm0, %v6239_v10  ;;  %v10157_v10 = vld [vmem:[#allocation2 + $0x40] sm:$0xf] }
 0x275   : > { %v3639_v21 = vpop.permute.xlu1 %3638  ;;  %v5368_v30 = vsel %vm8213_vm3, %v5363_v13, %v9981_v38  ;;  %v5389_v38 = vshrl.u32 %v4963_v12, 16 }
 0x276   : > { %3824 = vst.msk [vmem:[#allocation3 + $0xc8] sm:$0xf] %vm3798_vm10, %v3639_v21  ;;  %v3637_v50 = vpop.permute.xlu0 %3636  ;;  %v5051_v59 = vrot.slane %v5049_v27, 4  ;;  %v6138_v21 = vrot.slane %v6136_v24, 4  ;;  %v4541_v27 = vld [vmem:[#allocation2 + $0xb8] sm:$0xf] }
 0x277   : > { %3823 = vst.msk [vmem:[#allocation3 + $0xc0] sm:$0xf] %vm3798_vm10, %v3637_v50  ;;  %4649 = vrot.lane.b32.xlu1 %v4506_v32, %s8103_s8  ;;  %v4126_v32 = vrot.slane %v4124_v43, 4  ;;  %v5385_v43 = vshll.u32 %v4963_v12, 16  ;;  %v5391_v40 = vrot.slane %v5389_v38, 4 }
 0x278   : > { %4647 = vrot.lane.b32.xlu0 %v4505_v41, %s8103_s8  ;;  %v10050_v41 = vrot.slane %v5045_v7, 5  ;;  %v6140_v37 = vsel %vm8829_vm7, %v6138_v21, %v6139_v26 }
 0x279   : > { %v3643_v52 = vpop.permute.xlu1 %3642  ;;  %v4128_v50 = vsel %vm8829_vm7, %v4126_v32, %v4127_v6  ;;  %v10072_v3 = vrot.slane %v5385_v43, 5  ;;  %v5381_v6 = vrot.slane %v5379_v48, 4  ;;  %6408 = vst.msk [vmem:[#allocation3 + $0x2c] sm:$0xf] %vm465_vm0, %v6140_v37  ;;  %v3910_v43 = vld [vmem:[#allocation2 + $0xb4] sm:$0xf] }
 0x27a   : > { %3826 = vst.msk [vmem:[#allocation3 + $0xd8] sm:$0xf] %vm3798_vm10, %v3643_v52  ;;  %v3641_v63 = vpop.permute.xlu0 %3640  ;;  %v5052_v60 = vor.u32 %v5051_v59, %v10050_v41  ;;  %v10078_v52 = vld [vmem:[#allocation2 + $0xc0] sm:$0xf]  ;;  %v10114_v59 = vld [vmem:[#allocation2 + $0x30] sm:$0xf] }
 0x27b   : > { %3825 = vst.msk [vmem:[#allocation3 + $0xd0] sm:$0xf] %vm3798_vm10, %v3641_v63  ;;  %4717 = vrot.lane.b32.xlu1 %v4540_v56, %s8103_s8  ;;  %v10081_v63 = vld [vmem:[#allocation2 + $0xc0] sm:$0xf]  ;;  %v6241_v16 = vrot.slane %v10078_v52, 5  ;;  %v5392_v13 = vor.u32 %v5391_v40, %v10072_v3  ;;  %v5382_v17 = vor.u32 %v5381_v6, %v10020_v11  ;;  %v4133_v48 = vrot.slane %v3910_v43, 5 }
 0x27c   : > { %4715 = vrot.lane.b32.xlu0 %v4539_v0, %s8103_s8  ;;  %v6240_v0 = vrot.slane %v6238_v33, 4  ;;  %v4132_v37 = vrot.slane %v4130_v5, 4 }
 0x27d   : > { %v3647_v18 = vpop.permute.xlu1 %3646  ;;  %v5393_v12 = vrot.slane %v5392_v13, 4  ;;  %v4135_v54 = vrot.slane %v4133_v48, 4  ;;  %v5399_v13 = vshrl.u32 %v10081_v63, 16 }
 0x27e   : > { %3828 = vst.msk [vmem:[#allocation3 + $0xe8] sm:$0xf] %vm3798_vm10, %v3647_v18  ;;  %v3645_v9 = vpop.permute.xlu0 %3644  ;;  %v5053_v18 = vrot.slane %v5052_v60, 4  ;;  %v6242_v55 = vsel %vm8829_vm7, %v6240_v0, %v6241_v16  ;;  %v4965_v60 = vld [vmem:[#allocation2 + $0xc4] sm:$0xf] }
 0x27f   : > { %3827 = vst.msk [vmem:[#allocation3 + $0xe0] sm:$0xf] %vm3798_vm10, %v3645_v9  ;;  %5705 = vrot.lane.b32.xlu1 %v5038_v8, %s8104_s9  ;;  %v5395_v9 = vshll.u32 %v10081_v63, 16  ;;  %v5987_v0 = vld [vmem:[#allocation2 + $0x3c] sm:$0xf]  ;;  %v5409_v5 = vshrl.u32 %v4965_v60, 16 }
 0x280   : > { %5703 = vrot.lane.b32.xlu0 %v5028_v20, %s8104_s9  ;;  %v10092_v20 = vrot.slane %v5055_v47, 5  ;;  %6442 = vst.msk [vmem:[#allocation3 + $0x13c] sm:$0xf] %vm465_vm0, %v6242_v55  ;;  %v5059_v47 = vshrl.u32 %v10048_v36, 16  ;;  %v4134_v55 = vsel %vm8829_vm7, %v4132_v37, %v4133_v48  ;;  %v5401_v48 = vrot.slane %v5399_v13, 4 }
 0x281   : > { %v3651_v28 = vpop.permute.xlu1 %3650  ;;  %v10109_v14 = vrot.slane %v5395_v9, 5 }
 0x282   : > { %3830 = vst.msk [vmem:[#allocation3 + $0xf8] sm:$0xf] %vm3798_vm10, %v3651_v28  ;;  %v3649_v31 = vpop.permute.xlu0 %3648  ;;  %v3876_v28 = vld [vmem:[#allocation2 + $0x2c] sm:$0xf]  ;;  %v5058_v32 = vsel %vm8213_vm3, %v5053_v18, %v10092_v20  ;;  %v6141_v18 = vrot.slane %v6139_v26, 4 }
 0x283   : > { %3829 = vst.msk [vmem:[#allocation3 + $0xf0] sm:$0xf] %vm3798_vm10, %v3649_v31  ;;  %5773 = vrot.lane.b32.xlu1 %v5378_v19, %s8104_s9  ;;  %v5043_v19 = vrot.slane %v5042_v2, 4  ;;  %v4031_v11 = vrot.slane %v3876_v28, 5  ;;  %v5398_v23 = vsel %vm8213_vm3, %v5393_v12, %v10109_v14  ;;  %v10148_v2 = vld [vmem:[#allocation2 + $0x40] sm:$0xf] }
 0x284   : > { %5771 = vrot.lane.b32.xlu0 %v5368_v30, %s8104_s9  ;;  %v5075_v63 = vshll.u32 %v10148_v2, 16  ;;  %v5411_v12 = vrot.slane %v5409_v5, 4 }
 0x285   : > { %v3655_v49 = vpop.permute.xlu1 %3654  ;;  %v5048_v24 = vsel %vm8213_vm3, %v5043_v19, %v10050_v41  ;;  %v4033_v21 = vrot.slane %v4031_v11, 4  ;;  %v4034_v41 = vrot.slane %v10114_v59, 5  ;;  %v4032_v40 = vsel %vm8829_vm7, %v4030_v35, %v4031_v11  ;;  %v6021_v19 = vld [vmem:[#allocation2 + $0xc4] sm:$0xf] }
 0x286   : > { %3832 = vst.msk [vmem:[#allocation3 + $0x108] sm:$0xf] %vm3798_vm10, %v3655_v49  ;;  %v3653_v56 = vpop.permute.xlu0 %3652  ;;  %v4931_v49 = vld [vmem:[#allocation2 + $0x3c] sm:$0xf] }
 0x287   : > { %3831 = vst.msk [vmem:[#allocation3 + $0x100] sm:$0xf] %vm3798_vm10, %v3653_v56  ;;  %4300 = vrot.lane.b32.xlu1 %v4131_v4, %s8102_s25  ;;  %v5383_v4 = vrot.slane %v5382_v17, 4  ;;  %v10129_v56 = vld [vmem:[#allocation2 + $0xb8] sm:$0xf]  ;;  %v5065_v15 = vshll.u32 %v4931_v49, 16 }
 0x288   : > { %4298 = vrot.lane.b32.xlu0 %v4128_v50, %s8102_s25  ;;  %v5069_v33 = vshrl.u32 %v4931_v49, 16  ;;  %v4136_v1 = vrot.slane %v10129_v56, 5 }
 0x289   : > { %v3659_v46 = vpop.permute.xlu1 %3658  ;;  %v5388_v39 = vsel %vm8213_vm3, %v5383_v4, %v10072_v3  ;;  %v10150_v6 = vrot.slane %v5065_v15, 5 }
 0x28a   : > { %3834 = vst.msk [vmem:[#allocation3 + $0x118] sm:$0xf] %vm3798_vm10, %v3659_v46  ;;  %v3657_v8 = vpop.permute.xlu0 %3656  ;;  %v5071_v36 = vrot.slane %v5069_v33, 4  ;;  %v4137_v62 = vsel %vm8829_vm7, %v4135_v54, %v4136_v1 }
 0x28b   : > { %3833 = vst.msk [vmem:[#allocation3 + $0x110] sm:$0xf] %vm3798_vm10, %v3657_v8  ;;  %4653 = vrot.lane.b32.xlu1 %v4508_v22, %s8103_s8  ;;  %v4035_v22 = vsel %vm8829_vm7, %v4033_v21, %v4034_v41  ;;  %v5405_v8 = vshll.u32 %v4965_v60, 16  ;;  %v10185_v21 = vld [vmem:[#allocation2 + $0xc8] sm:$0xf]  ;;  %v5402_v60 = vor.u32 %v5401_v48, %v10109_v14 }
 0x28c   : > { %4651 = vrot.lane.b32.xlu0 %v4507_v58, %s8103_s8  ;;  %v6142_v58 = vrot.slane %v5987_v0, 5  ;;  %v5072_v26 = vor.u32 %v5071_v36, %v10150_v6 }
 0x28d   : > { %v3663_v7 = vpop.permute.xlu1 %3662  ;;  %v5403_v36 = vrot.slane %v5402_v60, 4 }
 0x28e   : > { %3836 = vst.msk [vmem:[#allocation3 + $0x128] sm:$0xf] %vm3798_vm10, %v3663_v7  ;;  %v3661_v30 = vpop.permute.xlu0 %3660  ;;  %v5061_v7 = vrot.slane %v5059_v47, 4  ;;  %v6143_v28 = vsel %vm8829_vm7, %v6141_v18, %v6142_v58  ;;  %v5073_v52 = vrot.slane %v5072_v26, 4  ;;  %v3878_v47 = vld [vmem:[#allocation2 + $0x34] sm:$0xf] }
 0x28f   : > { %3835 = vst.msk [vmem:[#allocation3 + $0x120] sm:$0xf] %vm3798_vm10, %v3661_v30  ;;  %4721 = vrot.lane.b32.xlu1 %v4542_v34, %s8103_s8  ;;  %v6144_v34 = vrot.slane %v6142_v58, 4  ;;  %v6244_v30 = vrot.slane %v6021_v19, 5  ;;  %v4037_v14 = vrot.slane %v3878_v47, 5  ;;  %v4036_v19 = vrot.slane %v4034_v41, 4 }
 0x290   : > { %4719 = vrot.lane.b32.xlu0 %v4541_v27, %s8103_s8  ;;  %v6145_v27 = vrot.slane %v10157_v10, 5  ;;  %6409 = vst.msk [vmem:[#allocation3 + $0x34] sm:$0xf] %vm465_vm0, %v6143_v28  ;;  %v4512_v10 = vld [vmem:[#allocation2 + $0x44] sm:$0xf] }
 0x291   : > { %v3667_v31 = vpop.permute.xlu1 %3666  ;;  %v6246_v4 = vrot.slane %v6244_v30, 4 }
 0x292   : > { %3838 = vst.msk [vmem:[#allocation3 + $0x138] sm:$0xf] %vm3798_vm10, %v3667_v31  ;;  %v3665_v38 = vpop.permute.xlu0 %3664  ;;  %v6146_v11 = vsel %vm8829_vm7, %v6144_v34, %v6145_v27  ;;  %v10180_v31 = vld [vmem:[#allocation2 + $0xc8] sm:$0xf]  ;;  %v4039_v34 = vrot.slane %v4037_v14, 4 }
 0x293   : > { %3837 = vst.msk [vmem:[#allocation3 + $0x130] sm:$0xf] %vm3798_vm10, %v3665_v38  ;;  %5709 = vrot.lane.b32.xlu1 %v5058_v32, %s8104_s9  ;;  %v10172_v32 = vrot.slane %v5405_v8, 5  ;;  %v4509_v38 = vld [vmem:[#allocation2 + $0x38] sm:$0xf] }
 0x294   : > { %5707 = vrot.lane.b32.xlu0 %v5048_v24, %s8104_s9  ;;  %v6243_v24 = vrot.slane %v6241_v16, 4  ;;  %6410 = vst.msk [vmem:[#allocation3 + $0x3c] sm:$0xf] %vm465_vm0, %v6146_v11  ;;  %v4544_v16 = vld [vmem:[#allocation2 + $0xc4] sm:$0xf]  ;;  %v4038_v11 = vsel %vm8829_vm7, %v4036_v19, %v4037_v14 }
 0x295   : > { %v3671_v50 = vpop.permute.xlu1 %3670  ;;  %v5412_v35 = vor.u32 %v5411_v12, %v10172_v32  ;;  %v10218_v8 = vld [vmem:[#allocation2 + $0x38] sm:$0xf] }
 0x296   : > { %3840 = vst.msk [vmem:[#allocation3 + $0x148] sm:$0xf] %vm3798_vm10, %v3671_v50  ;;  %v3669_v57 = vpop.permute.xlu0 %3668  ;;  %v6245_v50 = vsel %vm8829_vm7, %v6243_v24, %v6244_v30  ;;  %v4138_v24 = vrot.slane %v4136_v1, 4 }
 0x297   : > { %3839 = vst.msk [vmem:[#allocation3 + $0x140] sm:$0xf] %vm3798_vm10, %v3669_v57  ;;  %5777 = vrot.lane.b32.xlu1 %v5398_v23, %s8104_s9  ;;  %v5062_v23 = vor.u32 %v5061_v7, %v10092_v20  ;;  %v10196_v20 = vrot.slane %v5075_v63, 5  ;;  %v5415_v57 = vshll.u32 %v10185_v21, 16  ;;  %v5413_v37 = vrot.slane %v5412_v35, 4 }
 0x298   : > { %5775 = vrot.lane.b32.xlu0 %v5388_v39, %s8104_s9  ;;  %v6247_v39 = vrot.slane %v10180_v31, 5  ;;  %6443 = vst.msk [vmem:[#allocation3 + $0x144] sm:$0xf] %vm465_vm0, %v6245_v50  ;;  %v5408_v7 = vsel %vm8213_vm3, %v5403_v36, %v10172_v32  ;;  %v4967_v63 = vld [vmem:[#allocation2 + $0xcc] sm:$0xf]  ;;  %v5079_v32 = vshrl.u32 %v10148_v2, 16 }
 0x299   : > { %v3675_v3 = vpop.permute.xlu1 %3674  ;;  %v5063_v54 = vrot.slane %v5062_v23, 4  ;;  %v10213_v0 = vrot.slane %v5415_v57, 5  ;;  %v10252_v23 = vld [vmem:[#allocation2 + $0x48] sm:$0xf]  ;;  %v5429_v1 = vshrl.u32 %v4967_v63, 16  ;;  %v5419_v35 = vshrl.u32 %v10185_v21, 16 }
 0x29a   : > { %3842 = vst.msk [vmem:[#allocation3 + $0x158] sm:$0xf] %vm3798_vm10, %v3675_v3  ;;  %v3673_v46 = vpop.permute.xlu0 %3672  ;;  %v6248_v15 = vsel %vm8829_vm7, %v6246_v4, %v6247_v39  ;;  %v5989_v4 = vld [vmem:[#allocation2 + $0x44] sm:$0xf]  ;;  %v10261_v50 = vld [vmem:[#allocation2 + $0x48] sm:$0xf] }
 0x29b   : > { %3841 = vst.msk [vmem:[#allocation3 + $0x150] sm:$0xf] %vm3798_vm10, %v3673_v46  ;;  %4236 = vrot.lane.b32.xlu1 %v4035_v22, %s8102_s25  ;;  %v4543_v22 = vld [vmem:[#allocation2 + $0xc0] sm:$0xf]  ;;  %v5068_v58 = vsel %vm8213_vm3, %v5063_v54, %v10150_v6  ;;  %v5418_v18 = vsel %vm8213_vm3, %v5413_v37, %v10213_v0  ;;  %v4040_v6 = vrot.slane %v10218_v8, 5  ;;  %v5095_v21 = vshll.u32 %v10252_v23, 16 }
 0x29c   : > { %4234 = vrot.lane.b32.xlu0 %v4032_v40, %s8102_s25  ;;  %6444 = vst.msk [vmem:[#allocation3 + $0x14c] sm:$0xf] %vm465_vm0, %v6248_v15  ;;  %v5078_v40 = vsel %vm8213_vm3, %v5073_v52, %v10196_v20  ;;  %v6147_v52 = vrot.slane %v6145_v27, 4  ;;  %v6023_v54 = vld [vmem:[#allocation2 + $0xcc] sm:$0xf]  ;;  %v5431_v37 = vrot.slane %v5429_v1, 4 }
 0x29d   : > { %v3679_v9 = vpop.permute.xlu1 %3678  ;;  %v4041_v26 = vsel %vm8829_vm7, %v4039_v34, %v4040_v6  ;;  %v10289_v34 = vld [vmem:[#allocation2 + $0xd0] sm:$0xf] }
 0x29e   : > { %3844 = vst.msk [vmem:[#allocation3 + $0x168] sm:$0xf] %vm3798_vm10, %v3679_v9  ;;  %v3677_v17 = vpop.permute.xlu0 %3676  ;;  %v4933_v9 = vld [vmem:[#allocation2 + $0x44] sm:$0xf] }
 0x29f   : > { %3843 = vst.msk [vmem:[#allocation3 + $0x160] sm:$0xf] %vm3798_vm10, %v3677_v17  ;;  %4304 = vrot.lane.b32.xlu1 %v4137_v62, %s8102_s25  ;;  %v3912_v62 = vld [vmem:[#allocation2 + $0xbc] sm:$0xf]  ;;  %v10233_v17 = vld [vmem:[#allocation2 + $0xc0] sm:$0xf] }
 0x2a0   : > { %4302 = vrot.lane.b32.xlu0 %v4134_v55, %s8102_s25  ;;  %v4139_v13 = vrot.slane %v3912_v62, 5  ;;  %v5085_v30 = vshll.u32 %v4933_v9, 16  ;;  %v4142_v41 = vrot.slane %v10233_v17, 5 }
 0x2a1   : > { %v3683_v43 = vpop.permute.xlu1 %3682 }
 0x2a2   : > { %3846 = vst.msk [vmem:[#allocation3 + $0x178] sm:$0xf] %vm3798_vm10, %v3683_v43  ;;  %v3681_v49 = vpop.permute.xlu0 %3680  ;;  %v4141_v59 = vrot.slane %v4139_v13, 4  ;;  %v10254_v48 = vrot.slane %v5085_v30, 5  ;;  %v4140_v15 = vsel %vm8829_vm7, %v4138_v24, %v4139_v13  ;;  %v5421_v13 = vrot.slane %v5419_v35, 4 }
 0x2a3   : > { %3845 = vst.msk [vmem:[#allocation3 + $0x170] sm:$0xf] %vm3798_vm10, %v3681_v49  ;;  %4657 = vrot.lane.b32.xlu1 %v4510_v44, %s8103_s8  ;;  %v5089_v44 = vshrl.u32 %v4933_v9, 16  ;;  %v5425_v49 = vshll.u32 %v4967_v63, 16 }
 0x2a4   : > { %4655 = vrot.lane.b32.xlu0 %v4509_v38, %s8103_s8  ;;  %v6148_v38 = vrot.slane %v5989_v4, 5  ;;  %v4143_v56 = vsel %vm8829_vm7, %v4141_v59, %v4142_v41  ;;  %v5422_v63 = vor.u32 %v5421_v13, %v10213_v0 }
 0x2a5   : > { %v3687_v33 = vpop.permute.xlu1 %3686  ;;  %v5091_v2 = vrot.slane %v5089_v44, 4 }
 0x2a6   : > { %3848 = vst.msk [vmem:[#allocation3 + $0x188] sm:$0xf] %vm3798_vm10, %v3687_v33  ;;  %v3685_v3 = vpop.permute.xlu0 %3684  ;;  %v5081_v33 = vrot.slane %v5079_v32, 4  ;;  %v6149_v47 = vsel %vm8829_vm7, %v6147_v52, %v6148_v38  ;;  %v3880_v32 = vld [vmem:[#allocation2 + $0x3c] sm:$0xf] }
 0x2a7   : > { %3847 = vst.msk [vmem:[#allocation3 + $0x180] sm:$0xf] %vm3798_vm10, %v3685_v3  ;;  %4725 = vrot.lane.b32.xlu1 %v4544_v16, %s8103_s8  ;;  %v6150_v16 = vrot.slane %v6148_v38, 4  ;;  %v6250_v3 = vrot.slane %v6023_v54, 5  ;;  %v5092_v27 = vor.u32 %v5091_v2, %v10254_v48  ;;  %v4043_v0 = vrot.slane %v3880_v32, 5 }
 0x2a8   : > { %4723 = vrot.lane.b32.xlu0 %v4543_v22, %s8103_s8  ;;  %v6151_v22 = vrot.slane %v10261_v50, 5  ;;  %6411 = vst.msk [vmem:[#allocation3 + $0x44] sm:$0xf] %vm465_vm0, %v6149_v47  ;;  %v5423_v2 = vrot.slane %v5422_v63, 4  ;;  %v4042_v54 = vrot.slane %v4040_v6, 4 }
 0x2a9   : > { %v3691_v46 = vpop.permute.xlu1 %3690  ;;  %v6252_v36 = vrot.slane %v6250_v3, 4  ;;  %v5093_v31 = vrot.slane %v5092_v27, 4  ;;  %v4514_v50 = vld [vmem:[#allocation2 + $0x4c] sm:$0xf] }
 0x2aa   : > { %3850 = vst.msk [vmem:[#allocation3 + $0x198] sm:$0xf] %vm3798_vm10, %v3691_v46  ;;  %v3689_v5 = vpop.permute.xlu0 %3688  ;;  %v6152_v14 = vsel %vm8829_vm7, %v6150_v16, %v6151_v22  ;;  %v10284_v46 = vld [vmem:[#allocation2 + $0xd0] sm:$0xf]  ;;  %v4045_v16 = vrot.slane %v4043_v0, 4 }
 0x2ab   : > { %3849 = vst.msk [vmem:[#allocation3 + $0x190] sm:$0xf] %vm3798_vm10, %v3689_v5  ;;  %5713 = vrot.lane.b32.xlu1 %v5078_v40, %s8104_s9  ;;  %v10276_v40 = vrot.slane %v5425_v49, 5  ;;  %v4511_v5 = vld [vmem:[#allocation2 + $0x40] sm:$0xf] }
 0x2ac   : > { %5711 = vrot.lane.b32.xlu0 %v5068_v58, %s8104_s9  ;;  %v6249_v58 = vrot.slane %v6247_v39, 4  ;;  %6412 = vst.msk [vmem:[#allocation3 + $0x4c] sm:$0xf] %vm465_vm0, %v6152_v14  ;;  %v4546_v39 = vld [vmem:[#allocation2 + $0xcc] sm:$0xf]  ;;  %v4044_v14 = vsel %vm8829_vm7, %v4042_v54, %v4043_v0 }
 0x2ad   : > { %v3695_v55 = vpop.permute.xlu1 %3694  ;;  %v5432_v19 = vor.u32 %v5431_v37, %v10276_v40  ;;  %v10322_v49 = vld [vmem:[#allocation2 + $0x40] sm:$0xf] }
 0x2ae   : > { %3852 = vst.msk [vmem:[#allocation3 + $0x1a8] sm:$0xf] %vm3798_vm10, %v3695_v55  ;;  %v3693_v28 = vpop.permute.xlu0 %3692  ;;  %v6251_v55 = vsel %vm8829_vm7, %v6249_v58, %v6250_v3  ;;  %v4144_v58 = vrot.slane %v4142_v41, 4 }
 0x2af   : > { %3851 = vst.msk [vmem:[#allocation3 + $0x1a0] sm:$0xf] %vm3798_vm10, %v3693_v28  ;;  %5781 = vrot.lane.b32.xlu1 %v5418_v18, %s8104_s9  ;;  %v5082_v18 = vor.u32 %v5081_v33, %v10196_v20  ;;  %v10300_v20 = vrot.slane %v5095_v21, 5  ;;  %v5435_v28 = vshll.u32 %v10289_v34, 16  ;;  %v5433_v24 = vrot.slane %v5432_v19, 4 }
 0x2b0   : > { %5779 = vrot.lane.b32.xlu0 %v5408_v7, %s8104_s9  ;;  %v6253_v7 = vrot.slane %v10284_v46, 5  ;;  %6445 = vst.msk [vmem:[#allocation3 + $0x154] sm:$0xf] %vm465_vm0, %v6251_v55  ;;  %v5428_v33 = vsel %vm8213_vm3, %v5423_v2, %v10276_v40  ;;  %v4969_v21 = vld [vmem:[#allocation2 + $0xd4] sm:$0xf]  ;;  %v5099_v40 = vshrl.u32 %v10252_v23, 16 }
 0x2b1   : > { %v3699_v12 = vpop.permute.xlu1 %3698  ;;  %v5083_v59 = vrot.slane %v5082_v18, 4  ;;  %v10317_v4 = vrot.slane %v5435_v28, 5  ;;  %v10356_v18 = vld [vmem:[#allocation2 + $0x50] sm:$0xf]  ;;  %v5449_v41 = vshrl.u32 %v4969_v21, 16  ;;  %v5439_v19 = vshrl.u32 %v10289_v34, 16 }
 0x2b2   : > { %3854 = vst.msk [vmem:[#allocation3 + $0x1b8] sm:$0xf] %vm3798_vm10, %v3699_v12  ;;  %v3697_v43 = vpop.permute.xlu0 %3696  ;;  %v6254_v30 = vsel %vm8829_vm7, %v6252_v36, %v6253_v7  ;;  %v5991_v36 = vld [vmem:[#allocation2 + $0x4c] sm:$0xf]  ;;  %v10365_v55 = vld [vmem:[#allocation2 + $0x50] sm:$0xf] }
 0x2b3   : > { %3853 = vst.msk [vmem:[#allocation3 + $0x1b0] sm:$0xf] %vm3798_vm10, %v3697_v43  ;;  %4240 = vrot.lane.b32.xlu1 %v4041_v26, %s8102_s25  ;;  %v4545_v26 = vld [vmem:[#allocation2 + $0xc8] sm:$0xf]  ;;  %v5088_v38 = vsel %vm8213_vm3, %v5083_v59, %v10254_v48  ;;  %v5438_v52 = vsel %vm8213_vm3, %v5433_v24, %v10317_v4  ;;  %v4046_v48 = vrot.slane %v10322_v49, 5  ;;  %v5115_v34 = vshll.u32 %v10356_v18, 16 }
 0x2b4   : > { %4238 = vrot.lane.b32.xlu0 %v4038_v11, %s8102_s25  ;;  %6446 = vst.msk [vmem:[#allocation3 + $0x15c] sm:$0xf] %vm465_vm0, %v6254_v30  ;;  %v5098_v11 = vsel %vm8213_vm3, %v5093_v31, %v10300_v20  ;;  %v6153_v31 = vrot.slane %v6151_v22, 4  ;;  %v6025_v59 = vld [vmem:[#allocation2 + $0xd4] sm:$0xf]  ;;  %v5451_v24 = vrot.slane %v5449_v41, 4 }
 0x2b5   : > { %v3703_v57 = vpop.permute.xlu1 %3702  ;;  %v4047_v27 = vsel %vm8829_vm7, %v4045_v16, %v4046_v48  ;;  %v10393_v16 = vld [vmem:[#allocation2 + $0xd8] sm:$0xf] }
 0x2b6   : > { %3856 = vst.msk [vmem:[#allocation3 + $0x1c8] sm:$0xf] %vm3798_vm10, %v3703_v57  ;;  %v3701_v60 = vpop.permute.xlu0 %3700  ;;  %v4935_v57 = vld [vmem:[#allocation2 + $0x4c] sm:$0xf] }
 0x2b7   : > { %3855 = vst.msk [vmem:[#allocation3 + $0x1c0] sm:$0xf] %vm3798_vm10, %v3701_v60  ;;  %4308 = vrot.lane.b32.xlu1 %v4143_v56, %s8102_s25  ;;  %v3914_v56 = vld [vmem:[#allocation2 + $0xc4] sm:$0xf]  ;;  %v10337_v60 = vld [vmem:[#allocation2 + $0xc8] sm:$0xf] }
 0x2b8   : > { %4306 = vrot.lane.b32.xlu0 %v4140_v15, %s8102_s25  ;;  %v4145_v35 = vrot.slane %v3914_v56, 5  ;;  %v5105_v3 = vshll.u32 %v4935_v57, 16  ;;  %v4148_v6 = vrot.slane %v10337_v60, 5 }
 0x2b9   : > { %v3707_v62 = vpop.permute.xlu1 %3706 }
 0x2ba   : > { %3858 = vst.msk [vmem:[#allocation3 + $0x1d8] sm:$0xf] %vm3798_vm10, %v3707_v62  ;;  %v3705_v9 = vpop.permute.xlu0 %3704  ;;  %v4147_v8 = vrot.slane %v4145_v35, 4  ;;  %v10358_v13 = vrot.slane %v5105_v3, 5  ;;  %v4146_v30 = vsel %vm8829_vm7, %v4144_v58, %v4145_v35  ;;  %v5441_v35 = vrot.slane %v5439_v19, 4 }
 0x2bb   : > { %3857 = vst.msk [vmem:[#allocation3 + $0x1d0] sm:$0xf] %vm3798_vm10, %v3705_v9  ;;  %4661 = vrot.lane.b32.xlu1 %v4512_v10, %s8103_s8  ;;  %v5109_v10 = vshrl.u32 %v4935_v57, 16  ;;  %v5445_v9 = vshll.u32 %v4969_v21, 16 }
 0x2bc   : > { %4659 = vrot.lane.b32.xlu0 %v4511_v5, %s8103_s8  ;;  %v6154_v5 = vrot.slane %v5991_v36, 5  ;;  %v4149_v17 = vsel %vm8829_vm7, %v4147_v8, %v4148_v6  ;;  %v5442_v21 = vor.u32 %v5441_v35, %v10317_v4 }
 0x2bd   : > { %v3711_v44 = vpop.permute.xlu1 %3710  ;;  %v5111_v23 = vrot.slane %v5109_v10, 4 }
 0x2be   : > { %3860 = vst.msk [vmem:[#allocation3 + $0x1e8] sm:$0xf] %vm3798_vm10, %v3711_v44  ;;  %v3709_v12 = vpop.permute.xlu0 %3708  ;;  %v5101_v44 = vrot.slane %v5099_v40, 4  ;;  %v6155_v32 = vsel %vm8829_vm7, %v6153_v31, %v6154_v5  ;;  %v3882_v40 = vld [vmem:[#allocation2 + $0x44] sm:$0xf] }
 0x2bf   : > { %3859 = vst.msk [vmem:[#allocation3 + $0x1e0] sm:$0xf] %vm3798_vm10, %v3709_v12  ;;  %4729 = vrot.lane.b32.xlu1 %v4546_v39, %s8103_s8  ;;  %v6156_v39 = vrot.slane %v6154_v5, 4  ;;  %v6256_v12 = vrot.slane %v6025_v59, 5  ;;  %v5112_v22 = vor.u32 %v5111_v23, %v10358_v13  ;;  %v4049_v4 = vrot.slane %v3882_v40, 5 }
 0x2c0   : > { %4727 = vrot.lane.b32.xlu0 %v4545_v26, %s8103_s8  ;;  %v6157_v26 = vrot.slane %v10365_v55, 5  ;;  %6413 = vst.msk [vmem:[#allocation3 + $0x54] sm:$0xf] %vm465_vm0, %v6155_v32  ;;  %v4516_v55 = vld [vmem:[#allocation2 + $0x54] sm:$0xf] }
 0x2c1   : > { %v3715_v43 = vpop.permute.xlu1 %3714  ;;  %v6258_v2 = vrot.slane %v6256_v12, 4  ;;  %v5113_v46 = vrot.slane %v5112_v22, 4  ;;  %v4051_v19 = vrot.slane %v4049_v4, 4 }
 0x2c2   : > { %3862 = vst.msk [vmem:[#allocation3 + $0x1f8] sm:$0xf] %vm3798_vm10, %v3715_v43  ;;  %v3713_v1 = vpop.permute.xlu0 %3712  ;;  %v6158_v0 = vsel %vm8829_vm7, %v6156_v39, %v6157_v26  ;;  %v10388_v43 = vld [vmem:[#allocation2 + $0xd8] sm:$0xf] }
 0x2c3   : > { %3861 = vst.msk [vmem:[#allocation3 + $0x1f0] sm:$0xf] %vm3798_vm10, %v3713_v1  ;;  %5717 = vrot.lane.b32.xlu1 %v5098_v11, %s8104_s9  ;;  %v10380_v11 = vrot.slane %v5445_v9, 5  ;;  %v4513_v1 = vld [vmem:[#allocation2 + $0x48] sm:$0xf]  ;;  %v5443_v9 = vrot.slane %v5442_v21, 4 }
 0x2c4   : > { %5715 = vrot.lane.b32.xlu0 %v5088_v38, %s8104_s9  ;;  %v6255_v38 = vrot.slane %v6253_v7, 4  ;;  %6414 = vst.msk [vmem:[#allocation3 + $0x5c] sm:$0xf] %vm465_vm0, %v6158_v0  ;;  %v4548_v7 = vld [vmem:[#allocation2 + $0xd4] sm:$0xf]  ;;  %v4150_v0 = vrot.slane %v4148_v6, 4 }
 0x2c5   : > { %v3719_v15 = vpop.permute.xlu1 %3718  ;;  %v5452_v54 = vor.u32 %v5451_v24, %v10380_v11  ;;  %v5448_v59 = vsel %vm8213_vm3, %v5443_v9, %v10380_v11 }
 0x2c6   : > { %3864 = vst.msk [vmem:[#allocation3 + $0x208] sm:$0xf] %vm3798_vm10, %v3719_v15  ;;  %v3717_v47 = vpop.permute.xlu0 %3716  ;;  %v6257_v15 = vsel %vm8829_vm7, %v6255_v38, %v6256_v12  ;;  %v4971_v38 = vld [vmem:[#allocation2 + $0xdc] sm:$0xf] }
 0x2c7   : > { %3863 = vst.msk [vmem:[#allocation3 + $0x200] sm:$0xf] %vm3798_vm10, %v3717_v47  ;;  %5785 = vrot.lane.b32.xlu1 %v5438_v52, %s8104_s9  ;;  %v5102_v52 = vor.u32 %v5101_v44, %v10300_v20  ;;  %v10404_v20 = vrot.slane %v5115_v34, 5  ;;  %v5455_v47 = vshll.u32 %v10393_v16, 16  ;;  %v5453_v58 = vrot.slane %v5452_v54, 4 }
 0x2c8   : > { %5783 = vrot.lane.b32.xlu0 %v5428_v33, %s8104_s9  ;;  %v6259_v33 = vrot.slane %v10388_v43, 5  ;;  %6447 = vst.msk [vmem:[#allocation3 + $0x164] sm:$0xf] %vm465_vm0, %v6257_v15  ;;  %v5465_v6 = vshll.u32 %v4971_v38, 16  ;;  %v10469_v15 = vld [vmem:[#allocation2 + $0x58] sm:$0xf] }
 0x2c9   : > { %v3723_v37 = vpop.permute.xlu1 %3722  ;;  %v5103_v8 = vrot.slane %v5102_v52, 4  ;;  %v10421_v36 = vrot.slane %v5455_v47, 5  ;;  %v10464_v52 = vld [vmem:[#allocation2 + $0x58] sm:$0xf]  ;;  %v5459_v54 = vshrl.u32 %v10393_v16, 16 }
 0x2ca   : > { %3866 = vst.msk [vmem:[#allocation3 + $0x218] sm:$0xf] %vm3798_vm10, %v3723_v37  ;;  %v3721_v62 = vpop.permute.xlu0 %3720  ;;  %v6260_v3 = vsel %vm8829_vm7, %v6258_v2, %v6259_v33  ;;  %v5993_v2 = vld [vmem:[#allocation2 + $0x54] sm:$0xf]  ;;  %v5135_v16 = vshll.u32 %v10464_v52, 16 }
 0x2cb   : > { %3865 = vst.msk [vmem:[#allocation3 + $0x210] sm:$0xf] %vm3798_vm10, %v3721_v62  ;;  %4244 = vrot.lane.b32.xlu1 %v4047_v27, %s8102_s25  ;;  %v4547_v27 = vld [vmem:[#allocation2 + $0xd0] sm:$0xf]  ;;  %v3916_v62 = vld [vmem:[#allocation2 + $0xcc] sm:$0xf]  ;;  %v5108_v23 = vsel %vm8213_vm3, %v5103_v8, %v10358_v13  ;;  %v5458_v39 = vsel %vm8213_vm3, %v5453_v58, %v10421_v36 }
 0x2cc   : > { %4242 = vrot.lane.b32.xlu0 %v4044_v14, %s8102_s25  ;;  %6448 = vst.msk [vmem:[#allocation3 + $0x16c] sm:$0xf] %vm465_vm0, %v6260_v3  ;;  %v5118_v14 = vsel %vm8213_vm3, %v5113_v46, %v10404_v20  ;;  %v4151_v31 = vrot.slane %v3916_v62, 5  ;;  %v6159_v46 = vrot.slane %v6157_v26, 4  ;;  %v6027_v8 = vld [vmem:[#allocation2 + $0xdc] sm:$0xf] }
 0x2cd   : > { %v3727_v28 = vpop.permute.xlu1 %3726  ;;  %v10486_v58 = vrot.slane %v5465_v6, 5 }
 0x2ce   : > { %3868 = vst.msk [vmem:[#allocation3 + $0x228] sm:$0xf] %vm3798_vm10, %v3727_v28  ;;  %v3725_v63 = vpop.permute.xlu0 %3724  ;;  %v10436_v28 = vld [vmem:[#allocation2 + $0xd0] sm:$0xf]  ;;  %v4153_v12 = vrot.slane %v4151_v31, 4  ;;  %v4152_v3 = vsel %vm8829_vm7, %v4150_v0, %v4151_v31  ;;  %v5461_v31 = vrot.slane %v5459_v54, 4 }
 0x2cf   : > { %3867 = vst.msk [vmem:[#allocation3 + $0x220] sm:$0xf] %vm3798_vm10, %v3725_v63  ;;  %4312 = vrot.lane.b32.xlu1 %v4149_v17, %s8102_s25  ;;  %v10426_v17 = vld [vmem:[#allocation2 + $0x48] sm:$0xf]  ;;  %v4048_v63 = vrot.slane %v4046_v48, 4  ;;  %v5119_v48 = vshrl.u32 %v10356_v18, 16 }
 0x2d0   : > { %4310 = vrot.lane.b32.xlu0 %v4146_v30, %s8102_s25  ;;  %v4052_v13 = vrot.slane %v10426_v17, 5  ;;  %v4937_v30 = vld [vmem:[#allocation2 + $0x54] sm:$0xf] }
 0x2d1   : > { %v4225_v56 = vpop.permute.xlu1 %4224  ;;  %v5125_v22 = vshll.u32 %v4937_v30, 16  ;;  %v5129_v34 = vshrl.u32 %v4937_v30, 16  ;;  %v4050_v24 = vsel %vm8829_vm7, %v4048_v63, %v4049_v4 }
 0x2d2   : > { %4434 = vst.msk [vmem:[#allocation3 + $0x8] sm:$0xf] %vm4432_vm11, %v4225_v56  ;;  %v4223_v57 = vpop.permute.xlu0 %4222  ;;  %v4053_v49 = vsel %vm8829_vm7, %v4051_v19, %v4052_v13 }
 0x2d3   : > { %4433 = vst.msk [vmem:[#allocation3] sm:$0xf] %vm4432_vm11, %v4223_v57  ;;  %4665 = vrot.lane.b32.xlu1 %v4514_v50, %s8103_s8  ;;  %v4154_v50 = vrot.slane %v10436_v28, 5  ;;  %v10466_v35 = vrot.slane %v5125_v22, 5  ;;  %v5131_v60 = vrot.slane %v5129_v34, 4  ;;  %v5469_v57 = vshrl.u32 %v4971_v38, 16 }
 0x2d4   : > { %4663 = vrot.lane.b32.xlu0 %v4513_v1, %s8103_s8  ;;  %v6160_v1 = vrot.slane %v5993_v2, 5 }
 0x2d5   : > { %v4229_v10 = vpop.permute.xlu1 %4228  ;;  %v4155_v18 = vsel %vm8829_vm7, %v4153_v12, %v4154_v50  ;;  %v5132_v26 = vor.u32 %v5131_v60, %v10466_v35  ;;  %v5471_v4 = vrot.slane %v5469_v57, 4 }
 0x2d6   : > { %4436 = vst.msk [vmem:[#allocation3 + $0x18] sm:$0xf] %vm4432_vm11, %v4229_v10  ;;  %v4227_v37 = vpop.permute.xlu0 %4226  ;;  %v5121_v10 = vrot.slane %v5119_v48, 4  ;;  %v6161_v40 = vsel %vm8829_vm7, %v6159_v46, %v6160_v1  ;;  %v10531_v46 = vld [vmem:[#allocation2 + $0x50] sm:$0xf] }
 0x2d7   : > { %4435 = vst.msk [vmem:[#allocation3 + $0x10] sm:$0xf] %vm4432_vm11, %v4227_v37  ;;  %4733 = vrot.lane.b32.xlu1 %v4548_v7, %s8103_s8  ;;  %v6162_v7 = vrot.slane %v6160_v1, 4  ;;  %v6262_v37 = vrot.slane %v6027_v8, 5  ;;  %v5133_v63 = vrot.slane %v5132_v26, 4 }
 0x2d8   : > { %4731 = vrot.lane.b32.xlu0 %v4547_v27, %s8103_s8  ;;  %v6163_v27 = vrot.slane %v10469_v15, 5  ;;  %6415 = vst.msk [vmem:[#allocation3 + $0x64] sm:$0xf] %vm465_vm0, %v6161_v40  ;;  %v5122_v9 = vor.u32 %v5121_v10, %v10404_v20  ;;  %v4550_v20 = vld [vmem:[#allocation2 + $0xdc] sm:$0xf] }
 0x2d9   : > { %v4233_v5 = vpop.permute.xlu1 %4232  ;;  %v6264_v43 = vrot.slane %v6262_v37, 4  ;;  %v10541_v10 = vld [vmem:[#allocation2 + $0xd8] sm:$0xf]  ;;  %v4939_v8 = vld [vmem:[#allocation2 + $0x5c] sm:$0xf] }
 0x2da   : > { %4438 = vst.msk [vmem:[#allocation3 + $0x28] sm:$0xf] %vm4432_vm11, %v4233_v5  ;;  %v4231_v41 = vpop.permute.xlu0 %4230  ;;  %v6164_v62 = vsel %vm8829_vm7, %v6162_v7, %v6163_v27  ;;  %v6261_v5 = vrot.slane %v6259_v33, 4  ;;  %v10505_v33 = vrot.slane %v5135_v16, 5  ;;  %v5123_v48 = vrot.slane %v5122_v9, 4 }
 0x2db   : > { %4437 = vst.msk [vmem:[#allocation3 + $0x20] sm:$0xf] %vm4432_vm11, %v4231_v41  ;;  %5721 = vrot.lane.b32.xlu1 %v5118_v14, %s8104_s9  ;;  %v4515_v14 = vld [vmem:[#allocation2 + $0x50] sm:$0xf]  ;;  %v10495_v41 = vld [vmem:[#allocation2 + $0xe0] sm:$0xf] }
 0x2dc   : > { %5719 = vrot.lane.b32.xlu0 %v5108_v23, %s8104_s9  ;;  %6416 = vst.msk [vmem:[#allocation3 + $0x6c] sm:$0xf] %vm465_vm0, %v6164_v62  ;;  %v5475_v12 = vshll.u32 %v10495_v41, 16  ;;  %v5128_v6 = vsel %vm8213_vm3, %v5123_v48, %v10466_v35  ;;  %v4058_v35 = vrot.slane %v10531_v46, 5  ;;  %v4160_v16 = vrot.slane %v10541_v10, 5 }
 0x2dd   : > { %v4646_v44 = vpop.permute.xlu1 %4645  ;;  %v5139_v62 = vshrl.u32 %v10464_v52, 16  ;;  %v4973_v9 = vld [vmem:[#allocation2 + $0xe4] sm:$0xf] }
 0x2de   : > { %4855 = vst.msk [vmem:[#allocation3 + $0x8] sm:$0xf] %vm4853_vm12, %v4646_v44  ;;  %v4644_v32 = vpop.permute.xlu0 %4643  ;;  %v7999_v44 = vld [vmem:[#allocation3 + $0x4] ss:$8 sps:$4 sm:$0xff]  }
 0x2df   : > { %4854 = vst.msk [vmem:[#allocation3] sm:$0xf] %vm4853_vm12, %v4644_v32  ;;  %5789 = vrot.lane.b32.xlu1 %v5458_v39, %s8104_s9  ;;  %v10498_v39 = vld [vmem:[#allocation2 + $0xe0] sm:$0xf]  ;;  %7893 = vmatprep.mubr.msk.bf16.mxu0 %vm6930_vm14, %v7999_v44  ;;  %v5472_v32 = vor.u32 %v5471_v4, %v10486_v58  ;;  %v5149_v4 = vshrl.u32 %v4939_v8, 16 }
 0x2e0   : > { %5787 = vrot.lane.b32.xlu0 %v5448_v59, %s8104_s9  ;;  %v6263_v59 = vsel %vm8829_vm7, %v6261_v5, %v6262_v37  ;;  %v6265_v22 = vrot.slane %v10498_v39, 5  ;;  %v4054_v37 = vrot.slane %v4052_v13, 4 }
 0x2e1   : > { %v5702_v11 = vpop.permute.xlu1 %5701  ;;  %6449 = vst.msk [vmem:[#allocation3 + $0x174] sm:$0xf] %vm465_vm0, %v6263_v59  ;;  %v5473_v2 = vrot.slane %v5472_v32, 4  ;;  %v10573_v32 = vld [vmem:[#allocation2 + $0x60] sm:$0xf] }
 0x2e2   : > { %5911 = vst.msk [vmem:[#allocation3 + $0x8] sm:$0xf] %vm5909_vm13, %v5702_v11  ;;  %v5700_v56 = vpop.permute.xlu0 %5699  ;;  %v5462_v11 = vor.u32 %v5461_v31, %v10421_v36  ;;  %v6266_v38 = vsel %vm8829_vm7, %v6264_v43, %v6265_v22  ;;  %v5138_v36 = vsel %vm8213_vm3, %v5133_v63, %v10505_v33  ;;  %v5995_v31 = vld [vmem:[#allocation2 + $0x5c] sm:$0xf]  ;;  %v5489_v63 = vshrl.u32 %v4973_v9, 16 }
 0x2e3   : > { %5910 = vst.msk [vmem:[#allocation3] sm:$0xf] %vm5909_vm13, %v5700_v56  ;;  %4248 = vrot.lane.b32.xlu1 %v4053_v49, %s8102_s25  ;;  %v4549_v49 = vld [vmem:[#allocation2 + $0xd8] sm:$0xf]  ;;  %v10526_v56 = vrot.slane %v5475_v12, 5  ;;  %v6166_v44 = vrot.slane %v5995_v31, 5 }
 0x2e4   : > { %4246 = vrot.lane.b32.xlu0 %v4050_v24, %s8102_s25  ;;  %v3884_v24 = vld [vmem:[#allocation2 + $0x4c] sm:$0xf]  ;;  %6450 = vst.msk [vmem:[#allocation3 + $0x17c] sm:$0xf] %vm465_vm0, %v6266_v38  ;;  %v5463_v57 = vrot.slane %v5462_v11, 4  ;;  %v6165_v12 = vrot.slane %v6163_v27, 4 }
 0x2e5   : > { %v4297_v47 = vpop.permute.xlu1 %4296  ;;  %v4055_v1 = vrot.slane %v3884_v24, 5  ;;  %v10580_v24 = vld [vmem:[#allocation2 + $0x60] sm:$0xf]  ;;  %v6169_v38 = vrot.slane %v10573_v32, 5  ;;  %v4518_v27 = vld [vmem:[#allocation2 + $0x5c] sm:$0xf] }
 0x2e6   : > { %4470 = vst.msk [vmem:[#allocation3 + $0x128] sm:$0xf] %vm4432_vm11, %v4297_v47  ;;  %v4295_v21 = vpop.permute.xlu0 %4294  ;;  %v5478_v47 = vsel %vm8213_vm3, %v5473_v2, %v10526_v56  ;;  %v5468_v40 = vsel %vm8213_vm3, %v5463_v57, %v10486_v58  ;;  %v6167_v15 = vsel %vm8829_vm7, %v6165_v12, %v6166_v44  ;;  %v3920_v12 = vld [vmem:[#allocation2 + $0xdc] sm:$0xf] }
 0x2e7   : > { %4469 = vst.msk [vmem:[#allocation3 + $0x120] sm:$0xf] %vm4432_vm11, %v4295_v21  ;;  %4316 = vrot.lane.b32.xlu1 %v4155_v18, %s8102_s25  ;;  %v3918_v18 = vld [vmem:[#allocation2 + $0xd4] sm:$0xf]  ;;  %v4056_v58 = vsel %vm8829_vm7, %v4054_v37, %v4055_v1  ;;  %v10605_v37 = vld [vmem:[#allocation2 + $0xe8] sm:$0xf] }
 0x2e8   : > { %4314 = vrot.lane.b32.xlu0 %v4152_v3, %s8102_s25  ;;  %v4157_v54 = vrot.slane %v3918_v18, 5  ;;  %v4057_v3 = vrot.slane %v4055_v1, 4  ;;  %v8004_v1 = vld [vmem:[#allocation3 + $0x124] ss:$8 sps:$4 sm:$0xff]   ;;  %6417 = vst.msk [vmem:[#allocation3 + $0x74] sm:$0xf] %vm465_vm0, %v6167_v15 }
 0x2e9   : > { %v4650_v23 = vpop.permute.xlu1 %4649  ;;  %7911 = vmatprep.mubr.msk.bf16.mxu1 %vm6930_vm14, %v8004_v1  ;;  %v6271_v39 = vrot.slane %v10605_v37, 5  ;;  %v4060_v15 = vrot.slane %v4058_v35, 4 }
 0x2ea   : > { %4857 = vst.msk [vmem:[#allocation3 + $0x18] sm:$0xf] %vm4853_vm12, %v4650_v23  ;;  %v4648_v19 = vpop.permute.xlu0 %4647  ;;  %v7997_v30 = vld [vmem:[#allocation3] ss:$8 sps:$4 sm:$0xff]   ;;  %v4159_v26 = vrot.slane %v4157_v54, 4  ;;  %v4059_v17 = vsel %vm8829_vm7, %v4057_v3, %v4058_v35  ;;  %v4156_v23 = vrot.slane %v4154_v50, 4 }
 0x2eb   : > { %4856 = vst.msk [vmem:[#allocation3 + $0x10] sm:$0xf] %vm4853_vm12, %v4648_v19  ;;  %4669 = vrot.lane.b32.xlu1 %v4516_v55, %s8103_s8  ;;  %7069 = vmatmul.mubr.bf16.vlgmr.msra.gmra.mxu0 %v7997_v30  ;;  %v8000_v30 = vld [vmem:[#allocation3 + $0x14] ss:$8 sps:$4 sm:$0xff]   ;;  %v5151_v50 = vrot.slane %v5149_v4, 4 }
 0x2ec   : > { %4667 = vrot.lane.b32.xlu0 %v4515_v14, %s8103_s8  ;;  %v5145_v14 = vshll.u32 %v4939_v8, 16  ;;  %v4161_v43 = vsel %vm8829_vm7, %v4159_v26, %v4160_v16  ;;  %7894 = vmatprep.mubr.msk.bf16.mxu0 %vm6930_vm14, %v8000_v30  ;;  %v4158_v11 = vsel %vm8829_vm7, %v4156_v23, %v4157_v54  ;;  %v6029_v54 = vld [vmem:[#allocation2 + $0xe4] sm:$0xf] }
 0x2ed   : > { %v4718_v34 = vpop.permute.xlu1 %4717  ;;  %v6268_v26 = vrot.slane %v6029_v54, 5 }
 0x2ee   : > { %4891 = vst.msk [vmem:[#allocation3 + $0x128] sm:$0xf] %vm4853_vm12, %v4718_v34  ;;  %v4716_v0 = vpop.permute.xlu0 %4715  ;;  %v10569_v28 = vrot.slane %v5145_v14, 5  ;;  %v6168_v34 = vrot.slane %v6166_v44, 4 }
 0x2ef   : > { %4890 = vst.msk [vmem:[#allocation3 + $0x120] sm:$0xf] %vm4853_vm12, %v4716_v0  ;;  %4737 = vrot.lane.b32.xlu1 %v4550_v20, %s8103_s8  ;;  %v5485_v20 = vshll.u32 %v4973_v9, 16  ;;  %v5141_v0 = vrot.slane %v5139_v62, 4  ;;  %v3886_v9 = vld [vmem:[#allocation2 + $0x54] sm:$0xf] }
 0x2f0   : > { %4735 = vrot.lane.b32.xlu0 %v4549_v49, %s8103_s8  ;;  %v5479_v49 = vshrl.u32 %v10495_v41, 16  ;;  %v4517_v41 = vld [vmem:[#allocation2 + $0x58] sm:$0xf]  ;;  %v5152_v18 = vor.u32 %v5151_v50, %v10569_v28  ;;  %v6270_v31 = vrot.slane %v6268_v26, 4 }
 0x2f1   : > { %v5706_v60 = vpop.permute.xlu1 %5705  ;;  %v10597_v57 = vrot.slane %v5485_v20, 5  ;;  %v5142_v8 = vor.u32 %v5141_v0, %v10505_v33  ;;  %v4941_v0 = vld [vmem:[#allocation2 + $0x64] sm:$0xf] }
 0x2f2   : > { %5913 = vst.msk [vmem:[#allocation3 + $0x18] sm:$0xf] %vm5909_vm13, %v5706_v60  ;;  %v5704_v7 = vpop.permute.xlu0 %5703  ;;  %v6170_v60 = vsel %vm8829_vm7, %v6168_v34, %v6169_v38  ;;  %v5153_v14 = vrot.slane %v5152_v18, 4  ;;  %v5169_v54 = vshrl.u32 %v4941_v0, 16 }
 0x2f3   : > { %5912 = vst.msk [vmem:[#allocation3 + $0x10] sm:$0xf] %vm5909_vm13, %v5704_v7  ;;  %5725 = vrot.lane.b32.xlu1 %v5138_v36, %s8104_s9  ;;  %v5491_v7 = vrot.slane %v5489_v63, 4  ;;  %v10637_v63 = vld [vmem:[#allocation2 + $0x58] sm:$0xf] }
 0x2f4   : > { %5723 = vrot.lane.b32.xlu0 %v5128_v6, %s8104_s9  ;;  %v5155_v6 = vshll.u32 %v10580_v24, 16  ;;  %6418 = vst.msk [vmem:[#allocation3 + $0x7c] sm:$0xf] %vm465_vm0, %v6170_v60  ;;  %v8005_v60 = vld [vmem:[#allocation3 + $0x24] ss:$8 sps:$4 sm:$0xff]  }
 0x2f5   : > { %v5774_v21 = vpop.permute.xlu1 %5773  ;;  %v5492_v4 = vor.u32 %v5491_v7, %v10597_v57  ;;  %v5165_v7 = vshll.u32 %v4941_v0, 16  ;;  %v10705_v0 = vld [vmem:[#allocation2 + $0xf0] sm:$0xf] }
 0x2f6   : > { %5947 = vst.msk [vmem:[#allocation3 + $0x128] sm:$0xf] %vm5909_vm13, %v5774_v21  ;;  %v5772_v55 = vpop.permute.xlu0 %5771  ;;  %v10603_v21 = vld [vmem:[#allocation2 + $0xe8] sm:$0xf]  ;;  %v10612_v33 = vrot.slane %v5155_v6, 5 }
 0x2f7   : > { %5946 = vst.msk [vmem:[#allocation3 + $0x120] sm:$0xf] %vm5909_vm13, %v5772_v55  ;;  %5793 = vrot.lane.b32.xlu1 %v5478_v47, %s8104_s9  ;;  %v6267_v47 = vrot.slane %v6265_v22, 4  ;;  %v4552_v22 = vld [vmem:[#allocation2 + $0xe4] sm:$0xf]  ;;  %v5495_v62 = vshll.u32 %v10603_v21, 16 }
 0x2f8   : > { %5791 = vrot.lane.b32.xlu0 %v5468_v40, %s8104_s9  ;;  %v5481_v40 = vrot.slane %v5479_v49, 4  ;;  %v5493_v30 = vrot.slane %v5492_v4, 4 }
 0x2f9   : > { %v4301_v13 = vpop.permute.xlu1 %4300  ;;  %v6476_v5 = vld [vmem:[#allocation3 + $0x18] sm:$0xff]  ;;  %v10631_v44 = vrot.slane %v5495_v62, 5 }
 0x2fa   : > { %4472 = vst.msk [vmem:[#allocation3 + $0x138] sm:$0xf] %vm4432_vm11, %v4301_v13  ;;  %v4299_v52 = vpop.permute.xlu0 %4298  ;;  %v6475_v19 = vld [vmem:[#allocation3 + $0x10] sm:$0xff]  ;;  %v5482_v23 = vor.u32 %v5481_v40, %v10526_v56  ;;  %v5158_v56 = vsel %vm8213_vm3, %v5153_v14, %v10612_v33  ;;  %v5997_v14 = vld [vmem:[#allocation2 + $0x64] sm:$0xf] }
 0x2fb   : > { %4471 = vst.msk [vmem:[#allocation3 + $0x130] sm:$0xf] %vm4432_vm11, %v4299_v52  ;;  %4252 = vrot.lane.b32.xlu1 %v4059_v17, %s8102_s25  ;;  %v7816_v59 = vcombine.low %v6475_v19, %v6476_v5  ;;  %v6269_v17 = vsel %vm8829_vm7, %v6267_v47, %v6268_v26  ;;  %v5143_v5 = vrot.slane %v5142_v8, 4  ;;  %v6272_v19 = vsel %vm8829_vm7, %v6270_v31, %v6271_v39  ;;  %v4975_v47 = vld [vmem:[#allocation2 + $0xec] sm:$0xf] }
 0x2fc   : > { %4250 = vrot.lane.b32.xlu0 %v4056_v58, %s8102_s25  ;;  %v4551_v58 = vld [vmem:[#allocation2 + $0xe0] sm:$0xf]  ;;  %6451 = vst.msk [vmem:[#allocation3 + $0x184] sm:$0xf] %vm465_vm0, %v6269_v17  ;;  %6452 = vst.msk [vmem:[#allocation3 + $0x18c] sm:$0xf] %vm465_vm0, %v6272_v19  ;;  %v5498_v49 = vsel %vm8213_vm3, %v5493_v30, %v10631_v44 }
 0x2fd   : > { %v4654_v48 = vpop.permute.xlu1 %4653  ;;  %7077 = vmatmul.mubr.bf16.gmra.mxu0 %v7816_v59  ;;  %v4061_v59 = vrot.slane %v3886_v9, 5  ;;  %v5148_v50 = vsel %vm8213_vm3, %v5143_v5, %v10569_v28  ;;  %v5483_v20 = vrot.slane %v5482_v23, 4  ;;  %v4064_v28 = vrot.slane %v10637_v63, 5  ;;  %v8007_v62 = vld [vmem:[#allocation3 + $0x134] ss:$8 sps:$4 sm:$0xff]  }
 0x2fe   : > { %4859 = vst.msk [vmem:[#allocation3 + $0x28] sm:$0xf] %vm4853_vm12, %v4654_v48  ;;  %v4652_v36 = vpop.permute.xlu0 %4651  ;;  %v8002_v2 = vld [vmem:[#allocation3 + $0x120] ss:$8 sps:$4 sm:$0xff]   ;;  %7895 = vmatprep.mubr.msk.bf16.mxu0 %vm6930_vm14, %v8005_v60  ;;  %v4162_v26 = vrot.slane %v4160_v16, 4  ;;  %v6172_v17 = vrot.slane %v5997_v14, 5 }
 0x2ff   : > { %4858 = vst.msk [vmem:[#allocation3 + $0x20] sm:$0xf] %vm4853_vm12, %v4652_v36  ;;  %4320 = vrot.lane.b32.xlu1 %v4161_v43, %s8102_s25  ;;  %7213 = vmatmul.mubr.bf16.vlgmr.msra.gmra.mxu1 %v8002_v2  ;;  %v4063_v48 = vrot.slane %v4061_v59, 4  ;;  %v5488_v2 = vsel %vm8213_vm3, %v5483_v20, %v10597_v57  ;;  %v4062_v40 = vsel %vm8829_vm7, %v4060_v15, %v4061_v59  ;;  %v5171_v5 = vrot.slane %v5169_v54, 4  ;;  %v10682_v9 = vld [vmem:[#allocation2 + $0x68] sm:$0xf] }
 0x300   : > { %4318 = vrot.lane.b32.xlu0 %v4158_v11, %s8102_s25  ;;  %v4163_v11 = vrot.slane %v3920_v12, 5  ;;  %v5505_v23 = vshll.u32 %v4975_v47, 16  ;;  %7912 = vmatprep.mubr.msk.bf16.mxu1 %vm6930_vm14, %v8007_v62  ;;  %v5509_v16 = vshrl.u32 %v4975_v47, 16  ;;  %v6171_v31 = vrot.slane %v6169_v38, 4  ;;  %v4520_v38 = vld [vmem:[#allocation2 + $0x64] sm:$0xf] }
 0x301   : > { %v4722_v3 = vpop.permute.xlu1 %4721  ;;  %v4065_v46 = vsel %vm8829_vm7, %v4063_v48, %v4064_v28  ;;  %v5499_v19 = vshrl.u32 %v10603_v21, 16  ;;  %v4519_v15 = vld [vmem:[#allocation2 + $0x60] sm:$0xf]  ;;  %v6277_v54 = vrot.slane %v10705_v0, 5 }
 0x302   : > { %4893 = vst.msk [vmem:[#allocation3 + $0x138] sm:$0xf] %vm4853_vm12, %v4722_v3  ;;  %v4720_v55 = vpop.permute.xlu0 %4719  ;;  %v4165_v35 = vrot.slane %v4163_v11, 4  ;;  %v5159_v3 = vshrl.u32 %v10580_v24, 16  ;;  %v4164_v30 = vsel %vm8829_vm7, %v4162_v26, %v4163_v11  ;;  %v6173_v12 = vsel %vm8829_vm7, %v6171_v31, %v6172_v17  ;;  %v3888_v26 = vld [vmem:[#allocation2 + $0x5c] sm:$0xf] }
 0x303   : > { %4892 = vst.msk [vmem:[#allocation3 + $0x130] sm:$0xf] %vm4853_vm12, %v4720_v55  ;;  %4673 = vrot.lane.b32.xlu1 %v4518_v27, %s8103_s8  ;;  %v10652_v27 = vld [vmem:[#allocation2 + $0xe0] sm:$0xf]  ;;  %v5511_v48 = vrot.slane %v5509_v16, 4  ;;  %v5501_v60 = vrot.slane %v5499_v19, 4 }
 0x304   : > { %4671 = vrot.lane.b32.xlu0 %v4517_v41, %s8103_s8  ;;  %v4166_v57 = vrot.slane %v10652_v27, 5  ;;  %v5161_v59 = vrot.slane %v5159_v3, 4  ;;  %6419 = vst.msk [vmem:[#allocation3 + $0x84] sm:$0xf] %vm465_vm0, %v6173_v12  ;;  %v4066_v12 = vrot.slane %v4064_v28, 4 }
 0x305   : > { %v5710_v13 = vpop.permute.xlu1 %5709  ;;  %v10785_v27 = vld [vmem:[#allocation2 + $0x70] sm:$0xf] }
 0x306   : > { %5915 = vst.msk [vmem:[#allocation3 + $0x28] sm:$0xf] %vm5909_vm13, %v5710_v13  ;;  %v5708_v52 = vpop.permute.xlu0 %5707  ;;  %v10672_v13 = vld [vmem:[#allocation2 + $0x68] sm:$0xf]  ;;  %v4167_v10 = vsel %vm8829_vm7, %v4165_v35, %v4166_v57 }
 0x307   : > { %5914 = vst.msk [vmem:[#allocation3 + $0x20] sm:$0xf] %vm5909_vm13, %v5708_v52  ;;  %4741 = vrot.lane.b32.xlu1 %v4552_v22, %s8103_s8  ;;  %v6174_v52 = vrot.slane %v6172_v17, 4  ;;  %v4067_v17 = vrot.slane %v3888_v26, 5 }
 0x308   : > { %4739 = vrot.lane.b32.xlu0 %v4551_v58, %s8103_s8  ;;  %v10674_v58 = vrot.slane %v5165_v7, 5 }
 0x309   : > { %v5778_v43 = vpop.permute.xlu1 %5777  ;;  %v4069_v19 = vrot.slane %v4067_v17, 4 }
 0x30a   : > { %5949 = vst.msk [vmem:[#allocation3 + $0x138] sm:$0xf] %vm5909_vm13, %v5778_v43  ;;  %v5776_v34 = vpop.permute.xlu0 %5775  ;;  %v6175_v43 = vrot.slane %v10682_v9, 5  ;;  %v5172_v21 = vor.u32 %v5171_v5, %v10674_v58 }
 0x30b   : > { %5948 = vst.msk [vmem:[#allocation3 + $0x130] sm:$0xf] %vm5909_vm13, %v5776_v34  ;;  %5729 = vrot.lane.b32.xlu1 %v5158_v56, %s8104_s9  ;;  %v5175_v34 = vshll.u32 %v10672_v13, 16 }
 0x30c   : > { %5727 = vrot.lane.b32.xlu0 %v5148_v50, %s8104_s9  ;;  %v6031_v50 = vld [vmem:[#allocation2 + $0xec] sm:$0xf]  ;;  %v6176_v11 = vsel %vm8829_vm7, %v6174_v52, %v6175_v43  ;;  %v5173_v37 = vrot.slane %v5172_v21, 4  ;;  %v8009_v21 = vld [vmem:[#allocation3 + $0x34] ss:$8 sps:$4 sm:$0xff]  }
 0x30d   : > { %v4237_v36 = vpop.permute.xlu1 %4236  ;;  %v6478_v1 = vld [vmem:[#allocation3 + $0x28] sm:$0xff]  ;;  %v6274_v32 = vrot.slane %v6031_v50, 5  ;;  %6420 = vst.msk [vmem:[#allocation3 + $0x8c] sm:$0xf] %vm465_vm0, %v6176_v11 }
 0x30e   : > { %4440 = vst.msk [vmem:[#allocation3 + $0x38] sm:$0xf] %vm4432_vm11, %v4237_v36  ;;  %v4235_v41 = vpop.permute.xlu0 %4234  ;;  %v6477_v18 = vld [vmem:[#allocation3 + $0x20] sm:$0xff]  ;;  %v6273_v36 = vrot.slane %v6271_v39, 4  ;;  %v4554_v39 = vld [vmem:[#allocation2 + $0xec] sm:$0xf] }
 0x30f   : > { %4439 = vst.msk [vmem:[#allocation3 + $0x30] sm:$0xf] %vm4432_vm11, %v4235_v41  ;;  %5797 = vrot.lane.b32.xlu1 %v5498_v49, %s8104_s9  ;;  %v7818_v6 = vcombine.low %v6477_v18, %v6478_v1  ;;  %v10697_v49 = vrot.slane %v5505_v23, 5  ;;  %v5162_v41 = vor.u32 %v5161_v59, %v10612_v33  ;;  %v10710_v18 = vld [vmem:[#allocation2 + $0xf0] sm:$0xf]  ;;  %v10721_v33 = vrot.slane %v5175_v34, 5 }
 0x310   : > { %5795 = vrot.lane.b32.xlu0 %v5488_v2, %s8104_s9  ;;  %v6276_v2 = vrot.slane %v6274_v32, 4  ;;  %v6275_v7 = vsel %vm8829_vm7, %v6273_v36, %v6274_v32  ;;  %v5515_v35 = vshll.u32 %v10710_v18, 16 }
 0x311   : > { %v4305_v8 = vpop.permute.xlu1 %4304  ;;  %7085 = vmatmul.mubr.bf16.gmra.mxu0 %v7818_v6  ;;  %v6512_v55 = vld [vmem:[#allocation3 + $0x138] sm:$0xff]  ;;  %6453 = vst.msk [vmem:[#allocation3 + $0x194] sm:$0xf] %vm465_vm0, %v6275_v7 }
 0x312   : > { %4474 = vst.msk [vmem:[#allocation3 + $0x148] sm:$0xf] %vm4432_vm11, %v4305_v8  ;;  %v4303_v22 = vpop.permute.xlu0 %4302  ;;  %v6511_v4 = vld [vmem:[#allocation3 + $0x130] sm:$0xff]  ;;  %v6278_v47 = vsel %vm8829_vm7, %v6276_v2, %v6277_v54  ;;  %v4553_v8 = vld [vmem:[#allocation2 + $0xe8] sm:$0xf]  ;;  %7896 = vmatprep.mubr.msk.bf16.mxu0 %vm6930_vm14, %v8009_v21 }
 0x313   : > { %4473 = vst.msk [vmem:[#allocation3 + $0x140] sm:$0xf] %vm4432_vm11, %v4303_v22  ;;  %4256 = vrot.lane.b32.xlu1 %v4065_v46, %s8102_s25  ;;  %v7852_v24 = vcombine.low %v6511_v4, %v6512_v55  ;;  %v5512_v46 = vor.u32 %v5511_v48, %v10697_v49  ;;  %v5502_v55 = vor.u32 %v5501_v60, %v10631_v44  ;;  %v10734_v22 = vld [vmem:[#allocation2 + $0xe4] sm:$0xf]  ;;  %v10740_v44 = vrot.slane %v5515_v35, 5 }
 0x314   : > { %4254 = vrot.lane.b32.xlu0 %v4062_v40, %s8102_s25  ;;  %v5163_v40 = vrot.slane %v5162_v41, 4  ;;  %6454 = vst.msk [vmem:[#allocation3 + $0x19c] sm:$0xf] %vm465_vm0, %v6278_v47  ;;  %v5178_v4 = vsel %vm8213_vm3, %v5173_v37, %v10721_v33  ;;  %v4169_v31 = vrot.slane %v10734_v22, 5  ;;  %v4168_v41 = vrot.slane %v4166_v57, 4 }
 0x315   : > { %v4658_v56 = vpop.permute.xlu1 %4657  ;;  %7221 = vmatmul.mubr.bf16.gmra.mxu1 %v7852_v24  ;;  %v5513_v62 = vrot.slane %v5512_v46, 4  ;;  %v5503_v23 = vrot.slane %v5502_v55, 4  ;;  %v4977_v60 = vld [vmem:[#allocation2 + $0xf4] sm:$0xf]  ;;  %v8011_v37 = vld [vmem:[#allocation3 + $0x144] ss:$8 sps:$4 sm:$0xff]  }
 0x316   : > { %4861 = vst.msk [vmem:[#allocation3 + $0x38] sm:$0xf] %vm4853_vm12, %v4658_v56  ;;  %v4656_v20 = vpop.permute.xlu0 %4655  ;;  %v5168_v5 = vsel %vm8213_vm3, %v5163_v40, %v10674_v58  ;;  %v10756_v56 = vld [vmem:[#allocation2 + $0xe8] sm:$0xf]  ;;  %v4171_v34 = vrot.slane %v4169_v31, 4  ;;  %7913 = vmatprep.mubr.msk.bf16.mxu1 %vm6930_vm14, %v8011_v37  ;;  %v6177_v55 = vrot.slane %v6175_v43, 4 }
 0x317   : > { %4860 = vst.msk [vmem:[#allocation3 + $0x30] sm:$0xf] %vm4853_vm12, %v4656_v20  ;;  %4324 = vrot.lane.b32.xlu1 %v4167_v10, %s8102_s25  ;;  %v10745_v10 = vld [vmem:[#allocation2 + $0x60] sm:$0xf]  ;;  %v5518_v52 = vsel %vm8213_vm3, %v5513_v62, %v10740_v44  ;;  %v5508_v50 = vsel %vm8213_vm3, %v5503_v23, %v10697_v49  ;;  %v4172_v11 = vrot.slane %v10756_v56, 5  ;;  %v5179_v49 = vshrl.u32 %v10672_v13, 16 }
 0x318   : > { %4322 = vrot.lane.b32.xlu0 %v4164_v30, %s8102_s25  ;;  %v4070_v58 = vrot.slane %v10745_v10, 5  ;;  %v4943_v30 = vld [vmem:[#allocation2 + $0x6c] sm:$0xf]  ;;  %v10791_v40 = vld [vmem:[#allocation2 + $0x70] sm:$0xf]  ;;  %v5195_v43 = vshll.u32 %v10785_v27, 16 }
 0x319   : > { %v4726_v1 = vpop.permute.xlu1 %4725  ;;  %v5185_v36 = vshll.u32 %v4943_v30, 16  ;;  %v5189_v2 = vshrl.u32 %v4943_v30, 16  ;;  %v5999_v13 = vld [vmem:[#allocation2 + $0x6c] sm:$0xf]  ;;  %v4173_v35 = vsel %vm8829_vm7, %v4171_v34, %v4172_v11  ;;  %v5181_v62 = vrot.slane %v5179_v49, 4 }
 0x31a   : > { %4895 = vst.msk [vmem:[#allocation3 + $0x148] sm:$0xf] %vm4853_vm12, %v4726_v1  ;;  %v4724_v6 = vpop.permute.xlu0 %4723  ;;  %v4071_v63 = vsel %vm8829_vm7, %v4069_v19, %v4070_v58  ;;  %v4068_v1 = vsel %vm8829_vm7, %v4066_v12, %v4067_v17  ;;  %v6181_v17 = vrot.slane %v10791_v40, 5  ;;  %v6033_v23 = vld [vmem:[#allocation2 + $0xf4] sm:$0xf] }
 0x31b   : > { %4894 = vst.msk [vmem:[#allocation3 + $0x140] sm:$0xf] %vm4853_vm12, %v4724_v6  ;;  %4677 = vrot.lane.b32.xlu1 %v4520_v38, %s8103_s8  ;;  %v10787_v57 = vrot.slane %v5185_v36, 5  ;;  %v5191_v47 = vrot.slane %v5189_v2, 4  ;;  %v10818_v12 = vld [vmem:[#allocation2 + $0xf8] sm:$0xf] }
 0x31c   : > { %4675 = vrot.lane.b32.xlu0 %v4519_v15, %s8103_s8  ;;  %v6280_v21 = vrot.slane %v6033_v23, 5  ;;  %v8013_v23 = vld [vmem:[#allocation3 + $0x44] ss:$8 sps:$4 sm:$0xff]  }
 0x31d   : > { %v5714_v3 = vpop.permute.xlu1 %5713  ;;  %v5192_v9 = vor.u32 %v5191_v47, %v10787_v57  ;;  %v10852_v47 = vld [vmem:[#allocation2 + $0x68] sm:$0xf] }
 0x31e   : > { %5917 = vst.msk [vmem:[#allocation3 + $0x38] sm:$0xf] %vm5909_vm13, %v5714_v3  ;;  %v5712_v14 = vpop.permute.xlu0 %5711  ;;  %v5525_v3 = vshll.u32 %v4977_v60, 16  ;;  %v6282_v0 = vrot.slane %v6280_v21, 4 }
 0x31f   : > { %5916 = vst.msk [vmem:[#allocation3 + $0x30] sm:$0xf] %vm5909_vm13, %v5712_v14  ;;  %4745 = vrot.lane.b32.xlu1 %v4554_v39, %s8103_s8  ;;  %v6178_v39 = vrot.slane %v5999_v13, 5  ;;  %v5519_v14 = vshrl.u32 %v10710_v18, 16  ;;  %v5193_v34 = vrot.slane %v5192_v9, 4 }
 0x320   : > { %4743 = vrot.lane.b32.xlu0 %v4553_v8, %s8103_s8  ;;  %v5529_v8 = vshrl.u32 %v4977_v60, 16  ;;  %v10867_v9 = vld [vmem:[#allocation2 + $0xf0] sm:$0xf] }
 0x321   : > { %v5782_v24 = vpop.permute.xlu1 %5781  ;;  %v6180_v26 = vrot.slane %v6178_v39, 4 }
 0x322   : > { %5951 = vst.msk [vmem:[#allocation3 + $0x148] sm:$0xf] %vm5909_vm13, %v5782_v24  ;;  %v5780_v16 = vpop.permute.xlu0 %5779  ;;  %v5531_v19 = vrot.slane %v5529_v8, 4 }
 0x323   : > { %5950 = vst.msk [vmem:[#allocation3 + $0x140] sm:$0xf] %vm5909_vm13, %v5780_v16  ;;  %5733 = vrot.lane.b32.xlu1 %v5178_v4, %s8104_s9  ;;  %v4170_v4 = vsel %vm8829_vm7, %v4168_v41, %v4169_v31  ;;  %v6182_v18 = vsel %vm8829_vm7, %v6180_v26, %v6181_v17  ;;  %v4522_v16 = vld [vmem:[#allocation2 + $0x6c] sm:$0xf]  ;;  %v10812_v31 = vld [vmem:[#allocation2 + $0xf8] sm:$0xf] }
 0x324   : > { %5731 = vrot.lane.b32.xlu0 %v5168_v5, %s8104_s9  ;;  %v6179_v5 = vsel %vm8829_vm7, %v6177_v55, %v6178_v39  ;;  %6422 = vst.msk [vmem:[#allocation3 + $0x9c] sm:$0xf] %vm465_vm0, %v6182_v18  ;;  %v5535_v36 = vshll.u32 %v10812_v31, 16  ;;  %v3890_v41 = vld [vmem:[#allocation2 + $0x64] sm:$0xf] }
 0x325   : > { %v4241_v59 = vpop.permute.xlu1 %4240  ;;  %v6480_v20 = vld [vmem:[#allocation3 + $0x38] sm:$0xff]  ;;  %6421 = vst.msk [vmem:[#allocation3 + $0x94] sm:$0xf] %vm465_vm0, %v6179_v5  ;;  %v4073_v37 = vrot.slane %v3890_v41, 5  ;;  %v4072_v5 = vrot.slane %v4070_v58, 4 }
 0x326   : > { %4442 = vst.msk [vmem:[#allocation3 + $0x48] sm:$0xf] %vm4432_vm11, %v4241_v59  ;;  %v4239_v32 = vpop.permute.xlu0 %4238  ;;  %v6479_v38 = vld [vmem:[#allocation3 + $0x30] sm:$0xff]  ;;  %v4521_v59 = vld [vmem:[#allocation2 + $0x68] sm:$0xf] }
 0x327   : > { %4441 = vst.msk [vmem:[#allocation3 + $0x40] sm:$0xf] %vm4432_vm11, %v4239_v32  ;;  %5801 = vrot.lane.b32.xlu1 %v5518_v52, %s8104_s9  ;;  %v7820_v48 = vcombine.low %v6479_v38, %v6480_v20  ;;  %v10814_v52 = vrot.slane %v5525_v3, 5  ;;  %v5521_v20 = vrot.slane %v5519_v14, 4  ;;  %v6279_v38 = vrot.slane %v6277_v54, 4 }
 0x328   : > { %5799 = vrot.lane.b32.xlu0 %v5508_v50, %s8104_s9  ;;  %v5182_v50 = vor.u32 %v5181_v62, %v10721_v33  ;;  %v4556_v33 = vld [vmem:[#allocation2 + $0xf4] sm:$0xf]  ;;  %v6283_v54 = vrot.slane %v10818_v12, 5  ;;  %v3924_v3 = vld [vmem:[#allocation2 + $0xec] sm:$0xf]  ;;  %v4075_v26 = vrot.slane %v4073_v37, 4 }
 0x329   : > { %v4309_v28 = vpop.permute.xlu1 %4308  ;;  %7093 = vmatmul.mubr.bf16.gmra.mxu0 %v7820_v48  ;;  %v6514_v15 = vld [vmem:[#allocation3 + $0x148] sm:$0xff]  ;;  %v10825_v48 = vrot.slane %v5195_v43, 5  ;;  %v5532_v2 = vor.u32 %v5531_v19, %v10814_v52  ;;  %v6281_v49 = vsel %vm8829_vm7, %v6279_v38, %v6280_v21  ;;  %v4175_v14 = vrot.slane %v3924_v3, 5  ;;  %v4979_v38 = vld [vmem:[#allocation2 + $0xfc] sm:$0xf] }
 0x32a   : > { %4476 = vst.msk [vmem:[#allocation3 + $0x158] sm:$0xf] %vm4432_vm11, %v4309_v28  ;;  %v4307_v6 = vpop.permute.xlu0 %4306  ;;  %v6513_v7 = vld [vmem:[#allocation3 + $0x140] sm:$0xff]  ;;  %v4555_v28 = vld [vmem:[#allocation2 + $0xf0] sm:$0xf]  ;;  %v6284_v13 = vsel %vm8829_vm7, %v6282_v0, %v6283_v54  ;;  %7897 = vmatprep.mubr.msk.bf16.mxu0 %vm6930_vm14, %v8013_v23  ;;  %v5539_v21 = vshrl.u32 %v10812_v31, 16 }
 0x32b   : > { %4475 = vst.msk [vmem:[#allocation3 + $0x150] sm:$0xf] %vm4432_vm11, %v4307_v6  ;;  %4260 = vrot.lane.b32.xlu1 %v4071_v63, %s8102_s25  ;;  %v7854_v46 = vcombine.low %v6513_v7, %v6514_v15  ;;  %v5522_v15 = vor.u32 %v5521_v20, %v10740_v44  ;;  %v5198_v44 = vsel %vm8213_vm3, %v5193_v34, %v10825_v48  ;;  %v5533_v6 = vrot.slane %v5532_v2, 4  ;;  %v6001_v2 = vld [vmem:[#allocation2 + $0x74] sm:$0xf] }
 0x32c   : > { %4258 = vrot.lane.b32.xlu0 %v4068_v1, %s8102_s25  ;;  %v5183_v1 = vrot.slane %v5182_v50, 4  ;;  %6455 = vst.msk [vmem:[#allocation3 + $0x1a4] sm:$0xf] %vm465_vm0, %v6281_v49  ;;  %6456 = vst.msk [vmem:[#allocation3 + $0x1ac] sm:$0xf] %vm465_vm0, %v6284_v13  ;;  %v10847_v7 = vrot.slane %v5535_v36, 5  ;;  %v4074_v20 = vsel %vm8829_vm7, %v4072_v5, %v4073_v37 }
 0x32d   : > { %v4662_v22 = vpop.permute.xlu1 %4661  ;;  %7229 = vmatmul.mubr.bf16.gmra.mxu1 %v7854_v46  ;;  %v4177_v58 = vrot.slane %v4175_v14, 4  ;;  %v5545_v31 = vshll.u32 %v4979_v38, 16  ;;  %v10900_v13 = vld [vmem:[#allocation2 + $0x78] sm:$0xf]  ;;  %v4523_v3 = vld [vmem:[#allocation2 + $0x70] sm:$0xf] }
 0x32e   : > { %4863 = vst.msk [vmem:[#allocation3 + $0x48] sm:$0xf] %vm4853_vm12, %v4662_v22  ;;  %v4660_v24 = vpop.permute.xlu0 %4659  ;;  %v5188_v46 = vsel %vm8213_vm3, %v5183_v1, %v10787_v57  ;;  %v5538_v55 = vsel %vm8213_vm3, %v5533_v6, %v10847_v7  ;;  %v4076_v57 = vrot.slane %v10852_v47, 5  ;;  %v4945_v22 = vld [vmem:[#allocation2 + $0x74] sm:$0xf]  ;;  %v5549_v1 = vshrl.u32 %v4979_v38, 16 }
 0x32f   : > { %4862 = vst.msk [vmem:[#allocation3 + $0x40] sm:$0xf] %vm4853_vm12, %v4660_v24  ;;  %4328 = vrot.lane.b32.xlu1 %v4173_v35, %s8102_s25  ;;  %v5523_v35 = vrot.slane %v5522_v15, 4  ;;  %v5205_v19 = vshll.u32 %v4945_v22, 16 }
 0x330   : > { %4326 = vrot.lane.b32.xlu0 %v4170_v4, %s8102_s25  ;;  %v4077_v10 = vsel %vm8829_vm7, %v4075_v26, %v4076_v57 }
 0x331   : > { %v4730_v30 = vpop.permute.xlu1 %4729  ;;  %v5528_v62 = vsel %vm8213_vm3, %v5523_v35, %v10814_v52  ;;  %v5199_v52 = vshrl.u32 %v10785_v27, 16  ;;  %v4174_v27 = vrot.slane %v4172_v11, 4  ;;  %v10888_v0 = vrot.slane %v5205_v19, 5  ;;  %v4524_v35 = vld [vmem:[#allocation2 + $0x74] sm:$0xf] }
 0x332   : > { %4897 = vst.msk [vmem:[#allocation3 + $0x158] sm:$0xf] %vm4853_vm12, %v4730_v30  ;;  %v4728_v32 = vpop.permute.xlu0 %4727  ;;  %v5209_v30 = vshrl.u32 %v4945_v22, 16  ;;  %v10916_v22 = vrot.slane %v5545_v31, 5 }
 0x333   : > { %4896 = vst.msk [vmem:[#allocation3 + $0x150] sm:$0xf] %vm4853_vm12, %v4728_v32  ;;  %4681 = vrot.lane.b32.xlu1 %v4522_v16, %s8103_s8  ;;  %v5201_v11 = vrot.slane %v5199_v52, 4  ;;  %v4176_v41 = vsel %vm8829_vm7, %v4174_v27, %v4175_v14  ;;  %v10914_v14 = vld [vmem:[#allocation2 + $0x100] sm:$0xf] }
 0x334   : > { %4679 = vrot.lane.b32.xlu0 %v4521_v59, %s8103_s8  ;;  %v4178_v59 = vrot.slane %v10867_v9, 5  ;;  %v3892_v27 = vld [vmem:[#allocation2 + $0x6c] sm:$0xf] }
 0x335   : > { %v5718_v63 = vpop.permute.xlu1 %5717  ;;  %v5202_v26 = vor.u32 %v5201_v11, %v10825_v48 }
 0x336   : > { %5919 = vst.msk [vmem:[#allocation3 + $0x48] sm:$0xf] %vm5909_vm13, %v5718_v63  ;;  %v5716_v60 = vpop.permute.xlu0 %5715  ;;  %v5211_v63 = vrot.slane %v5209_v30, 4  ;;  %v4179_v56 = vsel %vm8829_vm7, %v4177_v58, %v4178_v59  ;;  %v4558_v30 = vld [vmem:[#allocation2 + $0xfc] sm:$0xf] }
 0x337   : > { %5918 = vst.msk [vmem:[#allocation3 + $0x40] sm:$0xf] %vm5909_vm13, %v5716_v60  ;;  %4749 = vrot.lane.b32.xlu1 %v4556_v33, %s8103_s8  ;;  %v8015_v33 = vld [vmem:[#allocation3 + $0x154] ss:$8 sps:$4 sm:$0xff]   ;;  %v10898_v60 = vld [vmem:[#allocation2 + $0x78] sm:$0xf] }
 0x338   : > { %4747 = vrot.lane.b32.xlu0 %v4555_v28, %s8103_s8  ;;  %v6184_v28 = vrot.slane %v6001_v2, 5  ;;  %7914 = vmatprep.mubr.msk.bf16.mxu1 %vm6930_vm14, %v8015_v33  ;;  %v4079_v33 = vrot.slane %v3892_v27, 5 }
 0x339   : > { %v5786_v39 = vpop.permute.xlu1 %5785 }
 0x33a   : > { %5953 = vst.msk [vmem:[#allocation3 + $0x158] sm:$0xf] %vm5909_vm13, %v5786_v39  ;;  %v5784_v8 = vpop.permute.xlu0 %5783  ;;  %v6186_v6 = vrot.slane %v6184_v28, 4  ;;  %v6187_v39 = vrot.slane %v10900_v13, 5  ;;  %v4525_v13 = vld [vmem:[#allocation2 + $0x78] sm:$0xf] }
 0x33b   : > { %5952 = vst.msk [vmem:[#allocation3 + $0x150] sm:$0xf] %vm5909_vm13, %v5784_v8  ;;  %5737 = vrot.lane.b32.xlu1 %v5198_v44, %s8104_s9  ;;  %v6183_v44 = vrot.slane %v6181_v17, 4  ;;  %v5212_v8 = vor.u32 %v5211_v63, %v10888_v0  ;;  %v5215_v17 = vshll.u32 %v10898_v60, 16 }
 0x33c   : > { %5735 = vrot.lane.b32.xlu0 %v5188_v46, %s8104_s9  ;;  %v6035_v46 = vld [vmem:[#allocation2 + $0xfc] sm:$0xf]  ;;  %v6188_v5 = vsel %vm8829_vm7, %v6186_v6, %v6187_v39 }
 0x33d   : > { %v4245_v4 = vpop.permute.xlu1 %4244  ;;  %v6482_v24 = vld [vmem:[#allocation3 + $0x48] sm:$0xff]  ;;  %v6286_v40 = vrot.slane %v6035_v46, 5  ;;  %6424 = vst.msk [vmem:[#allocation3 + $0xac] sm:$0xf] %vm465_vm0, %v6188_v5  ;;  %v5213_v12 = vrot.slane %v5212_v8, 4  ;;  %v4078_v46 = vrot.slane %v4076_v57, 4 }
 0x33e   : > { %4444 = vst.msk [vmem:[#allocation3 + $0x58] sm:$0xf] %vm4432_vm11, %v4245_v4  ;;  %v4243_v43 = vpop.permute.xlu0 %4242  ;;  %v6481_v18 = vld [vmem:[#allocation3 + $0x40] sm:$0xff]  ;;  %v5551_v4 = vrot.slane %v5549_v1, 4  ;;  %v4081_v1 = vrot.slane %v4079_v33, 4 }
 0x33f   : > { %4443 = vst.msk [vmem:[#allocation3 + $0x50] sm:$0xf] %vm4432_vm11, %v4243_v43  ;;  %5805 = vrot.lane.b32.xlu1 %v5538_v55, %s8104_s9  ;;  %v7822_v16 = vcombine.low %v6481_v18, %v6482_v24  ;;  %v6185_v55 = vsel %vm8829_vm7, %v6183_v44, %v6184_v28  ;;  %v5541_v24 = vrot.slane %v5539_v21, 4  ;;  %v10923_v43 = vld [vmem:[#allocation2 + $0x100] sm:$0xf]  ;;  %v6285_v18 = vrot.slane %v6283_v54, 4 }
 0x340   : > { %5803 = vrot.lane.b32.xlu0 %v5528_v62, %s8104_s9  ;;  %6423 = vst.msk [vmem:[#allocation3 + $0xa4] sm:$0xf] %vm465_vm0, %v6185_v55  ;;  %v6288_v48 = vrot.slane %v6286_v40, 4  ;;  %v6289_v19 = vrot.slane %v10923_v43, 5  ;;  %v10935_v54 = vrot.slane %v5215_v17, 5  ;;  %v5552_v52 = vor.u32 %v5551_v4, %v10916_v22 }
 0x341   : > { %v4313_v50 = vpop.permute.xlu1 %4312  ;;  %7101 = vmatmul.mubr.bf16.gmra.mxu0 %v7822_v16  ;;  %v6516_v32 = vld [vmem:[#allocation3 + $0x158] sm:$0xff]  ;;  %v6287_v16 = vsel %vm8829_vm7, %v6285_v18, %v6286_v40  ;;  %v10958_v28 = vld [vmem:[#allocation2 + $0x70] sm:$0xf]  ;;  %v541_v4 = vld [vmem:[%s8625_s30 + $0x14] sm:$0xf]  ;;  %v4180_v18 = vrot.slane %v4178_v59, 4 }
 0x342   : > { %4478 = vst.msk [vmem:[#allocation3 + $0x168] sm:$0xf] %vm4432_vm11, %v4313_v50  ;;  %v4311_v34 = vpop.permute.xlu0 %4310  ;;  %v6515_v36 = vld [vmem:[#allocation3 + $0x150] sm:$0xff]  ;;  %v4557_v50 = vld [vmem:[#allocation2 + $0xf8] sm:$0xf]  ;;  %v6290_v38 = vsel %vm8829_vm7, %v6288_v48, %v6289_v19 }
 0x343   : > { %4477 = vst.msk [vmem:[#allocation3 + $0x160] sm:$0xf] %vm4432_vm11, %v4311_v34  ;;  %4264 = vrot.lane.b32.xlu1 %v4077_v10, %s8102_s25  ;;  %v7856_v49 = vcombine.low %v6515_v36, %v6516_v32  ;;  %v5555_v10 = vshll.u32 %v10914_v14, 16  ;;  %v5542_v32 = vor.u32 %v5541_v24, %v10847_v7  ;;  %v5218_v7 = vsel %vm8213_vm3, %v5213_v12, %v10935_v54  ;;  %v8017_v55 = vld [vmem:[#allocation3 + $0x54] ss:$8 sps:$4 sm:$0xff]  }
 0x344   : > { %4262 = vrot.lane.b32.xlu0 %v4074_v20, %s8102_s25  ;;  %6457 = vst.msk [vmem:[#allocation3 + $0x1b4] sm:$0xf] %vm465_vm0, %v6287_v16  ;;  %v5203_v20 = vrot.slane %v5202_v26, 4  ;;  %6458 = vst.msk [vmem:[#allocation3 + $0x1bc] sm:$0xf] %vm465_vm0, %v6290_v38  ;;  %v5553_v34 = vrot.slane %v5552_v52, 4  ;;  %7898 = vmatprep.mubr.msk.bf16.mxu0 %vm6930_vm14, %v8017_v55 }
 0x345   : > { %v4666_v15 = vpop.permute.xlu1 %4665  ;;  %7237 = vmatmul.mubr.bf16.gmra.mxu1 %v7856_v49  ;;  %v10953_v36 = vrot.slane %v5555_v10, 5  ;;  %v5543_v63 = vrot.slane %v5542_v32, 4  ;;  %551 = vst.msk [vmem:[#allocation2 + $0x12c] sm:$0xf] %vm465_vm0, %v541_v4  ;;  %v4981_v48 = vld [vmem:[#allocation2 + $0x104] sm:$0xf] }
 0x346   : > { %4865 = vst.msk [vmem:[#allocation3 + $0x58] sm:$0xf] %vm4853_vm12, %v4666_v15  ;;  %v4664_v37 = vpop.permute.xlu0 %4663  ;;  %v5208_v49 = vsel %vm8213_vm3, %v5203_v20, %v10888_v0  ;;  %v4082_v0 = vrot.slane %v10958_v28, 5  ;;  %v8019_v12 = vld [vmem:[#allocation3 + $0x164] ss:$8 sps:$4 sm:$0xff]   ;;  %v5565_v32 = vshll.u32 %v4981_v48, 16 }
 0x347   : > { %4864 = vst.msk [vmem:[#allocation3 + $0x50] sm:$0xf] %vm4853_vm12, %v4664_v37  ;;  %4332 = vrot.lane.b32.xlu1 %v4179_v56, %s8102_s25  ;;  %v10960_v56 = vld [vmem:[#allocation2 + $0xf4] sm:$0xf]  ;;  %v5558_v31 = vsel %vm8213_vm3, %v5553_v34, %v10953_v36  ;;  %v5548_v6 = vsel %vm8213_vm3, %v5543_v63, %v10916_v22  ;;  %v5219_v22 = vshrl.u32 %v10898_v60, 16  ;;  %v4080_v60 = vsel %vm8829_vm7, %v4078_v46, %v4079_v33 }
 0x348   : > { %4330 = vrot.lane.b32.xlu0 %v4176_v41, %s8102_s25  ;;  %v4181_v15 = vrot.slane %v10960_v56, 5  ;;  %v4947_v41 = vld [vmem:[#allocation2 + $0x7c] sm:$0xf]  ;;  %v4083_v47 = vsel %vm8829_vm7, %v4081_v1, %v4082_v0  ;;  %v542_v20 = vld [vmem:[%s8625_s30 + $0x18] sm:$0xf]  ;;  %7915 = vmatprep.mubr.msk.bf16.mxu1 %vm6930_vm14, %v8019_v12  ;;  %v5569_v27 = vshrl.u32 %v4981_v48, 16 }
 0x349   : > { %v4734_v62 = vpop.permute.xlu1 %4733  ;;  %v5225_v17 = vshll.u32 %v4947_v41, 16  ;;  %v5229_v26 = vshrl.u32 %v4947_v41, 16  ;;  %v6003_v52 = vld [vmem:[#allocation2 + $0x7c] sm:$0xf]  ;;  %552 = vst.msk [vmem:[#allocation2 + $0x130] sm:$0xf] %vm465_vm0, %v542_v20 }
 0x34a   : > { %4899 = vst.msk [vmem:[#allocation3 + $0x168] sm:$0xf] %vm4853_vm12, %v4734_v62  ;;  %v4732_v23 = vpop.permute.xlu0 %4731  ;;  %v4183_v57 = vrot.slane %v4181_v15, 4  ;;  %v6190_v9 = vrot.slane %v6003_v52, 5  ;;  %v11013_v34 = vld [vmem:[#allocation2 + $0x80] sm:$0xf] }
 0x34b   : > { %4898 = vst.msk [vmem:[#allocation3 + $0x160] sm:$0xf] %vm4853_vm12, %v4732_v23  ;;  %4685 = vrot.lane.b32.xlu1 %v4524_v35, %s8103_s8  ;;  %v10976_v35 = vld [vmem:[#allocation2 + $0xf8] sm:$0xf]  ;;  %v5559_v23 = vshrl.u32 %v10914_v14, 16  ;;  %v5221_v14 = vrot.slane %v5219_v22, 4 }
 0x34c   : > { %4683 = vrot.lane.b32.xlu0 %v4523_v3, %s8103_s8  ;;  %v4184_v62 = vrot.slane %v10976_v35, 5  ;;  %v6189_v33 = vrot.slane %v6187_v39, 4  ;;  %v6193_v63 = vrot.slane %v11013_v34, 5  ;;  %v6037_v56 = vld [vmem:[#allocation2 + $0x104] sm:$0xf]  ;;  %v11026_v41 = vrot.slane %v5565_v32, 5 }
 0x34d   : > { %v5722_v58 = vpop.permute.xlu1 %5721  ;;  %v11030_v46 = vld [vmem:[#allocation2 + $0x108] sm:$0xf]  ;;  %v4560_v22 = vld [vmem:[#allocation2 + $0x104] sm:$0xf]  ;;  %v3894_v48 = vld [vmem:[#allocation2 + $0x74] sm:$0xf] }
 0x34e   : > { %5921 = vst.msk [vmem:[#allocation3 + $0x58] sm:$0xf] %vm5909_vm13, %v5722_v58  ;;  %v5720_v21 = vpop.permute.xlu0 %5719  ;;  %v10999_v58 = vrot.slane %v5225_v17, 5  ;;  %v4185_v59 = vsel %vm8829_vm7, %v4183_v57, %v4184_v62  ;;  %v6191_v1 = vsel %vm8829_vm7, %v6189_v33, %v6190_v9  ;;  %v11036_v55 = vld [vmem:[#allocation2 + $0x108] sm:$0xf]  ;;  %v4085_v52 = vrot.slane %v3894_v48, 5 }
 0x34f   : > { %5920 = vst.msk [vmem:[#allocation3 + $0x50] sm:$0xf] %vm5909_vm13, %v5720_v21  ;;  %4753 = vrot.lane.b32.xlu1 %v4558_v30, %s8103_s8  ;;  %v4182_v21 = vsel %vm8829_vm7, %v4180_v18, %v4181_v15  ;;  %v6292_v15 = vrot.slane %v6037_v56, 5  ;;  %v6295_v57 = vrot.slane %v11036_v55, 5  ;;  %v4084_v56 = vrot.slane %v4082_v0, 4 }
 0x350   : > { %4751 = vrot.lane.b32.xlu0 %v4557_v50, %s8103_s8  ;;  %v5231_v50 = vrot.slane %v5229_v26, 4  ;;  %6425 = vst.msk [vmem:[#allocation3 + $0xb4] sm:$0xf] %vm465_vm0, %v6191_v1 }
 0x351   : > { %v5790_v2 = vpop.permute.xlu1 %5789  ;;  %v6294_v26 = vrot.slane %v6292_v15, 4 }
 0x352   : > { %5955 = vst.msk [vmem:[#allocation3 + $0x168] sm:$0xf] %vm5909_vm13, %v5790_v2  ;;  %v5788_v11 = vpop.permute.xlu0 %5787  ;;  %v6192_v2 = vrot.slane %v6190_v9, 4  ;;  %v11071_v9 = vld [vmem:[#allocation2 + $0x78] sm:$0xf] }
 0x353   : > { %5954 = vst.msk [vmem:[#allocation3 + $0x160] sm:$0xf] %vm5909_vm13, %v5788_v11  ;;  %5741 = vrot.lane.b32.xlu1 %v5218_v7, %s8104_s9  ;;  %v11011_v7 = vld [vmem:[#allocation2 + $0x80] sm:$0xf]  ;;  %v4526_v11 = vld [vmem:[#allocation2 + $0x7c] sm:$0xf] }
 0x354   : > { %5739 = vrot.lane.b32.xlu0 %v5208_v49, %s8104_s9  ;;  %v5235_v39 = vshll.u32 %v11011_v7, 16 }
 0x355   : > { %v4249_v44 = vpop.permute.xlu1 %4248  ;;  %v6484_v37 = vld [vmem:[#allocation3 + $0x58] sm:$0xff] }
 0x356   : > { %4446 = vst.msk [vmem:[#allocation3 + $0x68] sm:$0xf] %vm4432_vm11, %v4249_v44  ;;  %v4247_v3 = vpop.permute.xlu0 %4246  ;;  %v6483_v8 = vld [vmem:[#allocation3 + $0x50] sm:$0xff]  ;;  %v5571_v44 = vrot.slane %v5569_v27, 4  ;;  %v4087_v27 = vrot.slane %v4085_v52, 4 }
 0x357   : > { %4445 = vst.msk [vmem:[#allocation3 + $0x60] sm:$0xf] %vm4432_vm11, %v4247_v3  ;;  %5809 = vrot.lane.b32.xlu1 %v5558_v31, %s8104_s9  ;;  %v7824_v40 = vcombine.low %v6483_v8, %v6484_v37  ;;  %v5232_v31 = vor.u32 %v5231_v50, %v10999_v58  ;;  %v5222_v37 = vor.u32 %v5221_v14, %v10935_v54  ;;  %v5561_v3 = vrot.slane %v5559_v23, 4 }
 0x358   : > { %5807 = vrot.lane.b32.xlu0 %v5548_v6, %s8104_s9  ;;  %v6194_v8 = vsel %vm8829_vm7, %v6192_v2, %v6193_v63  ;;  %v5572_v43 = vor.u32 %v5571_v44, %v11026_v41 }
 0x359   : > { %v4317_v24 = vpop.permute.xlu1 %4316  ;;  %7109 = vmatmul.mubr.bf16.gmra.mxu0 %v7824_v40  ;;  %v6518_v5 = vld [vmem:[#allocation3 + $0x168] sm:$0xff]  ;;  %v6291_v40 = vrot.slane %v6289_v19, 4  ;;  %6426 = vst.msk [vmem:[#allocation3 + $0xbc] sm:$0xf] %vm465_vm0, %v6194_v8  ;;  %v5233_v54 = vrot.slane %v5232_v31, 4  ;;  %v5575_v19 = vshll.u32 %v11030_v46, 16  ;;  %v5562_v18 = vor.u32 %v5561_v3, %v10953_v36 }
 0x35a   : > { %4480 = vst.msk [vmem:[#allocation3 + $0x178] sm:$0xf] %vm4432_vm11, %v4317_v24  ;;  %v4315_v16 = vpop.permute.xlu0 %4314  ;;  %v6517_v30 = vld [vmem:[#allocation3 + $0x160] sm:$0xff] }
 0x35b   : > { %4479 = vst.msk [vmem:[#allocation3 + $0x170] sm:$0xf] %vm4432_vm11, %v4315_v16  ;;  %4268 = vrot.lane.b32.xlu1 %v4083_v47, %s8102_s25  ;;  %v7858_v10 = vcombine.low %v6517_v30, %v6518_v5  ;;  %v6293_v4 = vsel %vm8829_vm7, %v6291_v40, %v6292_v15  ;;  %v11047_v47 = vrot.slane %v5235_v39, 5  ;;  %v5223_v5 = vrot.slane %v5222_v37, 4  ;;  %v8021_v15 = vld [vmem:[#allocation3 + $0x64] ss:$8 sps:$4 sm:$0xff]  }
 0x35c   : > { %4266 = vrot.lane.b32.xlu0 %v4080_v60, %s8102_s25  ;;  %6459 = vst.msk [vmem:[#allocation3 + $0x1c4] sm:$0xf] %vm465_vm0, %v6293_v4  ;;  %v4559_v60 = vld [vmem:[#allocation2 + $0x100] sm:$0xf]  ;;  %v6296_v16 = vsel %vm8829_vm7, %v6294_v26, %v6295_v57  ;;  %v5573_v30 = vrot.slane %v5572_v43, 4  ;;  %v11066_v12 = vrot.slane %v5575_v19, 5  ;;  %7899 = vmatprep.mubr.msk.bf16.mxu0 %vm6930_vm14, %v8021_v15 }
 0x35d   : > { %v4670_v38 = vpop.permute.xlu1 %4669  ;;  %7245 = vmatmul.mubr.bf16.gmra.mxu1 %v7858_v10  ;;  %6460 = vst.msk [vmem:[#allocation3 + $0x1cc] sm:$0xf] %vm465_vm0, %v6296_v16  ;;  %v5238_v36 = vsel %vm8213_vm3, %v5233_v54, %v11047_v47  ;;  %v5228_v50 = vsel %vm8213_vm3, %v5223_v5, %v10999_v58  ;;  %v5563_v20 = vrot.slane %v5562_v18, 4  ;;  %v4088_v58 = vrot.slane %v11071_v9, 5  ;;  %v6005_v43 = vld [vmem:[#allocation2 + $0x84] sm:$0xf] }
 0x35e   : > { %4867 = vst.msk [vmem:[#allocation3 + $0x68] sm:$0xf] %vm4853_vm12, %v4670_v38  ;;  %v4668_v49 = vpop.permute.xlu0 %4667  ;;  %v5578_v32 = vsel %vm8213_vm3, %v5573_v30, %v11066_v12  ;;  %v4186_v40 = vrot.slane %v4184_v62, 4  ;;  %v5579_v26 = vshrl.u32 %v11030_v46, 16  ;;  %v544_v5 = vld [vmem:[%s8625_s30 + $0x20] sm:$0xf] }
 0x35f   : > { %4866 = vst.msk [vmem:[#allocation3 + $0x60] sm:$0xf] %vm4853_vm12, %v4668_v49  ;;  %4336 = vrot.lane.b32.xlu1 %v4185_v59, %s8102_s25  ;;  %v11073_v59 = vld [vmem:[#allocation2 + $0xfc] sm:$0xf]  ;;  %v5568_v2 = vsel %vm8213_vm3, %v5563_v20, %v11026_v41  ;;  %v5239_v41 = vshrl.u32 %v11011_v7, 16  ;;  %v4089_v28 = vsel %vm8829_vm7, %v4087_v27, %v4088_v58  ;;  %v4086_v7 = vsel %vm8829_vm7, %v4084_v56, %v4085_v52 }
 0x360   : > { %4334 = vrot.lane.b32.xlu0 %v4182_v21, %s8102_s25  ;;  %v4187_v38 = vrot.slane %v11073_v59, 5  ;;  %v4949_v21 = vld [vmem:[#allocation2 + $0x84] sm:$0xf]  ;;  %v6196_v35 = vrot.slane %v6005_v43, 5  ;;  %554 = vst.msk [vmem:[#allocation2 + $0x138] sm:$0xf] %vm465_vm0, %v544_v5 }
 0x361   : > { %v4738_v6 = vpop.permute.xlu1 %4737  ;;  %v5245_v39 = vshll.u32 %v4949_v21, 16  ;;  %v5249_v44 = vshrl.u32 %v4949_v21, 16  ;;  %v5241_v46 = vrot.slane %v5239_v41, 4  ;;  %v11126_v30 = vld [vmem:[#allocation2 + $0x88] sm:$0xf]  ;;  %v6195_v52 = vrot.slane %v6193_v63, 4 }
 0x362   : > { %4901 = vst.msk [vmem:[#allocation3 + $0x178] sm:$0xf] %vm4853_vm12, %v4738_v6  ;;  %v4736_v17 = vpop.permute.xlu0 %4735  ;;  %v543_v6 = vld [vmem:[%s8625_s30 + $0x1c] sm:$0xf]  ;;  %v4189_v0 = vrot.slane %v4187_v38, 4  ;;  %v4188_v16 = vsel %vm8829_vm7, %v4186_v40, %v4187_v38  ;;  %v6199_v20 = vrot.slane %v11126_v30, 5 }
 0x363   : > { %4900 = vst.msk [vmem:[#allocation3 + $0x170] sm:$0xf] %vm4853_vm12, %v4736_v17  ;;  %4689 = vrot.lane.b32.xlu1 %v4526_v11, %s8103_s8  ;;  %v11089_v11 = vld [vmem:[#allocation2 + $0x100] sm:$0xf]  ;;  %v4983_v17 = vld [vmem:[#allocation2 + $0x10c] sm:$0xf]  ;;  %v6197_v38 = vsel %vm8829_vm7, %v6195_v52, %v6196_v35  ;;  %v5242_v21 = vor.u32 %v5241_v46, %v11047_v47 }
 0x364   : > { %4687 = vrot.lane.b32.xlu0 %v4525_v13, %s8103_s8  ;;  %v4190_v37 = vrot.slane %v11089_v11, 5  ;;  %553 = vst.msk [vmem:[#allocation2 + $0x134] sm:$0xf] %vm465_vm0, %v543_v6  ;;  %v5585_v18 = vshll.u32 %v4983_v17, 16  ;;  %v5589_v48 = vshrl.u32 %v4983_v17, 16 }
 0x365   : > { %v5726_v24 = vpop.permute.xlu1 %5725  ;;  %v6039_v59 = vld [vmem:[#allocation2 + $0x10c] sm:$0xf]  ;;  %6427 = vst.msk [vmem:[#allocation3 + $0xc4] sm:$0xf] %vm465_vm0, %v6197_v38  ;;  %v11149_v15 = vld [vmem:[#allocation2 + $0x110] sm:$0xf] }
 0x366   : > { %5923 = vst.msk [vmem:[#allocation3 + $0x68] sm:$0xf] %vm5909_vm13, %v5726_v24  ;;  %v5724_v23 = vpop.permute.xlu0 %5723  ;;  %v11112_v24 = vrot.slane %v5245_v39, 5  ;;  %v4191_v62 = vsel %vm8829_vm7, %v4189_v0, %v4190_v37  ;;  %v6298_v34 = vrot.slane %v6039_v59, 5  ;;  %v6301_v6 = vrot.slane %v11149_v15, 5 }
 0x367   : > { %5922 = vst.msk [vmem:[#allocation3 + $0x60] sm:$0xf] %vm5909_vm13, %v5724_v23  ;;  %4757 = vrot.lane.b32.xlu1 %v4560_v22, %s8103_s8  ;;  %v8023_v22 = vld [vmem:[#allocation3 + $0x174] ss:$8 sps:$4 sm:$0xff]   ;;  %v4562_v41 = vld [vmem:[#allocation2 + $0x10c] sm:$0xf] }
 0x368   : > { %4755 = vrot.lane.b32.xlu0 %v4559_v60, %s8103_s8  ;;  %v5251_v60 = vrot.slane %v5249_v44, 4  ;;  %7916 = vmatprep.mubr.msk.bf16.mxu1 %vm6930_vm14, %v8023_v22  ;;  %v6300_v47 = vrot.slane %v6298_v34, 4  ;;  %v3896_v17 = vld [vmem:[#allocation2 + $0x7c] sm:$0xf]  ;;  %v4090_v59 = vrot.slane %v4088_v58, 4 }
 0x369   : > { %v5794_v10 = vpop.permute.xlu1 %5793  ;;  %v4091_v43 = vrot.slane %v3896_v17, 5  ;;  %v8025_v38 = vld [vmem:[#allocation3 + $0x74] ss:$8 sps:$4 sm:$0xff]  }
 0x36a   : > { %5957 = vst.msk [vmem:[#allocation3 + $0x178] sm:$0xf] %vm5909_vm13, %v5794_v10  ;;  %v5792_v14 = vpop.permute.xlu0 %5791  ;;  %v6198_v10 = vrot.slane %v6196_v35, 4  ;;  %v5252_v27 = vor.u32 %v5251_v60, %v11112_v24  ;;  %v11184_v35 = vld [vmem:[#allocation2 + $0x80] sm:$0xf] }
 0x36b   : > { %5956 = vst.msk [vmem:[#allocation3 + $0x170] sm:$0xf] %vm5909_vm13, %v5792_v14  ;;  %5745 = vrot.lane.b32.xlu1 %v5238_v36, %s8104_s9  ;;  %v11124_v36 = vld [vmem:[#allocation2 + $0x88] sm:$0xf]  ;;  %v4528_v14 = vld [vmem:[#allocation2 + $0x84] sm:$0xf] }
 0x36c   : > { %5743 = vrot.lane.b32.xlu0 %v5228_v50, %s8104_s9  ;;  %v5255_v63 = vshll.u32 %v11124_v36, 16  ;;  %v5253_v55 = vrot.slane %v5252_v27, 4  ;;  %v4993_v42 = vld [vmem:[#allocation2 + $0x134] sm:$0xf] }
 0x36d   : > { %v4253_v33 = vpop.permute.xlu1 %4252  ;;  %v6486_v49 = vld [vmem:[#allocation3 + $0x68] sm:$0xff] }
 0x36e   : > { %4448 = vst.msk [vmem:[#allocation3 + $0x78] sm:$0xf] %vm4432_vm11, %v4253_v33  ;;  %v4251_v31 = vpop.permute.xlu0 %4250  ;;  %v6485_v1 = vld [vmem:[#allocation3 + $0x60] sm:$0xff]  ;;  %v11140_v33 = vld [vmem:[#allocation2 + $0x110] sm:$0xf] }
 0x36f   : > { %4447 = vst.msk [vmem:[#allocation3 + $0x70] sm:$0xf] %vm4432_vm11, %v4251_v31  ;;  %5813 = vrot.lane.b32.xlu1 %v5578_v32, %s8104_s9  ;;  %v7826_v13 = vcombine.low %v6485_v1, %v6486_v49  ;;  %v4527_v32 = vld [vmem:[#allocation2 + $0x80] sm:$0xf]  ;;  %v5591_v49 = vrot.slane %v5589_v48, 4  ;;  %v5581_v31 = vrot.slane %v5579_v26, 4  ;;  %v6200_v1 = vsel %vm8829_vm7, %v6198_v10, %v6199_v20 }
 0x370   : > { %5811 = vrot.lane.b32.xlu0 %v5568_v2, %s8104_s9  ;;  %v11142_v2 = vrot.slane %v5585_v18, 5  ;;  %6428 = vst.msk [vmem:[#allocation3 + $0xcc] sm:$0xf] %vm465_vm0, %v6200_v1  ;;  %v5595_v0 = vshll.u32 %v11140_v33, 16  ;;  %v6302_v26 = vsel %vm8829_vm7, %v6300_v47, %v6301_v6  ;;  %v4093_v48 = vrot.slane %v4091_v43, 4 }
 0x371   : > { %v4321_v3 = vpop.permute.xlu1 %4320  ;;  %7117 = vmatmul.mubr.bf16.gmra.mxu0 %v7826_v13  ;;  %v6520_v8 = vld [vmem:[#allocation3 + $0x178] sm:$0xff]  ;;  %v6297_v13 = vrot.slane %v6295_v57, 4  ;;  %v11161_v57 = vrot.slane %v5255_v63, 5  ;;  %v5582_v40 = vor.u32 %v5581_v31, %v11066_v12  ;;  %6462 = vst.msk [vmem:[#allocation3 + $0x1dc] sm:$0xf] %vm465_vm0, %v6302_v26  ;;  %v4092_v31 = vsel %vm8829_vm7, %v4090_v59, %v4091_v43 }
 0x372   : > { %4482 = vst.msk [vmem:[#allocation3 + $0x188] sm:$0xf] %vm4432_vm11, %v4321_v3  ;;  %v4319_v54 = vpop.permute.xlu0 %4318  ;;  %v6519_v4 = vld [vmem:[#allocation3 + $0x170] sm:$0xff]  ;;  %v11179_v22 = vrot.slane %v5595_v0, 5  ;;  %7900 = vmatprep.mubr.msk.bf16.mxu0 %vm6930_vm14, %v8025_v38  ;;  %v5599_v47 = vshrl.u32 %v11140_v33, 16 }
 0x373   : > { %4481 = vst.msk [vmem:[#allocation3 + $0x180] sm:$0xf] %vm4432_vm11, %v4319_v54  ;;  %4272 = vrot.lane.b32.xlu1 %v4089_v28, %s8102_s25  ;;  %v7860_v19 = vcombine.low %v6519_v4, %v6520_v8  ;;  %v6299_v44 = vsel %vm8829_vm7, %v6297_v13, %v6298_v34  ;;  %v5592_v28 = vor.u32 %v5591_v49, %v11142_v2  ;;  %v5243_v8 = vrot.slane %v5242_v21, 4  ;;  %v4985_v13 = vld [vmem:[#allocation2 + $0x114] sm:$0xf] }
 0x374   : > { %4270 = vrot.lane.b32.xlu0 %v4086_v7, %s8102_s25  ;;  %6461 = vst.msk [vmem:[#allocation3 + $0x1d4] sm:$0xf] %vm465_vm0, %v6299_v44  ;;  %v4561_v7 = vld [vmem:[#allocation2 + $0x108] sm:$0xf]  ;;  %v5258_v12 = vsel %vm8213_vm3, %v5253_v55, %v11161_v57  ;;  %v5583_v5 = vrot.slane %v5582_v40, 4  ;;  %v5605_v33 = vshll.u32 %v4985_v13, 16 }
 0x375   : > { %v4674_v23 = vpop.permute.xlu1 %4673  ;;  %7253 = vmatmul.mubr.bf16.gmra.mxu1 %v7860_v19  ;;  %v5593_v4 = vrot.slane %v5592_v28, 4  ;;  %v5248_v60 = vsel %vm8213_vm3, %v5243_v8, %v11112_v24  ;;  %v4094_v24 = vrot.slane %v11184_v35, 5  ;;  %v6007_v55 = vld [vmem:[#allocation2 + $0x8c] sm:$0xf]  ;;  %v5609_v8 = vshrl.u32 %v4985_v13, 16 }
 0x376   : > { %4869 = vst.msk [vmem:[#allocation3 + $0x78] sm:$0xf] %vm4853_vm12, %v4674_v23  ;;  %v4672_v50 = vpop.permute.xlu0 %4671  ;;  %v5588_v10 = vsel %vm8213_vm3, %v5583_v5, %v11142_v2  ;;  %v5259_v2 = vshrl.u32 %v11124_v36, 16  ;;  %v4192_v36 = vrot.slane %v4190_v37, 4  ;;  %v11228_v40 = vld [vmem:[#allocation2 + $0x90] sm:$0xf] }
 0x377   : > { %4868 = vst.msk [vmem:[#allocation3 + $0x70] sm:$0xf] %vm4853_vm12, %v4672_v50  ;;  %4340 = vrot.lane.b32.xlu1 %v4191_v62, %s8102_s25  ;;  %v3930_v62 = vld [vmem:[#allocation2 + $0x104] sm:$0xf]  ;;  %v5598_v18 = vsel %vm8213_vm3, %v5593_v4, %v11179_v22  ;;  %v4095_v9 = vsel %vm8829_vm7, %v4093_v48, %v4094_v24  ;;  %v6205_v43 = vrot.slane %v11228_v40, 5 }
 0x378   : > { %4338 = vrot.lane.b32.xlu0 %v4188_v16, %s8102_s25  ;;  %v4193_v23 = vrot.slane %v3930_v62, 5  ;;  %v4951_v16 = vld [vmem:[#allocation2 + $0x8c] sm:$0xf]  ;;  %v5261_v37 = vrot.slane %v5259_v2, 4  ;;  %v4529_v62 = vld [vmem:[#allocation2 + $0x88] sm:$0xf] }
 0x379   : > { %v4742_v56 = vpop.permute.xlu1 %4741  ;;  %v5265_v63 = vshll.u32 %v4951_v16, 16  ;;  %v5269_v21 = vshrl.u32 %v4951_v16, 16  ;;  %v4530_v5 = vld [vmem:[#allocation2 + $0x8c] sm:$0xf]  ;;  %v11250_v16 = vrot.slane %v5605_v33, 5 }
 0x37a   : > { %4903 = vst.msk [vmem:[#allocation3 + $0x188] sm:$0xf] %vm4853_vm12, %v4742_v56  ;;  %v4740_v39 = vpop.permute.xlu0 %4739  ;;  %v4195_v58 = vrot.slane %v4193_v23, 4  ;;  %v4194_v26 = vsel %vm8829_vm7, %v4192_v36, %v4193_v23  ;;  %v5262_v23 = vor.u32 %v5261_v37, %v11161_v57  ;;  %v11256_v59 = vld [vmem:[#allocation2 + $0x118] sm:$0xf] }
 0x37b   : > { %4902 = vst.msk [vmem:[#allocation3 + $0x180] sm:$0xf] %vm4853_vm12, %v4740_v39  ;;  %4693 = vrot.lane.b32.xlu1 %v4528_v14, %s8103_s8  ;;  %v11199_v14 = vld [vmem:[#allocation2 + $0x108] sm:$0xf]  ;;  %v11220_v0 = vrot.slane %v5265_v63, 5 }
 0x37c   : > { %4691 = vrot.lane.b32.xlu0 %v4527_v32, %s8103_s8  ;;  %v4196_v49 = vrot.slane %v11199_v14, 5  ;;  %v4564_v63 = vld [vmem:[#allocation2 + $0x114] sm:$0xf]  ;;  %v5263_v36 = vrot.slane %v5262_v23, 4 }
 0x37d   : > { %v5730_v3 = vpop.permute.xlu1 %5729 }
 0x37e   : > { %5925 = vst.msk [vmem:[#allocation3 + $0x78] sm:$0xf] %vm5909_vm13, %v5730_v3  ;;  %v5728_v54 = vpop.permute.xlu0 %5727  ;;  %v5271_v3 = vrot.slane %v5269_v21, 4  ;;  %v4197_v11 = vsel %vm8829_vm7, %v4195_v58, %v4196_v49  ;;  %v5615_v58 = vshll.u32 %v11256_v59, 16 }
 0x37f   : > { %5924 = vst.msk [vmem:[#allocation3 + $0x70] sm:$0xf] %vm5909_vm13, %v5728_v54  ;;  %4761 = vrot.lane.b32.xlu1 %v4562_v41, %s8103_s8  ;;  %v8027_v41 = vld [vmem:[#allocation3 + $0x184] ss:$8 sps:$4 sm:$0xff]   ;;  %v11232_v54 = vld [vmem:[#allocation2 + $0x90] sm:$0xf] }
 0x380   : > { %4759 = vrot.lane.b32.xlu0 %v4561_v7, %s8103_s8  ;;  %v6202_v7 = vrot.slane %v6007_v55, 5  ;;  %7917 = vmatprep.mubr.msk.bf16.mxu1 %vm6930_vm14, %v8027_v41  ;;  %v5275_v48 = vshll.u32 %v11232_v54, 16  ;;  %v11285_v55 = vrot.slane %v5615_v58, 5 }
 0x381   : > { %v5798_v19 = vpop.permute.xlu1 %5797 }
 0x382   : > { %5959 = vst.msk [vmem:[#allocation3 + $0x188] sm:$0xf] %vm5909_vm13, %v5798_v19  ;;  %v5796_v46 = vpop.permute.xlu0 %5795  ;;  %v6204_v4 = vrot.slane %v6202_v7, 4  ;;  %v11271_v2 = vrot.slane %v5275_v48, 5 }
 0x383   : > { %5958 = vst.msk [vmem:[#allocation3 + $0x180] sm:$0xf] %vm5909_vm13, %v5796_v46  ;;  %5749 = vrot.lane.b32.xlu1 %v5258_v12, %s8104_s9  ;;  %v6201_v12 = vrot.slane %v6199_v20, 4  ;;  %v5272_v46 = vor.u32 %v5271_v3, %v11220_v0  ;;  %v5268_v3 = vsel %vm8213_vm3, %v5263_v36, %v11220_v0 }
 0x384   : > { %5747 = vrot.lane.b32.xlu0 %v5248_v60, %s8104_s9  ;;  %v6041_v60 = vld [vmem:[#allocation2 + $0x114] sm:$0xf]  ;;  %v6206_v30 = vsel %vm8829_vm7, %v6204_v4, %v6205_v43 }
 0x385   : > { %v4257_v52 = vpop.permute.xlu1 %4256  ;;  %v6488_v50 = vld [vmem:[#allocation3 + $0x78] sm:$0xff]  ;;  %v6304_v20 = vrot.slane %v6041_v60, 5  ;;  %6430 = vst.msk [vmem:[#allocation3 + $0xdc] sm:$0xf] %vm465_vm0, %v6206_v30  ;;  %v11305_v60 = vld [vmem:[#allocation2 + $0x110] sm:$0xf] }
 0x386   : > { %4450 = vst.msk [vmem:[#allocation3 + $0x88] sm:$0xf] %vm4432_vm11, %v4257_v52  ;;  %v4255_v32 = vpop.permute.xlu0 %4254  ;;  %v6487_v27 = vld [vmem:[#allocation3 + $0x70] sm:$0xff]  ;;  %v5611_v52 = vrot.slane %v5609_v8, 4  ;;  %v5279_v30 = vshrl.u32 %v11232_v54, 16  ;;  %v4202_v23 = vrot.slane %v11305_v60, 5 }
 0x387   : > { %4449 = vst.msk [vmem:[#allocation3 + $0x80] sm:$0xf] %vm4432_vm11, %v4255_v32  ;;  %5817 = vrot.lane.b32.xlu1 %v5598_v18, %s8104_s9  ;;  %v7828_v34 = vcombine.low %v6487_v27, %v6488_v50  ;;  %v6203_v18 = vsel %vm8829_vm7, %v6201_v12, %v6202_v7  ;;  %v5601_v32 = vrot.slane %v5599_v47, 4  ;;  %v6303_v27 = vrot.slane %v6301_v6, 4 }
 0x388   : > { %5815 = vrot.lane.b32.xlu0 %v5588_v10, %s8104_s9  ;;  %6429 = vst.msk [vmem:[#allocation3 + $0xd4] sm:$0xf] %vm465_vm0, %v6203_v18  ;;  %v11254_v10 = vld [vmem:[#allocation2 + $0x118] sm:$0xf]  ;;  %v6306_v38 = vrot.slane %v6304_v20, 4  ;;  %v5273_v6 = vrot.slane %v5272_v46, 4 }
 0x389   : > { %v4325_v56 = vpop.permute.xlu1 %4324  ;;  %7125 = vmatmul.mubr.bf16.gmra.mxu0 %v7828_v34  ;;  %v6522_v1 = vld [vmem:[#allocation3 + $0x188] sm:$0xff]  ;;  %v6307_v34 = vrot.slane %v11254_v10, 5  ;;  %v6305_v21 = vsel %vm8829_vm7, %v6303_v27, %v6304_v20  ;;  %v5602_v13 = vor.u32 %v5601_v32, %v11179_v22  ;;  %v4198_v27 = vrot.slane %v4196_v49, 4 }
 0x38a   : > { %4484 = vst.msk [vmem:[#allocation3 + $0x198] sm:$0xf] %vm4432_vm11, %v4325_v56  ;;  %v4323_v39 = vpop.permute.xlu0 %4322  ;;  %v6521_v44 = vld [vmem:[#allocation3 + $0x180] sm:$0xff] }
 0x38b   : > { %4483 = vst.msk [vmem:[#allocation3 + $0x190] sm:$0xf] %vm4432_vm11, %v4323_v39  ;;  %4276 = vrot.lane.b32.xlu1 %v4095_v9, %s8102_s25  ;;  %v7862_v28 = vcombine.low %v6521_v44, %v6522_v1  ;;  %v6308_v15 = vsel %vm8829_vm7, %v6306_v38, %v6307_v34  ;;  %v5612_v9 = vor.u32 %v5611_v52, %v11250_v16  ;;  %v3898_v56 = vld [vmem:[#allocation2 + $0x84] sm:$0xf]  ;;  %v4563_v1 = vld [vmem:[#allocation2 + $0x110] sm:$0xf] }
 0x38c   : > { %4274 = vrot.lane.b32.xlu0 %v4092_v31, %s8102_s25  ;;  %6463 = vst.msk [vmem:[#allocation3 + $0x1e4] sm:$0xf] %vm465_vm0, %v6305_v21  ;;  %6464 = vst.msk [vmem:[#allocation3 + $0x1ec] sm:$0xf] %vm465_vm0, %v6308_v15  ;;  %v4097_v39 = vrot.slane %v3898_v56, 5  ;;  %v5278_v44 = vsel %vm8213_vm3, %v5273_v6, %v11271_v2  ;;  %v5603_v7 = vrot.slane %v5602_v13, 4 }
 0x38d   : > { %v4678_v17 = vpop.permute.xlu1 %4677  ;;  %7261 = vmatmul.mubr.bf16.gmra.mxu1 %v7862_v28  ;;  %v5613_v41 = vrot.slane %v5612_v9, 4  ;;  %v11287_v28 = vld [vmem:[#allocation2 + $0x88] sm:$0xf]  ;;  %v8029_v18 = vld [vmem:[#allocation3 + $0x84] ss:$8 sps:$4 sm:$0xff]   ;;  %v5619_v6 = vshrl.u32 %v11256_v59, 16 }
 0x38e   : > { %4871 = vst.msk [vmem:[#allocation3 + $0x88] sm:$0xf] %vm4853_vm12, %v4678_v17  ;;  %v4676_v19 = vpop.permute.xlu0 %4675  ;;  %v4099_v33 = vrot.slane %v4097_v39, 4  ;;  %v4100_v8 = vrot.slane %v11287_v28, 5  ;;  %v5608_v12 = vsel %vm8213_vm3, %v5603_v7, %v11250_v16  ;;  %7901 = vmatprep.mubr.msk.bf16.mxu0 %vm6930_vm14, %v8029_v18  ;;  %v6009_v15 = vld [vmem:[#allocation2 + $0x94] sm:$0xf] }
 0x38f   : > { %4870 = vst.msk [vmem:[#allocation3 + $0x80] sm:$0xf] %vm4853_vm12, %v4676_v19  ;;  %4344 = vrot.lane.b32.xlu1 %v4197_v11, %s8102_s25  ;;  %v3932_v11 = vld [vmem:[#allocation2 + $0x10c] sm:$0xf]  ;;  %v5618_v17 = vsel %vm8213_vm3, %v5613_v41, %v11285_v55  ;;  %v4096_v19 = vrot.slane %v4094_v24, 4  ;;  %v6208_v56 = vrot.slane %v6009_v15, 5 }
 0x390   : > { %4342 = vrot.lane.b32.xlu0 %v4194_v26, %s8102_s25  ;;  %v4199_v26 = vrot.slane %v3932_v11, 5  ;;  %v4101_v35 = vsel %vm8829_vm7, %v4099_v33, %v4100_v8  ;;  %v4987_v24 = vld [vmem:[#allocation2 + $0x11c] sm:$0xf]  ;;  %v5281_v59 = vrot.slane %v5279_v30, 4  ;;  %v4532_v11 = vld [vmem:[#allocation2 + $0x94] sm:$0xf] }
 0x391   : > { %v4746_v50 = vpop.permute.xlu1 %4745  ;;  %v5625_v21 = vshll.u32 %v4987_v24, 16  ;;  %v5629_v58 = vshrl.u32 %v4987_v24, 16  ;;  %v6043_v7 = vld [vmem:[#allocation2 + $0x11c] sm:$0xf] }
 0x392   : > { %4905 = vst.msk [vmem:[#allocation3 + $0x198] sm:$0xf] %vm4853_vm12, %v4746_v50  ;;  %v4744_v57 = vpop.permute.xlu0 %4743  ;;  %v4201_v48 = vrot.slane %v4199_v26, 4  ;;  %v4098_v50 = vsel %vm8829_vm7, %v4096_v19, %v4097_v39  ;;  %v4200_v13 = vsel %vm8829_vm7, %v4198_v27, %v4199_v26  ;;  %v6207_v39 = vrot.slane %v6205_v43, 4  ;;  %v4565_v27 = vld [vmem:[#allocation2 + $0x118] sm:$0xf] }
 0x393   : > { %4904 = vst.msk [vmem:[#allocation3 + $0x190] sm:$0xf] %vm4853_vm12, %v4744_v57  ;;  %4697 = vrot.lane.b32.xlu1 %v4530_v5, %s8103_s8  ;;  %v4953_v5 = vld [vmem:[#allocation2 + $0x94] sm:$0xf]  ;;  %v6310_v43 = vrot.slane %v6043_v7, 5 }
 0x394   : > { %4695 = vrot.lane.b32.xlu0 %v4529_v62, %s8103_s8  ;;  %v5285_v16 = vshll.u32 %v4953_v5, 16  ;;  %v5289_v54 = vshrl.u32 %v4953_v5, 16  ;;  %v4203_v14 = vsel %vm8829_vm7, %v4201_v48, %v4202_v23  ;;  %v6209_v33 = vsel %vm8829_vm7, %v6207_v39, %v6208_v56  ;;  %v4531_v5 = vld [vmem:[#allocation2 + $0x90] sm:$0xf]  ;;  %v11387_v48 = vld [vmem:[%s12044_s4] ss:$0 sm:$0xff] }
 0x395   : > { %v5734_v31 = vpop.permute.xlu1 %5733  ;;  %6431 = vst.msk [vmem:[#allocation3 + $0xe4] sm:$0xf] %vm465_vm0, %v6209_v33  ;;  %v6312_v18 = vrot.slane %v6310_v43, 4  ;;  %v11414_v39 = vld [vmem:[#allocation2 + $0x90] sm:$0xf] }
 0x396   : > { %5927 = vst.msk [vmem:[#allocation3 + $0x88] sm:$0xf] %vm5909_vm13, %v5734_v31  ;;  %v5732_v47 = vpop.permute.xlu0 %5731  ;;  %v11332_v49 = vrot.slane %v5285_v16, 5  ;;  %v5291_v31 = vrot.slane %v5289_v54, 4  ;;  %v4566_v16 = vld [vmem:[#allocation2 + $0x11c] sm:$0xf] }
 0x397   : > { %5926 = vst.msk [vmem:[#allocation3 + $0x80] sm:$0xf] %vm5909_vm13, %v5732_v47  ;;  %4765 = vrot.lane.b32.xlu1 %v4564_v63, %s8103_s8  ;;  %v8031_v63 = vld [vmem:[#allocation3 + $0x194] ss:$8 sps:$4 sm:$0xff]   ;;  %v11338_v47 = vld [vmem:[#allocation2 + $0x98] sm:$0xf] }
 0x398   : > { %4763 = vrot.lane.b32.xlu0 %v4563_v1, %s8103_s8  ;;  %7918 = vmatprep.mubr.msk.bf16.mxu1 %vm6930_vm14, %v8031_v63  ;;  %v11334_v1 = vld [vmem:[#allocation2 + $0x98] sm:$0xf]  ;;  %v5295_v26 = vshll.u32 %v11338_v47, 16  ;;  %v3900_v63 = vld [vmem:[#allocation2 + $0x8c] sm:$0xf] }
 0x399   : > { %v5802_v22 = vpop.permute.xlu1 %5801  ;;  %v6211_v41 = vrot.slane %v11334_v1, 5 }
 0x39a   : > { %5961 = vst.msk [vmem:[#allocation3 + $0x198] sm:$0xf] %vm5909_vm13, %v5802_v22  ;;  %v5800_v37 = vpop.permute.xlu0 %5799 }
 0x39b   : > { %5960 = vst.msk [vmem:[#allocation3 + $0x190] sm:$0xf] %vm5909_vm13, %v5800_v37  ;;  %5753 = vrot.lane.b32.xlu1 %v5278_v44, %s8104_s9  ;;  %v6210_v44 = vrot.slane %v6208_v56, 4  ;;  %v5631_v37 = vrot.slane %v5629_v58, 4 }
 0x39c   : > { %5751 = vrot.lane.b32.xlu0 %v5268_v3, %s8104_s9  ;;  %v11344_v3 = vrot.slane %v5625_v21, 5 }
 0x39d   : > { %v4261_v0 = vpop.permute.xlu1 %4260  ;;  %v6490_v4 = vld [vmem:[#allocation3 + $0x88] sm:$0xff]  ;;  %v6212_v40 = vsel %vm8829_vm7, %v6210_v44, %v6211_v41  ;;  %v11416_v44 = vld [vmem:[#allocation2 + $0x114] sm:$0xf] }
 0x39e   : > { %4452 = vst.msk [vmem:[#allocation3 + $0x98] sm:$0xf] %vm4432_vm11, %v4261_v0  ;;  %v4259_v62 = vpop.permute.xlu0 %4258  ;;  %v6489_v46 = vld [vmem:[#allocation3 + $0x80] sm:$0xff]  ;;  %v5282_v0 = vor.u32 %v5281_v59, %v11271_v2 }
 0x39f   : > { %4451 = vst.msk [vmem:[#allocation3 + $0x90] sm:$0xf] %vm4432_vm11, %v4259_v62  ;;  %5821 = vrot.lane.b32.xlu1 %v5618_v17, %s8104_s9  ;;  %v7830_v20 = vcombine.low %v6489_v46, %v6490_v4  ;;  %v5292_v17 = vor.u32 %v5291_v31, %v11332_v49  ;;  %v11362_v4 = vld [vmem:[#allocation2 + $0x120] sm:$0xf]  ;;  %v5621_v62 = vrot.slane %v5619_v6, 4  ;;  %v6309_v46 = vrot.slane %v6307_v34, 4 }
 0x3a0   : > { %5819 = vrot.lane.b32.xlu0 %v5608_v12, %s8104_s9  ;;  %v11358_v12 = vld [vmem:[#allocation2 + $0x120] sm:$0xf]  ;;  %6432 = vst.msk [vmem:[#allocation3 + $0xec] sm:$0xf] %vm465_vm0, %v6212_v40  ;;  %v6313_v30 = vrot.slane %v11362_v4, 5 }
 0x3a1   : > { %v4329_v52 = vpop.permute.xlu1 %4328  ;;  %7133 = vmatmul.mubr.bf16.gmra.mxu0 %v7830_v20  ;;  %v6524_v32 = vld [vmem:[#allocation3 + $0x198] sm:$0xff]  ;;  %v11373_v20 = vld [vmem:[%s12043_s3] ss:$0 sm:$0xff]  ;;  %v5635_v10 = vshll.u32 %v11358_v12, 16  ;;  %v6311_v34 = vsel %vm8829_vm7, %v6309_v46, %v6310_v43  ;;  %v5293_v54 = vrot.slane %v5292_v17, 4  ;;  %v4106_v17 = vrot.slane %v11414_v39, 5 }
 0x3a2   : > { %4486 = vst.msk [vmem:[#allocation3 + $0x1a8] sm:$0xf] %vm4432_vm11, %v4329_v52  ;;  %v4327_v38 = vpop.permute.xlu0 %4326  ;;  %v6523_v57 = vld [vmem:[#allocation3 + $0x190] sm:$0xff]  ;;  %v6314_v24 = vsel %vm8829_vm7, %v6312_v18, %v6313_v30  ;;  %v11389_v52 = vrot.slane %v5295_v26, 5  ;;  %v4205_v26 = vrot.slane %v11416_v44, 5 }
 0x3a3   : > { %4485 = vst.msk [vmem:[#allocation3 + $0x1a0] sm:$0xf] %vm4432_vm11, %v4327_v38  ;;  %4280 = vrot.lane.b32.xlu1 %v4101_v35, %s8102_s25  ;;  %v7864_v9 = vcombine.low %v6523_v57, %v6524_v32  ;;  %v5632_v35 = vor.u32 %v5631_v37, %v11344_v3  ;;  %v5283_v38 = vrot.slane %v5282_v0, 4  ;;  %v5622_v57 = vor.u32 %v5621_v62, %v11285_v55  ;;  %v4955_v37 = vld [vmem:[#allocation2 + $0x9c] sm:$0xf] }
 0x3a4   : > { %4278 = vrot.lane.b32.xlu0 %v4098_v50, %s8102_s25  ;;  %6465 = vst.msk [vmem:[#allocation3 + $0x1f4] sm:$0xf] %vm465_vm0, %v6311_v34  ;;  %6466 = vst.msk [vmem:[#allocation3 + $0x1fc] sm:$0xf] %vm465_vm0, %v6314_v24  ;;  %v11399_v58 = vrot.slane %v5635_v10, 5  ;;  %v5298_v55 = vsel %vm8213_vm3, %v5293_v54, %v11389_v52  ;;  %v4102_v62 = vrot.slane %v4100_v8, 4 }
 0x3a5   : > { %v4682_v36 = vpop.permute.xlu1 %4681  ;;  %7269 = vmatmul.mubr.bf16.gmra.mxu1 %v7864_v9  ;;  %v5633_v9 = vrot.slane %v5632_v35, 4  ;;  %v11435_v46 = vld [vmem:[#allocation2 + $0x118] sm:$0xf]  ;;  %v5305_v18 = vshll.u32 %v4955_v37, 16  ;;  %v8033_v34 = vld [vmem:[#allocation3 + $0x94] ss:$8 sps:$4 sm:$0xff]  }
 0x3a6   : > { %4873 = vst.msk [vmem:[#allocation3 + $0x98] sm:$0xf] %vm4853_vm12, %v4682_v36  ;;  %v4680_v22 = vpop.permute.xlu0 %4679  ;;  %v5288_v36 = vsel %vm8213_vm3, %v5283_v38, %v11332_v49  ;;  %v5309_v24 = vshrl.u32 %v4955_v37, 16  ;;  %7902 = vmatprep.mubr.msk.bf16.mxu0 %vm6930_vm14, %v8033_v34  ;;  %v4207_v8 = vrot.slane %v4205_v26, 4  ;;  %v4208_v54 = vrot.slane %v11435_v46, 5 }
 0x3a7   : > { %4872 = vst.msk [vmem:[#allocation3 + $0x90] sm:$0xf] %vm4853_vm12, %v4680_v22  ;;  %4348 = vrot.lane.b32.xlu1 %v4203_v14, %s8102_s25  ;;  %v4103_v14 = vrot.slane %v3900_v63, 5  ;;  %v5638_v49 = vsel %vm8213_vm3, %v5633_v9, %v11399_v58  ;;  %v11453_v38 = vrot.slane %v5305_v18, 5  ;;  %v6011_v9 = vld [vmem:[#allocation2 + $0x9c] sm:$0xf] }
 0x3a8   : > { %4346 = vrot.lane.b32.xlu0 %v4200_v13, %s8102_s25  ;;  %v5623_v13 = vrot.slane %v5622_v57, 4  ;;  %v4989_v57 = vld [vmem:[#allocation2 + $0x124] sm:$0xf]  ;;  %v6214_v60 = vrot.slane %v6011_v9, 5  ;;  %v4533_v18 = vld [vmem:[#allocation2 + $0x98] sm:$0xf] }
 0x3a9   : > { %v4750_v19 = vpop.permute.xlu1 %4749  ;;  %v4105_v43 = vrot.slane %v4103_v14, 4  ;;  %v11496_v34 = vld [vmem:[#allocation2 + $0x128] sm:$0xf]  ;;  %v8039_v46 = vld [vmem:[#allocation3 + $0x1b4] ss:$8 sps:$4 sm:$0xff]  }
 0x3aa   : > { %4907 = vst.msk [vmem:[#allocation3 + $0x1a8] sm:$0xf] %vm4853_vm12, %v4750_v19  ;;  %v4748_v2 = vpop.permute.xlu0 %4747  ;;  %v5628_v19 = vsel %vm8213_vm3, %v5623_v13, %v11344_v3 }
 0x3ab   : > { %4906 = vst.msk [vmem:[#allocation3 + $0x1a0] sm:$0xf] %vm4853_vm12, %v4748_v2  ;;  %4701 = vrot.lane.b32.xlu1 %v4532_v11, %s8103_s8  ;;  %v7070_v32 = vpop.f32.mrf.mxu0  ;;  %v4107_v28 = vsel %vm8829_vm7, %v4105_v43, %v4106_v17  ;;  %v6045_v43 = vld [vmem:[#allocation2 + $0x124] sm:$0xf] }
 0x3ac   : > { %4699 = vrot.lane.b32.xlu0 %v4531_v5, %s8103_s8  ;;  %v7356_v15 = vmul.f32 %v11373_v20, %v7070_v32 }
 0x3ad   : > { %v5738_v50 = vpop.permute.xlu1 %5737  ;;  %v7072_v6 = vpop.f32.mrf.mxu0 }
 0x3ae   : > { %5929 = vst.msk [vmem:[#allocation3 + $0x98] sm:$0xf] %vm5909_vm13, %v5738_v50  ;;  %v5736_v21 = vpop.permute.xlu0 %5735  ;;  %v7433_v56 = vadd.f32 %v11387_v48, %v7356_v15  ;;  %v8035_v15 = vld [vmem:[#allocation3 + $0x1a4] ss:$8 sps:$4 sm:$0xff]   ;;  %v5311_v6 = vrot.slane %v5309_v24, 4 }
 0x3af   : > { %5928 = vst.msk [vmem:[#allocation3 + $0x90] sm:$0xf] %vm5909_vm13, %v5736_v21  ;;  %4769 = vrot.lane.b32.xlu1 %v4566_v16, %s8103_s8  ;;  %v7073_v59 = vpop.f32.mrf.mxu0  ;;  %v5299_v16 = vshrl.u32 %v11338_v47, 16  ;;  %v4104_v47 = vsel %vm8829_vm7, %v4102_v62, %v4103_v14  ;;  %7919 = vmatprep.mubr.msk.bf16.mxu1 %vm6930_vm14, %v8035_v15 }
 0x3b0   : > { %4767 = vrot.lane.b32.xlu0 %v4565_v27, %s8103_s8  ;;  %v7503_v22 = vmax.f32 %v7433_v56, 0.0  ;;  %v7357_v11 = vmul.f32 %v11373_v20, %v7073_v59  ;;  %v4204_v27 = vrot.slane %v4202_v23, 4  ;;  %v5639_v56 = vshrl.u32 %v11358_v12, 16 }
 0x3b1   : > { %v5806_v31 = vpop.permute.xlu1 %5805  ;;  %v7075_v33 = vpop.f32.mrf.mxu0  ;;  %v11459_v14 = vrot.slane %v5299_v16, 4  ;;  %v4209_v23 = vsel %vm8829_vm7, %v4207_v8, %v4208_v54  ;;  %v5645_v12 = vshll.u32 %v4989_v57, 16  ;;  %v5649_v59 = vshrl.u32 %v4989_v57, 16 }
 0x3b2   : > { %5963 = vst.msk [vmem:[#allocation3 + $0x1a8] sm:$0xf] %vm5909_vm13, %v5806_v31  ;;  %v5804_v7 = vpop.permute.xlu0 %5803  ;;  %7573 = vst [vmem:[%s11409_s15] sm:$0xff] %v7503_v22  ;;  %v7434_v40 = vadd.f32 %v11387_v48, %v7357_v11  ;;  %v11467_v31 = vld [vmem:[#allocation2 + $0xa0] sm:$0xf]  ;;  %v4206_v22 = vsel %vm8829_vm7, %v4204_v27, %v4205_v26  ;;  %v6216_v11 = vrot.slane %v6214_v60, 4  ;;  %v6315_v8 = vrot.slane %v6313_v30, 4 }
 0x3b3   : > { %5962 = vst.msk [vmem:[#allocation3 + $0x1a0] sm:$0xf] %vm5909_vm13, %v5804_v7  ;;  %5757 = vrot.lane.b32.xlu1 %v5298_v55, %s8104_s9  ;;  %v6213_v7 = vrot.slane %v6211_v41, 4  ;;  %v4534_v26 = vld [vmem:[#allocation2 + $0x9c] sm:$0xf]  ;;  %v5315_v1 = vshll.u32 %v11467_v31, 16 }
 0x3b4   : > { %5755 = vrot.lane.b32.xlu0 %v5288_v36, %s8104_s9  ;;  %v7504_v2 = vmax.f32 %v7434_v40, 0.0  ;;  %v11469_v36 = vld [vmem:[#allocation2 + $0xa0] sm:$0xf]  ;;  %v5312_v40 = vor.u32 %v5311_v6, %v11453_v38 }
 0x3b5   : > { %v4265_v0 = vpop.permute.xlu1 %4264  ;;  %v6492_v5 = vld [vmem:[#allocation3 + $0x98] sm:$0xff]  ;;  %v6217_v37 = vrot.slane %v11469_v36, 5  ;;  %v6215_v41 = vsel %vm8829_vm7, %v6213_v7, %v6214_v60  ;;  %v11508_v30 = vrot.slane %v5315_v1, 5  ;;  %v3902_v7 = vld [vmem:[#allocation2 + $0x94] sm:$0xf] }
 0x3b6   : > { %4454 = vst.msk [vmem:[#allocation3 + $0xa8] sm:$0xf] %vm4432_vm11, %v4265_v0  ;;  %v4263_v35 = vpop.permute.xlu0 %4262  ;;  %v6491_v10 = vld [vmem:[#allocation3 + $0x90] sm:$0xff]  ;;  %7574 = vst [vmem:[%s11409_s15 + $0x8] sm:$0xff] %v7504_v2  ;;  %v5302_v2 = vor.u32 %v11459_v14, %v11389_v52  ;;  %v6319_v52 = vrot.slane %v11496_v34, 5 }
 0x3b7   : > { %4453 = vst.msk [vmem:[#allocation3 + $0xa0] sm:$0xf] %vm4432_vm11, %v4263_v35  ;;  %5825 = vrot.lane.b32.xlu1 %v5638_v49, %s8104_s9  ;;  %v7832_v3 = vcombine.low %v6491_v10, %v6492_v5  ;;  %v6316_v5 = vrot.slane %v6045_v43, 5  ;;  %v11492_v35 = vrot.slane %v5645_v12, 5  ;;  %v5651_v10 = vrot.slane %v5649_v59, 4 }
 0x3b8   : > { %5823 = vrot.lane.b32.xlu0 %v5628_v19, %s8104_s9  ;;  %v6218_v19 = vsel %vm8829_vm7, %v6216_v11, %v6217_v37  ;;  %6433 = vst.msk [vmem:[#allocation3 + $0xf4] sm:$0xf] %vm465_vm0, %v6215_v41  ;;  %v4109_v41 = vrot.slane %v3902_v7, 5 }
 0x3b9   : > { %v4333_v50 = vpop.permute.xlu1 %4332  ;;  %7141 = vmatmul.mubr.bf16.gmra.mxu0 %v7832_v3  ;;  %v6526_v32 = vld [vmem:[#allocation3 + $0x1a8] sm:$0xff]  ;;  %6434 = vst.msk [vmem:[#allocation3 + $0xfc] sm:$0xf] %vm465_vm0, %v6218_v19  ;;  %v6317_v15 = vsel %vm8829_vm7, %v6315_v8, %v6316_v5  ;;  %v5652_v14 = vor.u32 %v5651_v10, %v11492_v35  ;;  %v11537_v19 = vld [vmem:[#allocation2 + $0x11c] sm:$0xf] }
 0x3ba   : > { %4488 = vst.msk [vmem:[#allocation3 + $0x1b8] sm:$0xf] %vm4432_vm11, %v4333_v50  ;;  %v4331_v63 = vpop.permute.xlu0 %4330  ;;  %v6525_v21 = vld [vmem:[#allocation3 + $0x1a0] sm:$0xff]  ;;  %v11498_v3 = vld [vmem:[#allocation2 + $0x128] sm:$0xf]  ;;  %v6318_v50 = vrot.slane %v6316_v5, 4 }
 0x3bb   : > { %4487 = vst.msk [vmem:[#allocation3 + $0x1b0] sm:$0xf] %vm4432_vm11, %v4331_v63  ;;  %4284 = vrot.lane.b32.xlu1 %v4107_v28, %s8102_s25  ;;  %v7866_v55 = vcombine.low %v6525_v21, %v6526_v32  ;;  %v5641_v28 = vrot.slane %v5639_v56, 4  ;;  %v5313_v63 = vrot.slane %v5312_v40, 4  ;;  %v5655_v60 = vshll.u32 %v11498_v3, 16 }
 0x3bc   : > { %4282 = vrot.lane.b32.xlu0 %v4104_v47, %s8102_s25  ;;  %v6320_v6 = vsel %vm8829_vm7, %v6318_v50, %v6319_v52  ;;  %6467 = vst.msk [vmem:[#allocation3 + $0x204] sm:$0xf] %vm465_vm0, %v6317_v15  ;;  %v4111_v8 = vrot.slane %v4109_v41, 4  ;;  %v5319_v15 = vshrl.u32 %v11467_v31, 16 }
 0x3bd   : > { %v4686_v13 = vpop.permute.xlu1 %4685  ;;  %7277 = vmatmul.mubr.bf16.gmra.mxu1 %v7866_v55  ;;  %v7078_v44 = vpop.f32.mrf.mxu0  ;;  %v4568_v55 = vld [vmem:[#allocation2 + $0x124] sm:$0xf]  ;;  %6468 = vst.msk [vmem:[#allocation3 + $0x20c] sm:$0xf] %vm465_vm0, %v6320_v6  ;;  %v11535_v1 = vrot.slane %v5655_v60, 5 }
 0x3be   : > { %4875 = vst.msk [vmem:[#allocation3 + $0xa8] sm:$0xf] %vm4853_vm12, %v4686_v13  ;;  %v4684_v33 = vpop.permute.xlu0 %4683  ;;  %v7358_v49 = vmul.f32 %v11373_v20, %v7078_v44  ;;  %v4567_v13 = vld [vmem:[#allocation2 + $0x120] sm:$0xf]  ;;  %v5303_v44 = vrot.slane %v5302_v2, 4  ;;  %7920 = vmatprep.mubr.msk.bf16.mxu1 %vm6930_vm14, %v8039_v46 }
 0x3bf   : > { %4874 = vst.msk [vmem:[#allocation3 + $0xa0] sm:$0xf] %vm4853_vm12, %v4684_v33  ;;  %4352 = vrot.lane.b32.xlu1 %v4209_v23, %s8102_s25  ;;  %v7080_v0 = vpop.f32.mrf.mxu0  ;;  %v7214_v16 = vpop.f32.mrf.mxu1  ;;  %v11543_v2 = vld [vmem:[#allocation2 + $0x98] sm:$0xf] }
 0x3c0   : > { %v7435_v62 = vadd.f32 %v11387_v48, %v7358_v49  ;;  %4350 = vrot.lane.b32.xlu0 %v4206_v22, %s8102_s25  ;;  %v7392_v32 = vmul.f32 %v11373_v20, %v7214_v16  ;;  %v5642_v22 = vor.u32 %v5641_v28, %v11399_v58  ;;  %v5318_v0 = vsel %vm8213_vm3, %v5313_v63, %v11508_v30  ;;  %v4957_v16 = vld [vmem:[#allocation2 + $0xa4] sm:$0xf] }
 0x3c1   : > { %v4754_v24 = vpop.permute.xlu1 %4753  ;;  %v7081_v57 = vpop.f32.mrf.mxu0  ;;  %v4211_v28 = vrot.slane %v11537_v19, 5  ;;  %v4112_v50 = vrot.slane %v11543_v2, 5  ;;  %v4108_v63 = vrot.slane %v4106_v17, 4  ;;  %v4210_v17 = vrot.slane %v4208_v54, 4 }
 0x3c2   : > { %v7505_v47 = vmax.f32 %v7435_v62, 0.0  ;;  %4909 = vst.msk [vmem:[#allocation3 + $0x1b8] sm:$0xf] %vm4853_vm12, %v4754_v24  ;;  %v4752_v27 = vpop.permute.xlu0 %4751  ;;  %v7359_v21 = vmul.f32 %v11373_v20, %v7081_v57  ;;  %v7216_v4 = vpop.f32.mrf.mxu1  ;;  %v7469_v9 = vadd.f32 %v11387_v48, %v7392_v32  ;;  %v5308_v62 = vsel %vm8213_vm3, %v5303_v44, %v11453_v38  ;;  %v4991_v44 = vld [vmem:[#allocation2 + $0x12c] sm:$0xf] }
 0x3c3   : > { %4908 = vst.msk [vmem:[#allocation3 + $0x1b0] sm:$0xf] %vm4853_vm12, %v4752_v27  ;;  %4705 = vrot.lane.b32.xlu1 %v4534_v26, %s8103_s8  ;;  %v7083_v56 = vpop.f32.mrf.mxu0  ;;  %v5653_v26 = vrot.slane %v5652_v14, 4  ;;  %v5329_v4 = vshrl.u32 %v4957_v16, 16  ;;  %v4213_v14 = vrot.slane %v4211_v28, 4  ;;  %v4113_v39 = vsel %vm8829_vm7, %v4111_v8, %v4112_v50 }
 0x3c4   : > { %7575 = vst [vmem:[%s11409_s15 + $0x10] sm:$0xff] %v7505_v47  ;;  %4703 = vrot.lane.b32.xlu0 %v4533_v18, %s8103_s8  ;;  %v7436_v23 = vadd.f32 %v11387_v48, %v7359_v21  ;;  %v7217_v59 = vpop.f32.mrf.mxu1  ;;  %v7539_v11 = vmax.f32 %v7469_v9, 0.0  ;;  %v5643_v18 = vrot.slane %v5642_v22, 4  ;;  %v11555_v47 = vld [vmem:[#allocation2 + $0x120] sm:$0xf]  ;;  %v5325_v21 = vshll.u32 %v4957_v16, 16 }
 0x3c5   : > { %v5742_v12 = vpop.permute.xlu1 %5741  ;;  %v7393_v33 = vmul.f32 %v11373_v20, %v7217_v59  ;;  %v5658_v38 = vsel %vm8213_vm3, %v5653_v26, %v11535_v1  ;;  %v8037_v56 = vld [vmem:[#allocation3 + $0xa4] ss:$8 sps:$4 sm:$0xff]   ;;  %v11583_v54 = vrot.slane %v5319_v15, 4  ;;  %v5665_v19 = vshll.u32 %v4991_v44, 16 }
 0x3c6   : > { %5931 = vst.msk [vmem:[#allocation3 + $0xa8] sm:$0xf] %vm5909_vm13, %v5742_v12  ;;  %v5740_v49 = vpop.permute.xlu0 %5739  ;;  %v7506_v40 = vmax.f32 %v7436_v23, 0.0  ;;  %v7219_v43 = vpop.f32.mrf.mxu1  ;;  %7609 = vst [vmem:[%s11409_s15 + $0x120] sm:$0xff] %v7539_v11  ;;  %v5648_v27 = vsel %vm8213_vm3, %v5643_v18, %v11492_v35  ;;  %v4214_v35 = vrot.slane %v11555_v47, 5  ;;  %7903 = vmatprep.mubr.msk.bf16.mxu0 %vm6930_vm14, %v8037_v56  ;;  %v4110_v23 = vsel %vm8829_vm7, %v4108_v63, %v4109_v41 }
 0x3c7   : > { %5930 = vst.msk [vmem:[#allocation3 + $0xa0] sm:$0xf] %vm5909_vm13, %v5740_v49  ;;  %4773 = vrot.lane.b32.xlu1 %v4568_v55, %s8103_s8  ;;  %v7470_v58 = vadd.f32 %v11387_v48, %v7393_v33  ;;  %v11577_v59 = vrot.slane %v5325_v21, 5  ;;  %v6013_v33 = vld [vmem:[#allocation2 + $0xa4] sm:$0xf]  ;;  %v5659_v49 = vshrl.u32 %v11498_v3, 16  ;;  %v4212_v3 = vsel %vm8829_vm7, %v4210_v17, %v4211_v28 }
 0x3c8   : > { %4771 = vrot.lane.b32.xlu0 %v4567_v13, %s8103_s8  ;;  %7576 = vst [vmem:[%s11409_s15 + $0x18] sm:$0xff] %v7506_v40  ;;  %v11579_v13 = vrot.slane %v5329_v4, 4  ;;  %v6220_v26 = vrot.slane %v6013_v33, 5  ;;  %v6219_v16 = vrot.slane %v6217_v37, 4  ;;  %v5322_v21 = vor.u32 %v11583_v54, %v11508_v30  ;;  %v6047_v4 = vld [vmem:[#allocation2 + $0x12c] sm:$0xf] }
 0x3c9   : > { %v5810_v5 = vpop.permute.xlu1 %5809  ;;  %v7540_v10 = vmax.f32 %v7470_v58, 0.0  ;;  %v11592_v58 = vld [vmem:[#allocation2 + $0xa8] sm:$0xf]  ;;  %v4536_v15 = vld [vmem:[#allocation2 + $0xa4] sm:$0xf] }
 0x3ca   : > { %5965 = vst.msk [vmem:[#allocation3 + $0x1b8] sm:$0xf] %vm5909_vm13, %v5810_v5  ;;  %v5808_v24 = vpop.permute.xlu0 %5807  ;;  %v5669_v5 = vshrl.u32 %v4991_v44, 16  ;;  %v5335_v63 = vshll.u32 %v11592_v58, 16  ;;  %v11630_v44 = vld [vmem:[#allocation2 + $0x130] sm:$0xf] }
 0x3cb   : > { %5964 = vst.msk [vmem:[#allocation3 + $0x1b0] sm:$0xf] %vm5909_vm13, %v5808_v24  ;;  %5761 = vrot.lane.b32.xlu1 %v5318_v0, %s8104_s9  ;;  %7610 = vst [vmem:[%s11409_s15 + $0x128] sm:$0xff] %v7540_v10  ;;  %v4215_v0 = vsel %vm8829_vm7, %v4213_v14, %v4214_v35  ;;  %v5332_v24 = vor.u32 %v11579_v13, %v11577_v59 }
 0x3cc   : > { %5759 = vrot.lane.b32.xlu0 %v5308_v62, %s8104_s9  ;;  %v11599_v62 = vld [vmem:[#allocation2 + $0xa8] sm:$0xf]  ;;  %v5671_v17 = vrot.slane %v5669_v5, 4 }
 0x3cd   : > { %v4269_v32 = vpop.permute.xlu1 %4268  ;;  %v6494_v57 = vld [vmem:[#allocation3 + $0xa8] sm:$0xff]  ;;  %v6223_v8 = vrot.slane %v11599_v62, 5 }
 0x3ce   : > { %4456 = vst.msk [vmem:[#allocation3 + $0xb8] sm:$0xf] %vm4432_vm11, %v4269_v32  ;;  %v4267_v6 = vpop.permute.xlu0 %4266  ;;  %v6493_v9 = vld [vmem:[#allocation3 + $0xa0] sm:$0xff] }
 0x3cf   : > { %4455 = vst.msk [vmem:[#allocation3 + $0xb0] sm:$0xf] %vm4432_vm11, %v4267_v6  ;;  %5829 = vrot.lane.b32.xlu1 %v5658_v38, %s8104_s9  ;;  %v7834_v55 = vcombine.low %v6493_v9, %v6494_v57  ;;  %v6222_v38 = vrot.slane %v6220_v26, 4  ;;  %v4535_v6 = vld [vmem:[#allocation2 + $0xa0] sm:$0xf]  ;;  %v6221_v9 = vsel %vm8829_vm7, %v6219_v16, %v6220_v26 }
 0x3d0   : > { %5827 = vrot.lane.b32.xlu0 %v5648_v27, %s8104_s9  ;;  %6435 = vst.msk [vmem:[#allocation3 + $0x104] sm:$0xf] %vm465_vm0, %v6221_v9  ;;  %v4570_v26 = vld [vmem:[#allocation2 + $0x12c] sm:$0xf]  ;;  %v3904_v16 = vld [vmem:[#allocation2 + $0x9c] sm:$0xf] }
 0x3d1   : > { %v4337_v31 = vpop.permute.xlu1 %4336  ;;  %v7086_v60 = vpop.f32.mrf.mxu0  ;;  %7149 = vmatmul.mubr.bf16.gmra.mxu0 %v7834_v55  ;;  %v6528_v12 = vld [vmem:[#allocation3 + $0x1b8] sm:$0xff]  ;;  %v6224_v56 = vsel %vm8829_vm7, %v6222_v38, %v6223_v8  ;;  %v6322_v55 = vrot.slane %v6047_v4, 5 }
 0x3d2   : > { %4490 = vst.msk [vmem:[#allocation3 + $0x1c8] sm:$0xf] %vm4432_vm11, %v4337_v31  ;;  %v4335_v22 = vpop.permute.xlu0 %4334  ;;  %v7360_v7 = vmul.f32 %v11373_v20, %v7086_v60  ;;  %v6527_v11 = vld [vmem:[#allocation3 + $0x1b0] sm:$0xff]  ;;  %v5661_v31 = vrot.slane %v5659_v49, 4 }
 0x3d3   : > { %4489 = vst.msk [vmem:[#allocation3 + $0x1c0] sm:$0xf] %vm4432_vm11, %v4335_v22  ;;  %4288 = vrot.lane.b32.xlu1 %v4113_v39, %s8102_s25  ;;  %v7088_v40 = vpop.f32.mrf.mxu0  ;;  %v7868_v43 = vcombine.low %v6527_v11, %v6528_v12  ;;  %v11623_v39 = vrot.slane %v5665_v19, 5  ;;  %v11627_v60 = vld [vmem:[#allocation2 + $0x130] sm:$0xf]  ;;  %v6321_v22 = vrot.slane %v6319_v52, 4 }
 0x3d4   : > { %v7437_v41 = vadd.f32 %v11387_v48, %v7360_v7  ;;  %4286 = vrot.lane.b32.xlu0 %v4110_v23, %s8102_s25  ;;  %6436 = vst.msk [vmem:[#allocation3 + $0x10c] sm:$0xf] %vm465_vm0, %v6224_v56  ;;  %v6324_v7 = vrot.slane %v6322_v55, 4  ;;  %v6325_v11 = vrot.slane %v11627_v60, 5  ;;  %v5675_v19 = vshll.u32 %v11630_v44, 16 }
 0x3d5   : > { %v4690_v18 = vpop.permute.xlu1 %4689  ;;  %v7222_v10 = vpop.f32.mrf.mxu1  ;;  %7285 = vmatmul.mubr.bf16.gmra.mxu1 %v7868_v43  ;;  %v5333_v43 = vrot.slane %v5332_v24, 4  ;;  %v6323_v34 = vsel %vm8829_vm7, %v6321_v22, %v6322_v55  ;;  %v5662_v24 = vor.u32 %v5661_v31, %v11535_v1  ;;  %v4115_v1 = vrot.slane %v3904_v16, 5 }
 0x3d6   : > { %v7507_v32 = vmax.f32 %v7437_v41, 0.0  ;;  %4877 = vst.msk [vmem:[#allocation3 + $0xb8] sm:$0xf] %vm4853_vm12, %v4690_v18  ;;  %v7394_v28 = vmul.f32 %v11373_v20, %v7222_v10  ;;  %v4688_v27 = vpop.permute.xlu0 %4687  ;;  %v7089_v57 = vpop.f32.mrf.mxu0  ;;  %v6326_v52 = vsel %vm8829_vm7, %v6324_v7, %v6325_v11  ;;  %v11648_v41 = vrot.slane %v5335_v63, 5  ;;  %v4569_v18 = vld [vmem:[#allocation2 + $0x128] sm:$0xf] }
 0x3d7   : > { %4876 = vst.msk [vmem:[#allocation3 + $0xb0] sm:$0xf] %vm4853_vm12, %v4688_v27  ;;  %v7361_v36 = vmul.f32 %v11373_v20, %v7089_v57  ;;  %4356 = vrot.lane.b32.xlu1 %v4215_v0, %s8102_s25  ;;  %v7224_v37 = vpop.f32.mrf.mxu1  ;;  %v5323_v10 = vrot.slane %v5322_v21, 4  ;;  %v11664_v57 = vrot.slane %v5675_v19, 5  ;;  %v5663_v4 = vrot.slane %v5662_v24, 4 }
 0x3d8   : > { %7577 = vst [vmem:[%s11409_s15 + $0x20] sm:$0xff] %v7507_v32  ;;  %v7471_v30 = vadd.f32 %v11387_v48, %v7394_v28  ;;  %4354 = vrot.lane.b32.xlu0 %v4212_v3, %s8102_s25  ;;  %v7091_v14 = vpop.f32.mrf.mxu0  ;;  %v5672_v3 = vor.u32 %v5671_v17, %v11623_v39  ;;  %6469 = vst.msk [vmem:[#allocation3 + $0x214] sm:$0xf] %vm465_vm0, %v6323_v34  ;;  %v5338_v28 = vsel %vm8213_vm3, %v5333_v43, %v11648_v41  ;;  %v3939_v17 = vld [vmem:[#allocation2 + $0x128] sm:$0x1] }
 0x3d9   : > { %v7438_v23 = vadd.f32 %v11387_v48, %v7361_v36  ;;  %v4758_v12 = vpop.permute.xlu1 %4757  ;;  %v7225_v13 = vpop.f32.mrf.mxu1  ;;  %6470 = vst.msk [vmem:[#allocation3 + $0x21c] sm:$0xf] %vm465_vm0, %v6326_v52  ;;  %v5328_v21 = vsel %vm8213_vm3, %v5323_v10, %v11577_v59  ;;  %v11669_v36 = vld [vmem:[#allocation2 + $0x124] sm:$0xf]  ;;  %v4117_v9 = vrot.slane %v4115_v1, 4  ;;  %v5668_v55 = vsel %vm8213_vm3, %v5663_v4, %v11623_v39 }
 0x3da   : > { %v7541_v46 = vmax.f32 %v7471_v30, 0.0  ;;  %4911 = vst.msk [vmem:[#allocation3 + $0x1c8] sm:$0xf] %vm4853_vm12, %v4758_v12  ;;  %v7395_v54 = vmul.f32 %v11373_v20, %v7225_v13  ;;  %v4756_v33 = vpop.permute.xlu0 %4755  ;;  %v5673_v27 = vrot.slane %v5672_v3, 4  ;;  %v4217_v59 = vrot.slane %v11669_v36, 5 }
 0x3db   : > { %v7508_v49 = vmax.f32 %v7438_v23, 0.0  ;;  %4910 = vst.msk [vmem:[#allocation3 + $0x1c0] sm:$0xf] %vm4853_vm12, %v4756_v33  ;;  %4709 = vrot.lane.b32.xlu1 %v4536_v15, %s8103_s8  ;;  %v7227_v40 = vpop.f32.mrf.mxu1  ;;  %v4959_v15 = vld [vmem:[#allocation2 + $0xac] sm:$0xf]  ;;  %v4114_v14 = vrot.slane %v4112_v50, 4  ;;  %v4119_v2 = vsel %vm8829_vm7, %v4117_v9, %v4118_v61 }
 0x3dc   : > { %7611 = vst [vmem:[%s11409_s15 + $0x130] sm:$0xff] %v7541_v46  ;;  %v7472_v0 = vadd.f32 %v11387_v48, %v7395_v54  ;;  %4707 = vrot.lane.b32.xlu0 %v4535_v6, %s8103_s8  ;;  %v5678_v6 = vsel %vm8213_vm3, %v5673_v27, %v11664_v57  ;;  %v5345_v31 = vshll.u32 %v4959_v15, 16  ;;  %v5349_v23 = vshrl.u32 %v4959_v15, 16  ;;  %v8041_v7 = vld [vmem:[#allocation3 + $0xb4] ss:$8 sps:$4 sm:$0xff]  }
 0x3dd   : > { %7578 = vst [vmem:[%s11409_s15 + $0x28] sm:$0xff] %v7508_v49  ;;  %v5746_v5 = vpop.permute.xlu1 %5745  ;;  %v5339_v12 = vshrl.u32 %v11592_v58, 16  ;;  %7904 = vmatprep.mubr.msk.bf16.mxu0 %vm6930_vm14, %v8041_v7  ;;  %v4219_v50 = vrot.slane %v4217_v59, 4  ;;  %v4220_v58 = vrot.slane %v3939_v17, 5  ;;  %v4116_v33 = vsel %vm8829_vm7, %v4114_v14, %v4115_v1  ;;  %v6015_v19 = vld [vmem:[#allocation2 + $0xac] sm:$0xf] }
 0x3de   : > { %v7542_v38 = vmax.f32 %v7472_v0, 0.0  ;;  %5933 = vst.msk [vmem:[#allocation3 + $0xb8] sm:$0xf] %vm5909_vm13, %v5746_v5  ;;  %v5744_v32 = vpop.permute.xlu0 %5743  ;;  %v4216_v40 = vrot.slane %v4214_v35, 4  ;;  %v11698_v43 = vrot.slane %v5345_v31, 5  ;;  %v11700_v34 = vrot.slane %v5349_v23, 4 }
 0x3df   : > { %5932 = vst.msk [vmem:[#allocation3 + $0xb0] sm:$0xf] %vm5909_vm13, %v5744_v32  ;;  %4777 = vrot.lane.b32.xlu1 %v4570_v26, %s8103_s8  ;;  %v8043_v26 = vld [vmem:[#allocation3 + $0x1c4] ss:$8 sps:$4 sm:$0xff]   ;;  %v11704_v3 = vrot.slane %v5339_v12, 4  ;;  %v5679_v5 = vshrl.u32 %v11630_v44, 16  ;;  %v4221_v24 = vsel %vm8829_vm7, %v4219_v50, %v4220_v58 }
 0x3e0   : > { %7612 = vst [vmem:[%s11409_s15 + $0x138] sm:$0xff] %v7542_v38  ;;  %4775 = vrot.lane.b32.xlu0 %v4569_v18, %s8103_s8  ;;  %v6226_v18 = vrot.slane %v6015_v19, 5  ;;  %7921 = vmatprep.mubr.msk.bf16.mxu1 %vm6930_vm14, %v8043_v26  ;;  %v5685_v16 = vshll.u32 %v4993_v42, 16  ;;  %v5689_v38 = vshrl.u32 %v4993_v42, 16  ;;  %v6225_v27 = vrot.slane %v6223_v8, 4 }
 0x3e1   : > { %v5814_v63 = vpop.permute.xlu1 %5813  ;;  %v5342_v15 = vor.u32 %v11704_v3, %v11648_v41  ;;  %v4538_v9 = vld [vmem:[#allocation2 + $0xac] sm:$0xf]  ;;  %v5681_v23 = vrot.slane %v5679_v5, 4  ;;  %v6050_v12 = vld [vmem:[#allocation2 + $0x138] sm:$0x1]  ;;  %v6327_v7 = vrot.slane %v6325_v11, 4 }
 0x3e2   : > { %5967 = vst.msk [vmem:[#allocation3 + $0x1c8] sm:$0xf] %vm5909_vm13, %v5814_v63  ;;  %v5812_v37 = vpop.permute.xlu0 %5811  ;;  %v6228_v1 = vrot.slane %v6226_v18, 4  ;;  %v11736_v17 = vrot.slane %v5685_v16, 5  ;;  %v5691_v31 = vrot.slane %v5689_v38, 4 }
 0x3e3   : > { %5966 = vst.msk [vmem:[#allocation3 + $0x1c0] sm:$0xf] %vm5909_vm13, %v5812_v37  ;;  %5765 = vrot.lane.b32.xlu1 %v5338_v28, %s8104_s9  ;;  %v4218_v28 = vsel %vm8829_vm7, %v4216_v40, %v4217_v59  ;;  %v5352_v37 = vor.u32 %v11700_v34, %v11698_v43  ;;  %v4537_v59 = vld [vmem:[#allocation2 + $0xa8] sm:$0xf]  ;;  %v4572_v40 = vld [vmem:[#allocation2 + $0x134] sm:$0xf]  ;;  %v5682_v26 = vor.u32 %v5681_v23, %v11664_v57 }
 0x3e4   : > { %5763 = vrot.lane.b32.xlu0 %v5328_v21, %s8104_s9  ;;  %v5692_v42 = vor.u32 %v5691_v31, %v11736_v17  ;;  %v5343_v53 = vrot.slane %v5342_v15, 4 }
 0x3e5   : > { %v4273_v56 = vpop.permute.xlu1 %4272  ;;  %v6496_v30 = vld [vmem:[#allocation3 + $0xb8] sm:$0xff]  ;;  %v5353_v34 = vrot.slane %v5352_v37, 4 }
 0x3e6   : > { %4458 = vst.msk [vmem:[#allocation3 + $0xc8] sm:$0xf] %vm4432_vm11, %v4273_v56  ;;  %v4271_v13 = vpop.permute.xlu0 %4270  ;;  %v6495_v22 = vld [vmem:[#allocation3 + $0xb0] sm:$0xff]  ;;  %v6227_v56 = vsel %vm8829_vm7, %v6225_v27, %v6226_v18  ;;  %v5348_v57 = vsel %vm8213_vm3, %v5343_v53, %v11698_v43 }
 0x3e7   : > { %4457 = vst.msk [vmem:[#allocation3 + $0xc0] sm:$0xf] %vm4432_vm11, %v4271_v13  ;;  %5833 = vrot.lane.b32.xlu1 %v5678_v6, %s8104_s9  ;;  %v7836_v46 = vcombine.low %v6495_v22, %v6496_v30  ;;  %v6049_v6 = vld [vmem:[#allocation2 + $0x134] sm:$0xf]  ;;  %v4994_v22 = vld [vmem:[#allocation2 + $0x138] sm:$0x1]  ;;  %v5358_v5 = vsel %vm8213_vm3, %v5353_v34, %v9990_v25 }
 0x3e8   : > { %5831 = vrot.lane.b32.xlu0 %v5668_v55, %s8104_s9  ;;  %v6230_v55 = vsel %vm8829_vm7, %v6228_v1, %v6229_v45  ;;  %v6328_v30 = vrot.slane %v6049_v6, 5  ;;  %6437 = vst.msk [vmem:[#allocation3 + $0x114] sm:$0xf] %vm465_vm0, %v6227_v56  ;;  %v8047_v37 = vld [vmem:[#allocation3 + $0x1d4] ss:$8 sps:$4 sm:$0xff]  }
 0x3e9   : > { %v4341_v39 = vpop.permute.xlu1 %4340  ;;  %v7094_v54 = vpop.f32.mrf.mxu0  ;;  %7157 = vmatmul.mubr.bf16.gmra.mxu0 %v7836_v46  ;;  %v6530_v49 = vld [vmem:[#allocation3 + $0x1c8] sm:$0xff]  ;;  %6438 = vst.msk [vmem:[#allocation3 + $0x11c] sm:$0xf] %vm465_vm0, %v6230_v55  ;;  %v8049_v34 = vld [vmem:[#allocation3 + $0xd4] ss:$8 sps:$4 sm:$0xff]  }
 0x3ea   : > { %4492 = vst.msk [vmem:[#allocation3 + $0x1d8] sm:$0xf] %vm4432_vm11, %v4341_v39  ;;  %v4339_v61 = vpop.permute.xlu0 %4338  ;;  %v7362_v52 = vmul.f32 %v11373_v20, %v7094_v54  ;;  %v6529_v0 = vld [vmem:[#allocation3 + $0x1c0] sm:$0xff]  ;;  %v6330_v46 = vrot.slane %v6328_v30, 4 }
 0x3eb   : > { %4491 = vst.msk [vmem:[#allocation3 + $0x1d0] sm:$0xf] %vm4432_vm11, %v4339_v61  ;;  %4292 = vrot.lane.b32.xlu1 %v4119_v2, %s8102_s25  ;;  %v7096_v47 = vpop.f32.mrf.mxu0  ;;  %v7870_v35 = vcombine.low %v6529_v0, %v6530_v49  ;;  %v6331_v2 = vrot.slane %v6050_v12, 5  ;;  %v6329_v49 = vsel %vm8829_vm7, %v6327_v7, %v6328_v30  ;;  %v5695_v61 = vshll.u32 %v4994_v22, 16  ;;  %v4571_v0 = vld [vmem:[#allocation2 + $0x130] sm:$0xf] }
 0x3ec   : > { %v7439_v10 = vadd.f32 %v11387_v48, %v7362_v52  ;;  %4290 = vrot.lane.b32.xlu0 %v4116_v33, %s8102_s25  ;;  %6471 = vst.msk [vmem:[#allocation3 + $0x224] sm:$0xf] %vm465_vm0, %v6329_v49  ;;  %v5693_v47 = vrot.slane %v5692_v42, 4 }
 0x3ed   : > { %v4694_v32 = vpop.permute.xlu1 %4693  ;;  %v7230_v44 = vpop.f32.mrf.mxu1  ;;  %7293 = vmatmul.mubr.bf16.gmra.mxu1 %v7870_v35  ;;  %v6332_v60 = vsel %vm8829_vm7, %v6330_v46, %v6331_v2  ;;  %v5697_v35 = vrot.slane %v5695_v61, 5 }
 0x3ee   : > { %v7509_v63 = vmax.f32 %v7439_v10, 0.0  ;;  %4879 = vst.msk [vmem:[#allocation3 + $0xc8] sm:$0xf] %vm4853_vm12, %v4694_v32  ;;  %v7396_v21 = vmul.f32 %v11373_v20, %v7230_v44  ;;  %v4692_v4 = vpop.permute.xlu0 %4691  ;;  %v7097_v36 = vpop.f32.mrf.mxu0  ;;  %v5683_v10 = vrot.slane %v5682_v26, 4  ;;  %7922 = vmatprep.mubr.msk.bf16.mxu1 %vm6930_vm14, %v8047_v37 }
 0x3ef   : > { %4878 = vst.msk [vmem:[#allocation3 + $0xc0] sm:$0xf] %vm4853_vm12, %v4692_v4  ;;  %v7363_v62 = vmul.f32 %v11373_v20, %v7097_v36  ;;  %4360 = vrot.lane.b32.xlu1 %v4221_v24, %s8102_s25  ;;  %v7232_v8 = vpop.f32.mrf.mxu1  ;;  %v5698_v25 = vsel %vm8213_vm3, %v5693_v47, %v5697_v35 }
 0x3f0   : > { %7579 = vst [vmem:[%s11409_s15 + $0x30] sm:$0xff] %v7509_v63  ;;  %v7473_v41 = vadd.f32 %v11387_v48, %v7396_v21  ;;  %4358 = vrot.lane.b32.xlu0 %v4218_v28, %s8102_s25  ;;  %v7099_v14 = vpop.f32.mrf.mxu0  ;;  %6472 = vst.msk [vmem:[#allocation3 + $0x22c] sm:$0xf] %vm465_vm0, %v6332_v60  ;;  %v5688_v38 = vsel %vm8213_vm3, %v5683_v10, %v11736_v17  ;;  %v8045_v28 = vld [vmem:[#allocation3 + $0xc4] ss:$8 sps:$4 sm:$0xff]  }
 0x3f1   : > { %v7440_v29 = vadd.f32 %v11387_v48, %v7363_v62  ;;  %v4762_v13 = vpop.permute.xlu1 %4761  ;;  %v7233_v45 = vpop.f32.mrf.mxu1  ;;  %7905 = vmatprep.mubr.msk.bf16.mxu0 %vm6930_vm14, %v8045_v28 }
 0x3f2   : > { %v7543_v50 = vmax.f32 %v7473_v41, 0.0  ;;  %4913 = vst.msk [vmem:[#allocation3 + $0x1d8] sm:$0xf] %vm4853_vm12, %v4762_v13  ;;  %v7397_v58 = vmul.f32 %v11373_v20, %v7233_v45  ;;  %v4760_v39 = vpop.permute.xlu0 %4759  ;;  %v11800_v45 = vld [vmem:[%s12043_s3] ss:$0 sm:$0xff] }
 0x3f3   : > { %v7510_v54 = vmax.f32 %v7440_v29, 0.0  ;;  %4912 = vst.msk [vmem:[#allocation3 + $0x1d0] sm:$0xf] %vm4853_vm12, %v4760_v39  ;;  %4713 = vrot.lane.b32.xlu1 %v4538_v9, %s8103_s8  ;;  %v7235_v33 = vpop.f32.mrf.mxu1 }
 0x3f4   : > { %7613 = vst [vmem:[%s11409_s15 + $0x140] sm:$0xff] %v7543_v50  ;;  %v7474_v11 = vadd.f32 %v11387_v48, %v7397_v58  ;;  %4711 = vrot.lane.b32.xlu0 %v4537_v59, %s8103_s8 }
 0x3f5   : > { %7580 = vst [vmem:[%s11409_s15 + $0x38] sm:$0xff] %v7510_v54  ;;  %v5750_v52 = vpop.permute.xlu1 %5749 }
 0x3f6   : > { %v7544_v3 = vmax.f32 %v7474_v11, 0.0  ;;  %5935 = vst.msk [vmem:[#allocation3 + $0xc8] sm:$0xf] %vm5909_vm13, %v5750_v52  ;;  %v5748_v19 = vpop.permute.xlu0 %5747 }
 0x3f7   : > { %5934 = vst.msk [vmem:[#allocation3 + $0xc0] sm:$0xf] %vm5909_vm13, %v5748_v19  ;;  %4781 = vrot.lane.b32.xlu1 %v4572_v40, %s8103_s8  ;;  %v8051_v19 = vld [vmem:[#allocation3 + $0x1e4] ss:$8 sps:$4 sm:$0xff]  }
 0x3f8   : > { %7614 = vst [vmem:[%s11409_s15 + $0x148] sm:$0xff] %v7544_v3  ;;  %4779 = vrot.lane.b32.xlu0 %v4571_v0, %s8103_s8 }
 0x3f9   : > { %v5818_v18 = vpop.permute.xlu1 %5817 }
 0x3fa   : > { %5969 = vst.msk [vmem:[#allocation3 + $0x1d8] sm:$0xf] %vm5909_vm13, %v5818_v18  ;;  %v5816_v24 = vpop.permute.xlu0 %5815 }
 0x3fb   : > { %5968 = vst.msk [vmem:[#allocation3 + $0x1d0] sm:$0xf] %vm5909_vm13, %v5816_v24  ;;  %5769 = vrot.lane.b32.xlu1 %v5358_v5, %s8104_s9 }
 0x3fc   : > { %5767 = vrot.lane.b32.xlu0 %v5348_v57, %s8104_s9 }
 0x3fd   : > { %v4277_v16 = vpop.permute.xlu1 %4276  ;;  %v6498_v32 = vld [vmem:[#allocation3 + $0xc8] sm:$0xff] }
 0x3fe   : > { %4460 = vst.msk [vmem:[#allocation3 + $0xd8] sm:$0xf] %vm4432_vm11, %v4277_v16  ;;  %v4275_v43 = vpop.permute.xlu0 %4274  ;;  %v6497_v44 = vld [vmem:[#allocation3 + $0xc0] sm:$0xff] }
 0x3ff   : > { %4459 = vst.msk [vmem:[#allocation3 + $0xd0] sm:$0xf] %vm4432_vm11, %v4275_v43  ;;  %5837 = vrot.lane.b32.xlu1 %v5698_v25, %s8104_s9  ;;  %v7838_v27 = vcombine.low %v6497_v44, %v6498_v32 }
 0x400   : > { %5835 = vrot.lane.b32.xlu0 %v5688_v38, %s8104_s9 }
 0x401   : > { %v4345_v1 = vpop.permute.xlu1 %4344  ;;  %v7102_v63 = vpop.f32.mrf.mxu0  ;;  %7165 = vmatmul.mubr.bf16.gmra.mxu0 %v7838_v27  ;;  %v6532_v51 = vld [vmem:[#allocation3 + $0x1d8] sm:$0xff] }
 0x402   : > { %4494 = vst.msk [vmem:[#allocation3 + $0x1e8] sm:$0xf] %vm4432_vm11, %v4345_v1  ;;  %v4343_v21 = vpop.permute.xlu0 %4342  ;;  %v7364_v4 = vmul.f32 %v11373_v20, %v7102_v63  ;;  %v6531_v36 = vld [vmem:[#allocation3 + $0x1d0] sm:$0xff]  ;;  %7906 = vmatprep.mubr.msk.bf16.mxu0 %vm6930_vm14, %v8049_v34 }
 0x403   : > { %4493 = vst.msk [vmem:[#allocation3 + $0x1e0] sm:$0xf] %vm4432_vm11, %v4343_v21  ;;  %v7104_v15 = vpop.f32.mrf.mxu0  ;;  %v7872_v6 = vcombine.low %v6531_v36, %v6532_v51 }
 0x404   : > { %v7441_v62 = vadd.f32 %v11387_v48, %v7364_v4 }
 0x405   : > { %v4698_v8 = vpop.permute.xlu1 %4697  ;;  %v7238_v9 = vpop.f32.mrf.mxu1  ;;  %7301 = vmatmul.mubr.bf16.gmra.mxu1 %v7872_v6 }
 0x406   : > { %v7511_v59 = vmax.f32 %v7441_v62, 0.0  ;;  %4881 = vst.msk [vmem:[#allocation3 + $0xd8] sm:$0xf] %vm4853_vm12, %v4698_v8  ;;  %v7398_v56 = vmul.f32 %v11373_v20, %v7238_v9  ;;  %v4696_v55 = vpop.permute.xlu0 %4695  ;;  %v7105_v30 = vpop.f32.mrf.mxu0  ;;  %7923 = vmatprep.mubr.msk.bf16.mxu1 %vm6930_vm14, %v8051_v19 }
 0x407   : > { %4880 = vst.msk [vmem:[#allocation3 + $0xd0] sm:$0xf] %vm4853_vm12, %v4696_v55  ;;  %v7365_v41 = vmul.f32 %v11373_v20, %v7105_v30  ;;  %v7240_v14 = vpop.f32.mrf.mxu1 }
 0x408   : > { %7581 = vst [vmem:[%s11409_s15 + $0x40] sm:$0xff] %v7511_v59  ;;  %v7475_v17 = vadd.f32 %v11387_v48, %v7398_v56  ;;  %v7107_v31 = vpop.f32.mrf.mxu0 }
 0x409   : > { %v7442_v23 = vadd.f32 %v11387_v48, %v7365_v41  ;;  %v4766_v12 = vpop.permute.xlu1 %4765  ;;  %v7241_v29 = vpop.f32.mrf.mxu1  ;;  %v11808_v48 = vld [vmem:[%s12044_s4] ss:$0 sm:$0xff]  ;;  %v8053_v41 = vld [vmem:[#allocation3 + $0xe4] ss:$8 sps:$4 sm:$0xff]  }
 0x40a   : > { %v7545_v13 = vmax.f32 %v7475_v17, 0.0  ;;  %4915 = vst.msk [vmem:[#allocation3 + $0x1e8] sm:$0xf] %vm4853_vm12, %v4766_v12  ;;  %v7399_v20 = vmul.f32 %v11800_v45, %v7241_v29  ;;  %v4764_v22 = vpop.permute.xlu0 %4763 }
 0x40b   : > { %v7512_v7 = vmax.f32 %v7442_v23, 0.0  ;;  %4914 = vst.msk [vmem:[#allocation3 + $0x1e0] sm:$0xf] %vm4853_vm12, %v4764_v22  ;;  %v7243_v46 = vpop.f32.mrf.mxu1 }
 0x40c   : > { %7615 = vst [vmem:[%s11409_s15 + $0x150] sm:$0xff] %v7545_v13  ;;  %v7476_v2 = vadd.f32 %v11808_v48, %v7399_v20  ;;  %v8055_v20 = vld [vmem:[#allocation3 + $0x1f4] ss:$8 sps:$4 sm:$0xff]  }
 0x40d   : > { %7582 = vst [vmem:[%s11409_s15 + $0x48] sm:$0xff] %v7512_v7  ;;  %v5754_v50 = vpop.permute.xlu1 %5753 }
 0x40e   : > { %v7546_v58 = vmax.f32 %v7476_v2, 0.0  ;;  %5937 = vst.msk [vmem:[#allocation3 + $0xd8] sm:$0xf] %vm5909_vm13, %v5754_v50  ;;  %v5752_v39 = vpop.permute.xlu0 %5751 }
 0x40f   : > { %5936 = vst.msk [vmem:[#allocation3 + $0xd0] sm:$0xf] %vm5909_vm13, %v5752_v39 }
 0x410   : > { %7616 = vst [vmem:[%s11409_s15 + $0x158] sm:$0xff] %v7546_v58 }
 0x411   : > { %v5822_v54 = vpop.permute.xlu1 %5821 }
 0x412   : > { %5971 = vst.msk [vmem:[#allocation3 + $0x1e8] sm:$0xf] %vm5909_vm13, %v5822_v54  ;;  %v5820_v33 = vpop.permute.xlu0 %5819 }
 0x413   : > { %5970 = vst.msk [vmem:[#allocation3 + $0x1e0] sm:$0xf] %vm5909_vm13, %v5820_v33 }
 0x415   : > { %v4281_v49 = vpop.permute.xlu1 %4280  ;;  %v6500_v60 = vld [vmem:[#allocation3 + $0xd8] sm:$0xff] }
 0x416   : > { %4462 = vst.msk [vmem:[#allocation3 + $0xe8] sm:$0xf] %vm4432_vm11, %v4281_v49  ;;  %v4279_v11 = vpop.permute.xlu0 %4278  ;;  %v6499_v40 = vld [vmem:[#allocation3 + $0xd0] sm:$0xff] }
 0x417   : > { %4461 = vst.msk [vmem:[#allocation3 + $0xe0] sm:$0xf] %vm4432_vm11, %v4279_v11  ;;  %v7840_v42 = vcombine.low %v6499_v40, %v6500_v60 }
 0x419   : > { %v4349_v61 = vpop.permute.xlu1 %4348  ;;  %v7110_v52 = vpop.f32.mrf.mxu0  ;;  %7173 = vmatmul.mubr.bf16.gmra.mxu0 %v7840_v42  ;;  %v6534_v0 = vld [vmem:[#allocation3 + $0x1e8] sm:$0xff] }
 0x41a   : > { %4496 = vst.msk [vmem:[#allocation3 + $0x1f8] sm:$0xf] %vm4432_vm11, %v4349_v61  ;;  %v4347_v53 = vpop.permute.xlu0 %4346  ;;  %v7366_v26 = vmul.f32 %v11800_v45, %v7110_v52  ;;  %v6533_v3 = vld [vmem:[#allocation3 + $0x1e0] sm:$0xff]  ;;  %7907 = vmatprep.mubr.msk.bf16.mxu0 %vm6930_vm14, %v8053_v41 }
 0x41b   : > { %4495 = vst.msk [vmem:[#allocation3 + $0x1f0] sm:$0xf] %vm4432_vm11, %v4347_v53  ;;  %v7112_v5 = vpop.f32.mrf.mxu0  ;;  %v7874_v47 = vcombine.low %v6533_v3, %v6534_v0 }
 0x41c   : > { %v7443_v35 = vadd.f32 %v11808_v48, %v7366_v26 }
 0x41d   : > { %v4702_v18 = vpop.permute.xlu1 %4701  ;;  %v7246_v57 = vpop.f32.mrf.mxu1  ;;  %7309 = vmatmul.mubr.bf16.gmra.mxu1 %v7874_v47 }
 0x41e   : > { %v7513_v10 = vmax.f32 %v7443_v35, 0.0  ;;  %4883 = vst.msk [vmem:[#allocation3 + $0xe8] sm:$0xf] %vm4853_vm12, %v4702_v18  ;;  %v7400_v24 = vmul.f32 %v11800_v45, %v7246_v57  ;;  %v4700_v25 = vpop.permute.xlu0 %4699  ;;  %v7113_v16 = vpop.f32.mrf.mxu0  ;;  %7924 = vmatprep.mubr.msk.bf16.mxu1 %vm6930_vm14, %v8055_v20 }
 0x41f   : > { %4882 = vst.msk [vmem:[#allocation3 + $0xe0] sm:$0xf] %vm4853_vm12, %v4700_v25  ;;  %v7367_v38 = vmul.f32 %v11800_v45, %v7113_v16  ;;  %v7248_v32 = vpop.f32.mrf.mxu1 }
 0x420   : > { %7583 = vst [vmem:[%s11409_s15 + $0x50] sm:$0xff] %v7513_v10  ;;  %v7477_v43 = vadd.f32 %v11808_v48, %v7400_v24  ;;  %v7115_v44 = vpop.f32.mrf.mxu0 }
 0x421   : > { %v7444_v28 = vadd.f32 %v11808_v48, %v7367_v38  ;;  %v4770_v27 = vpop.permute.xlu1 %4769  ;;  %v7249_v1 = vpop.f32.mrf.mxu1  ;;  %v8057_v38 = vld [vmem:[#allocation3 + $0xf4] ss:$8 sps:$4 sm:$0xff]  }
 0x422   : > { %v7547_v63 = vmax.f32 %v7477_v43, 0.0  ;;  %4917 = vst.msk [vmem:[#allocation3 + $0x1f8] sm:$0xf] %vm4853_vm12, %v4770_v27  ;;  %v7401_v51 = vmul.f32 %v11800_v45, %v7249_v1  ;;  %v4768_v21 = vpop.permute.xlu0 %4767 }
 0x423   : > { %v7514_v4 = vmax.f32 %v7444_v28, 0.0  ;;  %4916 = vst.msk [vmem:[#allocation3 + $0x1f0] sm:$0xf] %vm4853_vm12, %v4768_v21  ;;  %v7251_v36 = vpop.f32.mrf.mxu1 }
 0x424   : > { %7617 = vst [vmem:[%s11409_s15 + $0x160] sm:$0xff] %v7547_v63  ;;  %v7478_v37 = vadd.f32 %v11808_v48, %v7401_v51  ;;  %v8059_v51 = vld [vmem:[#allocation3 + $0x204] ss:$8 sps:$4 sm:$0xff]  }
 0x425   : > { %7584 = vst [vmem:[%s11409_s15 + $0x58] sm:$0xff] %v7514_v4  ;;  %v5758_v15 = vpop.permute.xlu1 %5757 }
 0x426   : > { %v7548_v6 = vmax.f32 %v7478_v37, 0.0  ;;  %5939 = vst.msk [vmem:[#allocation3 + $0xe8] sm:$0xf] %vm5909_vm13, %v5758_v15  ;;  %v5756_v62 = vpop.permute.xlu0 %5755 }
 0x427   : > { %5938 = vst.msk [vmem:[#allocation3 + $0xe0] sm:$0xf] %vm5909_vm13, %v5756_v62 }
 0x428   : > { %7618 = vst [vmem:[%s11409_s15 + $0x168] sm:$0xff] %v7548_v6 }
 0x429   : > { %v5826_v8 = vpop.permute.xlu1 %5825 }
 0x42a   : > { %5973 = vst.msk [vmem:[#allocation3 + $0x1f8] sm:$0xf] %vm5909_vm13, %v5826_v8  ;;  %v5824_v9 = vpop.permute.xlu0 %5823 }
 0x42b   : > { %5972 = vst.msk [vmem:[#allocation3 + $0x1f0] sm:$0xf] %vm5909_vm13, %v5824_v9 }
 0x42d   : > { %v4285_v59 = vpop.permute.xlu1 %4284  ;;  %v6502_v56 = vld [vmem:[#allocation3 + $0xe8] sm:$0xff] }
 0x42e   : > { %4464 = vst.msk [vmem:[#allocation3 + $0xf8] sm:$0xf] %vm4432_vm11, %v4285_v59  ;;  %v4283_v55 = vpop.permute.xlu0 %4282  ;;  %v6501_v30 = vld [vmem:[#allocation3 + $0xe0] sm:$0xff] }
 0x42f   : > { %4463 = vst.msk [vmem:[#allocation3 + $0xf0] sm:$0xf] %vm4432_vm11, %v4283_v55  ;;  %v7842_v14 = vcombine.low %v6501_v30, %v6502_v56 }
 0x431   : > { %v4353_v17 = vpop.permute.xlu1 %4352  ;;  %v7118_v31 = vpop.f32.mrf.mxu0  ;;  %7181 = vmatmul.mubr.bf16.gmra.mxu0 %v7842_v14  ;;  %v6536_v23 = vld [vmem:[#allocation3 + $0x1f8] sm:$0xff] }
 0x432   : > { %4498 = vst.msk [vmem:[#allocation3 + $0x208] sm:$0xf] %vm4432_vm11, %v4353_v17  ;;  %v4351_v12 = vpop.permute.xlu0 %4350  ;;  %v7368_v29 = vmul.f32 %v11800_v45, %v7118_v31  ;;  %v6535_v13 = vld [vmem:[#allocation3 + $0x1f0] sm:$0xff]  ;;  %7908 = vmatprep.mubr.msk.bf16.mxu0 %vm6930_vm14, %v8057_v38 }
 0x433   : > { %4497 = vst.msk [vmem:[#allocation3 + $0x200] sm:$0xf] %vm4432_vm11, %v4351_v12  ;;  %v7120_v22 = vpop.f32.mrf.mxu0  ;;  %v7876_v7 = vcombine.low %v6535_v13, %v6536_v23 }
 0x434   : > { %v7445_v46 = vadd.f32 %v11808_v48, %v7368_v29 }
 0x435   : > { %v4706_v2 = vpop.permute.xlu1 %4705  ;;  %v7254_v50 = vpop.f32.mrf.mxu1  ;;  %7317 = vmatmul.mubr.bf16.gmra.mxu1 %v7876_v7 }
 0x436   : > { %v7515_v58 = vmax.f32 %v7445_v46, 0.0  ;;  %4885 = vst.msk [vmem:[#allocation3 + $0xf8] sm:$0xf] %vm4853_vm12, %v4706_v2  ;;  %v7402_v39 = vmul.f32 %v11800_v45, %v7254_v50  ;;  %v4704_v54 = vpop.permute.xlu0 %4703  ;;  %v7121_v33 = vpop.f32.mrf.mxu0  ;;  %7925 = vmatprep.mubr.msk.bf16.mxu1 %vm6930_vm14, %v8059_v51 }
 0x437   : > { %4884 = vst.msk [vmem:[#allocation3 + $0xf0] sm:$0xf] %vm4853_vm12, %v4704_v54  ;;  %v7369_v49 = vmul.f32 %v11800_v45, %v7121_v33  ;;  %v7256_v60 = vpop.f32.mrf.mxu1 }
 0x438   : > { %7585 = vst [vmem:[%s11409_s15 + $0x60] sm:$0xff] %v7515_v58  ;;  %v7479_v11 = vadd.f32 %v11808_v48, %v7402_v39  ;;  %v7123_v40 = vpop.f32.mrf.mxu0 }
 0x439   : > { %v7446_v34 = vadd.f32 %v11808_v48, %v7369_v49  ;;  %v4774_v42 = vpop.permute.xlu1 %4773  ;;  %v7257_v61 = vpop.f32.mrf.mxu1  ;;  %v8061_v49 = vld [vmem:[#allocation3 + $0x104] ss:$8 sps:$4 sm:$0xff]  }
 0x43a   : > { %v7549_v52 = vmax.f32 %v7479_v11, 0.0  ;;  %4919 = vst.msk [vmem:[#allocation3 + $0x208] sm:$0xf] %vm4853_vm12, %v4774_v42  ;;  %v7403_v0 = vmul.f32 %v11800_v45, %v7257_v61  ;;  %v4772_v53 = vpop.permute.xlu0 %4771 }
 0x43b   : > { %v7516_v26 = vmax.f32 %v7446_v34, 0.0  ;;  %4918 = vst.msk [vmem:[#allocation3 + $0x200] sm:$0xf] %vm4853_vm12, %v4772_v53  ;;  %v7259_v3 = vpop.f32.mrf.mxu1 }
 0x43c   : > { %7619 = vst [vmem:[%s11409_s15 + $0x170] sm:$0xff] %v7549_v52  ;;  %v7480_v19 = vadd.f32 %v11808_v48, %v7403_v0  ;;  %v8063_v0 = vld [vmem:[#allocation3 + $0x214] ss:$8 sps:$4 sm:$0xff]  }
 0x43d   : > { %7586 = vst [vmem:[%s11409_s15 + $0x68] sm:$0xff] %v7516_v26  ;;  %v5762_v5 = vpop.permute.xlu1 %5761 }
 0x43e   : > { %v7550_v47 = vmax.f32 %v7480_v19, 0.0  ;;  %5941 = vst.msk [vmem:[#allocation3 + $0xf8] sm:$0xf] %vm5909_vm13, %v5762_v5  ;;  %v5760_v35 = vpop.permute.xlu0 %5759 }
 0x43f   : > { %5940 = vst.msk [vmem:[#allocation3 + $0xf0] sm:$0xf] %vm5909_vm13, %v5760_v35 }
 0x440   : > { %7620 = vst [vmem:[%s11409_s15 + $0x178] sm:$0xff] %v7550_v47 }
 0x441   : > { %v5830_v18 = vpop.permute.xlu1 %5829 }
 0x442   : > { %5975 = vst.msk [vmem:[#allocation3 + $0x208] sm:$0xf] %vm5909_vm13, %v5830_v18  ;;  %v5828_v57 = vpop.permute.xlu0 %5827 }
 0x443   : > { %5974 = vst.msk [vmem:[#allocation3 + $0x200] sm:$0xf] %vm5909_vm13, %v5828_v57 }
 0x445   : > { %v4289_v10 = vpop.permute.xlu1 %4288  ;;  %v6504_v24 = vld [vmem:[#allocation3 + $0xf8] sm:$0xff] }
 0x446   : > { %4466 = vst.msk [vmem:[#allocation3 + $0x108] sm:$0xf] %vm4432_vm11, %v4289_v10  ;;  %v4287_v25 = vpop.permute.xlu0 %4286  ;;  %v6503_v16 = vld [vmem:[#allocation3 + $0xf0] sm:$0xff] }
 0x447   : > { %4465 = vst.msk [vmem:[#allocation3 + $0x100] sm:$0xf] %vm4432_vm11, %v4287_v25  ;;  %v7844_v32 = vcombine.low %v6503_v16, %v6504_v24 }
 0x449   : > { %v4357_v43 = vpop.permute.xlu1 %4356  ;;  %v7126_v44 = vpop.f32.mrf.mxu0  ;;  %7189 = vmatmul.mubr.bf16.gmra.mxu0 %v7844_v32  ;;  %v6538_v28 = vld [vmem:[#allocation3 + $0x208] sm:$0xff] }
 0x44a   : > { %4500 = vst.msk [vmem:[#allocation3 + $0x218] sm:$0xf] %vm4432_vm11, %v4357_v43  ;;  %v4355_v27 = vpop.permute.xlu0 %4354  ;;  %v7370_v1 = vmul.f32 %v11800_v45, %v7126_v44  ;;  %v6537_v63 = vld [vmem:[#allocation3 + $0x200] sm:$0xff]  ;;  %7909 = vmatprep.mubr.msk.bf16.mxu0 %vm6930_vm14, %v8061_v49 }
 0x44b   : > { %4499 = vst.msk [vmem:[#allocation3 + $0x210] sm:$0xf] %vm4432_vm11, %v4355_v27  ;;  %v7128_v21 = vpop.f32.mrf.mxu0  ;;  %v7878_v4 = vcombine.low %v6537_v63, %v6538_v28 }
 0x44c   : > { %v7447_v36 = vadd.f32 %v11808_v48, %v7370_v1 }
 0x44d   : > { %v4710_v37 = vpop.permute.xlu1 %4709  ;;  %v7262_v15 = vpop.f32.mrf.mxu1  ;;  %7325 = vmatmul.mubr.bf16.gmra.mxu1 %v7878_v4 }
 0x44e   : > { %v7517_v6 = vmax.f32 %v7447_v36, 0.0  ;;  %4887 = vst.msk [vmem:[#allocation3 + $0x108] sm:$0xf] %vm4853_vm12, %v4710_v37  ;;  %v7404_v62 = vmul.f32 %v11800_v45, %v7262_v15  ;;  %v4708_v8 = vpop.permute.xlu0 %4707  ;;  %v7129_v9 = vpop.f32.mrf.mxu0  ;;  %7926 = vmatprep.mubr.msk.bf16.mxu1 %vm6930_vm14, %v8063_v0 }
 0x44f   : > { %4886 = vst.msk [vmem:[#allocation3 + $0x100] sm:$0xf] %vm4853_vm12, %v4708_v8  ;;  %v7371_v59 = vmul.f32 %v11800_v45, %v7129_v9  ;;  %v7264_v56 = vpop.f32.mrf.mxu1 }
 0x450   : > { %7587 = vst [vmem:[%s11409_s15 + $0x70] sm:$0xff] %v7517_v6  ;;  %v7481_v55 = vadd.f32 %v11808_v48, %v7404_v62  ;;  %v7131_v30 = vpop.f32.mrf.mxu0  ;;  %v8065_v6 = vld [vmem:[#allocation3 + $0x114] ss:$8 sps:$4 sm:$0xff]  }
 0x451   : > { %v7448_v41 = vadd.f32 %v11808_v48, %v7371_v59  ;;  %v4778_v14 = vpop.permute.xlu1 %4777  ;;  %v7265_v17 = vpop.f32.mrf.mxu1  ;;  %v8068_v59 = vld [vmem:[#allocation3 + $0x224] ss:$8 sps:$4 sm:$0xff]  }
 0x452   : > { %v7551_v31 = vmax.f32 %v7481_v55, 0.0  ;;  %4921 = vst.msk [vmem:[#allocation3 + $0x218] sm:$0xf] %vm4853_vm12, %v4778_v14  ;;  %v7405_v23 = vmul.f32 %v11800_v45, %v7265_v17  ;;  %v4776_v12 = vpop.permute.xlu0 %4775 }
 0x453   : > { %v7518_v29 = vmax.f32 %v7448_v41, 0.0  ;;  %4920 = vst.msk [vmem:[#allocation3 + $0x210] sm:$0xf] %vm4853_vm12, %v4776_v12  ;;  %v7267_v13 = vpop.f32.mrf.mxu1 }
 0x454   : > { %7621 = vst [vmem:[%s11409_s15 + $0x180] sm:$0xff] %v7551_v31  ;;  %v7482_v20 = vadd.f32 %v11808_v48, %v7405_v23 }
 0x455   : > { %7588 = vst [vmem:[%s11409_s15 + $0x78] sm:$0xff] %v7518_v29  ;;  %v5766_v22 = vpop.permute.xlu1 %5765 }
 0x456   : > { %v7552_v7 = vmax.f32 %v7482_v20, 0.0  ;;  %5943 = vst.msk [vmem:[#allocation3 + $0x108] sm:$0xf] %vm5909_vm13, %v5766_v22  ;;  %v5764_v46 = vpop.permute.xlu0 %5763 }
 0x457   : > { %5942 = vst.msk [vmem:[#allocation3 + $0x100] sm:$0xf] %vm5909_vm13, %v5764_v46 }
 0x458   : > { %7622 = vst [vmem:[%s11409_s15 + $0x188] sm:$0xff] %v7552_v7 }
 0x459   : > { %v5834_v2 = vpop.permute.xlu1 %5833 }
 0x45a   : > { %5977 = vst.msk [vmem:[#allocation3 + $0x218] sm:$0xf] %vm5909_vm13, %v5834_v2  ;;  %v5832_v50 = vpop.permute.xlu0 %5831 }
 0x45b   : > { %5976 = vst.msk [vmem:[#allocation3 + $0x210] sm:$0xf] %vm5909_vm13, %v5832_v50 }
 0x45d   : > { %v4293_v58 = vpop.permute.xlu1 %4292  ;;  %v6506_v39 = vld [vmem:[#allocation3 + $0x108] sm:$0xff] }
 0x45e   : > { %4468 = vst.msk [vmem:[#allocation3 + $0x118] sm:$0xf] %vm4432_vm11, %v4293_v58  ;;  %v4291_v54 = vpop.permute.xlu0 %4290  ;;  %v6505_v33 = vld [vmem:[#allocation3 + $0x100] sm:$0xff] }
 0x45f   : > { %4467 = vst.msk [vmem:[#allocation3 + $0x110] sm:$0xf] %vm4432_vm11, %v4291_v54  ;;  %v7846_v60 = vcombine.low %v6505_v33, %v6506_v39 }
 0x461   : > { %v4361_v11 = vpop.permute.xlu1 %4360  ;;  %v7134_v40 = vpop.f32.mrf.mxu0  ;;  %7197 = vmatmul.mubr.bf16.gmra.mxu0 %v7846_v60  ;;  %v6540_v34 = vld [vmem:[#allocation3 + $0x218] sm:$0xff] }
 0x462   : > { %4502 = vst.msk [vmem:[#allocation3 + $0x228] sm:$0xf] %vm4432_vm11, %v4361_v11  ;;  %v4359_v42 = vpop.permute.xlu0 %4358  ;;  %v7372_v61 = vmul.f32 %v11800_v45, %v7134_v40  ;;  %v6539_v52 = vld [vmem:[#allocation3 + $0x210] sm:$0xff]  ;;  %7910 = vmatprep.mubr.msk.bf16.mxu0 %vm6930_vm14, %v8065_v6 }
 0x463   : > { %4501 = vst.msk [vmem:[#allocation3 + $0x220] sm:$0xf] %vm4432_vm11, %v4359_v42  ;;  %v7136_v53 = vpop.f32.mrf.mxu0  ;;  %v7880_v26 = vcombine.low %v6539_v52, %v6540_v34 }
 0x464   : > { %v7449_v3 = vadd.f32 %v11808_v48, %v7372_v61 }
 0x465   : > { %v4714_v19 = vpop.permute.xlu1 %4713  ;;  %v7270_v5 = vpop.f32.mrf.mxu1  ;;  %7333 = vmatmul.mubr.bf16.gmra.mxu1 %v7880_v26 }
 0x466   : > { %v7519_v47 = vmax.f32 %v7449_v3, 0.0  ;;  %4889 = vst.msk [vmem:[#allocation3 + $0x118] sm:$0xf] %vm4853_vm12, %v4714_v19  ;;  %v7406_v35 = vmul.f32 %v11800_v45, %v7270_v5  ;;  %v4712_v18 = vpop.permute.xlu0 %4711  ;;  %v7137_v57 = vpop.f32.mrf.mxu0  ;;  %7927 = vmatprep.mubr.msk.bf16.mxu1 %vm6930_vm14, %v8068_v59 }
 0x467   : > { %4888 = vst.msk [vmem:[#allocation3 + $0x110] sm:$0xf] %vm4853_vm12, %v4712_v18  ;;  %v7373_v10 = vmul.f32 %v11800_v45, %v7137_v57  ;;  %v7272_v24 = vpop.f32.mrf.mxu1 }
 0x468   : > { %7589 = vst [vmem:[%s11409_s15 + $0x80] sm:$0xff] %v7519_v47  ;;  %v7483_v25 = vadd.f32 %v11808_v48, %v7406_v35  ;;  %v7139_v16 = vpop.f32.mrf.mxu0 }
 0x469   : > { %v7450_v38 = vadd.f32 %v11808_v48, %v7373_v10  ;;  %v4782_v32 = vpop.permute.xlu1 %4781  ;;  %v7273_v43 = vpop.f32.mrf.mxu1 }
 0x46a   : > { %v7553_v44 = vmax.f32 %v7483_v25, 0.0  ;;  %4923 = vst.msk [vmem:[#allocation3 + $0x228] sm:$0xf] %vm4853_vm12, %v4782_v32  ;;  %v7407_v28 = vmul.f32 %v11800_v45, %v7273_v43  ;;  %v4780_v27 = vpop.permute.xlu0 %4779 }
 0x46b   : > { %v7520_v1 = vmax.f32 %v7450_v38, 0.0  ;;  %4922 = vst.msk [vmem:[#allocation3 + $0x220] sm:$0xf] %vm4853_vm12, %v4780_v27  ;;  %v7275_v63 = vpop.f32.mrf.mxu1 }
 0x46c   : > { %7623 = vst [vmem:[%s11409_s15 + $0x190] sm:$0xff] %v7553_v44  ;;  %v7484_v51 = vadd.f32 %v11808_v48, %v7407_v28 }
 0x46d   : > { %7590 = vst [vmem:[%s11409_s15 + $0x88] sm:$0xff] %v7520_v1  ;;  %v5770_v21 = vpop.permute.xlu1 %5769 }
 0x46e   : > { %v7554_v4 = vmax.f32 %v7484_v51, 0.0  ;;  %5945 = vst.msk [vmem:[#allocation3 + $0x118] sm:$0xf] %vm5909_vm13, %v5770_v21  ;;  %v5768_v36 = vpop.permute.xlu0 %5767 }
 0x46f   : > { %5944 = vst.msk [vmem:[#allocation3 + $0x110] sm:$0xf] %vm5909_vm13, %v5768_v36 }
 0x470   : > { %7624 = vst [vmem:[%s11409_s15 + $0x198] sm:$0xff] %v7554_v4 }
 0x471   : > { %v5838_v37 = vpop.permute.xlu1 %5837 }
 0x472   : > { %5979 = vst.msk [vmem:[#allocation3 + $0x228] sm:$0xf] %vm5909_vm13, %v5838_v37  ;;  %v5836_v15 = vpop.permute.xlu0 %5835 }
 0x473   : > { %5978 = vst.msk [vmem:[#allocation3 + $0x220] sm:$0xf] %vm5909_vm13, %v5836_v15 }
 0x476   : > { %v8067_v62 = vld [vmem:[#allocation3 + $0x110] ss:$8 sps:$4 sm:$0xff]  }
 0x477   : > { %7205 = vmatmul.mubr.bf16.gmra.mxu0 %v8067_v62 }
 0x479   : > { %v7142_v8 = vpop.f32.mrf.mxu0 }
 0x47a   : > { %v7374_v9 = vmul.f32 %v11800_v45, %v7142_v8  ;;  %v8070_v56 = vld [vmem:[#allocation3 + $0x220] ss:$8 sps:$4 sm:$0xff]  }
 0x47b   : > { %v7144_v55 = vpop.f32.mrf.mxu0  ;;  %7341 = vmatmul.mubr.bf16.gmra.mxu1 %v8070_v56 }
 0x47c   : > { %v7451_v30 = vadd.f32 %v11808_v48, %v7374_v9 }
 0x47d   : > { %v7145_v41 = vpop.f32.mrf.mxu0  ;;  %v7278_v14 = vpop.f32.mrf.mxu1 }
 0x47e   : > { %v7521_v17 = vmax.f32 %v7451_v30, 0.0  ;;  %v7375_v31 = vmul.f32 %v11800_v45, %v7145_v41  ;;  %v7408_v23 = vmul.f32 %v11800_v45, %v7278_v14 }
 0x47f   : > { %v7147_v12 = vpop.f32.mrf.mxu0  ;;  %v7280_v29 = vpop.f32.mrf.mxu1 }
 0x480   : > { %7591 = vst [vmem:[%s11409_s15 + $0x90] sm:$0xff] %v7521_v17  ;;  %v7452_v13 = vadd.f32 %v11808_v48, %v7375_v31  ;;  %v7485_v20 = vadd.f32 %v11808_v48, %v7408_v23 }
 0x481   : > { %v7281_v22 = vpop.f32.mrf.mxu1 }
 0x482   : > { %v7522_v7 = vmax.f32 %v7452_v13, 0.0  ;;  %v7555_v46 = vmax.f32 %v7485_v20, 0.0  ;;  %v7409_v2 = vmul.f32 %v11800_v45, %v7281_v22 }
 0x483   : > { %v7283_v50 = vpop.f32.mrf.mxu1 }
 0x484   : > { %7592 = vst [vmem:[%s11409_s15 + $0x98] sm:$0xff] %v7522_v7  ;;  %7625 = vst [vmem:[%s11409_s15 + $0x1a0] sm:$0xff] %v7555_v46  ;;  %v7486_v58 = vadd.f32 %v11808_v48, %v7409_v2 }
 0x486   : > { %v7556_v39 = vmax.f32 %v7486_v58, 0.0 }
 0x488   : > { %7626 = vst [vmem:[%s11409_s15 + $0x1a8] sm:$0xff] %v7556_v39 }
 0x491   : > { %v7150_v54 = vpop.f32.mrf.mxu0 }
 0x492   : > { %v7376_v33 = vmul.f32 %v11800_v45, %v7150_v54 }
 0x493   : > { %v7152_v49 = vpop.f32.mrf.mxu0 }
 0x494   : > { %v7453_v60 = vadd.f32 %v11808_v48, %v7376_v33 }
 0x495   : > { %v7153_v11 = vpop.f32.mrf.mxu0  ;;  %v7286_v40 = vpop.f32.mrf.mxu1 }
 0x496   : > { %v7523_v34 = vmax.f32 %v7453_v60, 0.0  ;;  %v7377_v42 = vmul.f32 %v11800_v45, %v7153_v11  ;;  %v7410_v61 = vmul.f32 %v11800_v45, %v7286_v40 }
 0x497   : > { %v7155_v52 = vpop.f32.mrf.mxu0  ;;  %v7288_v0 = vpop.f32.mrf.mxu1 }
 0x498   : > { %7593 = vst [vmem:[%s11409_s15 + $0xa0] sm:$0xff] %v7523_v34  ;;  %v7454_v53 = vadd.f32 %v11808_v48, %v7377_v42  ;;  %v7487_v26 = vadd.f32 %v11808_v48, %v7410_v61 }
 0x499   : > { %v7289_v3 = vpop.f32.mrf.mxu1 }
 0x49a   : > { %v7524_v19 = vmax.f32 %v7454_v53, 0.0  ;;  %v7557_v5 = vmax.f32 %v7487_v26, 0.0  ;;  %v7411_v47 = vmul.f32 %v11800_v45, %v7289_v3 }
 0x49b   : > { %v7291_v35 = vpop.f32.mrf.mxu1 }
 0x49c   : > { %7594 = vst [vmem:[%s11409_s15 + $0xa8] sm:$0xff] %v7524_v19  ;;  %7627 = vst [vmem:[%s11409_s15 + $0x1b0] sm:$0xff] %v7557_v5  ;;  %v7488_v18 = vadd.f32 %v11808_v48, %v7411_v47 }
 0x49e   : > { %v7558_v57 = vmax.f32 %v7488_v18, 0.0 }
 0x4a0   : > { %7628 = vst [vmem:[%s11409_s15 + $0x1b8] sm:$0xff] %v7558_v57 }
 0x4a9   : > { %v7158_v10 = vpop.f32.mrf.mxu0 }
 0x4aa   : > { %v7378_v24 = vmul.f32 %v11800_v45, %v7158_v10 }
 0x4ab   : > { %v7160_v25 = vpop.f32.mrf.mxu0 }
 0x4ac   : > { %v7455_v16 = vadd.f32 %v11808_v48, %v7378_v24 }
 0x4ad   : > { %v7161_v38 = vpop.f32.mrf.mxu0  ;;  %v7294_v32 = vpop.f32.mrf.mxu1 }
 0x4ae   : > { %v7525_v43 = vmax.f32 %v7455_v16, 0.0  ;;  %v7379_v44 = vmul.f32 %v11800_v45, %v7161_v38  ;;  %v7412_v28 = vmul.f32 %v11800_v45, %v7294_v32 }
 0x4af   : > { %v7163_v27 = vpop.f32.mrf.mxu0  ;;  %v7296_v1 = vpop.f32.mrf.mxu1 }
 0x4b0   : > { %7595 = vst [vmem:[%s11409_s15 + $0xb0] sm:$0xff] %v7525_v43  ;;  %v7456_v63 = vadd.f32 %v11808_v48, %v7379_v44  ;;  %v7489_v51 = vadd.f32 %v11808_v48, %v7412_v28 }
 0x4b1   : > { %v7297_v21 = vpop.f32.mrf.mxu1 }
 0x4b2   : > { %v7526_v4 = vmax.f32 %v7456_v63, 0.0  ;;  %v7559_v36 = vmax.f32 %v7489_v51, 0.0  ;;  %v7413_v37 = vmul.f32 %v11800_v45, %v7297_v21 }
 0x4b3   : > { %v7299_v15 = vpop.f32.mrf.mxu1 }
 0x4b4   : > { %7596 = vst [vmem:[%s11409_s15 + $0xb8] sm:$0xff] %v7526_v4  ;;  %7629 = vst [vmem:[%s11409_s15 + $0x1c0] sm:$0xff] %v7559_v36  ;;  %v7490_v6 = vadd.f32 %v11808_v48, %v7413_v37 }
 0x4b6   : > { %v7560_v62 = vmax.f32 %v7490_v6, 0.0 }
 0x4b8   : > { %7630 = vst [vmem:[%s11409_s15 + $0x1c8] sm:$0xff] %v7560_v62 }
 0x4c1   : > { %v7166_v8 = vpop.f32.mrf.mxu0 }
 0x4c2   : > { %v7380_v9 = vmul.f32 %v11800_v45, %v7166_v8 }
 0x4c3   : > { %v7168_v59 = vpop.f32.mrf.mxu0 }
 0x4c4   : > { %v7457_v56 = vadd.f32 %v11808_v48, %v7380_v9 }
 0x4c5   : > { %v7169_v55 = vpop.f32.mrf.mxu0  ;;  %v7302_v30 = vpop.f32.mrf.mxu1 }
 0x4c6   : > { %v7527_v41 = vmax.f32 %v7457_v56, 0.0  ;;  %v7381_v14 = vmul.f32 %v11800_v45, %v7169_v55  ;;  %v7414_v17 = vmul.f32 %v11800_v45, %v7302_v30 }
 0x4c7   : > { %v7171_v31 = vpop.f32.mrf.mxu0  ;;  %v7304_v23 = vpop.f32.mrf.mxu1 }
 0x4c8   : > { %7597 = vst [vmem:[%s11409_s15 + $0xc0] sm:$0xff] %v7527_v41  ;;  %v7458_v12 = vadd.f32 %v11808_v48, %v7381_v14  ;;  %v7491_v29 = vadd.f32 %v11808_v48, %v7414_v17 }
 0x4c9   : > { %v7305_v13 = vpop.f32.mrf.mxu1 }
 0x4ca   : > { %v7528_v20 = vmax.f32 %v7458_v12, 0.0  ;;  %v7561_v22 = vmax.f32 %v7491_v29, 0.0  ;;  %v7415_v7 = vmul.f32 %v11800_v45, %v7305_v13 }
 0x4cb   : > { %v7307_v46 = vpop.f32.mrf.mxu1 }
 0x4cc   : > { %7598 = vst [vmem:[%s11409_s15 + $0xc8] sm:$0xff] %v7528_v20  ;;  %7631 = vst [vmem:[%s11409_s15 + $0x1d0] sm:$0xff] %v7561_v22  ;;  %v7492_v2 = vadd.f32 %v11808_v48, %v7415_v7 }
 0x4ce   : > { %v7562_v50 = vmax.f32 %v7492_v2, 0.0 }
 0x4d0   : > { %7632 = vst [vmem:[%s11409_s15 + $0x1d8] sm:$0xff] %v7562_v50 }
 0x4d9   : > { %v7174_v58 = vpop.f32.mrf.mxu0 }
 0x4da   : > { %v7382_v39 = vmul.f32 %v11800_v45, %v7174_v58 }
 0x4db   : > { %v7176_v54 = vpop.f32.mrf.mxu0 }
 0x4dc   : > { %v7459_v33 = vadd.f32 %v11808_v48, %v7382_v39 }
 0x4dd   : > { %v7177_v49 = vpop.f32.mrf.mxu0  ;;  %v7310_v60 = vpop.f32.mrf.mxu1 }
 0x4de   : > { %v7529_v11 = vmax.f32 %v7459_v33, 0.0  ;;  %v7383_v40 = vmul.f32 %v11800_v45, %v7177_v49  ;;  %v7416_v34 = vmul.f32 %v11800_v45, %v7310_v60 }
 0x4df   : > { %v7179_v42 = vpop.f32.mrf.mxu0  ;;  %v7312_v61 = vpop.f32.mrf.mxu1 }
 0x4e0   : > { %7599 = vst [vmem:[%s11409_s15 + $0xd0] sm:$0xff] %v7529_v11  ;;  %v7460_v52 = vadd.f32 %v11808_v48, %v7383_v40  ;;  %v7493_v0 = vadd.f32 %v11808_v48, %v7416_v34 }
 0x4e1   : > { %v7313_v53 = vpop.f32.mrf.mxu1 }
 0x4e2   : > { %v7530_v26 = vmax.f32 %v7460_v52, 0.0  ;;  %v7563_v3 = vmax.f32 %v7493_v0, 0.0  ;;  %v7417_v19 = vmul.f32 %v11800_v45, %v7313_v53 }
 0x4e3   : > { %v7315_v5 = vpop.f32.mrf.mxu1 }
 0x4e4   : > { %7600 = vst [vmem:[%s11409_s15 + $0xd8] sm:$0xff] %v7530_v26  ;;  %7633 = vst [vmem:[%s11409_s15 + $0x1e0] sm:$0xff] %v7563_v3  ;;  %v7494_v47 = vadd.f32 %v11808_v48, %v7417_v19 }
 0x4e6   : > { %v7564_v35 = vmax.f32 %v7494_v47, 0.0 }
 0x4e8   : > { %7634 = vst [vmem:[%s11409_s15 + $0x1e8] sm:$0xff] %v7564_v35 }
 0x4f1   : > { %v7182_v18 = vpop.f32.mrf.mxu0 }
 0x4f2   : > { %v7384_v57 = vmul.f32 %v11800_v45, %v7182_v18 }
 0x4f3   : > { %v7184_v10 = vpop.f32.mrf.mxu0 }
 0x4f4   : > { %v7461_v24 = vadd.f32 %v11808_v48, %v7384_v57 }
 0x4f5   : > { %v7185_v25 = vpop.f32.mrf.mxu0  ;;  %v7318_v16 = vpop.f32.mrf.mxu1 }
 0x4f6   : > { %v7531_v38 = vmax.f32 %v7461_v24, 0.0  ;;  %v7385_v32 = vmul.f32 %v11800_v45, %v7185_v25  ;;  %v7418_v43 = vmul.f32 %v11800_v45, %v7318_v16 }
 0x4f7   : > { %v7187_v44 = vpop.f32.mrf.mxu0  ;;  %v7320_v28 = vpop.f32.mrf.mxu1 }
 0x4f8   : > { %7601 = vst [vmem:[%s11409_s15 + $0xe0] sm:$0xff] %v7531_v38  ;;  %v7462_v27 = vadd.f32 %v11808_v48, %v7385_v32  ;;  %v7495_v1 = vadd.f32 %v11808_v48, %v7418_v43 }
 0x4f9   : > { %v7321_v63 = vpop.f32.mrf.mxu1 }
 0x4fa   : > { %v7532_v51 = vmax.f32 %v7462_v27, 0.0  ;;  %v7565_v21 = vmax.f32 %v7495_v1, 0.0  ;;  %v7419_v4 = vmul.f32 %v11800_v45, %v7321_v63 }
 0x4fb   : > { %v7323_v36 = vpop.f32.mrf.mxu1 }
 0x4fc   : > { %7602 = vst [vmem:[%s11409_s15 + $0xe8] sm:$0xff] %v7532_v51  ;;  %7635 = vst [vmem:[%s11409_s15 + $0x1f0] sm:$0xff] %v7565_v21  ;;  %v7496_v37 = vadd.f32 %v11808_v48, %v7419_v4 }
 0x4fe   : > { %v7566_v15 = vmax.f32 %v7496_v37, 0.0 }
 0x500   : > { %7636 = vst [vmem:[%s11409_s15 + $0x1f8] sm:$0xff] %v7566_v15 }
 0x509   : > { %v7190_v6 = vpop.f32.mrf.mxu0 }
 0x50a   : > { %v7386_v62 = vmul.f32 %v11800_v45, %v7190_v6 }
 0x50b   : > { %v7192_v8 = vpop.f32.mrf.mxu0 }
 0x50c   : > { %v7463_v9 = vadd.f32 %v11808_v48, %v7386_v62 }
 0x50d   : > { %v7193_v59 = vpop.f32.mrf.mxu0  ;;  %v7326_v56 = vpop.f32.mrf.mxu1 }
 0x50e   : > { %v7533_v55 = vmax.f32 %v7463_v9, 0.0  ;;  %v7387_v30 = vmul.f32 %v11800_v45, %v7193_v59  ;;  %v7420_v41 = vmul.f32 %v11800_v45, %v7326_v56 }
 0x50f   : > { %v7195_v14 = vpop.f32.mrf.mxu0  ;;  %v7328_v17 = vpop.f32.mrf.mxu1 }
 0x510   : > { %7603 = vst [vmem:[%s11409_s15 + $0xf0] sm:$0xff] %v7533_v55  ;;  %v7464_v31 = vadd.f32 %v11808_v48, %v7387_v30  ;;  %v7497_v23 = vadd.f32 %v11808_v48, %v7420_v41 }
 0x511   : > { %v7329_v12 = vpop.f32.mrf.mxu1 }
 0x512   : > { %v7534_v29 = vmax.f32 %v7464_v31, 0.0  ;;  %v7567_v13 = vmax.f32 %v7497_v23, 0.0  ;;  %v7421_v20 = vmul.f32 %v11800_v45, %v7329_v12 }
 0x513   : > { %v7331_v22 = vpop.f32.mrf.mxu1 }
 0x514   : > { %7604 = vst [vmem:[%s11409_s15 + $0xf8] sm:$0xff] %v7534_v29  ;;  %7637 = vst [vmem:[%s11409_s15 + $0x200] sm:$0xff] %v7567_v13  ;;  %v7498_v7 = vadd.f32 %v11808_v48, %v7421_v20 }
 0x516   : > { %v7568_v46 = vmax.f32 %v7498_v7, 0.0 }
 0x518   : > { %7638 = vst [vmem:[%s11409_s15 + $0x208] sm:$0xff] %v7568_v46 }
 0x521   : > { %v7198_v2 = vpop.f32.mrf.mxu0 }
 0x522   : > { %v7388_v50 = vmul.f32 %v11800_v45, %v7198_v2 }
 0x523   : > { %v7200_v58 = vpop.f32.mrf.mxu0 }
 0x524   : > { %v7465_v39 = vadd.f32 %v11808_v48, %v7388_v50 }
 0x525   : > { %v7201_v54 = vpop.f32.mrf.mxu0  ;;  %v7334_v33 = vpop.f32.mrf.mxu1 }
 0x526   : > { %v7535_v49 = vmax.f32 %v7465_v39, 0.0  ;;  %v7389_v60 = vmul.f32 %v11800_v45, %v7201_v54  ;;  %v7422_v11 = vmul.f32 %v11800_v45, %v7334_v33 }
 0x527   : > { %v7203_v40 = vpop.f32.mrf.mxu0  ;;  %v7336_v34 = vpop.f32.mrf.mxu1 }
 0x528   : > { %7605 = vst [vmem:[%s11409_s15 + $0x100] sm:$0xff] %v7535_v49  ;;  %v7466_v42 = vadd.f32 %v11808_v48, %v7389_v60  ;;  %v7499_v61 = vadd.f32 %v11808_v48, %v7422_v11 }
 0x529   : > { %v7337_v52 = vpop.f32.mrf.mxu1 }
 0x52a   : > { %v7536_v0 = vmax.f32 %v7466_v42, 0.0  ;;  %v7569_v53 = vmax.f32 %v7499_v61, 0.0  ;;  %v7423_v26 = vmul.f32 %v11800_v45, %v7337_v52 }
 0x52b   : > { %v7339_v3 = vpop.f32.mrf.mxu1 }
 0x52c   : > { %7606 = vst [vmem:[%s11409_s15 + $0x108] sm:$0xff] %v7536_v0  ;;  %7639 = vst [vmem:[%s11409_s15 + $0x210] sm:$0xff] %v7569_v53  ;;  %v7500_v19 = vadd.f32 %v11808_v48, %v7423_v26 }
 0x52e   : > { %v7570_v5 = vmax.f32 %v7500_v19, 0.0 }
 0x530   : > { %7640 = vst [vmem:[%s11409_s15 + $0x218] sm:$0xff] %v7570_v5 }
 0x537   : > { %v7206_v47 = vpop.f32.mrf.mxu0 }
 0x538   : > { %v7390_v35 = vmul.f32 %v11800_v45, %v7206_v47 }
 0x539   : > { %v7208_v18 = vpop.f32.mrf.mxu0 }
 0x53a   : > { %v7467_v57 = vadd.f32 %v11808_v48, %v7390_v35 }
 0x53b   : > { %v7209_v10 = vpop.f32.mrf.mxu0  ;;  %v7342_v24 = vpop.f32.mrf.mxu1 }
 0x53c   : > { %v7537_v25 = vmax.f32 %v7467_v57, 0.0  ;;  %v7391_v16 = vmul.f32 %v11800_v45, %v7209_v10  ;;  %v7424_v38 = vmul.f32 %v11800_v45, %v7342_v24 }
 0x53d   : > { %v7211_v32 = vpop.f32.mrf.mxu0  ;;  %v7344_v43 = vpop.f32.mrf.mxu1 }
 0x53e   : > { %7607 = vst [vmem:[%s11409_s15 + $0x110] sm:$0xff] %v7537_v25  ;;  %v7468_v44 = vadd.f32 %v11808_v48, %v7391_v16  ;;  %v7501_v28 = vadd.f32 %v11808_v48, %v7424_v38 }
 0x53f   : > { %v7345_v27 = vpop.f32.mrf.mxu1 }
 0x540   : > { %v7538_v1 = vmax.f32 %v7468_v44, 0.0  ;;  %v7571_v63 = vmax.f32 %v7501_v28, 0.0  ;;  %v7425_v51 = vmul.f32 %v11800_v45, %v7345_v27 }
 0x541   : > { %v7347_v21 = vpop.f32.mrf.mxu1 }
 0x542   : > { %7608 = vst [vmem:[%s11409_s15 + $0x118] sm:$0xff] %v7538_v1  ;;  %7641 = vst [vmem:[%s11409_s15 + $0x220] sm:$0xff] %v7571_v63  ;;  %v7502_v4 = vadd.f32 %v11808_v48, %v7425_v51 }
 0x544   : > { %v7572_v36 = vmax.f32 %v7502_v4, 0.0 }
 0x546   : > { %7642 = vst [vmem:[%s11409_s15 + $0x228] sm:$0xff] %v7572_v36 }
 0x547 PF: > { %s15_s20 = sadd.s32 1, %s8095_s20   ;;  %s12050_s18 = smov %s8091_s19 }
 0x548   : > { %p12_p5 = scmp.ge.s32.totalorder %s15_s20, 4   ;;  %s12051_s19 = smov %s12053_s21 }
 0x54a   :  { %14 = sbr.rel (!%p12_p5) target bundleno = 2 (0x2), region = 82 }

</bundles_post_ra>
